<compile_context>
chip_gen: v6e
topology: v6e:2x2x1
jax: 0.10.0
libtpu: 0.0.40
codegen_flags: <defaults>
</compile_context>

<pallas_src>
import functools

import jax
import jax.numpy as jnp
import numpy as np
from jax.experimental import pallas as pl
from jax.experimental.pallas import tpu as pltpu

CV = 66        # real channel count of the PyTorch model
C = 128        # zero-padded channel count (one full vreg of lanes)
TAPS = 16      # conv1 tap dimension, zero-padded 9 -> 16


def _round_up(a, b):
    return ((a + b - 1) // b) * b


# ---------------------------------------------------------------------------
# Kernel 1: padding(-1) -> conv3x3 -> (folded)BN -> ReLU, three times.
# Grid is over the batch dimension; everything else lives in VMEM.
# ---------------------------------------------------------------------------
def _conv_stack_kernel(H, W,
                       x1_ref, mask_ref, w1_ref, b1_ref, w2_ref, b2_ref,
                       w3_ref, b3_ref, o_ref, pad_ref, col_ref):
    Wp = W + 2                 # padded row width
    L = H * Wp                 # flattened conv-center count (incl. garbage cols)
    OFF = Wp + 1               # flat offset of padded position (1, 1)

    # Reset the -1 border scratch every step: ~23 vreg stores, and it keeps the
    # kernel correct when the "parallel" batch axis is sharded across cores
    # (each core owns its own scratch, so a program_id==0 init would not do).
    pad_ref[...] = jnp.full(pad_ref.shape, -1.0, jnp.float32)

    valid = mask_ref[...] > 0.5                       # (L, 1): real columns

    # ---- conv1: single (L,16)@(16,128) MXU matmul on the prebuilt im2col ----
    a = jnp.dot(x1_ref[0], w1_ref[...], preferred_element_type=jnp.float32)
    a = jnp.maximum(a + b1_ref[...], 0.0)             # (L, C)

    # ---- conv2 / conv3: bulk padded write + im2col + one big-K matmul ------
    for w_ref, b_ref in ((w2_ref, b2_ref), (w3_ref, b3_ref)):
        # One bulk store of the whole interior band; the mask re-inserts the
        # -1 left/right border columns that fall inside the band.
        pad_ref[OFF:OFF + L, :] = jnp.where(valid, a, -1.0)

        # im2col slab (L, 9*C): 9 shifted contiguous slices of the padded grid.
        for t in range(9):
            dy, dx = divmod(t, 3)
            s = dy * Wp + dx
            col_ref[:, t * C:(t + 1) * C] = pad_ref[s:s + L, :]

        # Single K = 9*128 matmul (accumulates inside the MXU).
        a = jnp.dot(col_ref[...], w_ref[...], preferred_element_type=jnp.float32)
        a = jnp.maximum(a + b_ref[...], 0.0)

    # Gather the H*W valid rows, transpose once (XLU) to channel-major and emit
    # only the CV real channels -> output is already PyTorch's flatten layout.
    feat = jnp.concatenate([a[hh * Wp: hh * Wp + W, :] for hh in range(H)],
                           axis=0)                    # (H*W, C)
    o_ref[0] = jnp.transpose(feat)[:CV, :]            # (CV, H*W), lane-dense


def conv_stack(x1, mask, h, w, p):
    B = x1.shape[0]
    Wp = w + 2
    L = h * Wp
    HW = h * w
    np_ext = _round_up(L + 2 * Wp + 2, 8)             # padded-grid scratch rows
    kernel = functools.partial(_conv_stack_kernel, h, w)
    return pl.pallas_call(
        kernel,
        out_shape=jax.ShapeDtypeStruct((B, CV, HW), jnp.float32),
        grid=(B,),
        in_specs=[
            pl.BlockSpec((1, L, TAPS), lambda b: (b, 0, 0)),   # conv1 im2col
            pl.BlockSpec((L, 1), lambda b: (0, 0)),            # column mask
            pl.BlockSpec((TAPS, C), lambda b: (0, 0)),
            pl.BlockSpec((1, C), lambda b: (0, 0)),
            pl.BlockSpec((9 * C, C), lambda b: (0, 0)),
            pl.BlockSpec((1, C), lambda b: (0, 0)),
            pl.BlockSpec((9 * C, C), lambda b: (0, 0)),
            pl.BlockSpec((1, C), lambda b: (0, 0)),
        ],
        out_specs=pl.BlockSpec((1, CV, HW), lambda b: (b, 0, 0)),
        scratch_shapes=[
            pltpu.VMEM((np_ext, C), jnp.float32),     # -1 padded activation grid
            pltpu.VMEM((L, 9 * C), jnp.float32),      # im2col slab
        ],
        compiler_params=pltpu.CompilerParams(
            dimension_semantics=("parallel",),
            vmem_limit_bytes=16 << 20),
    )(x1, mask, p["w1"], p["b1"], p["w2"], p["b2"], p["w3"], p["b3"])


# ---------------------------------------------------------------------------
# Kernel 2: head MLP  relu(feat @ Wh + bh) @ Wf + bf   (bf16 weights, f32 acc)
#
# Note: a dual-TensorCore split of Wh for v7x was considered; splitting N=200
# would require padding to 256 (+28% HBM on the dominant weight stream on
# v5e/v6e) and per-TC HBM bandwidth on v7x already covers this HBM-bound
# stream, so the head stays a single grid step.
# ---------------------------------------------------------------------------
def _head_kernel(feat_ref, wh_ref, bh_ref, wf_ref, bf_ref, out_ref):
    feat = feat_ref[...].astype(jnp.bfloat16)
    hdd = jnp.dot(feat, wh_ref[...], preferred_element_type=jnp.float32)
    hdd = jnp.maximum(hdd + bh_ref[...], 0.0)
    out = jnp.dot(hdd.astype(jnp.bfloat16), wf_ref[...],
                  preferred_element_type=jnp.float32)
    out_ref[...] = out + bf_ref[...]


def head_mlp(feat, p):
    B, D = feat.shape
    NH = p["wh"].shape[1]
    OUT = p["wf"].shape[1]
    return pl.pallas_call(
        _head_kernel,
        out_shape=jax.ShapeDtypeStruct((B, OUT), jnp.float32),
        grid=(1,),
        in_specs=[
            pl.BlockSpec((B, D), lambda i: (0, 0)),
            pl.BlockSpec((D, NH), lambda i: (0, 0)),
            pl.BlockSpec((1, NH), lambda i: (0, 0)),
            pl.BlockSpec((NH, OUT), lambda i: (0, 0)),
            pl.BlockSpec((1, OUT), lambda i: (0, 0)),
        ],
        out_specs=pl.BlockSpec((B, OUT), lambda i: (0, 0)),
        compiler_params=pltpu.CompilerParams(
            dimension_semantics=("arbitrary",),
            vmem_limit_bytes=24 << 20),
    )(feat, p["wh"], p["bh"], p["wf"], p["bf"])


# ---------------------------------------------------------------------------
# Parameters (deterministic, synthetic) — BN folded into conv weight/bias,
# channel dim zero-padded 66 -> 128, head weights stored in bf16.
# ---------------------------------------------------------------------------
def init_params(h, w, outputs, key):
    eps = 1e-5
    keys = jax.random.split(key, 5)

    def conv_bn_block(k, cin, cin_pad):
        kk = jax.random.split(k, 6)
        cw = jax.random.normal(kk[0], (CV, cin, 3, 3), jnp.float32) * (0.3 / np.sqrt(cin * 9.0))
        cb = 0.05 * jax.random.normal(kk[1], (CV,), jnp.float32)
        gamma = 1.0 + 0.1 * jax.random.normal(kk[2], (CV,), jnp.float32)
        beta = 0.05 * jax.random.normal(kk[3], (CV,), jnp.float32)
        rmean = 0.05 * jax.random.normal(kk[4], (CV,), jnp.float32)
        rvar = jax.random.uniform(kk[5], (CV,), jnp.float32, minval=0.5, maxval=1.5)
        s = gamma / jnp.sqrt(rvar + eps)
        w_eff = cw * s[:, None, None, None]                       # (CV,cin,3,3)
        b_eff = (cb - rmean) * s + beta                           # (CV,)
        # (cout, cin, kh, kw) -> (kh*kw, cin, cout), zero-pad cin and cout.
        w_taps = jnp.transpose(w_eff, (2, 3, 1, 0)).reshape(9, cin, CV)
        w_taps = jnp.pad(w_taps, ((0, 0), (0, cin_pad - cin), (0, C - CV)))
        b_pad = jnp.pad(b_eff, (0, C - CV)).reshape(1, C)
        return w_taps, b_pad

    w1, b1 = conv_bn_block(keys[0], 1, 1)                         # (9,1,C)
    w1 = jnp.pad(w1.reshape(9, C), ((0, TAPS - 9), (0, 0)))       # (16, C)
    w2, b2 = conv_bn_block(keys[1], CV, C)                        # (9,C,C)
    w3, b3 = conv_bn_block(keys[2], CV, C)
    w2 = w2.reshape(9 * C, C)                                     # row = t*C + cin
    w3 = w3.reshape(9 * C, C)

    D = CV * h * w
    kk = jax.random.split(keys[3], 2)
    head_w = jax.random.normal(kk[0], (200, D), jnp.float32) / np.sqrt(D)
    head_b = 0.05 * jax.random.normal(kk[1], (200,), jnp.float32)
    kk = jax.random.split(keys[4], 2)
    fc1_w = jax.random.normal(kk[0], (outputs, 200), jnp.float32) / np.sqrt(200.0)
    fc1_b = 0.05 * jax.random.normal(kk[1], (outputs,), jnp.float32)

    return dict(w1=w1, b1=b1, w2=w2, b2=b2, w3=w3, b3=b3,
                wh=jnp.transpose(head_w).astype(jnp.bfloat16),
                bh=head_b.reshape(1, 200),
                wf=jnp.transpose(fc1_w).astype(jnp.bfloat16),
                bf=fc1_b.reshape(1, outputs))


# ---------------------------------------------------------------------------
# Full forward (glue: -1 pad + conv1 im2col + free reshape; kernels: hot path).
# ---------------------------------------------------------------------------
def model_forward(x, params):
    # x: (B, 1, h, w) float32, NCHW exactly as the PyTorch module expects.
    B, _, H, W = x.shape
    Wp = W + 2
    NP = (H + 2) * Wp
    L = H * Wp
    ext = _round_up(L + 2 * Wp + 2, 8)

    # ConstantPad2d(1, -1), flattened row-major, with a small -1 tail so every
    # shifted tap window is in-bounds.
    xp = jnp.pad(x[:, 0], ((0, 0), (1, 1), (1, 1)), constant_values=-1.0)
    xf = jnp.pad(xp.reshape(B, NP), ((0, 0), (0, ext - NP)), constant_values=-1.0)

    # conv1 im2col: lane axis = taps (zero-padded 9 -> 16).
    cols = [xf[:, dy * Wp + dx: dy * Wp + dx + L]
            for dy in range(3) for dx in range(3)]
    x1 = jnp.pad(jnp.stack(cols, axis=-1), ((0, 0), (0, 0), (0, TAPS - 9)))

    # Interior-column mask: 1.0 on the W real columns of each padded row.
    mask = jnp.asarray((np.arange(L) % Wp < W).astype(np.float32).reshape(L, 1))

    a3 = conv_stack(x1, mask, H, W, params)        # (B, 66, H*W), C-major
    feat = a3.reshape(B, CV * H * W)               # free contiguous reshape
    return head_mlp(feat, params)


# ---------------------------------------------------------------------------
# Pure-JAX reference (same stored parameters) for a correctness check.
# ---------------------------------------------------------------------------
def reference_forward(x, p):
    B, _, H, W = x.shape
    a = x[:, 0][..., None]                         # (B, H, W, 1)

    def conv_layer(a, w_flat, b, cin):
        ap = jnp.pad(a, ((0, 0), (1, 1), (1, 1), (0, 0)), constant_values=-1.0)
        out = jnp.zeros(a.shape[:3] + (C,), jnp.float32)
        for t in range(9):
            dy, dx = divmod(t, 3)
            wt = w_flat[t * cin:(t + 1) * cin, :]
            out = out + jnp.einsum("bhwc,cd->bhwd",
                                   ap[:, dy:dy + H, dx:dx + W, :], wt)
        return jnp.maximum(out + b[0], 0.0)

    a = conv_layer(a, p["w1"][:9, :], p["b1"], 1)
    a = conv_layer(a, p["w2"], p["b2"], C)
    a = conv_layer(a, p["w3"], p["b3"], C)
    flat = jnp.transpose(a, (0, 3, 1, 2))[:, :CV].reshape(B, -1)
    hdd = jnp.maximum(flat @ p["wh"].astype(jnp.float32) + p["bh"][0], 0.0)
    return hdd @ p["wf"].astype(jnp.float32) + p["bf"][0]


if __name__ == "__main__":
    h, w, outputs, B = 8, 16, 5, 2                 # H*W = 128 -> lane-dense emit
    key = jax.random.PRNGKey(0)
    kx, kp = jax.random.split(key)
    x = jax.random.normal(kx, (B, 1, h, w), jnp.float32)
    params = init_params(h, w, outputs, kp)

    fwd = jax.jit(model_forward)
    out = jax.block_until_ready(fwd(x, params))
    assert out.shape == (B, outputs)

    ref = reference_forward(x, params)
    np.testing.assert_allclose(np.asarray(out), np.asarray(ref),
                               rtol=2e-2, atol=1e-2)
    print("KERNEL_OK")
</pallas_src>

<mosaic_0001>
module attributes {stable_mosaic.version = 11 : i64} {
  func.func @_conv_stack_kernel(%arg0: i32, %arg1: memref<1x144x16xf32, #tpu.memory_space<vmem>>, %arg2: memref<144x1xf32, #tpu.memory_space<vmem>>, %arg3: memref<16x128xf32, #tpu.memory_space<vmem>>, %arg4: memref<1x128xf32, #tpu.memory_space<vmem>>, %arg5: memref<1152x128xf32, #tpu.memory_space<vmem>>, %arg6: memref<1x128xf32, #tpu.memory_space<vmem>>, %arg7: memref<1152x128xf32, #tpu.memory_space<vmem>>, %arg8: memref<1x128xf32, #tpu.memory_space<vmem>>, %arg9: memref<1x66x128xf32, #tpu.memory_space<vmem>>, %arg10: memref<184x128xf32, #tpu.memory_space<vmem>>, %arg11: memref<144x1152xf32, #tpu.memory_space<vmem>>) attributes {dimension_semantics = [#tpu.dimension_semantics<parallel>], iteration_bounds = array<i64: 2>, scalar_prefetch = 0 : i64, scratch_operands = 2 : i64, tpu.core_type = #tpu.core_type<tc>, window_params = [{transform_indices = @transform_0, window_bounds = array<i64: 1, 144, 16>}, {pipeline_mode = #tpu.pipeline_mode<synchronous>, transform_indices = @transform_1, window_bounds = array<i64: 144, 1>}, {pipeline_mode = #tpu.pipeline_mode<synchronous>, transform_indices = @transform_2, window_bounds = array<i64: 16, 128>}, {pipeline_mode = #tpu.pipeline_mode<synchronous>, transform_indices = @transform_3, window_bounds = array<i64: 1, 128>}, {pipeline_mode = #tpu.pipeline_mode<synchronous>, transform_indices = @transform_4, window_bounds = array<i64: 1152, 128>}, {pipeline_mode = #tpu.pipeline_mode<synchronous>, transform_indices = @transform_5, window_bounds = array<i64: 1, 128>}, {pipeline_mode = #tpu.pipeline_mode<synchronous>, transform_indices = @transform_6, window_bounds = array<i64: 1152, 128>}, {pipeline_mode = #tpu.pipeline_mode<synchronous>, transform_indices = @transform_7, window_bounds = array<i64: 1, 128>}, {transform_indices = @transform_8, window_bounds = array<i64: 1, 66, 128>}]} {
    %cst = arith.constant -1.000000e+00 : f32
    %0 = vector.broadcast %cst : f32 to vector<184x128xf32>
    %c0 = arith.constant 0 : index
    %c0_0 = arith.constant 0 : index
    %1 = vector.load %arg10[%c0, %c0_0] : memref<184x128xf32, #tpu.memory_space<vmem>>, vector<184x128xf32>
    tpu.vector_store %arg10[%c0, %c0_0], %0 {strides = array<i32>} : memref<184x128xf32, #tpu.memory_space<vmem>>, vector<184x128xf32>,
    %c0_1 = arith.constant 0 : index
    %c0_2 = arith.constant 0 : index
    %2 = vector.load %arg2[%c0_1, %c0_2] : memref<144x1xf32, #tpu.memory_space<vmem>>, vector<144x1xf32>
    %cst_3 = arith.constant 5.000000e-01 : f32
    %3 = vector.broadcast %cst_3 : f32 to vector<144x1xf32>
    %4 = arith.cmpf ogt, %2, %3 : vector<144x1xf32>
    %c0_4 = arith.constant 0 : index
    %c0_5 = arith.constant 0 : index
    %c0_6 = arith.constant 0 : index
    %5 = vector.load %arg1[%c0_4, %c0_5, %c0_6] : memref<1x144x16xf32, #tpu.memory_space<vmem>>, vector<1x144x16xf32>
    %6 = vector.shape_cast %5 : vector<1x144x16xf32> to vector<144x16xf32>
    %c0_7 = arith.constant 0 : index
    %c0_8 = arith.constant 0 : index
    %7 = vector.load %arg3[%c0_7, %c0_8] : memref<16x128xf32, #tpu.memory_space<vmem>>, vector<16x128xf32>
    %cst_9 = arith.constant dense<0.000000e+00> : vector<144x128xf32>
    %8 = tpu.matmul %6, %7, %cst_9 {dimension_numbers = #tpu.dot_dimension_numbers<[1], [0], [0], [1], [0, 0, 1, 1], [], []>} : vector<144x16xf32>, vector<16x128xf32>, vector<144x128xf32> -> vector<144x128xf32>
    %c0_10 = arith.constant 0 : index
    %c0_11 = arith.constant 0 : index
    %9 = vector.load %arg4[%c0_10, %c0_11] : memref<1x128xf32, #tpu.memory_space<vmem>>, vector<1x128xf32>
    %10 = vector.broadcast %9 : vector<1x128xf32> to vector<144x128xf32>
    %11 = arith.addf %8, %10 : vector<144x128xf32>
    %cst_12 = arith.constant 0.000000e+00 : f32
    %12 = vector.broadcast %cst_12 : f32 to vector<144x128xf32>
    %13 = arith.maximumf %11, %12 : vector<144x128xf32>
    %cst_13 = arith.constant -1.000000e+00 : f32
    %14 = vector.shape_cast %4 : vector<144x1xi1> to vector<144x1xi1>
    %15 = vector.broadcast %14 : vector<144x1xi1> to vector<144x128xi1>
    %16 = vector.broadcast %cst_13 : f32 to vector<144x128xf32>
    %17 = arith.select %15, %13, %16 : vector<144x128xi1>, vector<144x128xf32>
    %c19 = arith.constant 19 : index
    %c0_14 = arith.constant 0 : index
    %18 = vector.load %arg10[%c19, %c0_14] : memref<184x128xf32, #tpu.memory_space<vmem>>, vector<144x128xf32>
    tpu.vector_store %arg10[%c19, %c0_14], %17 {strides = array<i32>} : memref<184x128xf32, #tpu.memory_space<vmem>>, vector<144x128xf32>,
    %c0_15 = arith.constant 0 : index
    %c0_16 = arith.constant 0 : index
    %19 = vector.load %arg10[%c0_15, %c0_16] : memref<184x128xf32, #tpu.memory_space<vmem>>, vector<144x128xf32>
    %c0_17 = arith.constant 0 : index
    %c0_18 = arith.constant 0 : index
    %20 = vector.load %arg11[%c0_17, %c0_18] : memref<144x1152xf32, #tpu.memory_space<vmem>>, vector<144x128xf32>
    tpu.vector_store %arg11[%c0_17, %c0_18], %19 {strides = array<i32>} : memref<144x1152xf32, #tpu.memory_space<vmem>>, vector<144x128xf32>,
    %c1 = arith.constant 1 : index
    %c0_19 = arith.constant 0 : index
    %21 = vector.load %arg10[%c1, %c0_19] : memref<184x128xf32, #tpu.memory_space<vmem>>, vector<144x128xf32>
    %c0_20 = arith.constant 0 : index
    %c128 = arith.constant 128 : index
    %22 = vector.load %arg11[%c0_20, %c128] : memref<144x1152xf32, #tpu.memory_space<vmem>>, vector<144x128xf32>
    tpu.vector_store %arg11[%c0_20, %c128], %21 {strides = array<i32>} : memref<144x1152xf32, #tpu.memory_space<vmem>>, vector<144x128xf32>,
    %c2 = arith.constant 2 : index
    %c0_21 = arith.constant 0 : index
    %23 = vector.load %arg10[%c2, %c0_21] : memref<184x128xf32, #tpu.memory_space<vmem>>, vector<144x128xf32>
    %c0_22 = arith.constant 0 : index
    %c256 = arith.constant 256 : index
    %24 = vector.load %arg11[%c0_22, %c256] : memref<144x1152xf32, #tpu.memory_space<vmem>>, vector<144x128xf32>
    tpu.vector_store %arg11[%c0_22, %c256], %23 {strides = array<i32>} : memref<144x1152xf32, #tpu.memory_space<vmem>>, vector<144x128xf32>,
    %c18 = arith.constant 18 : index
    %c0_23 = arith.constant 0 : index
    %25 = vector.load %arg10[%c18, %c0_23] : memref<184x128xf32, #tpu.memory_space<vmem>>, vector<144x128xf32>
    %c0_24 = arith.constant 0 : index
    %c384 = arith.constant 384 : index
    %26 = vector.load %arg11[%c0_24, %c384] : memref<144x1152xf32, #tpu.memory_space<vmem>>, vector<144x128xf32>
    tpu.vector_store %arg11[%c0_24, %c384], %25 {strides = array<i32>} : memref<144x1152xf32, #tpu.memory_space<vmem>>, vector<144x128xf32>,
    %c19_25 = arith.constant 19 : index
    %c0_26 = arith.constant 0 : index
    %27 = vector.load %arg10[%c19_25, %c0_26] : memref<184x128xf32, #tpu.memory_space<vmem>>, vector<144x128xf32>
    %c0_27 = arith.constant 0 : index
    %c512 = arith.constant 512 : index
    %28 = vector.load %arg11[%c0_27, %c512] : memref<144x1152xf32, #tpu.memory_space<vmem>>, vector<144x128xf32>
    tpu.vector_store %arg11[%c0_27, %c512], %27 {strides = array<i32>} : memref<144x1152xf32, #tpu.memory_space<vmem>>, vector<144x128xf32>,
    %c20 = arith.constant 20 : index
    %c0_28 = arith.constant 0 : index
    %29 = vector.load %arg10[%c20, %c0_28] : memref<184x128xf32, #tpu.memory_space<vmem>>, vector<144x128xf32>
    %c0_29 = arith.constant 0 : index
    %c640 = arith.constant 640 : index
    %30 = vector.load %arg11[%c0_29, %c640] : memref<144x1152xf32, #tpu.memory_space<vmem>>, vector<144x128xf32>
    tpu.vector_store %arg11[%c0_29, %c640], %29 {strides = array<i32>} : memref<144x1152xf32, #tpu.memory_space<vmem>>, vector<144x128xf32>,
    %c36 = arith.constant 36 : index
    %c0_30 = arith.constant 0 : index
    %31 = vector.load %arg10[%c36, %c0_30] : memref<184x128xf32, #tpu.memory_space<vmem>>, vector<144x128xf32>
    %c0_31 = arith.constant 0 : index
    %c768 = arith.constant 768 : index
    %32 = vector.load %arg11[%c0_31, %c768] : memref<144x1152xf32, #tpu.memory_space<vmem>>, vector<144x128xf32>
    tpu.vector_store %arg11[%c0_31, %c768], %31 {strides = array<i32>} : memref<144x1152xf32, #tpu.memory_space<vmem>>, vector<144x128xf32>,
    %c37 = arith.constant 37 : index
    %c0_32 = arith.constant 0 : index
    %33 = vector.load %arg10[%c37, %c0_32] : memref<184x128xf32, #tpu.memory_space<vmem>>, vector<144x128xf32>
    %c0_33 = arith.constant 0 : index
    %c896 = arith.constant 896 : index
    %34 = vector.load %arg11[%c0_33, %c896] : memref<144x1152xf32, #tpu.memory_space<vmem>>, vector<144x128xf32>
    tpu.vector_store %arg11[%c0_33, %c896], %33 {strides = array<i32>} : memref<144x1152xf32, #tpu.memory_space<vmem>>, vector<144x128xf32>,
    %c38 = arith.constant 38 : index
    %c0_34 = arith.constant 0 : index
    %35 = vector.load %arg10[%c38, %c0_34] : memref<184x128xf32, #tpu.memory_space<vmem>>, vector<144x128xf32>
    %c0_35 = arith.constant 0 : index
    %c1024 = arith.constant 1024 : index
    %36 = vector.load %arg11[%c0_35, %c1024] : memref<144x1152xf32, #tpu.memory_space<vmem>>, vector<144x128xf32>
    tpu.vector_store %arg11[%c0_35, %c1024], %35 {strides = array<i32>} : memref<144x1152xf32, #tpu.memory_space<vmem>>, vector<144x128xf32>,
    %c0_36 = arith.constant 0 : index
    %c0_37 = arith.constant 0 : index
    %37 = vector.load %arg11[%c0_36, %c0_37] : memref<144x1152xf32, #tpu.memory_space<vmem>>, vector<144x1152xf32>
    %c0_38 = arith.constant 0 : index
    %c0_39 = arith.constant 0 : index
    %38 = vector.load %arg5[%c0_38, %c0_39] : memref<1152x128xf32, #tpu.memory_space<vmem>>, vector<1152x128xf32>
    %cst_40 = arith.constant dense<0.000000e+00> : vector<144x128xf32>
    %39 = tpu.matmul %37, %38, %cst_40 {dimension_numbers = #tpu.dot_dimension_numbers<[1], [0], [0], [1], [0, 0, 1, 1], [], []>} : vector<144x1152xf32>, vector<1152x128xf32>, vector<144x128xf32> -> vector<144x128xf32>
    %c0_41 = arith.constant 0 : index
    %c0_42 = arith.constant 0 : index
    %40 = vector.load %arg6[%c0_41, %c0_42] : memref<1x128xf32, #tpu.memory_space<vmem>>, vector<1x128xf32>
    %41 = vector.broadcast %40 : vector<1x128xf32> to vector<144x128xf32>
    %42 = arith.addf %39, %41 : vector<144x128xf32>
    %cst_43 = arith.constant 0.000000e+00 : f32
    %43 = vector.broadcast %cst_43 : f32 to vector<144x128xf32>
    %44 = arith.maximumf %42, %43 : vector<144x128xf32>
    %cst_44 = arith.constant -1.000000e+00 : f32
    %45 = vector.shape_cast %4 : vector<144x1xi1> to vector<144x1xi1>
    %46 = vector.broadcast %45 : vector<144x1xi1> to vector<144x128xi1>
    %47 = vector.broadcast %cst_44 : f32 to vector<144x128xf32>
    %48 = arith.select %46, %44, %47 : vector<144x128xi1>, vector<144x128xf32>
    %c19_45 = arith.constant 19 : index
    %c0_46 = arith.constant 0 : index
    %49 = vector.load %arg10[%c19_45, %c0_46] : memref<184x128xf32, #tpu.memory_space<vmem>>, vector<144x128xf32>
    tpu.vector_store %arg10[%c19_45, %c0_46], %48 {strides = array<i32>} : memref<184x128xf32, #tpu.memory_space<vmem>>, vector<144x128xf32>,
    %c0_47 = arith.constant 0 : index
    %c0_48 = arith.constant 0 : index
    %50 = vector.load %arg10[%c0_47, %c0_48] : memref<184x128xf32, #tpu.memory_space<vmem>>, vector<144x128xf32>
    %c0_49 = arith.constant 0 : index
    %c0_50 = arith.constant 0 : index
    %51 = vector.load %arg11[%c0_49, %c0_50] : memref<144x1152xf32, #tpu.memory_space<vmem>>, vector<144x128xf32>
    tpu.vector_store %arg11[%c0_49, %c0_50], %50 {strides = array<i32>} : memref<144x1152xf32, #tpu.memory_space<vmem>>, vector<144x128xf32>,
    %c1_51 = arith.constant 1 : index
    %c0_52 = arith.constant 0 : index
    %52 = vector.load %arg10[%c1_51, %c0_52] : memref<184x128xf32, #tpu.memory_space<vmem>>, vector<144x128xf32>
    %c0_53 = arith.constant 0 : index
    %c128_54 = arith.constant 128 : index
    %53 = vector.load %arg11[%c0_53, %c128_54] : memref<144x1152xf32, #tpu.memory_space<vmem>>, vector<144x128xf32>
    tpu.vector_store %arg11[%c0_53, %c128_54], %52 {strides = array<i32>} : memref<144x1152xf32, #tpu.memory_space<vmem>>, vector<144x128xf32>,
    %c2_55 = arith.constant 2 : index
    %c0_56 = arith.constant 0 : index
    %54 = vector.load %arg10[%c2_55, %c0_56] : memref<184x128xf32, #tpu.memory_space<vmem>>, vector<144x128xf32>
    %c0_57 = arith.constant 0 : index
    %c256_58 = arith.constant 256 : index
    %55 = vector.load %arg11[%c0_57, %c256_58] : memref<144x1152xf32, #tpu.memory_space<vmem>>, vector<144x128xf32>
    tpu.vector_store %arg11[%c0_57, %c256_58], %54 {strides = array<i32>} : memref<144x1152xf32, #tpu.memory_space<vmem>>, vector<144x128xf32>,
    %c18_59 = arith.constant 18 : index
    %c0_60 = arith.constant 0 : index
    %56 = vector.load %arg10[%c18_59, %c0_60] : memref<184x128xf32, #tpu.memory_space<vmem>>, vector<144x128xf32>
    %c0_61 = arith.constant 0 : index
    %c384_62 = arith.constant 384 : index
    %57 = vector.load %arg11[%c0_61, %c384_62] : memref<144x1152xf32, #tpu.memory_space<vmem>>, vector<144x128xf32>
    tpu.vector_store %arg11[%c0_61, %c384_62], %56 {strides = array<i32>} : memref<144x1152xf32, #tpu.memory_space<vmem>>, vector<144x128xf32>,
    %c19_63 = arith.constant 19 : index
    %c0_64 = arith.constant 0 : index
    %58 = vector.load %arg10[%c19_63, %c0_64] : memref<184x128xf32, #tpu.memory_space<vmem>>, vector<144x128xf32>
    %c0_65 = arith.constant 0 : index
    %c512_66 = arith.constant 512 : index
    %59 = vector.load %arg11[%c0_65, %c512_66] : memref<144x1152xf32, #tpu.memory_space<vmem>>, vector<144x128xf32>
    tpu.vector_store %arg11[%c0_65, %c512_66], %58 {strides = array<i32>} : memref<144x1152xf32, #tpu.memory_space<vmem>>, vector<144x128xf32>,
    %c20_67 = arith.constant 20 : index
    %c0_68 = arith.constant 0 : index
    %60 = vector.load %arg10[%c20_67, %c0_68] : memref<184x128xf32, #tpu.memory_space<vmem>>, vector<144x128xf32>
    %c0_69 = arith.constant 0 : index
    %c640_70 = arith.constant 640 : index
    %61 = vector.load %arg11[%c0_69, %c640_70] : memref<144x1152xf32, #tpu.memory_space<vmem>>, vector<144x128xf32>
    tpu.vector_store %arg11[%c0_69, %c640_70], %60 {strides = array<i32>} : memref<144x1152xf32, #tpu.memory_space<vmem>>, vector<144x128xf32>,
    %c36_71 = arith.constant 36 : index
    %c0_72 = arith.constant 0 : index
    %62 = vector.load %arg10[%c36_71, %c0_72] : memref<184x128xf32, #tpu.memory_space<vmem>>, vector<144x128xf32>
    %c0_73 = arith.constant 0 : index
    %c768_74 = arith.constant 768 : index
    %63 = vector.load %arg11[%c0_73, %c768_74] : memref<144x1152xf32, #tpu.memory_space<vmem>>, vector<144x128xf32>
    tpu.vector_store %arg11[%c0_73, %c768_74], %62 {strides = array<i32>} : memref<144x1152xf32, #tpu.memory_space<vmem>>, vector<144x128xf32>,
    %c37_75 = arith.constant 37 : index
    %c0_76 = arith.constant 0 : index
    %64 = vector.load %arg10[%c37_75, %c0_76] : memref<184x128xf32, #tpu.memory_space<vmem>>, vector<144x128xf32>
    %c0_77 = arith.constant 0 : index
    %c896_78 = arith.constant 896 : index
    %65 = vector.load %arg11[%c0_77, %c896_78] : memref<144x1152xf32, #tpu.memory_space<vmem>>, vector<144x128xf32>
    tpu.vector_store %arg11[%c0_77, %c896_78], %64 {strides = array<i32>} : memref<144x1152xf32, #tpu.memory_space<vmem>>, vector<144x128xf32>,
    %c38_79 = arith.constant 38 : index
    %c0_80 = arith.constant 0 : index
    %66 = vector.load %arg10[%c38_79, %c0_80] : memref<184x128xf32, #tpu.memory_space<vmem>>, vector<144x128xf32>
    %c0_81 = arith.constant 0 : index
    %c1024_82 = arith.constant 1024 : index
    %67 = vector.load %arg11[%c0_81, %c1024_82] : memref<144x1152xf32, #tpu.memory_space<vmem>>, vector<144x128xf32>
    tpu.vector_store %arg11[%c0_81, %c1024_82], %66 {strides = array<i32>} : memref<144x1152xf32, #tpu.memory_space<vmem>>, vector<144x128xf32>,
    %c0_83 = arith.constant 0 : index
    %c0_84 = arith.constant 0 : index
    %68 = vector.load %arg11[%c0_83, %c0_84] : memref<144x1152xf32, #tpu.memory_space<vmem>>, vector<144x1152xf32>
    %c0_85 = arith.constant 0 : index
    %c0_86 = arith.constant 0 : index
    %69 = vector.load %arg7[%c0_85, %c0_86] : memref<1152x128xf32, #tpu.memory_space<vmem>>, vector<1152x128xf32>
    %cst_87 = arith.constant dense<0.000000e+00> : vector<144x128xf32>
    %70 = tpu.matmul %68, %69, %cst_87 {dimension_numbers = #tpu.dot_dimension_numbers<[1], [0], [0], [1], [0, 0, 1, 1], [], []>} : vector<144x1152xf32>, vector<1152x128xf32>, vector<144x128xf32> -> vector<144x128xf32>
    %c0_88 = arith.constant 0 : index
    %c0_89 = arith.constant 0 : index
    %71 = vector.load %arg8[%c0_88, %c0_89] : memref<1x128xf32, #tpu.memory_space<vmem>>, vector<1x128xf32>
    %72 = vector.broadcast %71 : vector<1x128xf32> to vector<144x128xf32>
    %73 = arith.addf %70, %72 : vector<144x128xf32>
    %cst_90 = arith.constant 0.000000e+00 : f32
    %74 = vector.broadcast %cst_90 : f32 to vector<144x128xf32>
    %75 = arith.maximumf %73, %74 : vector<144x128xf32>
    %76 = vector.extract_strided_slice %75 {offsets = [0, 0], sizes = [16, 128], strides = [1, 1]} : vector<144x128xf32> to vector<16x128xf32>
    %77 = vector.extract_strided_slice %75 {offsets = [18, 0], sizes = [16, 128], strides = [1, 1]} : vector<144x128xf32> to vector<16x128xf32>
    %78 = vector.extract_strided_slice %75 {offsets = [36, 0], sizes = [16, 128], strides = [1, 1]} : vector<144x128xf32> to vector<16x128xf32>
    %79 = vector.extract_strided_slice %75 {offsets = [54, 0], sizes = [16, 128], strides = [1, 1]} : vector<144x128xf32> to vector<16x128xf32>
    %80 = vector.extract_strided_slice %75 {offsets = [72, 0], sizes = [16, 128], strides = [1, 1]} : vector<144x128xf32> to vector<16x128xf32>
    %81 = vector.extract_strided_slice %75 {offsets = [90, 0], sizes = [16, 128], strides = [1, 1]} : vector<144x128xf32> to vector<16x128xf32>
    %82 = vector.extract_strided_slice %75 {offsets = [108, 0], sizes = [16, 128], strides = [1, 1]} : vector<144x128xf32> to vector<16x128xf32>
    %83 = vector.extract_strided_slice %75 {offsets = [126, 0], sizes = [16, 128], strides = [1, 1]} : vector<144x128xf32> to vector<16x128xf32>
    %84 = tpu.concatenate %76, %77, %78, %79, %80, %81, %82, %83 in 0 : vector<16x128xf32>, vector<16x128xf32>, vector<16x128xf32>, vector<16x128xf32>, vector<16x128xf32>, vector<16x128xf32>, vector<16x128xf32>, vector<16x128xf32> -> vector<128x128xf32>
    %85 = tpu.transpose %84, [1, 0] : vector<128x128xf32> -> vector<128x128xf32>
    %86 = vector.extract_strided_slice %85 {offsets = [0, 0], sizes = [66, 128], strides = [1, 1]} : vector<128x128xf32> to vector<66x128xf32>
    %c0_91 = arith.constant 0 : index
    %c0_92 = arith.constant 0 : index
    %c0_93 = arith.constant 0 : index
    %87 = vector.load %arg9[%c0_91, %c0_92, %c0_93] : memref<1x66x128xf32, #tpu.memory_space<vmem>>, vector<1x66x128xf32>
    %88 = vector.shape_cast %87 : vector<1x66x128xf32> to vector<66x128xf32>
    %89 = vector.shape_cast %86 : vector<66x128xf32> to vector<1x66x128xf32>
    tpu.vector_store %arg9[%c0_91, %c0_92, %c0_93], %89 {strides = array<i32>} : memref<1x66x128xf32, #tpu.memory_space<vmem>>, vector<1x66x128xf32>,
    return
  }
  func.func @transform_0(%arg0: i32) -> (i32, i32, i32) {
    %c0_i32 = arith.constant 0 : i32
    %c0_i32_0 = arith.constant 0 : i32
    %c0_i32_1 = arith.constant 0 : i32
    return %arg0, %c0_i32, %c0_i32_0 : i32, i32, i32
  }
  func.func @transform_1(%arg0: i32) -> (i32, i32) {
    %c0_i32 = arith.constant 0 : i32
    %c0_i32_0 = arith.constant 0 : i32
    %c0_i32_1 = arith.constant 0 : i32
    return %c0_i32, %c0_i32_0 : i32, i32
  }
  func.func @transform_2(%arg0: i32) -> (i32, i32) {
    %c0_i32 = arith.constant 0 : i32
    %c0_i32_0 = arith.constant 0 : i32
    %c0_i32_1 = arith.constant 0 : i32
    return %c0_i32, %c0_i32_0 : i32, i32
  }
  func.func @transform_3(%arg0: i32) -> (i32, i32) {
    %c0_i32 = arith.constant 0 : i32
    %c0_i32_0 = arith.constant 0 : i32
    %c0_i32_1 = arith.constant 0 : i32
    return %c0_i32, %c0_i32_0 : i32, i32
  }
  func.func @transform_4(%arg0: i32) -> (i32, i32) {
    %c0_i32 = arith.constant 0 : i32
    %c0_i32_0 = arith.constant 0 : i32
    %c0_i32_1 = arith.constant 0 : i32
    return %c0_i32, %c0_i32_0 : i32, i32
  }
  func.func @transform_5(%arg0: i32) -> (i32, i32) {
    %c0_i32 = arith.constant 0 : i32
    %c0_i32_0 = arith.constant 0 : i32
    %c0_i32_1 = arith.constant 0 : i32
    return %c0_i32, %c0_i32_0 : i32, i32
  }
  func.func @transform_6(%arg0: i32) -> (i32, i32) {
    %c0_i32 = arith.constant 0 : i32
    %c0_i32_0 = arith.constant 0 : i32
    %c0_i32_1 = arith.constant 0 : i32
    return %c0_i32, %c0_i32_0 : i32, i32
  }
  func.func @transform_7(%arg0: i32) -> (i32, i32) {
    %c0_i32 = arith.constant 0 : i32
    %c0_i32_0 = arith.constant 0 : i32
    %c0_i32_1 = arith.constant 0 : i32
    return %c0_i32, %c0_i32_0 : i32, i32
  }
  func.func @transform_8(%arg0: i32) -> (i32, i32, i32) {
    %c0_i32 = arith.constant 0 : i32
    %c0_i32_0 = arith.constant 0 : i32
    %c0_i32_1 = arith.constant 0 : i32
    return %arg0, %c0_i32, %c0_i32_0 : i32, i32, i32
  }
}

module attributes {stable_mosaic.version = 11 : i64} {
  func.func @_head_kernel(%arg0: i32, %arg1: memref<2x8448xf32, #tpu.memory_space<vmem>>, %arg2: memref<8448x200xbf16, #tpu.memory_space<vmem>>, %arg3: memref<1x200xf32, #tpu.memory_space<vmem>>, %arg4: memref<200x5xbf16, #tpu.memory_space<vmem>>, %arg5: memref<1x5xf32, #tpu.memory_space<vmem>>, %arg6: memref<2x5xf32, #tpu.memory_space<vmem>>) attributes {dimension_semantics = [#tpu.dimension_semantics<arbitrary>], iteration_bounds = array<i64: 1>, scalar_prefetch = 0 : i64, scratch_operands = 0 : i64, tpu.core_type = #tpu.core_type<tc>, window_params = [{pipeline_mode = #tpu.pipeline_mode<synchronous>, transform_indices = @transform_0, window_bounds = array<i64: 2, 8448>}, {pipeline_mode = #tpu.pipeline_mode<synchronous>, transform_indices = @transform_1, window_bounds = array<i64: 8448, 200>}, {pipeline_mode = #tpu.pipeline_mode<synchronous>, transform_indices = @transform_2, window_bounds = array<i64: 1, 200>}, {pipeline_mode = #tpu.pipeline_mode<synchronous>, transform_indices = @transform_3, window_bounds = array<i64: 200, 5>}, {pipeline_mode = #tpu.pipeline_mode<synchronous>, transform_indices = @transform_4, window_bounds = array<i64: 1, 5>}, {pipeline_mode = #tpu.pipeline_mode<synchronous>, transform_indices = @transform_5, window_bounds = array<i64: 2, 5>}]} {
    %c0 = arith.constant 0 : index
    %c0_0 = arith.constant 0 : index
    %0 = vector.load %arg1[%c0, %c0_0] : memref<2x8448xf32, #tpu.memory_space<vmem>>, vector<2x8448xf32>
    %1 = arith.truncf %0 : vector<2x8448xf32> to vector<2x8448xbf16>
    %c0_1 = arith.constant 0 : index
    %c0_2 = arith.constant 0 : index
    %2 = vector.load %arg2[%c0_1, %c0_2] : memref<8448x200xbf16, #tpu.memory_space<vmem>>, vector<8448x200xbf16>
    %cst = arith.constant dense<0.000000e+00> : vector<2x200xf32>
    %3 = tpu.matmul %1, %2, %cst {dimension_numbers = #tpu.dot_dimension_numbers<[1], [0], [0], [1], [0, 0, 1, 1], [], []>} : vector<2x8448xbf16>, vector<8448x200xbf16>, vector<2x200xf32> -> vector<2x200xf32>
    %c0_3 = arith.constant 0 : index
    %c0_4 = arith.constant 0 : index
    %4 = vector.load %arg3[%c0_3, %c0_4] : memref<1x200xf32, #tpu.memory_space<vmem>>, vector<1x200xf32>
    %5 = vector.broadcast %4 : vector<1x200xf32> to vector<2x200xf32>
    %6 = arith.addf %3, %5 : vector<2x200xf32>
    %cst_5 = arith.constant 0.000000e+00 : f32
    %7 = vector.broadcast %cst_5 : f32 to vector<2x200xf32>
    %8 = arith.maximumf %6, %7 : vector<2x200xf32>
    %9 = arith.truncf %8 : vector<2x200xf32> to vector<2x200xbf16>
    %c0_6 = arith.constant 0 : index
    %c0_7 = arith.constant 0 : index
    %10 = vector.load %arg4[%c0_6, %c0_7] : memref<200x5xbf16, #tpu.memory_space<vmem>>, vector<200x5xbf16>
    %cst_8 = arith.constant dense<0.000000e+00> : vector<2x5xf32>
    %11 = tpu.matmul %9, %10, %cst_8 {dimension_numbers = #tpu.dot_dimension_numbers<[1], [0], [0], [1], [0, 0, 1, 1], [], []>} : vector<2x200xbf16>, vector<200x5xbf16>, vector<2x5xf32> -> vector<2x5xf32>
    %c0_9 = arith.constant 0 : index
    %c0_10 = arith.constant 0 : index
    %12 = vector.load %arg5[%c0_9, %c0_10] : memref<1x5xf32, #tpu.memory_space<vmem>>, vector<1x5xf32>
    %13 = vector.broadcast %12 : vector<1x5xf32> to vector<2x5xf32>
    %14 = arith.addf %11, %13 : vector<2x5xf32>
    %c0_11 = arith.constant 0 : index
    %c0_12 = arith.constant 0 : index
    %15 = vector.load %arg6[%c0_11, %c0_12] : memref<2x5xf32, #tpu.memory_space<vmem>>, vector<2x5xf32>
    tpu.vector_store %arg6[%c0_11, %c0_12], %14 {strides = array<i32>} : memref<2x5xf32, #tpu.memory_space<vmem>>, vector<2x5xf32>,
    return
  }
  func.func @transform_0(%arg0: i32) -> (i32, i32) {
    %c0_i32 = arith.constant 0 : i32
    %c0_i32_0 = arith.constant 0 : i32
    %c0_i32_1 = arith.constant 0 : i32
    return %c0_i32, %c0_i32_0 : i32, i32
  }
  func.func @transform_1(%arg0: i32) -> (i32, i32) {
    %c0_i32 = arith.constant 0 : i32
    %c0_i32_0 = arith.constant 0 : i32
    %c0_i32_1 = arith.constant 0 : i32
    return %c0_i32, %c0_i32_0 : i32, i32
  }
  func.func @transform_2(%arg0: i32) -> (i32, i32) {
    %c0_i32 = arith.constant 0 : i32
    %c0_i32_0 = arith.constant 0 : i32
    %c0_i32_1 = arith.constant 0 : i32
    return %c0_i32, %c0_i32_0 : i32, i32
  }
  func.func @transform_3(%arg0: i32) -> (i32, i32) {
    %c0_i32 = arith.constant 0 : i32
    %c0_i32_0 = arith.constant 0 : i32
    %c0_i32_1 = arith.constant 0 : i32
    return %c0_i32, %c0_i32_0 : i32, i32
  }
  func.func @transform_4(%arg0: i32) -> (i32, i32) {
    %c0_i32 = arith.constant 0 : i32
    %c0_i32_0 = arith.constant 0 : i32
    %c0_i32_1 = arith.constant 0 : i32
    return %c0_i32, %c0_i32_0 : i32, i32
  }
  func.func @transform_5(%arg0: i32) -> (i32, i32) {
    %c0_i32 = arith.constant 0 : i32
    %c0_i32_0 = arith.constant 0 : i32
    %c0_i32_1 = arith.constant 0 : i32
    return %c0_i32, %c0_i32_0 : i32, i32
  }
}

</mosaic_0001>

<bundles_post_ra>
// kernel: model_forward.2
= control target key start
LH: loop header
LB: loop body
LE: loop exit
PB: predicated region body
PF: predicated region fallthrough
CT: control target
= control target key end

     0   :  { %13 = vsyncpa [#allocation5], 0  ;;  %s5782_s0 = inlined_call_operand.vmem [shape: f32[2,144,16], index: 0, kind: input, shape index: {}]   ;;  %s5783_s1 = inlined_call_operand.hbm [shape: f32[144,1], index: 1, kind: input, shape index: {}]   ;;  %s5784_s2 = inlined_call_operand.hbm [shape: f32[16,128], index: 2, kind: input, shape index: {}]   ;;  %s5785_s3 = inlined_call_operand.hbm [shape: f32[1,128], index: 3, kind: input, shape index: {}]   ;;  %s5786_s4 = inlined_call_operand.hbm [shape: f32[1152,128], index: 4, kind: input, shape index: {}]   ;;  %s5787_s5 = inlined_call_operand.hbm [shape: f32[1,128], index: 5, kind: input, shape index: {}]   ;;  %s5788_s6 = inlined_call_operand.hbm [shape: f32[1152,128], index: 6, kind: input, shape index: {}]   ;;  %s5789_s7 = inlined_call_operand.hbm [shape: f32[1,128], index: 7, kind: input, shape index: {}]   ;;  %s5790_s8 = inlined_call_operand.vmem [shape: f32[2,66,128], index: 8, kind: output, shape index: {}]  }
   0x1   :  { %14 = vsyncpa [#allocation7], 0 }
   0x2   :  { %15 = vsyncpa [#allocation10], 0 }
   0x3   :  { %16 = vsyncpa [#allocation13], 0  ;;  %s4595_s27 = smov 0  }
   0x4 LB: > { %s4601_s28 = sadd.s32 4294967295, %s4536_s27   ;;  %p3964_p0 = scmp.ge.s32.totalorder %s4536_s27, 1  ;;  %s4536_s27 = sphi %s4595_s27, %s22_s27  }
   0x5   : > { %p226_p1 = scmp.lt.s32.totalorder %s4536_s27, 3  ;;  %p5791_p2 = scmp.eq.s32.totalorder %s4601_s28, 0 }
   0x6   : > { %s4538_s30 = smov [#allocation6]   ;;  %s4539_s10 = smov [#allocation9]  }
   0x7   : > { %p4606_p3 = pnand %p3964_p0, %p226_p1  ;;  %s251_s9 = sshll.u32 %s4538_s30, 4  ;;  %s252_s9 = int_to_ptr.vmem [resolvable:$true] %s251_s9 }
   0x8   : > { %s275_s11 = sshll.u32 %s4539_s10, 4  ;;  %s4540_s13 = smov [#allocation12]   ;;  %s4612_s11 = int_to_ptr.vmem [resolvable:$true] %s275_s11 }
   0x9   : > { %p4273_p4 = pneg %p4606_p3  ;;  %s299_s14 = sshll.u32 %s4540_s13, 4  ;;  %s4620_s14 = int_to_ptr.vmem [resolvable:$true] %s299_s14 }
   0xa   : > { %s4541_s15 = smov [#allocation4]   ;;  %s4343_s18 = scalar_lea.vmem %s252_s9, 256 }
   0xb   : > { %p4616_p5 = pnand %p5791_p2, %p4273_p4  ;;  %s4622_s16 = sshll.u32 %s4541_s15, 4  ;;  %s239_s16 = int_to_ptr.vmem [resolvable:$true] %s4622_s16 }
   0xc   : > { %p4344_p7 = scmp.ne.s32.totalorder %s252_s9, %s4343_s18  ;;  %p4351_p10 = scmp.lt.s32.totalorder %s252_s9, %s252_s9 }
   0xd   : > { %p4626_p6 = pneg %p4616_p5  ;;  %p4352_p11 = scmp.lt.s32.totalorder %s4343_s18, %s4343_s18 }
   0xf   : > { %p4346_p8 = pnand %p4344_p7, %p4626_p6  ;;  %p4353_p12 = por %p4352_p11, %p4351_p10 }
  0x11   : > { %p4347_p9 = pneg %p4346_p8 }
  0x13   : > { %p4354_p13 = pnand %p4353_p12, %p4347_p9 }
  0x15   : > { %4357 = shalt.err (!%p4354_p13)
}
  0x16   : > { %s4542_s19 = smov 128   ;;  %s4543_s20 = smov 8  }
  0x17   : > { %4279 = dma.hbm_to_vmem [thread:$0]  (!%p4616_p5), %s5784_s2, 256, %s252_s9, [#allocation7], %s4542_s19, %s4542_s19, %s4543_s20  }
  0x18   : > { %s4369_s23 = scalar_lea.vmem %s4612_s11, 18432  ;;  %p4377_p7 = scmp.lt.s32.totalorder %s4612_s11, %s4612_s11 }
  0x19   : > { %p4370_p0 = scmp.ne.s32.totalorder %s4612_s11, %s4369_s23  ;;  %p4378_p8 = scmp.lt.s32.totalorder %s4369_s23, %s4369_s23 }
  0x1b   : > { %p4372_p1 = pnand %p4370_p0, %p4626_p6  ;;  %p4379_p9 = por %p4378_p8, %p4377_p7 }
  0x1d   : > { %p4373_p4 = pneg %p4372_p1 }
  0x1f   : > { %p4380_p10 = pnand %p4379_p9, %p4373_p4 }
  0x21   : > { %4383 = shalt.err (!%p4380_p10)
}
  0x22   : > { %4285 = dma.hbm_to_vmem [thread:$0]  (!%p4616_p5), %s5786_s4, 18432, %s4612_s11, [#allocation10], %s4542_s19, %s4542_s19, %s4543_s20  }
  0x23   : > { %s4395_s26 = scalar_lea.vmem %s4620_s14, 18432  ;;  %p4403_p0 = scmp.lt.s32.totalorder %s4620_s14, %s4620_s14 }
  0x24   : > { %p4396_p11 = scmp.ne.s32.totalorder %s4620_s14, %s4395_s26  ;;  %p4404_p1 = scmp.lt.s32.totalorder %s4395_s26, %s4395_s26 }
  0x26   : > { %p4398_p12 = pnand %p4396_p11, %p4626_p6  ;;  %p4405_p4 = por %p4404_p1, %p4403_p0 }
  0x28   : > { %p4399_p13 = pneg %p4398_p12 }
  0x2a   : > { %p4406_p7 = pnand %p4405_p4, %p4399_p13 }
  0x2c   : > { %4409 = shalt.err (!%p4406_p7)
}
  0x2d   : > { %4291 = dma.hbm_to_vmem [thread:$0]  (!%p4616_p5), %s5788_s6, 18432, %s4620_s14, [#allocation13], %s4542_s19, %s4542_s19, %s4543_s20  }
  0x2e   : > { %s4421_s10 = scalar_lea.vmem %s239_s16, 2304  ;;  %p4429_p11 = scmp.lt.s32.totalorder %s239_s16, %s239_s16 }
  0x2f   : > { %p4422_p8 = scmp.ne.s32.totalorder %s239_s16, %s4421_s10  ;;  %p4430_p12 = scmp.lt.s32.totalorder %s4421_s10, %s4421_s10 }
  0x31   : > { %p4424_p9 = pnand %p4422_p8, %p4626_p6  ;;  %p4431_p13 = por %p4430_p12, %p4429_p11 }
  0x33   : > { %p4425_p10 = pneg %p4424_p9 }
  0x35   : > { %p4432_p0 = pnand %p4431_p13, %p4425_p10 }
  0x37   : > { %4435 = shalt.err (!%p4432_p0)
}
  0x38   : > { %4276 = dma.hbm_to_vmem [thread:$0]  (!%p4616_p5), %s5783_s1, 2304, %s239_s16, [#allocation5], %s4542_s19, %s4542_s19, %s4543_s20  }
  0x39   : > { %s4544_s14 = smov [#allocation8]   ;;  %s4545_s18 = smov [#allocation11]  }
  0x3a   : > { %s265_s15 = sshll.u32 %s4544_s14, 4  ;;  %s289_s21 = sshll.u32 %s4545_s18, 4  ;;  %s266_s15 = int_to_ptr.vmem [resolvable:$true] %s265_s15  ;;  %s290_s21 = int_to_ptr.vmem [resolvable:$true] %s289_s21 }
  0x3b   : > { %s4447_s22 = scalar_lea.vmem %s266_s15, 16  ;;  %s4454_s23 = scalar_lea.vmem %s266_s15, 32 }
  0x3c   : > { %p4448_p1 = scmp.ne.s32.totalorder %s266_s15, %s4447_s22  ;;  %p4455_p8 = scmp.lt.s32.totalorder %s266_s15, %s266_s15 }
  0x3d   : > { %p4456_p9 = scmp.lt.s32.totalorder %s4454_s23, %s4447_s22 }
  0x3e   : > { %p4450_p4 = pnand %p4448_p1, %p4626_p6 }
  0x3f   : > { %p4457_p10 = por %p4456_p9, %p4455_p8 }
  0x40   : > { %p4451_p7 = pneg %p4450_p4 }
  0x42   : > { %p4458_p11 = pnand %p4457_p10, %p4451_p7 }
  0x44   : > { %4461 = shalt.err (!%p4458_p11)
}
  0x45   : > { %4282 = dma.hbm_to_vmem [thread:$0]  (!%p4616_p5), %s5785_s3, 16, %s266_s15, [#allocation7]  }
  0x46   : > { %s4473_s19 = scalar_lea.vmem %s290_s21, 16  ;;  %s4480_s20 = scalar_lea.vmem %s290_s21, 32 }
  0x47   : > { %p4474_p12 = scmp.ne.s32.totalorder %s290_s21, %s4473_s19  ;;  %p4481_p1 = scmp.lt.s32.totalorder %s290_s21, %s290_s21 }
  0x48   : > { %p4482_p4 = scmp.lt.s32.totalorder %s4480_s20, %s4473_s19 }
  0x49   : > { %p4476_p13 = pnand %p4474_p12, %p4626_p6 }
  0x4a   : > { %p4483_p2 = por %p4482_p4, %p4481_p1 }
  0x4b   : > { %p4477_p0 = pneg %p4476_p13 }
  0x4d   : > { %p4484_p8 = pnand %p4483_p2, %p4477_p0 }
  0x4f   : > { %4487 = shalt.err (!%p4484_p8)
}
  0x50   : > { %4288 = dma.hbm_to_vmem [thread:$0]  (!%p4616_p5), %s5787_s5, 16, %s290_s21, [#allocation10]  }
  0x51   : > { %s4546_s30 = smov [#allocation14]  }
  0x52   : > { %s313_s9 = sshll.u32 %s4546_s30, 4  ;;  %s314_s9 = int_to_ptr.vmem [resolvable:$true] %s313_s9 }
  0x53   : > { %s4499_s10 = scalar_lea.vmem %s314_s9, 16  ;;  %s4506_s11 = scalar_lea.vmem %s314_s9, 32 }
  0x54   : > { %p4500_p7 = scmp.ne.s32.totalorder %s314_s9, %s4499_s10  ;;  %p4507_p11 = scmp.lt.s32.totalorder %s314_s9, %s314_s9 }
  0x55   : > { %p4508_p12 = scmp.lt.s32.totalorder %s4506_s11, %s4499_s10 }
  0x56   : > { %p4502_p9 = pnand %p4500_p7, %p4626_p6 }
  0x57   : > { %p4509_p2 = por %p4508_p12, %p4507_p11 }
  0x58   : > { %p4503_p10 = pneg %p4502_p9 }
  0x5a   : > { %p4510_p13 = pnand %p4509_p2, %p4503_p10 }
  0x5c   : > { %4513 = shalt.err (!%p4510_p13)
}
  0x5d   : > { %4294 = dma.hbm_to_vmem [thread:$0]  (!%p4616_p5), %s5789_s7, 16, %s314_s9, [#allocation13]  }
  0x5e   : > { %334 = sbr.rel (%p4606_p3) target bundleno = 1172 (0x494), region = 52 }
  0x63   : > { %p5807_p0 = scmp.eq.s32.totalorder %s4601_s28, 0 }
  0x65   : > { %4519 = dma.done.wait (%p5807_p0), [#allocation5], 2304   ;;  %p5808_p6 = pmov %p5807_p0 }
  0x66   : > { %p5809_p1 = pmov %p5807_p0 }
  0x67   : > { %4521 = vsyncadd (%p5808_p6), [#allocation5], 4294964992 }
  0x68   : > { %4523 = dma.done.wait (%p5809_p1), [#allocation7], 272   ;;  %p5810_p4 = pmov %p5807_p0 }
  0x69   : > { %p5811_p8 = pmov %p5807_p0 }
  0x6a   : > { %4525 = vsyncadd (%p5810_p4), [#allocation7], 4294967024 }
  0x6b   : > { %4527 = dma.done.wait (%p5811_p8), [#allocation10], 18448   ;;  %p5812_p5 = pmov %p5807_p0 }
  0x6c   : > { %p5813_p3 = pmov %p5807_p0 }
  0x6d   : > { %4529 = vsyncadd (%p5812_p5), [#allocation10], 4294948848 }
  0x6e   : > { %4531 = dma.done.wait (%p5813_p3), [#allocation13], 18448   ;;  %p5814_p7 = pmov %p5807_p0 }
  0x6f   : > { %p392_p9 = scmp.lt.s32.totalorder %s4601_s28, 1  ;;  %v4547_v0 = vmov 0   ;;  %v5794_v1 = vmov 0.0   ;;  %vm488_vm0 = vcmask 130048   ;;  %v480_v2 = vld [vmem:[#allocation6 + $0x8] sm:$0xff]  ;;  %v479_v3 = vld [vmem:[#allocation6] sm:$0xff] }
  0x70   : > { %4533 = vsyncadd (%p5814_p7), [#allocation13], 4294948848  ;;  %4329 = vset.pattern.permute.xlu0 %v4547_v0  ;;  %4330 = vset.pattern.permute.xlu1 %v4547_v0  ;;  %v425_v8 = vld [vmem:[#allocation4] sm:$0xff]  ;;  %v426_v10 = vld [vmem:[#allocation4 + $0x8] sm:$0xff]  ;;  %v4549_v58 = vmov -1.0  }
  0x71   : > { %s5851_s28 = smov (!%p392_p9, %s4601_s28), 1  ;;  %1479 = vmatprep.subr.mxu1 %v5794_v1  ;;  %4094 = vmatprep.subr.mxu0 %v480_v2  ;;  %vm443_vm1 = vcmp.gt.f32.partialorder %v425_v8, 0.5  ;;  %v427_v11 = vld [vmem:[#allocation4 + $0x10] sm:$0xff]  ;;  %vm444_vm2 = vcmp.gt.f32.partialorder %v426_v10, 0.5  ;;  %v429_v13 = vld [vmem:[#allocation4 + $0x20] sm:$0xff]  ;;  %v428_v14 = vld [vmem:[#allocation4 + $0x18] sm:$0xff] }
  0x72   : > { %s4243_s29 = smul.u32 144, %s5851_s28  ;;  %4095 = vmatpush3.msra.mxu0 %v480_v2  ;;  %v716_v12 = vsel %vm443_vm1, 1, %v4547_v0  ;;  %vm445_vm3 = vcmp.gt.f32.partialorder %v427_v11, 0.5  ;;  %vm446_vm4 = vcmp.gt.f32.partialorder %v428_v14, 0.5  ;;  %v430_v16 = vld [vmem:[#allocation4 + $0x28] sm:$0xff]  ;;  %v717_v18 = vsel %vm444_vm2, 1, %v4547_v0 }
  0x73   : > { %4096 = vmatprep.subr.mxu0 %v479_v3  ;;  %735 = vperm.xlu0 %4329, %v716_v12   ;;  %v718_v15 = vsel %vm445_vm3, 1, %v4547_v0  ;;  %vm447_vm5 = vcmp.gt.f32.partialorder %v429_v13, 0.5  ;;  %v719_v20 = vsel %vm446_vm4, 1, %v4547_v0  ;;  %v431_v21 = vld [vmem:[#allocation4 + $0x30] sm:$0xff]  ;;  %vm448_vm6 = vcmp.gt.f32.partialorder %v430_v16, 0.5  ;;  %v432_v22 = vld [vmem:[#allocation4 + $0x38] sm:$0xff] }
  0x74   : > { %s4731_s15 = scalar_lea.vmem %s5782_s0, %s4243_s29  ;;  %4097 = vmatpush3.msra.mxu0 %v479_v3  ;;  %741 = vperm.xlu1 %4330, %v718_v15   ;;  %v720_v24 = vsel %vm447_vm5, 1, %v4547_v0  ;;  %vm449_vm7 = vcmp.gt.f32.partialorder %v431_v21, 0.5  ;;  %v721_v26 = vsel %vm448_vm6, 1, %v4547_v0  ;;  %v1343_v27 = vld [vmem:[#allocation9 + $0x78] sm:$0xff]  ;;  %vm450_vm8 = vcmp.gt.f32.partialorder %v432_v22, 0.5  ;;  %v434_v29 = vld [vmem:[#allocation4 + $0x48] sm:$0xff] }
  0x75   : > { %v461_v4 = vld [vmem:[%s4731_s15] sm:$0xff]  ;;  %v462_v5 = vld [vmem:[%s4731_s15 + $0x8] sm:$0xff]  ;;  %v463_v6 = vld [vmem:[%s4731_s15 + $0x10] sm:$0xff]  ;;  %1634 = vmatprep.subr.mxu0 %v5794_v1  ;;  %1480 = vmatpush1.msra.mxu1 %v1343_v27  ;;  %v722_v33 = vsel %vm449_vm7, 1, %v4547_v0  ;;  %v723_v35 = vsel %vm450_vm8, 1, %v4547_v0  ;;  %vm452_vm10 = vcmp.gt.f32.partialorder %v434_v29, 0.5 }
  0x76   : > { %4098 = vmatprep.mubr.msk.f32.mxu0 %vm488_vm0, %v461_v4  ;;  %v464_v7 = vld [vmem:[%s4731_s15 + $0x18] sm:$0xff]  ;;  %v465_v9 = vld [vmem:[%s4731_s15 + $0x20] sm:$0xff]  ;;  %v466_v17 = vld [vmem:[%s4731_s15 + $0x28] sm:$0xff]  ;;  %1481 = vmatprep.subr.mxu1 %v5794_v1  ;;  %v725_v43 = vsel %vm452_vm10, 1, %v4547_v0  ;;  %405 = vst [vmem:[#allocation2 + $0x18] sm:$0xff] %v4549_v58  ;;  %s4244_s18 = smul.u32 72, %s5851_s28 }
  0x77   : > { %4099 = vmatmul.mubr.msk.f32.vlgmr.msra.gmra.mxu0 %vm488_vm0, %v462_v5  ;;  %v467_v19 = vld [vmem:[%s4731_s15 + $0x30] sm:$0xff]  ;;  %738 = vperm.xlu0 %4329, %v717_v18   ;;  %v468_v23 = vld [vmem:[%s4731_s15 + $0x38] sm:$0xff]  ;;  %v469_v25 = vld [vmem:[%s4731_s15 + $0x40] sm:$0xff]  ;;  %406 = vst [vmem:[#allocation2 + $0x20] sm:$0xff] %v4549_v58 }
  0x78   : > { %4101 = vmatprep.mubr.msk.f32.mxu0 %vm488_vm0, %v463_v6  ;;  %744 = vperm.xlu1 %4330, %v719_v20   ;;  %v433_v28 = vld [vmem:[#allocation4 + $0x40] sm:$0xff]  ;;  %v1342_v30 = vld [vmem:[#allocation9 + $0x70] sm:$0xff]  ;;  %v1341_v39 = vld [vmem:[#allocation9 + $0x68] sm:$0xff]  ;;  %402 = vst [vmem:[#allocation2] sm:$0xff] %v4549_v58  ;;  %s401_s23 = scalar_lea.vmem %s5790_s8, %s4244_s18 }
  0x79   : > { %v1375_v31 = vld [vmem:[#allocation9 + $0x178] sm:$0xff]  ;;  %v470_v32 = vld [vmem:[%s4731_s15 + $0x48] sm:$0xff]  ;;  %vm451_vm9 = vcmp.gt.f32.partialorder %v433_v28, 0.5  ;;  %1482 = vmatpush1.msra.mxu1 %v1342_v30  ;;  %v473_v42 = vld [vmem:[%s4731_s15 + $0x60] sm:$0xff]  ;;  %403 = vst [vmem:[#allocation2 + $0x8] sm:$0xff] %v4549_v58 }
  0x7a   : > { %v471_v34 = vld [vmem:[%s4731_s15 + $0x50] sm:$0xff]  ;;  %1635 = vmatpush1.msra.mxu0 %v1375_v31  ;;  %v435_v36 = vld [vmem:[#allocation4 + $0x50] sm:$0xff]  ;;  %v472_v40 = vld [vmem:[%s4731_s15 + $0x58] sm:$0xff]  ;;  %v724_v41 = vsel %vm451_vm9, 1, %v4547_v0  ;;  %1483 = vmatprep.subr.mxu1 %v5794_v1  ;;  %404 = vst [vmem:[#allocation2 + $0x10] sm:$0xff] %v4549_v58 }
  0x7b   : > { %4102 = vmatmul.mubr.msk.f32.gmra.mxu0 %vm488_vm0, %v464_v7  ;;  %747 = vperm.xlu0 %4329, %v720_v24   ;;  %v1374_v37 = vld [vmem:[#allocation9 + $0x170] sm:$0xff]  ;;  %vm453_vm11 = vcmp.gt.f32.partialorder %v435_v36, 0.5  ;;  %v437_v44 = vld [vmem:[#allocation4 + $0x60] sm:$0xff]  ;;  %v1373_v45 = vld [vmem:[#allocation9 + $0x168] sm:$0xff]  ;;  %407 = vst [vmem:[#allocation2 + $0x28] sm:$0xff] %v4549_v58 }
  0x7c   : > { %4104 = vmatprep.mubr.msk.f32.mxu0 %vm488_vm0, %v465_v9  ;;  %750 = vperm.xlu1 %4330, %v721_v26   ;;  %v436_v38 = vld [vmem:[#allocation4 + $0x58] sm:$0xff]  ;;  %v438_v46 = vld [vmem:[#allocation4 + $0x68] sm:$0xff]  ;;  %v474_v48 = vld [vmem:[%s4731_s15 + $0x68] sm:$0xff]  ;;  %v726_v49 = vsel %vm453_vm11, 1, %v4547_v0  ;;  %vm455_vm13 = vcmp.gt.f32.partialorder %v437_v44, 0.5  ;;  %408 = vst [vmem:[#allocation2 + $0x30] sm:$0xff] %v4549_v58 }
  0x7d   : > { %1636 = vmatprep.subr.mxu0 %v5794_v1  ;;  %vm454_vm12 = vcmp.gt.f32.partialorder %v436_v38, 0.5  ;;  %1484 = vmatpush1.msra.mxu1 %v1341_v39  ;;  %v1340_v47 = vld [vmem:[#allocation9 + $0x60] sm:$0xff]  ;;  %v475_v50 = vld [vmem:[%s4731_s15 + $0x70] sm:$0xff]  ;;  %v439_v52 = vld [vmem:[#allocation4 + $0x70] sm:$0xff]  ;;  %vm456_vm14 = vcmp.gt.f32.partialorder %v438_v46, 0.5  ;;  %v728_v57 = vsel %vm455_vm13, 1, %v4547_v0 }
  0x7e   : > { %1637 = vmatpush1.msra.mxu0 %v1374_v37  ;;  %v727_v51 = vsel %vm454_vm12, 1, %v4547_v0  ;;  %1485 = vmatprep.subr.mxu1 %v5794_v1  ;;  %v1372_v53 = vld [vmem:[#allocation9 + $0x160] sm:$0xff]  ;;  %v440_v54 = vld [vmem:[#allocation4 + $0x78] sm:$0xff]  ;;  %409 = vst [vmem:[#allocation2 + $0x38] sm:$0xff] %v4549_v58  ;;  %410 = vst [vmem:[#allocation2 + $0x40] sm:$0xff] %v4549_v58  ;;  %vm457_vm15 = vcmp.gt.f32.partialorder %v439_v52, 0.5 }
  0x7f   : > { %4105 = vmatmul.mubr.msk.f32.gmra.mxu0 %vm488_vm0, %v466_v17  ;;  %753 = vperm.xlu0 %4329, %v722_v33   ;;  %v1339_v55 = vld [vmem:[#allocation9 + $0x58] sm:$0xff]  ;;  %411 = vst [vmem:[#allocation2 + $0x48] sm:$0xff] %v4549_v58  ;;  %412 = vst [vmem:[#allocation2 + $0x50] sm:$0xff] %v4549_v58  ;;  %v477_v59 = vld [vmem:[%s4731_s15 + $0x80] sm:$0xff]  ;;  %v729_v60 = vsel %vm456_vm14, 1, %v4547_v0  ;;  %vm458_vm1 = vcmp.gt.f32.partialorder %v440_v54, 0.5 }
  0x80   : > { %4107 = vmatprep.mubr.msk.f32.mxu0 %vm488_vm0, %v467_v19  ;;  %756 = vperm.xlu1 %4330, %v723_v35   ;;  %v476_v56 = vld [vmem:[%s4731_s15 + $0x78] sm:$0xff]  ;;  %413 = vst [vmem:[#allocation2 + $0x58] sm:$0xff] %v4549_v58  ;;  %414 = vst [vmem:[#allocation2 + $0x60] sm:$0xff] %v4549_v58  ;;  %v442_v63 = vld [vmem:[#allocation4 + $0x88] sm:$0xff]  ;;  %v730_v4 = vsel %vm457_vm15, 1, %v4547_v0  ;;  %v731_v5 = vsel %vm458_vm1, 1, %v4547_v0 }
  0x81   : > { %1638 = vmatprep.subr.mxu0 %v5794_v1  ;;  %1486 = vmatpush1.msra.mxu1 %v1340_v47  ;;  %415 = vst [vmem:[#allocation2 + $0x68] sm:$0xff] %v4549_v58  ;;  %416 = vst [vmem:[#allocation2 + $0x70] sm:$0xff] %v4549_v58  ;;  %v441_v61 = vld [vmem:[#allocation4 + $0x80] sm:$0xff]  ;;  %v1338_v2 = vld [vmem:[#allocation9 + $0x50] sm:$0xff]  ;;  %vm460_vm3 = vcmp.gt.f32.partialorder %v442_v63, 0.5 }
  0x82   : > { %1639 = vmatpush1.msra.mxu0 %v1373_v45  ;;  %417 = vst [vmem:[#allocation2 + $0x78] sm:$0xff] %v4549_v58  ;;  %418 = vst [vmem:[#allocation2 + $0x80] sm:$0xff] %v4549_v58  ;;  %1487 = vmatprep.subr.mxu1 %v5794_v1  ;;  %v1371_v62 = vld [vmem:[#allocation9 + $0x158] sm:$0xff]  ;;  %v478_v3 = vld [vmem:[%s4731_s15 + $0x88] sm:$0xff]  ;;  %vm459_vm2 = vcmp.gt.f32.partialorder %v441_v61, 0.5  ;;  %v733_v10 = vsel %vm460_vm3, 1, %v4547_v0 }
  0x83   : > { %4108 = vmatmul.mubr.msk.f32.gmra.mxu0 %vm488_vm0, %v468_v23  ;;  %759 = vperm.xlu0 %4329, %v724_v41   ;;  %419 = vst [vmem:[#allocation2 + $0x88] sm:$0xff] %v4549_v58  ;;  %420 = vst [vmem:[#allocation2 + $0x90] sm:$0xff] %v4549_v58  ;;  %v1337_v6 = vld [vmem:[#allocation9 + $0x48] sm:$0xff]  ;;  %v1370_v7 = vld [vmem:[#allocation9 + $0x150] sm:$0xff]  ;;  %v732_v8 = vsel %vm459_vm2, 1, %v4547_v0 }
  0x84   : > { %4110 = vmatprep.mubr.msk.f32.mxu0 %vm488_vm0, %v469_v25  ;;  %762 = vperm.xlu1 %4330, %v725_v43   ;;  %421 = vst [vmem:[#allocation2 + $0x98] sm:$0xff] %v4549_v58  ;;  %422 = vst [vmem:[#allocation2 + $0xa0] sm:$0xff] %v4549_v58  ;;  %v1336_v9 = vld [vmem:[#allocation9 + $0x40] sm:$0xff]  ;;  %v1335_v11 = vld [vmem:[#allocation9 + $0x38] sm:$0xff] }
  0x85   : > { %1640 = vmatprep.subr.mxu0 %v5794_v1  ;;  %423 = vst [vmem:[#allocation2 + $0xa8] sm:$0xff] %v4549_v58  ;;  %424 = vst [vmem:[#allocation2 + $0xb0] sm:$0xff] %v4549_v58  ;;  %1488 = vmatpush1.msra.mxu1 %v1339_v55  ;;  %v1369_v12 = vld [vmem:[#allocation9 + $0x148] sm:$0xff]  ;;  %v1334_v13 = vld [vmem:[#allocation9 + $0x30] sm:$0xff] }
  0x86   : > { %1641 = vmatpush1.msra.mxu0 %v1372_v53  ;;  %1489 = vmatprep.subr.mxu1 %v5794_v1  ;;  %v1368_v14 = vld [vmem:[#allocation9 + $0x140] sm:$0xff]  ;;  %v1333_v0 = vld [vmem:[#allocation9 + $0x28] sm:$0xff]  ;;  %v1367_v15 = vld [vmem:[#allocation9 + $0x138] sm:$0xff] }
  0x87   : > { %4111 = vmatmul.mubr.msk.f32.gmra.mxu0 %vm488_vm0, %v470_v32  ;;  %765 = vperm.xlu0 %4329, %v726_v49   ;;  %v1332_v16 = vld [vmem:[#allocation9 + $0x20] sm:$0xff]  ;;  %v1366_v17 = vld [vmem:[#allocation9 + $0x130] sm:$0xff]  ;;  %v1331_v18 = vld [vmem:[#allocation9 + $0x18] sm:$0xff] }
  0x88   : > { %4113 = vmatprep.mubr.msk.f32.mxu0 %vm488_vm0, %v471_v34  ;;  %768 = vperm.xlu1 %4330, %v727_v51   ;;  %v1365_v19 = vld [vmem:[#allocation9 + $0x128] sm:$0xff]  ;;  %v1330_v20 = vld [vmem:[#allocation9 + $0x10] sm:$0xff]  ;;  %v1364_v21 = vld [vmem:[#allocation9 + $0x120] sm:$0xff] }
  0x89   : > { %1642 = vmatprep.subr.mxu0 %v5794_v1  ;;  %1490 = vmatpush1.msra.mxu1 %v1338_v2  ;;  %v1329_v22 = vld [vmem:[#allocation9 + $0x8] sm:$0xff]  ;;  %v1363_v23 = vld [vmem:[#allocation9 + $0x118] sm:$0xff]  ;;  %v1328_v24 = vld [vmem:[#allocation9] sm:$0xff] }
  0x8a   : > { %1643 = vmatpush1.msra.mxu0 %v1371_v62  ;;  %1491 = vmatprep.subr.mxu1 %v5794_v1  ;;  %v1362_v25 = vld [vmem:[#allocation9 + $0x110] sm:$0xff]  ;;  %v1359_v26 = vld [vmem:[#allocation9 + $0xf8] sm:$0xff]  ;;  %v1361_v27 = vld [vmem:[#allocation9 + $0x108] sm:$0xff] }
  0x8b   : > { %4114 = vmatmul.mubr.msk.f32.gmra.mxu0 %vm488_vm0, %v472_v40  ;;  %771 = vperm.xlu0 %4329, %v728_v57   ;;  %v1358_v28 = vld [vmem:[#allocation9 + $0xf0] sm:$0xff]  ;;  %v1360_v29 = vld [vmem:[#allocation9 + $0x100] sm:$0xff]  ;;  %v1357_v30 = vld [vmem:[#allocation9 + $0xe8] sm:$0xff] }
  0x8c   : > { %4116 = vmatprep.mubr.msk.f32.mxu0 %vm488_vm0, %v473_v42  ;;  %774 = vperm.xlu1 %4330, %v729_v60   ;;  %v1391_v31 = vld [vmem:[#allocation9 + $0x1f8] sm:$0xff]  ;;  %v1356_v32 = vld [vmem:[#allocation9 + $0xe0] sm:$0xff]  ;;  %v1390_v33 = vld [vmem:[#allocation9 + $0x1f0] sm:$0xff] }
  0x8d   : > { %1644 = vmatprep.subr.mxu0 %v5794_v1  ;;  %1492 = vmatpush1.msra.mxu1 %v1337_v6  ;;  %v1355_v34 = vld [vmem:[#allocation9 + $0xd8] sm:$0xff]  ;;  %v1389_v35 = vld [vmem:[#allocation9 + $0x1e8] sm:$0xff]  ;;  %v1354_v36 = vld [vmem:[#allocation9 + $0xd0] sm:$0xff] }
  0x8e   : > { %1645 = vmatpush1.msra.mxu0 %v1370_v7  ;;  %1493 = vmatprep.subr.mxu1 %v5794_v1  ;;  %v1388_v37 = vld [vmem:[#allocation9 + $0x1e0] sm:$0xff]  ;;  %v1353_v38 = vld [vmem:[#allocation9 + $0xc8] sm:$0xff]  ;;  %v1387_v39 = vld [vmem:[#allocation9 + $0x1d8] sm:$0xff] }
  0x8f   : > { %4117 = vmatmul.mubr.msk.f32.gmra.mxu0 %vm488_vm0, %v474_v48  ;;  %777 = vperm.xlu0 %4329, %v730_v4   ;;  %v1352_v40 = vld [vmem:[#allocation9 + $0xc0] sm:$0xff]  ;;  %v1386_v41 = vld [vmem:[#allocation9 + $0x1d0] sm:$0xff]  ;;  %v1351_v42 = vld [vmem:[#allocation9 + $0xb8] sm:$0xff] }
  0x90   : > { %4119 = vmatprep.mubr.msk.f32.mxu0 %vm488_vm0, %v475_v50  ;;  %780 = vperm.xlu1 %4330, %v731_v5   ;;  %v1385_v43 = vld [vmem:[#allocation9 + $0x1c8] sm:$0xff]  ;;  %v1350_v44 = vld [vmem:[#allocation9 + $0xb0] sm:$0xff]  ;;  %v1384_v45 = vld [vmem:[#allocation9 + $0x1c0] sm:$0xff] }
  0x91   : > { %1646 = vmatprep.subr.mxu0 %v5794_v1  ;;  %1494 = vmatpush1.msra.mxu1 %v1336_v9  ;;  %v1349_v46 = vld [vmem:[#allocation9 + $0xa8] sm:$0xff]  ;;  %v1383_v47 = vld [vmem:[#allocation9 + $0x1b8] sm:$0xff]  ;;  %v1348_v48 = vld [vmem:[#allocation9 + $0xa0] sm:$0xff] }
  0x92   : > { %1495 = vmatprep.subr.mxu1 %v5794_v1  ;;  %1647 = vmatpush1.msra.mxu0 %v1369_v12  ;;  %v1382_v49 = vld [vmem:[#allocation9 + $0x1b0] sm:$0xff]  ;;  %v1347_v50 = vld [vmem:[#allocation9 + $0x98] sm:$0xff]  ;;  %v878_v51 = vld [vmem:[#allocation2 + $0x1] sm:$0xff] }
  0x93   : > { %4120 = vmatmul.mubr.msk.f32.gmra.mxu0 %vm488_vm0, %v476_v56  ;;  %783 = vperm.xlu0 %4329, %v732_v8   ;;  %v1381_v52 = vld [vmem:[#allocation9 + $0x1a8] sm:$0xff]  ;;  %v1346_v53 = vld [vmem:[#allocation9 + $0x90] sm:$0xff]  ;;  %v1380_v54 = vld [vmem:[#allocation9 + $0x1a0] sm:$0xff] }
  0x94   : > { %4122 = vmatprep.mubr.msk.f32.mxu0 %vm488_vm0, %v477_v59  ;;  %786 = vperm.xlu1 %4330, %v733_v10   ;;  %v1345_v55 = vld [vmem:[#allocation9 + $0x88] sm:$0xff]  ;;  %v1379_v56 = vld [vmem:[#allocation9 + $0x198] sm:$0xff]  ;;  %v1344_v57 = vld [vmem:[#allocation9 + $0x80] sm:$0xff] }
  0x95   : > { %1496 = vmatpush1.msra.mxu1 %v1335_v11  ;;  %1648 = vmatprep.subr.mxu0 %v5794_v1  ;;  %v1407_v59 = vld [vmem:[#allocation9 + $0x278] sm:$0xff]  ;;  %v879_v60 = vld [vmem:[#allocation2 + $0x9] sm:$0xff]  ;;  %v1404_v4 = vld [vmem:[#allocation9 + $0x260] sm:$0xff] }
  0x96   : > { %1497 = vmatprep.subr.mxu1 %v5794_v1  ;;  %1649 = vmatpush1.msra.mxu0 %v1368_v14  ;;  %v1378_v61 = vld [vmem:[#allocation9 + $0x190] sm:$0xff]  ;;  %v1377_v63 = vld [vmem:[#allocation9 + $0x188] sm:$0xff]  ;;  %v1403_v5 = vld [vmem:[#allocation9 + $0x258] sm:$0xff] }
  0x97   : > { %4123 = vmatmul.mubr.msk.f32.gmra.mxu0 %vm488_vm0, %v478_v3  ;;  %1498 = vmatpush1.msra.mxu1 %v1334_v13  ;;  %v1406_v62 = vld [vmem:[#allocation9 + $0x270] sm:$0xff]  ;;  %v1405_v2 = vld [vmem:[#allocation9 + $0x268] sm:$0xff]  ;;  %v1376_v3 = vld [vmem:[#allocation9 + $0x180] sm:$0xff] }
  0x98   : > { %1499 = vmatprep.subr.mxu1 %v5794_v1  ;;  %1650 = vmatprep.subr.mxu0 %v5794_v1  ;;  %v1402_v6 = vld [vmem:[#allocation9 + $0x250] sm:$0xff]  ;;  %v1400_v7 = vld [vmem:[#allocation9 + $0x240] sm:$0xff]  ;;  %v1399_v8 = vld [vmem:[#allocation9 + $0x238] sm:$0xff] }
  0x99   : > { %1500 = vmatpush1.msra.mxu1 %v1333_v0  ;;  %1651 = vmatpush1.msra.mxu0 %v1367_v15  ;;  %v1398_v9 = vld [vmem:[#allocation9 + $0x230] sm:$0xff]  ;;  %v1397_v10 = vld [vmem:[#allocation9 + $0x228] sm:$0xff]  ;;  %v1396_v11 = vld [vmem:[#allocation9 + $0x220] sm:$0xff] }
  0x9a   : > { %1501 = vmatprep.subr.mxu1 %v5794_v1  ;;  %1652 = vmatprep.subr.mxu0 %v5794_v1  ;;  %v1395_v12 = vld [vmem:[#allocation9 + $0x218] sm:$0xff]  ;;  %v1394_v13 = vld [vmem:[#allocation9 + $0x210] sm:$0xff]  ;;  %v1393_v14 = vld [vmem:[#allocation9 + $0x208] sm:$0xff] }
  0x9b   : > { %1502 = vmatpush1.msra.mxu1 %v1332_v16  ;;  %1653 = vmatpush1.msra.mxu0 %v1366_v17  ;;  %v1392_v0 = vld [vmem:[#allocation9 + $0x200] sm:$0xff]  ;;  %v1423_v15 = vld [vmem:[#allocation9 + $0x2f8] sm:$0xff]  ;;  %v1422_v16 = vld [vmem:[#allocation9 + $0x2f0] sm:$0xff] }
  0x9c   : > { %1503 = vmatprep.subr.mxu1 %v5794_v1  ;;  %1654 = vmatprep.subr.mxu0 %v5794_v1  ;;  %v1421_v17 = vld [vmem:[#allocation9 + $0x2e8] sm:$0xff] }
  0x9d   : > { %1504 = vmatpush1.msra.mxu1 %v1331_v18  ;;  %1655 = vmatpush1.msra.mxu0 %v1365_v19  ;;  %v1420_v18 = vld [vmem:[#allocation9 + $0x2e0] sm:$0xff]  ;;  %v1419_v19 = vld [vmem:[#allocation9 + $0x2d8] sm:$0xff] }
  0x9e   : > { %1505 = vmatprep.subr.mxu1 %v5794_v1  ;;  %1656 = vmatprep.subr.mxu0 %v5794_v1 }
  0x9f   : > { %1506 = vmatpush1.msra.mxu1 %v1330_v20  ;;  %1657 = vmatpush1.msra.mxu0 %v1364_v21  ;;  %v1418_v20 = vld [vmem:[#allocation9 + $0x2d0] sm:$0xff]  ;;  %v1417_v21 = vld [vmem:[#allocation9 + $0x2c8] sm:$0xff] }
  0xa0   : > { %1507 = vmatprep.subr.mxu1 %v5794_v1  ;;  %1658 = vmatprep.subr.mxu0 %v5794_v1 }
  0xa1   : > { %1508 = vmatpush1.msra.mxu1 %v1329_v22  ;;  %1659 = vmatpush1.msra.mxu0 %v1363_v23  ;;  %v1416_v22 = vld [vmem:[#allocation9 + $0x2c0] sm:$0xff]  ;;  %v1415_v23 = vld [vmem:[#allocation9 + $0x2b8] sm:$0xff] }
  0xa2   : > { %1509 = vmatprep.subr.mxu1 %v5794_v1  ;;  %1660 = vmatprep.subr.mxu0 %v5794_v1 }
  0xa3   : > { %1510 = vmatpush1.msra.mxu1 %v1328_v24  ;;  %1661 = vmatpush1.msra.mxu0 %v1362_v25  ;;  %v1414_v24 = vld [vmem:[#allocation9 + $0x2b0] sm:$0xff]  ;;  %v1413_v25 = vld [vmem:[#allocation9 + $0x2a8] sm:$0xff] }
  0xa4   : > { %1511 = vmatprep.subr.mxu1 %v5794_v1  ;;  %1662 = vmatprep.subr.mxu0 %v5794_v1 }
  0xa5   : > { %1512 = vmatpush2.msra.mxu1 %v1359_v26  ;;  %1663 = vmatpush1.msra.mxu0 %v1361_v27  ;;  %v1412_v26 = vld [vmem:[#allocation9 + $0x2a0] sm:$0xff]  ;;  %v1411_v27 = vld [vmem:[#allocation9 + $0x298] sm:$0xff] }
  0xa6   : > { %1513 = vmatprep.subr.mxu1 %v5794_v1  ;;  %1664 = vmatprep.subr.mxu0 %v5794_v1 }
  0xa7   : > { %1514 = vmatpush2.msra.mxu1 %v1358_v28  ;;  %1665 = vmatpush1.msra.mxu0 %v1360_v29  ;;  %v1410_v28 = vld [vmem:[#allocation9 + $0x290] sm:$0xff]  ;;  %v1409_v29 = vld [vmem:[#allocation9 + $0x288] sm:$0xff] }
  0xa8   : > { %1515 = vmatprep.subr.mxu1 %v5794_v1  ;;  %1666 = vmatprep.subr.mxu0 %v5794_v1 }
  0xa9   : > { %1516 = vmatpush2.msra.mxu1 %v1357_v30  ;;  %1667 = vmatpush2.msra.mxu0 %v1391_v31  ;;  %v1408_v30 = vld [vmem:[#allocation9 + $0x280] sm:$0xff]  ;;  %v4908_v31 = vld [vmem:[#allocation9 + $0x478] sm:$0xff] }
  0xaa   : > { %1517 = vmatprep.subr.mxu1 %v5794_v1  ;;  %1668 = vmatprep.subr.mxu0 %v5794_v1 }
  0xab   : > { %1518 = vmatpush2.msra.mxu1 %v1356_v32  ;;  %1669 = vmatpush2.msra.mxu0 %v1390_v33 }
  0xac   : > { %1519 = vmatprep.subr.mxu1 %v5794_v1  ;;  %1670 = vmatprep.subr.mxu0 %v5794_v1 }
  0xad   : > { %1520 = vmatpush2.msra.mxu1 %v1355_v34  ;;  %1671 = vmatpush2.msra.mxu0 %v1389_v35 }
  0xae   : > { %1521 = vmatprep.subr.mxu1 %v5794_v1  ;;  %1672 = vmatprep.subr.mxu0 %v5794_v1 }
  0xaf   : > { %1522 = vmatpush2.msra.mxu1 %v1354_v36  ;;  %1673 = vmatpush2.msra.mxu0 %v1388_v37  ;;  %v4922_v37 = vld [vmem:[#allocation8] ss:$0 sm:$0xff] }
  0xb0   : > { %1523 = vmatprep.subr.mxu1 %v5794_v1  ;;  %1674 = vmatprep.subr.mxu0 %v5794_v1 }
  0xb1   : > { %1524 = vmatpush2.msra.mxu1 %v1353_v38  ;;  %1675 = vmatpush2.msra.mxu0 %v1387_v39 }
  0xb2   : > { %1525 = vmatprep.subr.mxu1 %v5794_v1  ;;  %1676 = vmatprep.subr.mxu0 %v5794_v1 }
  0xb3   : > { %1526 = vmatpush2.msra.mxu1 %v1352_v40  ;;  %1677 = vmatpush2.msra.mxu0 %v1386_v41 }
  0xb4   : > { %1527 = vmatprep.subr.mxu1 %v5794_v1  ;;  %1678 = vmatprep.subr.mxu0 %v5794_v1 }
  0xb5   : > { %1528 = vmatpush2.msra.mxu1 %v1351_v42  ;;  %1679 = vmatpush2.msra.mxu0 %v1385_v43 }
  0xb6   : > { %1529 = vmatprep.subr.mxu1 %v5794_v1  ;;  %1680 = vmatprep.subr.mxu0 %v5794_v1 }
  0xb7   : > { %1530 = vmatpush2.msra.mxu1 %v1350_v44  ;;  %1681 = vmatpush2.msra.mxu0 %v1384_v45 }
  0xb8   : > { %1531 = vmatprep.subr.mxu1 %v5794_v1  ;;  %1682 = vmatprep.subr.mxu0 %v5794_v1 }
  0xb9   : > { %1532 = vmatpush2.msra.mxu1 %v1349_v46  ;;  %1683 = vmatpush2.msra.mxu0 %v1383_v47 }
  0xba   : > { %1533 = vmatprep.subr.mxu1 %v5794_v1  ;;  %1684 = vmatprep.subr.mxu0 %v5794_v1 }
  0xbb   : > { %1534 = vmatpush2.msra.mxu1 %v1348_v48  ;;  %1685 = vmatpush2.msra.mxu0 %v1382_v49 }
  0xbc   : > { %1535 = vmatprep.subr.mxu1 %v5794_v1  ;;  %1686 = vmatprep.subr.mxu0 %v5794_v1 }
  0xbd   : > { %1536 = vmatpush2.msra.mxu1 %v1347_v50  ;;  %1543 = vmatprep.mubr.f32.mxu1 %v878_v51 }
  0xbe   : > { %1537 = vmatprep.subr.mxu1 %v5794_v1  ;;  %1687 = vmatpush2.msra.mxu0 %v1381_v52 }
  0xbf   : > { %1538 = vmatpush2.msra.mxu1 %v1346_v53  ;;  %1688 = vmatprep.subr.mxu0 %v5794_v1 }
  0xc0   : > { %1539 = vmatprep.subr.mxu1 %v5794_v1  ;;  %1689 = vmatpush2.msra.mxu0 %v1380_v54 }
  0xc1   : > { %1540 = vmatpush2.msra.mxu1 %v1345_v55  ;;  %1690 = vmatprep.subr.mxu0 %v5794_v1 }
  0xc2   : > { %1541 = vmatprep.subr.mxu1 %v5794_v1  ;;  %1691 = vmatpush2.msra.mxu0 %v1379_v56 }
  0xc3   : > { %1542 = vmatpush2.msra.mxu1 %v1344_v57  ;;  %1692 = vmatprep.subr.mxu0 %v5794_v1 }
  0xc4   : > { %1544 = vmatmul.mubr.f32.vlgmr.msra.gmra.mxu1 %v4549_v58  ;;  %1789 = vmatprep.subr.mxu1 %v5794_v1 }
  0xc5   : > { %1790 = vmatpush1.msra.mxu1 %v1407_v59  ;;  %1548 = vmatprep.mubr.f32.mxu1 %v879_v60 }
  0xc6   : > { %1791 = vmatprep.subr.mxu1 %v5794_v1  ;;  %1693 = vmatpush2.msra.mxu0 %v1378_v61 }
  0xc7   : > { %1792 = vmatpush1.msra.mxu1 %v1406_v62  ;;  %1694 = vmatprep.subr.mxu0 %v5794_v1 }
  0xc8   : > { %1549 = vmatmul.mubr.f32.gmra.mxu1 %v4549_v58  ;;  %1793 = vmatprep.subr.mxu1 %v5794_v1  ;;  %v1401_v58 = vld [vmem:[#allocation9 + $0x248] sm:$0xff] }
  0xc9   : > { %1695 = vmatpush2.msra.mxu0 %v1377_v63  ;;  %1794 = vmatpush1.msra.mxu1 %v1405_v2 }
  0xca   : > { %1696 = vmatprep.subr.mxu0 %v5794_v1  ;;  %1795 = vmatprep.subr.mxu1 %v5794_v1 }
  0xcb   : > { %1697 = vmatpush2.msra.mxu0 %v1376_v3  ;;  %1796 = vmatpush1.msra.mxu1 %v1404_v4 }
  0xcc   : > { %1797 = vmatprep.subr.mxu1 %v5794_v1  ;;  %1944 = vmatprep.subr.mxu0 %v5794_v1 }
  0xcd   : > { %1798 = vmatpush1.msra.mxu1 %v1403_v5 }
  0xce   : > { %1799 = vmatprep.subr.mxu1 %v5794_v1 }
  0xcf   : > { %1800 = vmatpush1.msra.mxu1 %v1402_v6 }
  0xd0   : > { %1801 = vmatprep.subr.mxu1 %v5794_v1 }
  0xd1   : > { %1802 = vmatpush1.msra.mxu1 %v1401_v58 }
  0xd2   : > { %1803 = vmatprep.subr.mxu1 %v5794_v1 }
  0xd3   : > { %1804 = vmatpush1.msra.mxu1 %v1400_v7  ;;  %v914_v7 = vld [vmem:[#allocation2 + $0x2] sm:$0xff] }
  0xd4   : > { %1805 = vmatprep.subr.mxu1 %v5794_v1 }
  0xd5   : > { %1806 = vmatpush1.msra.mxu1 %v1399_v8 }
  0xd6   : > { %1807 = vmatprep.subr.mxu1 %v5794_v1 }
  0xd7   : > { %1808 = vmatpush1.msra.mxu1 %v1398_v9 }
  0xd8   : > { %1809 = vmatprep.subr.mxu1 %v5794_v1 }
  0xd9   : > { %1810 = vmatpush1.msra.mxu1 %v1397_v10 }
  0xda   : > { %1811 = vmatprep.subr.mxu1 %v5794_v1 }
  0xdb   : > { %1812 = vmatpush1.msra.mxu1 %v1396_v11 }
  0xdc   : > { %1813 = vmatprep.subr.mxu1 %v5794_v1 }
  0xdd   : > { %1814 = vmatpush1.msra.mxu1 %v1395_v12 }
  0xde   : > { %1815 = vmatprep.subr.mxu1 %v5794_v1 }
  0xdf   : > { %1816 = vmatpush1.msra.mxu1 %v1394_v13 }
  0xe0   : > { %1817 = vmatprep.subr.mxu1 %v5794_v1 }
  0xe1   : > { %1818 = vmatpush1.msra.mxu1 %v1393_v14 }
  0xe2   : > { %1819 = vmatprep.subr.mxu1 %v5794_v1 }
  0xe3   : > { %1820 = vmatpush1.msra.mxu1 %v1392_v0 }
  0xe4   : > { %1821 = vmatprep.subr.mxu1 %v5794_v1 }
  0xe5   : > { %1822 = vmatpush2.msra.mxu1 %v1423_v15  ;;  %v1439_v15 = vld [vmem:[#allocation9 + $0x378] sm:$0xff] }
  0xe6   : > { %1823 = vmatprep.subr.mxu1 %v5794_v1 }
  0xe7   : > { %1824 = vmatpush2.msra.mxu1 %v1422_v16 }
  0xe8   : > { %1825 = vmatprep.subr.mxu1 %v5794_v1 }
  0xe9   : > { %1826 = vmatpush2.msra.mxu1 %v1421_v17 }
  0xea   : > { %1827 = vmatprep.subr.mxu1 %v5794_v1 }
  0xeb   : > { %1828 = vmatpush2.msra.mxu1 %v1420_v18 }
  0xec   : > { %1829 = vmatprep.subr.mxu1 %v5794_v1 }
  0xed   : > { %1830 = vmatpush2.msra.mxu1 %v1419_v19 }
  0xee   : > { %1831 = vmatprep.subr.mxu1 %v5794_v1  ;;  %v4914_v33 = vpop.permute.xlu0 %735 }
  0xef   : > { %1832 = vmatpush2.msra.mxu1 %v1418_v20  ;;  %v4912_v32 = vpop.permute.xlu1 %741  ;;  %vm788_vm4 = vcmp.eq.s32.totalorder %v4914_v33, 1 }
  0xf0   : > { %1833 = vmatprep.subr.mxu1 %v5794_v1  ;;  %vm790_vm6 = vcmp.eq.s32.totalorder %v4912_v32, 1 }
  0xf1   : > { %1834 = vmatpush2.msra.mxu1 %v1417_v21 }
  0xf2   : > { %1835 = vmatprep.subr.mxu1 %v5794_v1  ;;  %v4918_v35 = vpop.permute.xlu0 %738 }
  0xf3   : > { %1836 = vmatpush2.msra.mxu1 %v1416_v22  ;;  %v4916_v34 = vpop.permute.xlu1 %744  ;;  %vm789_vm0 = vcmp.eq.s32.totalorder %v4918_v35, 1 }
  0xf4   : > { %1837 = vmatprep.subr.mxu1 %v5794_v1  ;;  %vm791_vm5 = vcmp.eq.s32.totalorder %v4916_v34, 1 }
  0xf5   : > { %1838 = vmatpush2.msra.mxu1 %v1415_v23  ;;  %v915_v23 = vld [vmem:[#allocation2 + $0xa] sm:$0xff] }
  0xf6   : > { %1839 = vmatprep.subr.mxu1 %v5794_v1  ;;  %v4924_v38 = vpop.permute.xlu0 %747 }
  0xf7   : > { %1840 = vmatpush2.msra.mxu1 %v1414_v24  ;;  %v4920_v36 = vpop.permute.xlu1 %750  ;;  %vm792_vm8 = vcmp.eq.s32.totalorder %v4924_v38, 1 }
  0xf8   : > { %1841 = vmatprep.subr.mxu1 %v5794_v1  ;;  %vm793_vm7 = vcmp.eq.s32.totalorder %v4920_v36, 1 }
  0xf9   : > { %1842 = vmatpush2.msra.mxu1 %v1413_v25 }
  0xfa   : > { %1843 = vmatprep.subr.mxu1 %v5794_v1  ;;  %v4932_v46 = vpop.permute.xlu0 %753 }
  0xfb   : > { %1844 = vmatpush2.msra.mxu1 %v1412_v26  ;;  %v4928_v42 = vpop.permute.xlu1 %756  ;;  %vm794_vm10 = vcmp.eq.s32.totalorder %v4932_v46, 1 }
  0xfc   : > { %1845 = vmatprep.subr.mxu1 %v5794_v1  ;;  %vm795_vm9 = vcmp.eq.s32.totalorder %v4928_v42, 1 }
  0xfd   : > { %1846 = vmatpush2.msra.mxu1 %v1411_v27 }
  0xfe   : > { %1847 = vmatprep.subr.mxu1 %v5794_v1  ;;  %v4957_v61 = vpop.permute.xlu0 %759 }
  0xff   : > { %1848 = vmatpush2.msra.mxu1 %v1410_v28  ;;  %v4948_v55 = vpop.permute.xlu1 %762  ;;  %vm796_vm12 = vcmp.eq.s32.totalorder %v4957_v61, 1 }
 0x100   : > { %1849 = vmatprep.subr.mxu1 %v5794_v1  ;;  %vm797_vm11 = vcmp.eq.s32.totalorder %v4948_v55, 1 }
 0x101   : > { %1850 = vmatpush2.msra.mxu1 %v1409_v29  ;;  %v1438_v29 = vld [vmem:[#allocation9 + $0x370] sm:$0xff] }
 0x102   : > { %1851 = vmatprep.subr.mxu1 %v5794_v1  ;;  %v4981_v16 = vpop.permute.xlu0 %765 }
 0x103   : > { %1852 = vmatpush2.msra.mxu1 %v1408_v30  ;;  %v4972_v8 = vpop.permute.xlu1 %768  ;;  %5815 = vst [vmem:[#allocation19_spill] sm:$0xff] %v4981_v16  ;;  %vm798_vm14 = vcmp.eq.s32.totalorder %v4981_v16, 1 }
 0x104   : > { %4125 = vmatprep.subr.mxu1 %v4908_v31  ;;  %vm799_vm13 = vcmp.eq.s32.totalorder %v4972_v8, 1 }
 0x107   : > { %v5001_v30 = vpop.permute.xlu1 %774 }
 0x108   : > { %5816 = vst [vmem:[#allocation20_spill] sm:$0xff] %v5001_v30  ;;  %vm801_vm15 = vcmp.eq.s32.totalorder %v5001_v30, 1 }
 0x137   : > { %v4100_v39 = vpop.f32.mrf.mxu0 }
 0x138   : > { %v615_v40 = vadd.f32 %v4100_v39, %v4922_v37 }
 0x139   : > { %v609_v41 = vpop.f32.mrf.mxu0 }
 0x13a   : > { %v699_v43 = vmax.f32 %v615_v40, 0.0  ;;  %v610_v44 = vadd.f32 %v4922_v37, %v609_v41 }
 0x13b   : > { %v4103_v45 = vpop.f32.mrf.mxu0 }
 0x13c   : > { %v4936_v47 = vsel %vm789_vm0, %v699_v43, -1.0  ;;  %v698_v48 = vmax.f32 %v610_v44, 0.0  ;;  %v625_v49 = vadd.f32 %v4103_v45, %v4922_v37 }
 0x13d   : > { %825 = vst [vmem:[#allocation2 + $0x1b] sm:$0xff] %v4936_v47  ;;  %v619_v50 = vpop.f32.mrf.mxu0 }
 0x13e   : > { %v4943_v51 = vsel %vm788_vm4, %v698_v48, -1.0  ;;  %v701_v52 = vmax.f32 %v625_v49, 0.0  ;;  %v620_v53 = vadd.f32 %v4922_v37, %v619_v50  ;;  %v5013_v48 = vpop.permute.xlu0 %771 }
 0x13f   : > { %824 = vst [vmem:[#allocation2 + $0x13] sm:$0xff] %v4943_v51  ;;  %v4106_v54 = vpop.f32.mrf.mxu0  ;;  %5817 = vst [vmem:[#allocation21_spill] sm:$0xff] %v5013_v48  ;;  %vm800_vm1 = vcmp.eq.s32.totalorder %v5013_v48, 1 }
 0x140   : > { %v4952_v56 = vsel %vm791_vm5, %v701_v52, -1.0  ;;  %v700_v57 = vmax.f32 %v620_v53, 0.0  ;;  %v635_v59 = vadd.f32 %v4106_v54, %v4922_v37 }
 0x141   : > { %827 = vst [vmem:[#allocation2 + $0x2b] sm:$0xff] %v4952_v56  ;;  %v629_v60 = vpop.f32.mrf.mxu0 }
 0x142   : > { %v4961_v62 = vsel %vm790_vm6, %v700_v57, -1.0  ;;  %v703_v63 = vmax.f32 %v635_v59, 0.0  ;;  %v630_v2 = vadd.f32 %v4922_v37, %v629_v60  ;;  %v1437_v57 = vld [vmem:[#allocation9 + $0x368] sm:$0xff] }
 0x143   : > { %826 = vst [vmem:[#allocation2 + $0x23] sm:$0xff] %v4961_v62  ;;  %v4109_v3 = vpop.f32.mrf.mxu0 }
 0x144   : > { %v4967_v4 = vsel %vm793_vm7, %v703_v63, -1.0  ;;  %v702_v5 = vmax.f32 %v630_v2, 0.0  ;;  %v645_v6 = vadd.f32 %v4109_v3, %v4922_v37 }
 0x145   : > { %829 = vst [vmem:[#allocation2 + $0x3b] sm:$0xff] %v4967_v4  ;;  %v639_v58 = vpop.f32.mrf.mxu0 }
 0x146   : > { %v4976_v9 = vsel %vm792_vm8, %v702_v5, -1.0  ;;  %v705_v10 = vmax.f32 %v645_v6, 0.0  ;;  %v640_v11 = vadd.f32 %v4922_v37, %v639_v58  ;;  %v880_v12 = vld [vmem:[#allocation2 + $0x11] sm:$0xff]  ;;  %v881_v20 = vld [vmem:[#allocation2 + $0x19] sm:$0xff]  ;;  %v5033_v6 = vpop.permute.xlu1 %780 }
 0x147   : > { %v950_v13 = vld [vmem:[#allocation2 + $0x12] sm:$0xff]  ;;  %828 = vst [vmem:[#allocation2 + $0x33] sm:$0xff] %v4976_v9  ;;  %v4112_v0 = vpop.f32.mrf.mxu0  ;;  %1553 = vmatprep.mubr.f32.mxu1 %v880_v12  ;;  %v4988_v21 = vld [vmem:[#allocation2 + $0x1a] sm:$0xff]  ;;  %5818 = vst [vmem:[#allocation22_spill] sm:$0xff] %v5033_v6  ;;  %vm5792_vm2 = vcmp.eq.s32.totalorder %v5033_v6, 1 }
 0x148   : > { %v844_v14 = vld [vmem:[#allocation2 + $0x10] sm:$0xff]  ;;  %1698 = vmatprep.mubr.f32.mxu0 %v950_v13  ;;  %v4985_v17 = vsel %vm795_vm9, %v705_v10, -1.0  ;;  %v704_v18 = vmax.f32 %v640_v11, 0.0  ;;  %v655_v19 = vadd.f32 %v4112_v0, %v4922_v37  ;;  %v845_v28 = vld [vmem:[#allocation2 + $0x18] sm:$0xff] }
 0x149   : > { %1554 = vmatmul.mubr.f32.gmra.mxu1 %v844_v14  ;;  %1699 = vmatmul.mubr.f32.vlgmr.msra.gmra.mxu0 %v914_v7  ;;  %831 = vst [vmem:[#allocation2 + $0x4b] sm:$0xff] %v4985_v17  ;;  %v649_v22 = vpop.f32.mrf.mxu0  ;;  %v5043_v14 = vpop.permute.xlu0 %777 }
 0x14a   : > { %1558 = vmatprep.mubr.f32.mxu1 %v881_v20  ;;  %1703 = vmatprep.mubr.f32.mxu0 %v4988_v21  ;;  %v4995_v24 = vsel %vm794_vm10, %v704_v18, -1.0  ;;  %v707_v25 = vmax.f32 %v655_v19, 0.0  ;;  %v650_v26 = vadd.f32 %v4922_v37, %v649_v22  ;;  %v882_v43 = vld [vmem:[#allocation2 + $0x21] sm:$0xff]  ;;  %v883_v2 = vld [vmem:[#allocation2 + $0x29] sm:$0xff]  ;;  %5819 = vst [vmem:[#allocation23_spill] sm:$0xff] %v5043_v14  ;;  %vm5793_vm3 = vcmp.eq.s32.totalorder %v5043_v14, 1 }
 0x14b   : > { %1945 = vmatpush1.msra.mxu0 %v1439_v15  ;;  %830 = vst [vmem:[#allocation2 + $0x43] sm:$0xff] %v4995_v24  ;;  %v4115_v27 = vpop.f32.mrf.mxu0  ;;  %v5008_v44 = vld [vmem:[#allocation2 + $0x22] sm:$0xff]  ;;  %v5028_v3 = vld [vmem:[#allocation2 + $0x2a] sm:$0xff] }
 0x14c   : > { %1946 = vmatprep.subr.mxu0 %v5794_v1  ;;  %v5005_v39 = vsel %vm797_vm11, %v707_v25, -1.0  ;;  %v706_v40 = vmax.f32 %v650_v26, 0.0  ;;  %v665_v41 = vadd.f32 %v4115_v27, %v4922_v37  ;;  %v846_v54 = vld [vmem:[#allocation2 + $0x20] sm:$0xff]  ;;  %v847_v12 = vld [vmem:[#allocation2 + $0x28] sm:$0xff] }
 0x14d   : > { %1559 = vmatmul.mubr.f32.gmra.mxu1 %v845_v28  ;;  %1704 = vmatmul.mubr.f32.gmra.mxu0 %v915_v23  ;;  %833 = vst [vmem:[#allocation2 + $0x5b] sm:$0xff] %v5005_v39  ;;  %v659_v45 = vpop.f32.mrf.mxu0  ;;  %v1435_v28 = vld [vmem:[#allocation9 + $0x358] sm:$0xff] }
 0x14e   : > { %1563 = vmatprep.mubr.f32.mxu1 %v882_v43  ;;  %1708 = vmatprep.mubr.f32.mxu0 %v5008_v44  ;;  %v5017_v49 = vsel %vm796_vm12, %v706_v40, -1.0  ;;  %v709_v50 = vmax.f32 %v665_v41, 0.0  ;;  %v660_v52 = vadd.f32 %v4922_v37, %v659_v45  ;;  %v884_v19 = vld [vmem:[#allocation2 + $0x31] sm:$0xff]  ;;  %v885_v45 = vld [vmem:[#allocation2 + $0x39] sm:$0xff] }
 0x14f   : > { %1947 = vmatpush1.msra.mxu0 %v1438_v29  ;;  %832 = vst [vmem:[#allocation2 + $0x53] sm:$0xff] %v5017_v49  ;;  %v4118_v53 = vpop.f32.mrf.mxu0  ;;  %v954_v20 = vld [vmem:[#allocation2 + $0x32] sm:$0xff]  ;;  %v5061_v29 = vpop.permute.xlu1 %786 }
 0x150   : > { %1948 = vmatprep.subr.mxu0 %v5794_v1  ;;  %v5025_v59 = vsel %vm799_vm13, %v709_v50, -1.0  ;;  %v708_v60 = vmax.f32 %v660_v52, 0.0  ;;  %v675_v63 = vadd.f32 %v4118_v53, %v4922_v37  ;;  %v848_v27 = vld [vmem:[#allocation2 + $0x30] sm:$0xff]  ;;  %5820 = vst [vmem:[#allocation24_spill] sm:$0xff] %v5061_v29  ;;  %v955_v50 = vld [vmem:[#allocation2 + $0x3a] sm:$0xff] }
 0x151   : > { %1564 = vmatmul.mubr.f32.gmra.mxu1 %v846_v54  ;;  %1709 = vmatmul.mubr.f32.gmra.mxu0 %v950_v13  ;;  %835 = vst [vmem:[#allocation2 + $0x6b] sm:$0xff] %v5025_v59  ;;  %v669_v5 = vpop.f32.mrf.mxu0  ;;  %v1436_v13 = vld [vmem:[#allocation9 + $0x360] sm:$0xff]  ;;  %v1434_v53 = vld [vmem:[#allocation9 + $0x350] sm:$0xff]  ;;  %v5071_v54 = vpop.permute.xlu0 %783 }
 0x152   : > { %1568 = vmatprep.mubr.f32.mxu1 %v883_v2  ;;  %1713 = vmatprep.mubr.f32.mxu0 %v5028_v3  ;;  %v5037_v58 = vsel %vm798_vm14, %v708_v60, -1.0  ;;  %v711_v7 = vmax.f32 %v675_v63, 0.0  ;;  %v670_v10 = vadd.f32 %v4922_v37, %v669_v5  ;;  %5821 = vst [vmem:[#allocation25_spill] sm:$0xff] %v5071_v54 }
 0x153   : > { %1949 = vmatpush1.msra.mxu0 %v1437_v57  ;;  %834 = vst [vmem:[#allocation2 + $0x63] sm:$0xff] %v5037_v58  ;;  %v4121_v11 = vpop.f32.mrf.mxu0 }
 0x154   : > { %1950 = vmatprep.subr.mxu0 %v5794_v1  ;;  %v5047_v0 = vsel %vm801_vm15, %v711_v7, -1.0  ;;  %v710_v15 = vmax.f32 %v670_v10, 0.0  ;;  %v685_v18 = vadd.f32 %v4121_v11, %v4922_v37  ;;  %v1433_v7 = vld [vmem:[#allocation9 + $0x348] sm:$0xff] }
 0x155   : > { %1569 = vmatmul.mubr.f32.gmra.mxu1 %v847_v12  ;;  %1714 = vmatmul.mubr.f32.gmra.mxu0 %v4988_v21  ;;  %837 = vst [vmem:[#allocation2 + $0x7b] sm:$0xff] %v5047_v0  ;;  %v679_v22 = vpop.f32.mrf.mxu0  ;;  %v956_v10 = vld [vmem:[#allocation2 + $0x42] sm:$0xff]  ;;  %v1432_v12 = vld [vmem:[#allocation9 + $0x340] sm:$0xff] }
 0x156   : > { %1573 = vmatprep.mubr.f32.mxu1 %v884_v19  ;;  %1718 = vmatprep.mubr.f32.mxu0 %v954_v20  ;;  %v5055_v23 = vsel %vm800_vm1, %v710_v15, -1.0  ;;  %v713_v25 = vmax.f32 %v685_v18, 0.0  ;;  %v680_v26 = vadd.f32 %v4922_v37, %v679_v22  ;;  %v887_v15 = vld [vmem:[#allocation2 + $0x49] sm:$0xff] }
 0x157   : > { %1951 = vmatpush1.msra.mxu0 %v1436_v13  ;;  %836 = vst [vmem:[#allocation2 + $0x73] sm:$0xff] %v5055_v23  ;;  %v4124_v21 = vpop.f32.mrf.mxu0  ;;  %v850_v13 = vld [vmem:[#allocation2 + $0x40] sm:$0xff]  ;;  %v957_v18 = vld [vmem:[#allocation2 + $0x4a] sm:$0xff] }
 0x158   : > { %1952 = vmatprep.subr.mxu0 %v5794_v1  ;;  %v5065_v40 = vsel %vm5792_vm2, %v713_v25, -1.0  ;;  %v712_v41 = vmax.f32 %v680_v26, 0.0  ;;  %v695_v43 = vadd.f32 %v4124_v21, %v4922_v37  ;;  %vm805_vm2 = vcmp.eq.s32.totalorder %v5061_v29, 1  ;;  %v1430_v19 = vld [vmem:[#allocation9 + $0x330] sm:$0xff]  ;;  %v1429_v26 = vld [vmem:[#allocation9 + $0x328] sm:$0xff]  ;;  %v958_v21 = vld [vmem:[#allocation2 + $0x52] sm:$0xff] }
 0x159   : > { %1574 = vmatmul.mubr.f32.gmra.mxu1 %v848_v27  ;;  %1719 = vmatmul.mubr.f32.gmra.mxu0 %v5008_v44  ;;  %839 = vst [vmem:[#allocation2 + $0x8b] sm:$0xff] %v5065_v40  ;;  %v689_v52 = vpop.f32.mrf.mxu0  ;;  %v849_v44 = vld [vmem:[#allocation2 + $0x38] sm:$0xff]  ;;  %v851_v22 = vld [vmem:[#allocation2 + $0x48] sm:$0xff] }
 0x15a   : > { %1578 = vmatprep.mubr.f32.mxu1 %v885_v45  ;;  %1723 = vmatprep.mubr.f32.mxu0 %v955_v50  ;;  %v5075_v57 = vsel %vm5793_vm3, %v712_v41, -1.0  ;;  %v715_v60 = vmax.f32 %v695_v43, 0.0  ;;  %v690_v63 = vadd.f32 %v4922_v37, %v689_v52  ;;  %vm804_vm3 = vcmp.eq.s32.totalorder %v5071_v54, 1  ;;  %v886_v37 = vld [vmem:[#allocation2 + $0x41] sm:$0xff]  ;;  %v888_v25 = vld [vmem:[#allocation2 + $0x51] sm:$0xff] }
 0x15b   : > { %1953 = vmatpush1.msra.mxu0 %v1435_v28  ;;  %838 = vst [vmem:[#allocation2 + $0x83] sm:$0xff] %v5075_v57  ;;  %v1428_v27 = vld [vmem:[#allocation9 + $0x320] sm:$0xff]  ;;  %v1427_v41 = vld [vmem:[#allocation9 + $0x318] sm:$0xff]  ;;  %v1426_v45 = vld [vmem:[#allocation9 + $0x310] sm:$0xff] }
 0x15c   : > { %1954 = vmatprep.subr.mxu0 %v5794_v1  ;;  %v5083_v2 = vsel %vm805_vm2, %v715_v60, -1.0  ;;  %v714_v5 = vmax.f32 %v690_v63, 0.0  ;;  %v889_v28 = vld [vmem:[#allocation2 + $0x59] sm:$0xff]  ;;  %v890_v52 = vld [vmem:[#allocation2 + $0x61] sm:$0xff] }
 0x15d   : > { %1955 = vmatpush1.msra.mxu0 %v1434_v53  ;;  %1579 = vmatmul.mubr.f32.gmra.mxu1 %v849_v44  ;;  %841 = vst [vmem:[#allocation2 + $0x9b] sm:$0xff] %v5083_v2  ;;  %v959_v43 = vld [vmem:[#allocation2 + $0x5a] sm:$0xff]  ;;  %v1425_v53 = vld [vmem:[#allocation9 + $0x308] sm:$0xff] }
 0x15e   : > { %1724 = vmatmul.mubr.f32.gmra.mxu0 %v5028_v3  ;;  %1956 = vmatprep.subr.mxu0 %v5794_v1  ;;  %v5091_v11 = vsel %vm804_vm3, %v714_v5, -1.0  ;;  %v1431_v3 = vld [vmem:[#allocation9 + $0x338] sm:$0xff]  ;;  %v960_v60 = vld [vmem:[#allocation2 + $0x62] sm:$0xff]  ;;  %v1424_v63 = vld [vmem:[#allocation9 + $0x300] sm:$0xff] }
 0x15f   : > { %1583 = vmatprep.mubr.f32.mxu1 %v886_v37  ;;  %1728 = vmatprep.mubr.f32.mxu0 %v956_v10  ;;  %840 = vst [vmem:[#allocation2 + $0x93] sm:$0xff] %v5091_v11  ;;  %v854_v44 = vld [vmem:[#allocation2 + $0x60] sm:$0xff]  ;;  %v891_v5 = vld [vmem:[#allocation2 + $0x69] sm:$0xff] }
 0x160   : > { %1957 = vmatpush1.msra.mxu0 %v1433_v7  ;;  %v1455_v7 = vld [vmem:[#allocation9 + $0x3f8] sm:$0xff]  ;;  %v961_v37 = vld [vmem:[#allocation2 + $0x6a] sm:$0xff] }
 0x161   : > { %1958 = vmatprep.subr.mxu0 %v5794_v1  ;;  %1584 = vmatmul.mubr.f32.gmra.mxu1 %v850_v13  ;;  %v892_v13 = vld [vmem:[#allocation2 + $0x71] sm:$0xff] }
 0x162   : > { %1959 = vmatpush1.msra.mxu0 %v1432_v12  ;;  %1588 = vmatprep.mubr.f32.mxu1 %v887_v15  ;;  %v855_v12 = vld [vmem:[#allocation2 + $0x68] sm:$0xff] }
 0x163   : > { %1729 = vmatmul.mubr.f32.gmra.mxu0 %v954_v20  ;;  %1960 = vmatprep.subr.mxu0 %v5794_v1  ;;  %v852_v20 = vld [vmem:[#allocation2 + $0x50] sm:$0xff]  ;;  %v1453_v15 = vld [vmem:[#allocation9 + $0x3e8] sm:$0xff] }
 0x164   : > { %1733 = vmatprep.mubr.f32.mxu0 %v957_v18  ;;  %1961 = vmatpush1.msra.mxu0 %v1431_v3  ;;  %v962_v3 = vld [vmem:[#allocation2 + $0x72] sm:$0xff] }
 0x165   : > { %1962 = vmatprep.subr.mxu0 %v5794_v1  ;;  %1589 = vmatmul.mubr.f32.gmra.mxu1 %v851_v22  ;;  %v893_v22 = vld [vmem:[#allocation2 + $0x79] sm:$0xff] }
 0x166   : > { %1963 = vmatpush1.msra.mxu0 %v1430_v19  ;;  %1593 = vmatprep.mubr.f32.mxu1 %v888_v25  ;;  %v856_v19 = vld [vmem:[#allocation2 + $0x70] sm:$0xff] }
 0x167   : > { %1734 = vmatmul.mubr.f32.gmra.mxu0 %v955_v50  ;;  %1964 = vmatprep.subr.mxu0 %v5794_v1  ;;  %v853_v50 = vld [vmem:[#allocation2 + $0x58] sm:$0xff] }
 0x168   : > { %1738 = vmatprep.mubr.f32.mxu0 %v958_v21  ;;  %1965 = vmatpush1.msra.mxu0 %v1429_v26  ;;  %v1451_v25 = vld [vmem:[#allocation9 + $0x3d8] sm:$0xff]  ;;  %v963_v26 = vld [vmem:[#allocation2 + $0x7a] sm:$0xff] }
 0x169   : > { %1966 = vmatprep.subr.mxu0 %v5794_v1  ;;  %1594 = vmatmul.mubr.f32.gmra.mxu1 %v852_v20  ;;  %v894_v20 = vld [vmem:[#allocation2 + $0x81] sm:$0xff] }
 0x16a   : > { %1967 = vmatpush1.msra.mxu0 %v1428_v27  ;;  %1598 = vmatprep.mubr.f32.mxu1 %v889_v28  ;;  %v857_v27 = vld [vmem:[#allocation2 + $0x78] sm:$0xff]  ;;  %v1449_v28 = vld [vmem:[#allocation9 + $0x3c8] sm:$0xff] }
 0x16b   : > { %1739 = vmatmul.mubr.f32.gmra.mxu0 %v956_v10  ;;  %1968 = vmatprep.subr.mxu0 %v5794_v1  ;;  %v1454_v10 = vld [vmem:[#allocation9 + $0x3f0] sm:$0xff] }
 0x16c   : > { %1743 = vmatprep.mubr.f32.mxu0 %v959_v43  ;;  %1969 = vmatpush1.msra.mxu0 %v1427_v41  ;;  %v964_v41 = vld [vmem:[#allocation2 + $0x82] sm:$0xff] }
 0x16d   : > { %1970 = vmatprep.subr.mxu0 %v5794_v1  ;;  %1599 = vmatmul.mubr.f32.gmra.mxu1 %v853_v50  ;;  %v895_v50 = vld [vmem:[#allocation2 + $0x89] sm:$0xff] }
 0x16e   : > { %1971 = vmatpush1.msra.mxu0 %v1426_v45  ;;  %1603 = vmatprep.mubr.f32.mxu1 %v890_v52  ;;  %v858_v45 = vld [vmem:[#allocation2 + $0x80] sm:$0xff]  ;;  %v1447_v52 = vld [vmem:[#allocation9 + $0x3b8] sm:$0xff] }
 0x16f   : > { %1744 = vmatmul.mubr.f32.gmra.mxu0 %v957_v18  ;;  %1972 = vmatprep.subr.mxu0 %v5794_v1  ;;  %v1452_v18 = vld [vmem:[#allocation9 + $0x3e0] sm:$0xff] }
 0x170   : > { %1748 = vmatprep.mubr.f32.mxu0 %v960_v60  ;;  %1973 = vmatpush1.msra.mxu0 %v1425_v53  ;;  %v965_v53 = vld [vmem:[#allocation2 + $0x8a] sm:$0xff] }
 0x171   : > { %1974 = vmatprep.subr.mxu0 %v5794_v1  ;;  %1604 = vmatmul.mubr.f32.gmra.mxu1 %v854_v44  ;;  %v1022_v44 = vld [vmem:[#allocation2 + $0x14] sm:$0xff] }
 0x172   : > { %1975 = vmatpush1.msra.mxu0 %v1424_v63  ;;  %1608 = vmatprep.mubr.f32.mxu1 %v891_v5  ;;  %v859_v63 = vld [vmem:[#allocation2 + $0x88] sm:$0xff] }
 0x173   : > { %1749 = vmatmul.mubr.f32.gmra.mxu0 %v958_v21  ;;  %1976 = vmatprep.subr.mxu0 %v5794_v1  ;;  %v1450_v21 = vld [vmem:[#allocation9 + $0x3d0] sm:$0xff]  ;;  %v1445_v5 = vld [vmem:[#allocation9 + $0x3a8] sm:$0xff] }
 0x174   : > { %1753 = vmatprep.mubr.f32.mxu0 %v961_v37  ;;  %1977 = vmatpush2.msra.mxu0 %v1455_v7  ;;  %v966_v7 = vld [vmem:[#allocation2 + $0x92] sm:$0xff] }
 0x175   : > { %1978 = vmatprep.subr.mxu0 %v5794_v1  ;;  %1609 = vmatmul.mubr.f32.gmra.mxu1 %v855_v12  ;;  %v967_v12 = vld [vmem:[#allocation2 + $0x9a] sm:$0xff] }
 0x176   : > { %1979 = vmatpush2.msra.mxu0 %v1454_v10  ;;  %1613 = vmatprep.mubr.f32.mxu1 %v892_v13  ;;  %v1443_v10 = vld [vmem:[#allocation9 + $0x398] sm:$0xff]  ;;  %v1023_v13 = vld [vmem:[#allocation2 + $0x1c] sm:$0xff] }
 0x177   : > { %1754 = vmatmul.mubr.f32.gmra.mxu0 %v959_v43  ;;  %1980 = vmatprep.subr.mxu0 %v5794_v1  ;;  %v1448_v43 = vld [vmem:[#allocation9 + $0x3c0] sm:$0xff] }
 0x178   : > { %1758 = vmatprep.mubr.f32.mxu0 %v962_v3  ;;  %1981 = vmatpush2.msra.mxu0 %v1453_v15  ;;  %v1470_v15 = vld [vmem:[#allocation9 + $0x470] sm:$0xff] }
 0x179   : > { %1982 = vmatprep.subr.mxu0 %v5794_v1  ;;  %1614 = vmatmul.mubr.f32.gmra.mxu1 %v856_v19 }
 0x17a   : > { %1983 = vmatpush2.msra.mxu0 %v1452_v18  ;;  %1618 = vmatprep.mubr.f32.mxu1 %v893_v22  ;;  %v1094_v22 = vld [vmem:[#allocation2 + $0x25] sm:$0xff] }
 0x17b   : > { %1759 = vmatmul.mubr.f32.gmra.mxu0 %v960_v60  ;;  %1984 = vmatprep.subr.mxu0 %v5794_v1  ;;  %v1446_v60 = vld [vmem:[#allocation9 + $0x3b0] sm:$0xff] }
 0x17c   : > { %1763 = vmatprep.mubr.f32.mxu0 %v963_v26  ;;  %1985 = vmatpush2.msra.mxu0 %v1451_v25  ;;  %v1440_v25 = vld [vmem:[#allocation9 + $0x380] sm:$0xff] }
 0x17d   : > { %1986 = vmatprep.subr.mxu0 %v5794_v1  ;;  %1619 = vmatmul.mubr.f32.gmra.mxu1 %v857_v27  ;;  %v1025_v27 = vld [vmem:[#allocation2 + $0x2c] sm:$0xff] }
 0x17e   : > { %1987 = vmatpush2.msra.mxu0 %v1450_v21  ;;  %1623 = vmatprep.mubr.f32.mxu1 %v894_v20  ;;  %v1095_v20 = vld [vmem:[#allocation2 + $0x2d] sm:$0xff] }
 0x17f   : > { %1764 = vmatmul.mubr.f32.gmra.mxu0 %v961_v37  ;;  %1988 = vmatprep.subr.mxu0 %v5794_v1  ;;  %v1444_v37 = vld [vmem:[#allocation9 + $0x3a0] sm:$0xff] }
 0x180   : > { %1768 = vmatprep.mubr.f32.mxu0 %v964_v41  ;;  %1989 = vmatpush2.msra.mxu0 %v1449_v28  ;;  %v1468_v28 = vld [vmem:[#allocation9 + $0x460] sm:$0xff] }
 0x181   : > { %1990 = vmatprep.subr.mxu0 %v5794_v1  ;;  %1624 = vmatmul.mubr.f32.gmra.mxu1 %v858_v45  ;;  %v1096_v45 = vld [vmem:[#allocation2 + $0x35] sm:$0xff] }
 0x182   : > { %1991 = vmatpush2.msra.mxu0 %v1448_v43  ;;  %1628 = vmatprep.mubr.f32.mxu1 %v895_v50  ;;  %v1467_v43 = vld [vmem:[#allocation9 + $0x458] sm:$0xff]  ;;  %v1466_v50 = vld [vmem:[#allocation9 + $0x450] sm:$0xff] }
 0x183   : > { %1769 = vmatmul.mubr.f32.gmra.mxu0 %v962_v3  ;;  %1992 = vmatprep.subr.mxu0 %v5794_v1  ;;  %v1442_v3 = vld [vmem:[#allocation9 + $0x390] sm:$0xff] }
 0x184   : > { %1773 = vmatprep.mubr.f32.mxu0 %v965_v53  ;;  %1993 = vmatpush2.msra.mxu0 %v1447_v52  ;;  %v5119_v18 = vpop.f32.mrf.mxu1  ;;  %v1097_v52 = vld [vmem:[#allocation2 + $0x3d] sm:$0xff] }
 0x185   : > { %1994 = vmatprep.subr.mxu0 %v5794_v1  ;;  %1629 = vmatmul.mubr.f32.gmra.mxu1 %v859_v63  ;;  %v1464_v63 = vld [vmem:[#allocation9 + $0x440] sm:$0xff] }
 0x186   : > { %1995 = vmatpush2.msra.mxu0 %v1446_v60  ;;  %1853 = vmatprep.mubr.f32.mxu1 %v1022_v44  ;;  %v1547_v19 = vpop.f32.mrf.mxu1  ;;  %v1098_v60 = vld [vmem:[#allocation2 + $0x45] sm:$0xff]  ;;  %v1099_v44 = vld [vmem:[#allocation2 + $0x4d] sm:$0xff] }
 0x187   : > { %1774 = vmatmul.mubr.f32.gmra.mxu0 %v963_v26  ;;  %1996 = vmatprep.subr.mxu0 %v5794_v1  ;;  %v1469_v26 = vld [vmem:[#allocation9 + $0x468] sm:$0xff]  ;;  %v1458_v19 = vld [vmem:[#allocation9 + $0x410] sm:$0xff] }
 0x188   : > { %1778 = vmatprep.mubr.f32.mxu0 %v966_v7  ;;  %1997 = vmatpush2.msra.mxu0 %v1445_v5  ;;  %v5123_v21 = vpop.f32.mrf.mxu1  ;;  %v1463_v5 = vld [vmem:[#allocation9 + $0x438] sm:$0xff] }
 0x189   : > { %1998 = vmatprep.subr.mxu0 %v5794_v1  ;;  %1854 = vmatmul.mubr.f32.vlgmr.msra.gmra.mxu1 %v4943_v51  ;;  %v1024_v51 = vld [vmem:[#allocation2 + $0x24] sm:$0xff]  ;;  %v1100_v7 = vld [vmem:[#allocation2 + $0x55] sm:$0xff] }
 0x18a   : > { %1999 = vmatpush2.msra.mxu0 %v1444_v37  ;;  %4126 = vmatpush3.msra.mxu1 %v4908_v31  ;;  %v1441_v31 = vld [vmem:[#allocation9 + $0x388] sm:$0xff]  ;;  %v1462_v37 = vld [vmem:[#allocation9 + $0x430] sm:$0xff] }
 0x18b   : > { %1779 = vmatmul.mubr.f32.gmra.mxu0 %v964_v41  ;;  %2000 = vmatprep.subr.mxu0 %v5794_v1  ;;  %v1026_v41 = vld [vmem:[#allocation2 + $0x34] sm:$0xff] }
 0x18c   : > { %1783 = vmatprep.mubr.f32.mxu0 %v967_v12  ;;  %1858 = vmatprep.mubr.f32.mxu1 %v1023_v13  ;;  %v1461_v12 = vld [vmem:[#allocation9 + $0x428] sm:$0xff] }
 0x18d   : > { %2001 = vmatpush2.msra.mxu0 %v1443_v10  ;;  %1859 = vmatmul.mubr.f32.gmra.mxu1 %v4936_v47  ;;  %v1552_v47 = vpop.f32.mrf.mxu1  ;;  %v1101_v10 = vld [vmem:[#allocation2 + $0x5d] sm:$0xff]  ;;  %v1102_v13 = vld [vmem:[#allocation2 + $0x65] sm:$0xff] }
 0x18e   : > { %2002 = vmatprep.subr.mxu0 %v5794_v1  ;;  %4127 = vmatprep.subr.mxu1 %v1470_v15  ;;  %v1456_v47 = vld [vmem:[#allocation9 + $0x400] sm:$0xff] }
 0x18f   : > { %2003 = vmatpush2.msra.mxu0 %v1442_v3  ;;  %1863 = vmatprep.mubr.f32.mxu1 %v1024_v51  ;;  %v1103_v3 = vld [vmem:[#allocation2 + $0x6d] sm:$0xff] }
 0x190   : > { %1784 = vmatmul.mubr.f32.gmra.mxu0 %v965_v53  ;;  %2004 = vmatprep.subr.mxu0 %v5794_v1  ;;  %v1465_v53 = vld [vmem:[#allocation9 + $0x448] sm:$0xff] }
 0x191   : > { %2005 = vmatpush2.msra.mxu0 %v1441_v31  ;;  %2008 = vmatprep.mubr.f32.mxu0 %v1094_v22  ;;  %v1104_v31 = vld [vmem:[#allocation2 + $0x75] sm:$0xff]  ;;  %v1105_v22 = vld [vmem:[#allocation2 + $0x7d] sm:$0xff] }
 0x192   : > { %4128 = vmatpush3.msra.mxu1 %v1470_v15  ;;  %2006 = vmatprep.subr.mxu0 %v5794_v1  ;;  %v1460_v15 = vld [vmem:[#allocation9 + $0x420] sm:$0xff] }
 0x193   : > { %2007 = vmatpush2.msra.mxu0 %v1440_v25  ;;  %1864 = vmatmul.mubr.f32.gmra.mxu1 %v4961_v62  ;;  %v1027_v62 = vld [vmem:[#allocation2 + $0x3c] sm:$0xff] }
 0x194   : > { %2009 = vmatmul.mubr.f32.vlgmr.msra.gmra.mxu0 %v1024_v51  ;;  %4129 = vmatprep.subr.mxu1 %v1469_v26  ;;  %v1459_v51 = vld [vmem:[#allocation9 + $0x418] sm:$0xff]  ;;  %v1457_v25 = vld [vmem:[#allocation9 + $0x408] sm:$0xff] }
 0x195   : > { %1868 = vmatprep.mubr.f32.mxu1 %v1025_v27  ;;  %2013 = vmatprep.mubr.f32.mxu0 %v1095_v20  ;;  %v1108_v20 = vld [vmem:[#allocation2 + $0x95] sm:$0xff] }
 0x196   : > { %4130 = vmatpush3.msra.mxu1 %v1469_v26  ;;  %2945 = vmatprep.subr.mxu0 %v5794_v1  ;;  %v1106_v26 = vld [vmem:[#allocation2 + $0x85] sm:$0xff] }
 0x197   : > { %1869 = vmatmul.mubr.f32.gmra.mxu1 %v4952_v56  ;;  %4131 = vmatprep.subr.mxu1 %v1468_v28  ;;  %v1028_v56 = vld [vmem:[#allocation2 + $0x44] sm:$0xff] }
 0x198   : > { %2014 = vmatmul.mubr.f32.gmra.mxu0 %v1025_v27  ;;  %1873 = vmatprep.mubr.f32.mxu1 %v1026_v41  ;;  %v1107_v27 = vld [vmem:[#allocation2 + $0x8d] sm:$0xff] }
 0x199   : > { %2018 = vmatprep.mubr.f32.mxu0 %v1096_v45  ;;  %4132 = vmatpush3.msra.mxu1 %v1468_v28  ;;  %v1109_v28 = vld [vmem:[#allocation2 + $0x9d] sm:$0xff]  ;;  %v1131_v45 = vld [vmem:[#allocation2 + $0x2e] sm:$0xff] }
 0x19a   : > { %4133 = vmatprep.subr.mxu1 %v1467_v43 }
 0x19b   : > { %1874 = vmatmul.mubr.f32.gmra.mxu1 %v4976_v9  ;;  %v1029_v9 = vld [vmem:[#allocation2 + $0x4c] sm:$0xff] }
 0x19c   : > { %2019 = vmatmul.mubr.f32.gmra.mxu0 %v1026_v41  ;;  %1878 = vmatprep.mubr.f32.mxu1 %v1027_v62  ;;  %v1110_v41 = vld [vmem:[#allocation2 + $0xa5] sm:$0xff] }
 0x19d   : > { %2023 = vmatprep.mubr.f32.mxu0 %v1097_v52  ;;  %4134 = vmatpush3.msra.mxu1 %v1467_v43  ;;  %v1130_v43 = vld [vmem:[#allocation2 + $0x26] sm:$0xff]  ;;  %v2809_v52 = vld [vmem:[#allocation12 + $0x78] sm:$0xff] }
 0x19e   : > { %4135 = vmatprep.subr.mxu1 %v1466_v50  ;;  %2946 = vmatpush1.msra.mxu0 %v2809_v52  ;;  %v2824_v52 = vld [vmem:[#allocation12 + $0xf0] sm:$0xff] }
 0x19f   : > { %1879 = vmatmul.mubr.f32.gmra.mxu1 %v4967_v4  ;;  %v1030_v4 = vld [vmem:[#allocation2 + $0x54] sm:$0xff]  ;;  %2947 = vmatprep.subr.mxu0 %v5794_v1 }
 0x1a0   : > { %2024 = vmatmul.mubr.f32.gmra.mxu0 %v1027_v62  ;;  %1883 = vmatprep.mubr.f32.mxu1 %v1028_v56  ;;  %v1111_v62 = vld [vmem:[#allocation2 + $0xad] sm:$0xff] }
 0x1a1   : > { %2028 = vmatprep.mubr.f32.mxu0 %v1098_v60  ;;  %4136 = vmatpush3.msra.mxu1 %v1466_v50  ;;  %v1132_v50 = vld [vmem:[#allocation2 + $0x36] sm:$0xff]  ;;  %v1135_v60 = vld [vmem:[#allocation2 + $0x4e] sm:$0xff] }
 0x1a2   : > { %4137 = vmatprep.subr.mxu1 %v1465_v53 }
 0x1a3   : > { %1884 = vmatmul.mubr.f32.gmra.mxu1 %v4995_v24  ;;  %v1031_v24 = vld [vmem:[#allocation2 + $0x5c] sm:$0xff] }
 0x1a4   : > { %2029 = vmatmul.mubr.f32.gmra.mxu0 %v1028_v56  ;;  %1888 = vmatprep.mubr.f32.mxu1 %v1029_v9  ;;  %v1133_v56 = vld [vmem:[#allocation2 + $0x3e] sm:$0xff] }
 0x1a5   : > { %2033 = vmatprep.mubr.f32.mxu0 %v1099_v44  ;;  %4138 = vmatpush3.msra.mxu1 %v1465_v53  ;;  %v1134_v53 = vld [vmem:[#allocation2 + $0x46] sm:$0xff]  ;;  %v2806_v44 = vld [vmem:[#allocation12 + $0x60] sm:$0xff] }
 0x1a6   : > { %4139 = vmatprep.subr.mxu1 %v1464_v63 }
 0x1a7   : > { %1889 = vmatmul.mubr.f32.gmra.mxu1 %v4985_v17  ;;  %v1032_v17 = vld [vmem:[#allocation2 + $0x64] sm:$0xff] }
 0x1a8   : > { %2034 = vmatmul.mubr.f32.gmra.mxu0 %v1029_v9  ;;  %1893 = vmatprep.mubr.f32.mxu1 %v1030_v4  ;;  %v2807_v9 = vld [vmem:[#allocation12 + $0x68] sm:$0xff] }
 0x1a9   : > { %2038 = vmatprep.mubr.f32.mxu0 %v1100_v7  ;;  %4140 = vmatpush3.msra.mxu1 %v1464_v63  ;;  %v1136_v63 = vld [vmem:[#allocation2 + $0x56] sm:$0xff]  ;;  %v1138_v7 = vld [vmem:[#allocation2 + $0x66] sm:$0xff] }
 0x1aa   : > { %4141 = vmatprep.subr.mxu1 %v1463_v5 }
 0x1ab   : > { %1894 = vmatmul.mubr.f32.gmra.mxu1 %v5017_v49  ;;  %v1033_v49 = vld [vmem:[#allocation2 + $0x6c] sm:$0xff] }
 0x1ac   : > { %2039 = vmatmul.mubr.f32.gmra.mxu0 %v1030_v4  ;;  %1898 = vmatprep.mubr.f32.mxu1 %v1031_v24  ;;  %v1137_v4 = vld [vmem:[#allocation2 + $0x5e] sm:$0xff] }
 0x1ad   : > { %2043 = vmatprep.mubr.f32.mxu0 %v1101_v10  ;;  %4142 = vmatpush3.msra.mxu1 %v1463_v5  ;;  %v2805_v5 = vld [vmem:[#allocation12 + $0x58] sm:$0xff]  ;;  %v2803_v10 = vld [vmem:[#allocation12 + $0x48] sm:$0xff] }
 0x1ae   : > { %4143 = vmatprep.subr.mxu1 %v1462_v37 }
 0x1af   : > { %1899 = vmatmul.mubr.f32.gmra.mxu1 %v5005_v39  ;;  %v1034_v39 = vld [vmem:[#allocation2 + $0x74] sm:$0xff] }
 0x1b0   : > { %2044 = vmatmul.mubr.f32.gmra.mxu0 %v1031_v24  ;;  %1903 = vmatprep.mubr.f32.mxu1 %v1032_v17  ;;  %v2804_v24 = vld [vmem:[#allocation12 + $0x50] sm:$0xff] }
 0x1b1   : > { %2048 = vmatprep.mubr.f32.mxu0 %v1102_v13  ;;  %4144 = vmatpush3.msra.mxu1 %v1462_v37  ;;  %v1139_v37 = vld [vmem:[#allocation2 + $0x6e] sm:$0xff]  ;;  %v1141_v13 = vld [vmem:[#allocation2 + $0x7e] sm:$0xff] }
 0x1b2   : > { %4145 = vmatprep.subr.mxu1 %v1461_v12 }
 0x1b3   : > { %1904 = vmatmul.mubr.f32.gmra.mxu1 %v5037_v58  ;;  %v1035_v58 = vld [vmem:[#allocation2 + $0x7c] sm:$0xff] }
 0x1b4   : > { %2049 = vmatmul.mubr.f32.gmra.mxu0 %v1032_v17  ;;  %1908 = vmatprep.mubr.f32.mxu1 %v1033_v49  ;;  %v1140_v17 = vld [vmem:[#allocation2 + $0x76] sm:$0xff] }
 0x1b5   : > { %2053 = vmatprep.mubr.f32.mxu0 %v1103_v3  ;;  %4146 = vmatpush3.msra.mxu1 %v1461_v12  ;;  %v2802_v12 = vld [vmem:[#allocation12 + $0x40] sm:$0xff]  ;;  %v1142_v3 = vld [vmem:[#allocation2 + $0x86] sm:$0xff] }
 0x1b6   : > { %4147 = vmatprep.subr.mxu1 %v1460_v15 }
 0x1b7   : > { %1909 = vmatmul.mubr.f32.gmra.mxu1 %v5025_v59  ;;  %v1036_v59 = vld [vmem:[#allocation2 + $0x84] sm:$0xff] }
 0x1b8   : > { %2054 = vmatmul.mubr.f32.gmra.mxu0 %v1033_v49  ;;  %1913 = vmatprep.mubr.f32.mxu1 %v1034_v39  ;;  %v2841_v49 = vld [vmem:[#allocation12 + $0x178] sm:$0xff] }
 0x1b9   : > { %2058 = vmatprep.mubr.f32.mxu0 %v1104_v31  ;;  %4148 = vmatpush3.msra.mxu1 %v1460_v15  ;;  %v2801_v15 = vld [vmem:[#allocation12 + $0x38] sm:$0xff]  ;;  %v2800_v31 = vld [vmem:[#allocation12 + $0x30] sm:$0xff] }
 0x1ba   : > { %4149 = vmatprep.subr.mxu1 %v1459_v51 }
 0x1bb   : > { %1914 = vmatmul.mubr.f32.gmra.mxu1 %v5055_v23  ;;  %v1037_v23 = vld [vmem:[#allocation2 + $0x8c] sm:$0xff] }
 0x1bc   : > { %2059 = vmatmul.mubr.f32.gmra.mxu0 %v1034_v39  ;;  %1918 = vmatprep.mubr.f32.mxu1 %v1035_v58  ;;  %v2840_v39 = vld [vmem:[#allocation12 + $0x170] sm:$0xff] }
 0x1bd   : > { %2063 = vmatprep.mubr.f32.mxu0 %v1105_v22  ;;  %4150 = vmatpush3.msra.mxu1 %v1459_v51  ;;  %v1143_v51 = vld [vmem:[#allocation2 + $0x8e] sm:$0xff]  ;;  %v1146_v22 = vld [vmem:[#allocation2 + $0xa6] sm:$0xff] }
 0x1be   : > { %4151 = vmatprep.subr.mxu1 %v1458_v19 }
 0x1bf   : > { %1919 = vmatmul.mubr.f32.gmra.mxu1 %v5047_v0  ;;  %v1038_v0 = vld [vmem:[#allocation2 + $0x94] sm:$0xff] }
 0x1c0   : > { %2064 = vmatmul.mubr.f32.gmra.mxu0 %v1035_v58  ;;  %1923 = vmatprep.mubr.f32.mxu1 %v1036_v59  ;;  %v2839_v58 = vld [vmem:[#allocation12 + $0x168] sm:$0xff] }
 0x1c1   : > { %2068 = vmatprep.mubr.f32.mxu0 %v1106_v26  ;;  %4152 = vmatpush3.msra.mxu1 %v1458_v19  ;;  %v1144_v19 = vld [vmem:[#allocation2 + $0x96] sm:$0xff]  ;;  %v1145_v26 = vld [vmem:[#allocation2 + $0x9e] sm:$0xff] }
 0x1c2   : > { %4153 = vmatprep.subr.mxu1 %v1457_v25 }
 0x1c3   : > { %1924 = vmatmul.mubr.f32.gmra.mxu1 %v5075_v57  ;;  %v1039_v57 = vld [vmem:[#allocation2 + $0x9c] sm:$0xff] }
 0x1c4   : > { %2069 = vmatmul.mubr.f32.gmra.mxu0 %v1036_v59  ;;  %1928 = vmatprep.mubr.f32.mxu1 %v1037_v23  ;;  %v2799_v59 = vld [vmem:[#allocation12 + $0x28] sm:$0xff] }
 0x1c5   : > { %2073 = vmatprep.mubr.f32.mxu0 %v1107_v27  ;;  %4154 = vmatpush3.msra.mxu1 %v1457_v25  ;;  %v2838_v25 = vld [vmem:[#allocation12 + $0x160] sm:$0xff]  ;;  %v1147_v27 = vld [vmem:[#allocation2 + $0xae] sm:$0xff] }
 0x1c6   : > { %4155 = vmatprep.subr.mxu1 %v1456_v47 }
 0x1c7   : > { %1929 = vmatmul.mubr.f32.gmra.mxu1 %v5065_v40  ;;  %v1074_v40 = vld [vmem:[#allocation2 + $0xa4] sm:$0xff] }
 0x1c8   : > { %2074 = vmatmul.mubr.f32.gmra.mxu0 %v1037_v23  ;;  %1933 = vmatprep.mubr.f32.mxu1 %v1038_v0  ;;  %v2798_v23 = vld [vmem:[#allocation12 + $0x20] sm:$0xff] }
 0x1c9   : > { %2078 = vmatprep.mubr.f32.mxu0 %v1108_v20  ;;  %4156 = vmatpush3.msra.mxu1 %v1456_v47  ;;  %v2837_v47 = vld [vmem:[#allocation12 + $0x158] sm:$0xff]  ;;  %v2836_v20 = vld [vmem:[#allocation12 + $0x150] sm:$0xff] }
 0x1ca   : > { %3100 = vmatprep.subr.mxu1 %v5794_v1 }
 0x1cb   : > { %1934 = vmatmul.mubr.f32.gmra.mxu1 %v5091_v11  ;;  %v1075_v11 = vld [vmem:[#allocation2 + $0xac] sm:$0xff] }
 0x1cc   : > { %2079 = vmatmul.mubr.f32.gmra.mxu0 %v1038_v0  ;;  %1938 = vmatprep.mubr.f32.mxu1 %v1039_v57  ;;  %v2797_v0 = vld [vmem:[#allocation12 + $0x18] sm:$0xff] }
 0x1cd   : > { %2083 = vmatprep.mubr.f32.mxu0 %v1109_v28  ;;  %v2796_v28 = vld [vmem:[#allocation12 + $0x10] sm:$0xff] }
 0x1cf   : > { %1939 = vmatmul.mubr.f32.gmra.mxu1 %v5083_v2  ;;  %v2808_v2 = vld [vmem:[#allocation12 + $0x70] sm:$0xff] }
 0x1d0   : > { %2084 = vmatmul.mubr.f32.gmra.mxu0 %v1039_v57  ;;  %4157 = vmatprep.mubr.f32.mxu1 %v1130_v43  ;;  %v2835_v57 = vld [vmem:[#allocation12 + $0x148] sm:$0xff] }
 0x1d1   : > { %2088 = vmatprep.mubr.f32.mxu0 %v1110_v41  ;;  %2948 = vmatpush1.msra.mxu0 %v2808_v2  ;;  %v2834_v41 = vld [vmem:[#allocation12 + $0x140] sm:$0xff]  ;;  %v2795_v43 = vld [vmem:[#allocation12 + $0x8] sm:$0xff]  ;;  %v2829_v2 = vld [vmem:[#allocation12 + $0x118] sm:$0xff] }
 0x1d2   : > { %2949 = vmatprep.subr.mxu0 %v5794_v1 }
 0x1d3   : > { %4158 = vmatmul.mubr.f32.vlgmr.msra.gmra.mxu1 %v1131_v45  ;;  %2950 = vmatpush1.msra.mxu0 %v2807_v9  ;;  %v2794_v45 = vld [vmem:[#allocation12] sm:$0xff]  ;;  %v2828_v9 = vld [vmem:[#allocation12 + $0x110] sm:$0xff] }
 0x1d4   : > { %2089 = vmatmul.mubr.f32.gmra.mxu0 %v1074_v40  ;;  %4160 = vmatprep.mubr.f32.mxu1 %v1132_v50  ;;  %v2833_v40 = vld [vmem:[#allocation12 + $0x138] sm:$0xff] }
 0x1d5   : > { %2093 = vmatprep.mubr.f32.mxu0 %v1111_v62  ;;  %2951 = vmatprep.subr.mxu0 %v5794_v1  ;;  %v2832_v62 = vld [vmem:[#allocation12 + $0x130] sm:$0xff]  ;;  %v2825_v50 = vld [vmem:[#allocation12 + $0xf8] sm:$0xff] }
 0x1d6   : > { %2952 = vmatpush1.msra.mxu0 %v2806_v44  ;;  %3101 = vmatpush1.msra.mxu1 %v2841_v49  ;;  %v2827_v44 = vld [vmem:[#allocation12 + $0x108] sm:$0xff]  ;;  %v2818_v49 = vld [vmem:[#allocation12 + $0xc0] sm:$0xff] }
 0x1d7   : > { %4161 = vmatmul.mubr.f32.gmra.mxu1 %v1133_v56  ;;  %2953 = vmatprep.subr.mxu0 %v5794_v1  ;;  %v2830_v56 = vld [vmem:[#allocation12 + $0x120] sm:$0xff] }
 0x1d8   : > { %2094 = vmatmul.mubr.f32.gmra.mxu0 %v1075_v11  ;;  %4163 = vmatprep.mubr.f32.mxu1 %v1134_v53  ;;  %v2831_v11 = vld [vmem:[#allocation12 + $0x128] sm:$0xff] }
 0x1d9   : > { %2954 = vmatpush1.msra.mxu0 %v2805_v5  ;;  %3102 = vmatprep.subr.mxu1 %v5794_v1  ;;  %v2823_v53 = vld [vmem:[#allocation12 + $0xe8] sm:$0xff]  ;;  %v2826_v5 = vld [vmem:[#allocation12 + $0x100] sm:$0xff] }
 0x1da   : > { %2955 = vmatprep.subr.mxu0 %v5794_v1  ;;  %3103 = vmatpush1.msra.mxu1 %v2840_v39 }
 0x1db   : > { %4164 = vmatmul.mubr.f32.gmra.mxu1 %v1135_v60  ;;  %2956 = vmatpush1.msra.mxu0 %v2804_v24  ;;  %v2822_v60 = vld [vmem:[#allocation12 + $0xe0] sm:$0xff]  ;;  %v2819_v24 = vld [vmem:[#allocation12 + $0xc8] sm:$0xff] }
 0x1dc   : > { %4166 = vmatprep.mubr.f32.mxu1 %v1136_v63  ;;  %2957 = vmatprep.subr.mxu0 %v5794_v1  ;;  %v2821_v63 = vld [vmem:[#allocation12 + $0xd8] sm:$0xff] }
 0x1dd   : > { %2958 = vmatpush1.msra.mxu0 %v2803_v10  ;;  %3104 = vmatprep.subr.mxu1 %v5794_v1 }
 0x1de   : > { %2959 = vmatprep.subr.mxu0 %v5794_v1  ;;  %3105 = vmatpush1.msra.mxu1 %v2839_v58 }
 0x1df   : > { %4167 = vmatmul.mubr.f32.gmra.mxu1 %v1137_v4  ;;  %2960 = vmatpush1.msra.mxu0 %v2802_v12  ;;  %v5177_v4 = vld [vmem:[#allocation11] ss:$0 sm:$0xff] }
 0x1e0   : > { %4169 = vmatprep.mubr.f32.mxu1 %v1138_v7  ;;  %2961 = vmatprep.subr.mxu0 %v5794_v1  ;;  %v2820_v7 = vld [vmem:[#allocation12 + $0xd0] sm:$0xff]  ;;  %v1546_v10 = vadd.f32 %v5177_v4, %v5119_v18  ;;  %v2855_v18 = vld [vmem:[#allocation12 + $0x1e8] sm:$0xff] }
 0x1e1   : > { %2962 = vmatpush1.msra.mxu0 %v2801_v15  ;;  %3106 = vmatprep.subr.mxu1 %v5794_v1 }
 0x1e2   : > { %2963 = vmatprep.subr.mxu0 %v5794_v1  ;;  %3107 = vmatpush1.msra.mxu1 %v2838_v25  ;;  %v2816_v25 = vld [vmem:[#allocation12 + $0xb0] sm:$0xff] }
 0x1e3   : > { %4170 = vmatmul.mubr.f32.gmra.mxu1 %v1139_v37  ;;  %2964 = vmatpush1.msra.mxu0 %v2800_v31  ;;  %v2857_v37 = vld [vmem:[#allocation12 + $0x1f8] sm:$0xff]  ;;  %v1551_v31 = vadd.f32 %v5177_v4, %v5123_v21 }
 0x1e4   : > { %4172 = vmatprep.mubr.f32.mxu1 %v1140_v17  ;;  %2965 = vmatprep.subr.mxu0 %v5794_v1 }
 0x1e5   : > { %2966 = vmatpush1.msra.mxu0 %v2799_v59  ;;  %3108 = vmatprep.subr.mxu1 %v5794_v1 }
 0x1e6   : > { %2967 = vmatprep.subr.mxu0 %v5794_v1  ;;  %3109 = vmatpush1.msra.mxu1 %v2837_v47  ;;  %v2853_v47 = vld [vmem:[#allocation12 + $0x1d8] sm:$0xff] }
 0x1e7   : > { %4173 = vmatmul.mubr.f32.gmra.mxu1 %v1141_v13  ;;  %2968 = vmatpush1.msra.mxu0 %v2798_v23  ;;  %v2856_v13 = vld [vmem:[#allocation12 + $0x1f0] sm:$0xff] }
 0x1e8   : > { %4175 = vmatprep.mubr.f32.mxu1 %v1142_v3  ;;  %2969 = vmatprep.subr.mxu0 %v5794_v1  ;;  %v2817_v3 = vld [vmem:[#allocation12 + $0xb8] sm:$0xff] }
 0x1e9   : > { %3110 = vmatprep.subr.mxu1 %v5794_v1  ;;  %2970 = vmatpush1.msra.mxu0 %v2797_v0 }
 0x1ea   : > { %3111 = vmatpush1.msra.mxu1 %v2836_v20  ;;  %2971 = vmatprep.subr.mxu0 %v5794_v1  ;;  %v2815_v20 = vld [vmem:[#allocation12 + $0xa8] sm:$0xff] }
 0x1eb   : > { %4176 = vmatmul.mubr.f32.gmra.mxu1 %v1143_v51  ;;  %3112 = vmatprep.subr.mxu1 %v5794_v1 }
 0x1ec   : > { %4178 = vmatprep.mubr.f32.mxu1 %v1144_v19  ;;  %3113 = vmatpush1.msra.mxu1 %v2835_v57  ;;  %v2852_v57 = vld [vmem:[#allocation12 + $0x1d0] sm:$0xff] }
 0x1ed   : > { %2972 = vmatpush1.msra.mxu0 %v2796_v28  ;;  %3114 = vmatprep.subr.mxu1 %v5794_v1 }
 0x1ee   : > { %2973 = vmatprep.subr.mxu0 %v5794_v1  ;;  %3115 = vmatpush1.msra.mxu1 %v2834_v41  ;;  %v2814_v41 = vld [vmem:[#allocation12 + $0xa0] sm:$0xff] }
 0x1ef   : > { %4179 = vmatmul.mubr.f32.gmra.mxu1 %v1145_v26  ;;  %2974 = vmatpush1.msra.mxu0 %v2795_v43 }
 0x1f0   : > { %4181 = vmatprep.mubr.f32.mxu1 %v1146_v22  ;;  %3116 = vmatprep.subr.mxu1 %v5794_v1  ;;  %v2854_v22 = vld [vmem:[#allocation12 + $0x1e0] sm:$0xff] }
 0x1f1   : > { %2975 = vmatprep.subr.mxu0 %v5794_v1  ;;  %3117 = vmatpush1.msra.mxu1 %v2833_v40 }
 0x1f2   : > { %2976 = vmatpush1.msra.mxu0 %v2794_v45  ;;  %3118 = vmatprep.subr.mxu1 %v5794_v1  ;;  %v2851_v45 = vld [vmem:[#allocation12 + $0x1c8] sm:$0xff] }
 0x1f3   : > { %4182 = vmatmul.mubr.f32.gmra.mxu1 %v1147_v27  ;;  %2977 = vmatprep.subr.mxu0 %v5794_v1 }
 0x1f4   : > { %3119 = vmatpush1.msra.mxu1 %v2832_v62  ;;  %2978 = vmatpush2.msra.mxu0 %v2825_v50 }
 0x1f5   : > { %3120 = vmatprep.subr.mxu1 %v5794_v1  ;;  %2979 = vmatprep.subr.mxu0 %v5794_v1 }
 0x1f6   : > { %3121 = vmatpush1.msra.mxu1 %v2831_v11  ;;  %2980 = vmatpush2.msra.mxu0 %v2824_v52 }
 0x1f7   : > { %3122 = vmatprep.subr.mxu1 %v5794_v1  ;;  %2981 = vmatprep.subr.mxu0 %v5794_v1 }
 0x1f8   : > { %3123 = vmatpush1.msra.mxu1 %v2830_v56  ;;  %2982 = vmatpush2.msra.mxu0 %v2823_v53 }
 0x1f9   : > { %3124 = vmatprep.subr.mxu1 %v5794_v1  ;;  %2983 = vmatprep.subr.mxu0 %v5794_v1 }
 0x1fa   : > { %3125 = vmatpush1.msra.mxu1 %v2829_v2  ;;  %2984 = vmatpush2.msra.mxu0 %v2822_v60 }
 0x1fb   : > { %3126 = vmatprep.subr.mxu1 %v5794_v1  ;;  %2985 = vmatprep.subr.mxu0 %v5794_v1 }
 0x1fc   : > { %3127 = vmatpush1.msra.mxu1 %v2828_v9  ;;  %2986 = vmatpush2.msra.mxu0 %v2821_v63  ;;  %v2813_v63 = vld [vmem:[#allocation12 + $0x98] sm:$0xff] }
 0x1fd   : > { %3128 = vmatprep.subr.mxu1 %v5794_v1  ;;  %2987 = vmatprep.subr.mxu0 %v5794_v1 }
 0x1fe   : > { %3129 = vmatpush1.msra.mxu1 %v2827_v44  ;;  %2988 = vmatpush2.msra.mxu0 %v2820_v7  ;;  %v2850_v44 = vld [vmem:[#allocation12 + $0x1c0] sm:$0xff] }
 0x1ff   : > { %3130 = vmatprep.subr.mxu1 %v5794_v1  ;;  %2989 = vmatprep.subr.mxu0 %v5794_v1 }
 0x200   : > { %3131 = vmatpush1.msra.mxu1 %v2826_v5  ;;  %2990 = vmatpush2.msra.mxu0 %v2819_v24 }
 0x201   : > { %3132 = vmatprep.subr.mxu1 %v5794_v1  ;;  %2991 = vmatprep.subr.mxu0 %v5794_v1 }
 0x202   : > { %3133 = vmatpush2.msra.mxu1 %v2857_v37  ;;  %2992 = vmatpush2.msra.mxu0 %v2818_v49  ;;  %v2812_v37 = vld [vmem:[#allocation12 + $0x90] sm:$0xff] }
 0x203   : > { %3134 = vmatprep.subr.mxu1 %v5794_v1  ;;  %2993 = vmatprep.subr.mxu0 %v5794_v1  ;;  %v2848_v49 = vld [vmem:[#allocation12 + $0x1b0] sm:$0xff] }
 0x204   : > { %3135 = vmatpush2.msra.mxu1 %v2856_v13  ;;  %2994 = vmatpush2.msra.mxu0 %v2817_v3  ;;  %v2811_v13 = vld [vmem:[#allocation12 + $0x88] sm:$0xff] }
 0x205   : > { %3136 = vmatprep.subr.mxu1 %v5794_v1  ;;  %2995 = vmatprep.subr.mxu0 %v5794_v1 }
 0x206   : > { %3137 = vmatpush2.msra.mxu1 %v2855_v18  ;;  %2996 = vmatpush2.msra.mxu0 %v2816_v25  ;;  %v2810_v18 = vld [vmem:[#allocation12 + $0x80] sm:$0xff] }
 0x207   : > { %3138 = vmatprep.subr.mxu1 %v5794_v1  ;;  %2997 = vmatprep.subr.mxu0 %v5794_v1  ;;  %v4331_v25 = vld [vmem:[#allocation2] sm:$0xff] }
 0x208   : > { %3139 = vmatpush2.msra.mxu1 %v2854_v22  ;;  %2998 = vmatpush2.msra.mxu0 %v2815_v20  ;;  %v2845_v20 = vld [vmem:[#allocation12 + $0x198] sm:$0xff] }
 0x209   : > { %v1555_v17 = vpop.f32.mrf.mxu1  ;;  %v1700_v12 = vpop.f32.mrf.mxu0  ;;  %3140 = vmatprep.subr.mxu1 %v5794_v1  ;;  %2999 = vmatprep.subr.mxu0 %v5794_v1 }
 0x20a   : > { %v5187_v15 = vadd.f32 %v1700_v12, %v1546_v10  ;;  %v1556_v21 = vadd.f32 %v5177_v4, %v1555_v17  ;;  %3141 = vmatpush2.msra.mxu1 %v2853_v47  ;;  %3000 = vmatpush2.msra.mxu0 %v2814_v41  ;;  %v2849_v10 = vld [vmem:[#allocation12 + $0x1b8] sm:$0xff] }
 0x20b   : > { %v1557_v39 = vpop.f32.mrf.mxu1  ;;  %v1702_v51 = vpop.f32.mrf.mxu0  ;;  %3142 = vmatprep.subr.mxu1 %v5794_v1  ;;  %3001 = vmatprep.subr.mxu0 %v5794_v1 }
 0x20c   : > { %3143 = vmatpush2.msra.mxu1 %v2852_v57  ;;  %3002 = vmatpush2.msra.mxu0 %v2813_v63  ;;  %v2842_v63 = vld [vmem:[#allocation12 + $0x180] sm:$0xff] }
 0x20d   : > { %v1560_v58 = vpop.f32.mrf.mxu1  ;;  %v1705_v19 = vpop.f32.mrf.mxu0  ;;  %3144 = vmatprep.subr.mxu1 %v5794_v1  ;;  %3003 = vmatprep.subr.mxu0 %v5794_v1 }
 0x20e   : > { %v5195_v59 = vadd.f32 %v1705_v19, %v1551_v31  ;;  %v1561_v62 = vadd.f32 %v5177_v4, %v1560_v58  ;;  %3145 = vmatpush2.msra.mxu1 %v2851_v45  ;;  %3004 = vmatpush2.msra.mxu0 %v2812_v37  ;;  %v2344_v31 = vld [vmem:[#allocation2 + $0x1] sm:$0xff]  ;;  %v2872_v45 = vld [vmem:[#allocation12 + $0x270] sm:$0xff] }
 0x20f   : > { %v1562_v26 = vpop.f32.mrf.mxu1  ;;  %v1707_v23 = vpop.f32.mrf.mxu0  ;;  %3146 = vmatprep.subr.mxu1 %v5794_v1  ;;  %3005 = vmatprep.subr.mxu0 %v5794_v1  ;;  %v2847_v58 = vld [vmem:[#allocation12 + $0x1a8] sm:$0xff] }
 0x210   : > { %3147 = vmatpush2.msra.mxu1 %v2850_v44  ;;  %3006 = vmatpush2.msra.mxu0 %v2811_v13  ;;  %v2846_v26 = vld [vmem:[#allocation12 + $0x1a0] sm:$0xff]  ;;  %v2873_v23 = vld [vmem:[#allocation12 + $0x278] sm:$0xff] }
 0x211   : > { %v1565_v27 = vpop.f32.mrf.mxu1  ;;  %v1710_v0 = vpop.f32.mrf.mxu0  ;;  %3148 = vmatprep.subr.mxu1 %v5794_v1  ;;  %3007 = vmatprep.subr.mxu0 %v5794_v1  ;;  %v2870_v44 = vld [vmem:[#allocation12 + $0x260] sm:$0xff] }
 0x212   : > { %v5201_v28 = vadd.f32 %v1710_v0, %v1556_v21  ;;  %v1566_v2 = vadd.f32 %v5177_v4, %v1565_v27  ;;  %3149 = vmatpush2.msra.mxu1 %v2849_v10  ;;  %3008 = vmatpush2.msra.mxu0 %v2810_v18  ;;  %v2345_v0 = vld [vmem:[#allocation2 + $0x9] sm:$0xff]  ;;  %v2869_v10 = vld [vmem:[#allocation12 + $0x258] sm:$0xff] }
 0x213   : > { %v1567_v43 = vpop.f32.mrf.mxu1  ;;  %v1712_v40 = vpop.f32.mrf.mxu0  ;;  %3150 = vmatprep.subr.mxu1 %v5794_v1  ;;  %3009 = vmatprep.mubr.f32.mxu0 %v2344_v31  ;;  %v2867_v31 = vld [vmem:[#allocation12 + $0x248] sm:$0xff] }
 0x214   : > { %3151 = vmatpush2.msra.mxu1 %v2848_v49  ;;  %3010 = vmatmul.mubr.f32.vlgmr.msra.gmra.mxu0 %v4331_v25  ;;  %v2844_v40 = vld [vmem:[#allocation12 + $0x190] sm:$0xff] }
 0x215   : > { %v1570_v50 = vpop.f32.mrf.mxu1  ;;  %v1715_v11 = vpop.f32.mrf.mxu0  ;;  %3152 = vmatprep.subr.mxu1 %v5794_v1  ;;  %3255 = vmatprep.subr.mxu0 %v5794_v1  ;;  %v2868_v49 = vld [vmem:[#allocation12 + $0x250] sm:$0xff] }
 0x216   : > { %v5208_v52 = vadd.f32 %v1715_v11, %v1561_v62  ;;  %v1571_v17 = vadd.f32 %v5177_v4, %v1570_v50  ;;  %3153 = vmatpush2.msra.mxu1 %v2847_v58  ;;  %3256 = vmatpush1.msra.mxu0 %v2873_v23 }
 0x217   : > { %v1572_v56 = vpop.f32.mrf.mxu1  ;;  %v1717_v53 = vpop.f32.mrf.mxu0  ;;  %3154 = vmatprep.subr.mxu1 %v5794_v1  ;;  %3014 = vmatprep.mubr.f32.mxu0 %v2345_v0 }
 0x218   : > { %3155 = vmatpush2.msra.mxu1 %v2846_v26  ;;  %3015 = vmatmul.mubr.f32.gmra.mxu0 %v4331_v25  ;;  %v2843_v56 = vld [vmem:[#allocation12 + $0x188] sm:$0xff]  ;;  %v2866_v25 = vld [vmem:[#allocation12 + $0x240] sm:$0xff] }
 0x219   : > { %v1575_v60 = vpop.f32.mrf.mxu1  ;;  %v1720_v9 = vpop.f32.mrf.mxu0  ;;  %3156 = vmatprep.subr.mxu1 %v5794_v1  ;;  %3257 = vmatprep.subr.mxu0 %v5794_v1  ;;  %v2871_v53 = vld [vmem:[#allocation12 + $0x268] sm:$0xff] }
 0x21a   : > { %v5212_v5 = vadd.f32 %v1720_v9, %v1566_v2  ;;  %v1576_v47 = vadd.f32 %v5177_v4, %v1575_v60  ;;  %3157 = vmatpush2.msra.mxu1 %v2845_v20  ;;  %3258 = vmatpush1.msra.mxu0 %v2872_v45  ;;  %v2864_v45 = vld [vmem:[#allocation12 + $0x230] sm:$0xff] }
 0x21b   : > { %v1577_v7 = vpop.f32.mrf.mxu1  ;;  %v1722_v24 = vpop.f32.mrf.mxu0  ;;  %3158 = vmatprep.subr.mxu1 %v5794_v1  ;;  %3259 = vmatprep.subr.mxu0 %v5794_v1 }
 0x21c   : > { %3159 = vmatpush2.msra.mxu1 %v2844_v40  ;;  %3260 = vmatpush1.msra.mxu0 %v2871_v53 }
 0x21d   : > { %v1580_v12 = vpop.f32.mrf.mxu1  ;;  %3160 = vmatprep.subr.mxu1 %v5794_v1  ;;  %3261 = vmatprep.subr.mxu0 %v5794_v1 }
 0x21e   : > { %v1725_v3 = vpop.f32.mrf.mxu0  ;;  %v1581_v62 = vadd.f32 %v5177_v4, %v1580_v12  ;;  %3161 = vmatpush2.msra.mxu1 %v2843_v56  ;;  %3262 = vmatpush1.msra.mxu0 %v2870_v44  ;;  %v2863_v56 = vld [vmem:[#allocation12 + $0x228] sm:$0xff]  ;;  %v2861_v44 = vld [vmem:[#allocation12 + $0x218] sm:$0xff] }
 0x21f   : > { %v5219_v39 = vadd.f32 %v1725_v3, %v1571_v17  ;;  %v1582_v51 = vpop.f32.mrf.mxu1  ;;  %3162 = vmatprep.subr.mxu1 %v5794_v1  ;;  %3263 = vmatprep.subr.mxu0 %v5794_v1 }
 0x220   : > { %v1727_v19 = vpop.f32.mrf.mxu0  ;;  %3163 = vmatpush2.msra.mxu1 %v2842_v63  ;;  %3264 = vmatpush1.msra.mxu0 %v2869_v10  ;;  %v2862_v63 = vld [vmem:[#allocation12 + $0x220] sm:$0xff]  ;;  %v2860_v10 = vld [vmem:[#allocation12 + $0x210] sm:$0xff] }
 0x221   : > { %v1585_v22 = vpop.f32.mrf.mxu1  ;;  %3410 = vmatprep.subr.mxu1 %v5794_v1  ;;  %3265 = vmatprep.subr.mxu0 %v5794_v1 }
 0x222   : > { %v1586_v7 = vadd.f32 %v5177_v4, %v1585_v22  ;;  %3266 = vmatpush1.msra.mxu0 %v2868_v49 }
 0x223   : > { %v1730_v21 = vpop.f32.mrf.mxu0  ;;  %v1587_v27 = vpop.f32.mrf.mxu1  ;;  %3267 = vmatprep.subr.mxu0 %v5794_v1 }
 0x224   : > { %v5226_v57 = vadd.f32 %v1730_v21, %v1576_v47  ;;  %3268 = vmatpush1.msra.mxu0 %v2867_v31  ;;  %v2865_v21 = vld [vmem:[#allocation12 + $0x238] sm:$0xff] }
 0x225   : > { %v1732_v41 = vpop.f32.mrf.mxu0  ;;  %v1590_v43 = vpop.f32.mrf.mxu1  ;;  %3269 = vmatprep.subr.mxu0 %v5794_v1 }
 0x226   : > { %v1591_v3 = vadd.f32 %v5177_v4, %v1590_v43  ;;  %3270 = vmatpush1.msra.mxu0 %v2866_v25 }
 0x227   : > { %v1735_v50 = vpop.f32.mrf.mxu0  ;;  %v1592_v11 = vpop.f32.mrf.mxu1  ;;  %3271 = vmatprep.subr.mxu0 %v5794_v1 }
 0x228   : > { %v5232_v2 = vadd.f32 %v1735_v50, %v1581_v62  ;;  %3272 = vmatpush1.msra.mxu0 %v2865_v21 }
 0x229   : > { %v1737_v60 = vpop.f32.mrf.mxu0  ;;  %v1595_v9 = vpop.f32.mrf.mxu1  ;;  %3273 = vmatprep.subr.mxu0 %v5794_v1 }
 0x22a   : > { %v1596_v26 = vadd.f32 %v5177_v4, %v1595_v9  ;;  %3274 = vmatpush1.msra.mxu0 %v2864_v45  ;;  %v2887_v45 = vld [vmem:[#allocation12 + $0x2e8] sm:$0xff] }
 0x22b   : > { %v1740_v24 = vpop.f32.mrf.mxu0  ;;  %v1597_v37 = vpop.f32.mrf.mxu1  ;;  %3275 = vmatprep.subr.mxu0 %v5794_v1 }
 0x22c   : > { %v5239_v17 = vadd.f32 %v1740_v24, %v1586_v7  ;;  %3276 = vmatpush1.msra.mxu0 %v2863_v56 }
 0x22d   : > { %v1742_v12 = vpop.f32.mrf.mxu0  ;;  %v1600_v13 = vpop.f32.mrf.mxu1  ;;  %3277 = vmatprep.subr.mxu0 %v5794_v1 }
 0x22e   : > { %v1601_v41 = vadd.f32 %v5177_v4, %v1600_v13  ;;  %3278 = vmatpush1.msra.mxu0 %v2862_v63 }
 0x22f   : > { %v1745_v51 = vpop.f32.mrf.mxu0  ;;  %v1602_v18 = vpop.f32.mrf.mxu1  ;;  %3279 = vmatprep.subr.mxu0 %v5794_v1 }
 0x230   : > { %v5245_v58 = vadd.f32 %v1745_v51, %v1591_v3  ;;  %3280 = vmatpush1.msra.mxu0 %v2861_v44  ;;  %v2859_v3 = vld [vmem:[#allocation12 + $0x208] sm:$0xff] }
 0x231   : > { %v1747_v19 = vpop.f32.mrf.mxu0  ;;  %v1605_v22 = vpop.f32.mrf.mxu1  ;;  %3281 = vmatprep.subr.mxu0 %v5794_v1 }
 0x232   : > { %v1606_v53 = vadd.f32 %v5177_v4, %v1605_v22  ;;  %3282 = vmatpush1.msra.mxu0 %v2860_v10  ;;  %v2858_v19 = vld [vmem:[#allocation12 + $0x200] sm:$0xff] }
 0x233   : > { %v1750_v23 = vpop.f32.mrf.mxu0  ;;  %v1607_v47 = vpop.f32.mrf.mxu1  ;;  %3283 = vmatprep.subr.mxu0 %v5794_v1 }
 0x234   : > { %v5250_v27 = vadd.f32 %v1750_v23, %v1596_v26  ;;  %3284 = vmatpush1.msra.mxu0 %v2859_v3  ;;  %v2889_v23 = vld [vmem:[#allocation12 + $0x2f8] sm:$0xff] }
 0x235   : > { %v1752_v0 = vpop.f32.mrf.mxu0  ;;  %v1610_v20 = vpop.f32.mrf.mxu1  ;;  %3285 = vmatprep.subr.mxu0 %v5794_v1 }
 0x236   : > { %v1611_v12 = vadd.f32 %v5177_v4, %v1610_v20  ;;  %3286 = vmatpush1.msra.mxu0 %v2858_v19  ;;  %v2888_v20 = vld [vmem:[#allocation12 + $0x2f0] sm:$0xff] }
 0x237   : > { %v1755_v43 = vpop.f32.mrf.mxu0  ;;  %v1612_v40 = vpop.f32.mrf.mxu1  ;;  %3287 = vmatprep.subr.mxu0 %v5794_v1 }
 0x238   : > { %v5255_v62 = vadd.f32 %v1755_v43, %v1601_v41  ;;  %3288 = vmatpush2.msra.mxu0 %v2889_v23 }
 0x239   : > { %v1757_v50 = vpop.f32.mrf.mxu0  ;;  %v1615_v11 = vpop.f32.mrf.mxu1  ;;  %3289 = vmatprep.subr.mxu0 %v5794_v1 }
 0x23a   : > { %v1616_v22 = vadd.f32 %v5177_v4, %v1615_v11  ;;  %3290 = vmatpush2.msra.mxu0 %v2888_v20 }
 0x23b   : > { %v1760_v60 = vpop.f32.mrf.mxu0  ;;  %v1617_v9 = vpop.f32.mrf.mxu1  ;;  %3291 = vmatprep.subr.mxu0 %v5794_v1 }
 0x23c   : > { %v5260_v7 = vadd.f32 %v1760_v60, %v1606_v53  ;;  %v2886_v53 = vld [vmem:[#allocation12 + $0x2e0] sm:$0xff]  ;;  %3292 = vmatpush2.msra.mxu0 %v2887_v45 }
 0x23d   : > { %v1762_v24 = vpop.f32.mrf.mxu0  ;;  %v1620_v37 = vpop.f32.mrf.mxu1  ;;  %3293 = vmatprep.subr.mxu0 %v5794_v1 }
 0x23e   : > { %v1621_v41 = vadd.f32 %v5177_v4, %v1620_v37  ;;  %v2885_v24 = vld [vmem:[#allocation12 + $0x2d8] sm:$0xff]  ;;  %3294 = vmatpush2.msra.mxu0 %v2886_v53 }
 0x23f   : > { %v1765_v13 = vpop.f32.mrf.mxu0  ;;  %v1622_v49 = vpop.f32.mrf.mxu1  ;;  %3295 = vmatprep.subr.mxu0 %v5794_v1 }
 0x240   : > { %v5265_v51 = vadd.f32 %v1765_v13, %v1611_v12  ;;  %3296 = vmatpush2.msra.mxu0 %v2885_v24  ;;  %v2884_v49 = vld [vmem:[#allocation12 + $0x2d0] sm:$0xff] }
 0x241   : > { %v1767_v18 = vpop.f32.mrf.mxu0  ;;  %v1625_v31 = vpop.f32.mrf.mxu1  ;;  %3297 = vmatprep.subr.mxu0 %v5794_v1 }
 0x242   : > { %v1626_v60 = vadd.f32 %v5177_v4, %v1625_v31  ;;  %v2883_v18 = vld [vmem:[#allocation12 + $0x2c8] sm:$0xff]  ;;  %3298 = vmatpush2.msra.mxu0 %v2884_v49 }
 0x243   : > { %v1770_v25 = vpop.f32.mrf.mxu0  ;;  %v1627_v26 = vpop.f32.mrf.mxu1  ;;  %3299 = vmatprep.subr.mxu0 %v5794_v1 }
 0x244   : > { %v5270_v47 = vadd.f32 %v1770_v25, %v1616_v22  ;;  %3300 = vmatpush2.msra.mxu0 %v2883_v18  ;;  %v2882_v25 = vld [vmem:[#allocation12 + $0x2c0] sm:$0xff] }
 0x245   : > { %v1772_v21 = vpop.f32.mrf.mxu0  ;;  %v1630_v0 = vpop.f32.mrf.mxu1  ;;  %3301 = vmatprep.subr.mxu0 %v5794_v1 }
 0x246   : > { %5822 = vst [vmem:[#allocation26_spill] sm:$0xff] %v5270_v47  ;;  %3302 = vmatpush2.msra.mxu0 %v2882_v25 }
 0x247   : > { %v1775_v43 = vpop.f32.mrf.mxu0  ;;  %v1632_v40 = vpop.f32.mrf.mxu1  ;;  %3303 = vmatprep.subr.mxu0 %v5794_v1 }
 0x248   : > { %v5275_v50 = vadd.f32 %v1775_v43, %v1621_v41  ;;  %v2880_v41 = vld [vmem:[#allocation12 + $0x2b0] sm:$0xff]  ;;  %v2879_v40 = vld [vmem:[#allocation12 + $0x2a8] sm:$0xff] }
 0x249   : > { %v1777_v11 = vpop.f32.mrf.mxu0  ;;  %v1855_v56 = vpop.f32.mrf.mxu1 }
 0x24a   : > { %v5280_v9 = vadd.f32 %v1855_v56, %v5187_v15  ;;  %v1631_v15 = vadd.f32 %v5177_v4, %v1630_v0  ;;  %v2878_v56 = vld [vmem:[#allocation12 + $0x2a0] sm:$0xff] }
 0x24b   : > { %v1780_v63 = vpop.f32.mrf.mxu0  ;;  %v1857_v44 = vpop.f32.mrf.mxu1 }
 0x24c   : > { %v5283_v37 = vadd.f32 %v1780_v63, %v1626_v60  ;;  %v2877_v60 = vld [vmem:[#allocation12 + $0x298] sm:$0xff] }
 0x24d   : > { %v1782_v10 = vpop.f32.mrf.mxu0  ;;  %v1860_v12 = vpop.f32.mrf.mxu1 }
 0x24e   : > { %5823 = vst [vmem:[#allocation27_spill] sm:$0xff] %v5283_v37  ;;  %v5287_v13 = vadd.f32 %v1860_v12, %v5195_v59  ;;  %v2881_v59 = vld [vmem:[#allocation12 + $0x2b8] sm:$0xff]  ;;  %v2876_v10 = vld [vmem:[#allocation12 + $0x290] sm:$0xff] }
 0x24f   : > { %v1862_v3 = vpop.f32.mrf.mxu1  ;;  %3304 = vmatpush2.msra.mxu0 %v2881_v59 }
 0x250   : > { %v1785_v31 = vpop.f32.mrf.mxu0  ;;  %3305 = vmatprep.subr.mxu0 %v5794_v1  ;;  %v2875_v3 = vld [vmem:[#allocation12 + $0x288] sm:$0xff] }
 0x251   : > { %v5291_v19 = vadd.f32 %v1785_v31, %v1631_v15  ;;  %3306 = vmatpush2.msra.mxu0 %v2880_v41  ;;  %v2874_v31 = vld [vmem:[#allocation12 + $0x280] sm:$0xff] }
 0x252   : > { %v1787_v22 = vpop.f32.mrf.mxu0  ;;  %3307 = vmatprep.subr.mxu0 %v5794_v1 }
 0x253   : > { %5824 = vst [vmem:[#allocation28_spill] sm:$0xff] %v5291_v19  ;;  %v1865_v26 = vpop.f32.mrf.mxu1  ;;  %3308 = vmatpush2.msra.mxu0 %v2879_v40 }
 0x254   : > { %v5296_v23 = vadd.f32 %v1865_v26, %v5201_v28  ;;  %v5298_v4 = vpop.f32.mrf.mxu0  ;;  %3309 = vmatprep.subr.mxu0 %v5794_v1  ;;  %v5324_v26 = vld [vmem:[#allocation12 + $0x478] sm:$0xff] }
 0x255   : > { %v1867_v21 = vpop.f32.mrf.mxu1  ;;  %3310 = vmatpush2.msra.mxu0 %v2878_v56  ;;  %5825 = vst [vmem:[#allocation29_spill] sm:$0xff] %v5324_v26 }
 0x256   : > { %v2012_v0 = vpop.f32.mrf.mxu0  ;;  %3311 = vmatprep.subr.mxu0 %v5794_v1 }
 0x257   : > { %v5301_v20 = vpop.f32.mrf.mxu1  ;;  %3312 = vmatpush2.msra.mxu0 %v2877_v60 }
 0x258   : > { %v5304_v43 = vpop.f32.mrf.mxu0  ;;  %3313 = vmatprep.subr.mxu0 %v5794_v1 }
 0x259   : > { %v1872_v45 = vpop.f32.mrf.mxu1  ;;  %3314 = vmatpush2.msra.mxu0 %v2876_v10 }
 0x25a   : > { %v2017_v28 = vpop.f32.mrf.mxu0  ;;  %3315 = vmatprep.subr.mxu0 %v5794_v1 }
 0x25b   : > { %v5307_v11 = vpop.f32.mrf.mxu1  ;;  %3316 = vmatpush2.msra.mxu0 %v2875_v3 }
 0x25c   : > { %v5310_v53 = vpop.f32.mrf.mxu0  ;;  %3317 = vmatprep.subr.mxu0 %v5794_v1 }
 0x25d   : > { %v1877_v63 = vpop.f32.mrf.mxu1  ;;  %3318 = vmatpush2.msra.mxu0 %v2874_v31 }
 0x25e   : > { %v2022_v44 = vpop.f32.mrf.mxu0  ;;  %4184 = vmatprep.subr.mxu0 %v5324_v26 }
 0x25f   : > { %v5313_v24 = vpop.f32.mrf.mxu1 }
 0x260   : > { %v5316_v12 = vpop.f32.mrf.mxu0 }
 0x261   : > { %v1882_v49 = vpop.f32.mrf.mxu1 }
 0x262   : > { %v2027_v15 = vpop.f32.mrf.mxu0 }
 0x263   : > { %v5319_v18 = vpop.f32.mrf.mxu1 }
 0x264   : > { %v5321_v22 = vpop.f32.mrf.mxu0  ;;  %v1886_v33 = vadd.f32 %v5319_v18, %v5226_v57 }
 0x265   : > { %v1887_v25 = vpop.f32.mrf.mxu1 }
 0x266   : > { %v2032_v59 = vpop.f32.mrf.mxu0 }
 0x267   : > { %v5327_v21 = vpop.f32.mrf.mxu1 }
 0x268   : > { %v5329_v0 = vpop.f32.mrf.mxu0 }
 0x269   : > { %v1892_v41 = vpop.f32.mrf.mxu1 }
 0x26a   : > { %v2037_v40 = vpop.f32.mrf.mxu0 }
 0x26b   : > { %v5331_v45 = vpop.f32.mrf.mxu1 }
 0x26c   : > { %v5333_v28 = vpop.f32.mrf.mxu0  ;;  %v1896_v32 = vadd.f32 %v5331_v45, %v5239_v17  ;;  %v2905_v45 = vld [vmem:[#allocation12 + $0x378] sm:$0xff] }
 0x26d   : > { %v1897_v56 = vpop.f32.mrf.mxu1  ;;  %v2041_v34 = vadd.f32 %v5333_v28, %v1886_v33 }
 0x26e   : > { %v2042_v60 = vpop.f32.mrf.mxu0 }
 0x26f   : > { %v5335_v63 = vpop.f32.mrf.mxu1 }
 0x270   : > { %v5337_v44 = vpop.f32.mrf.mxu0 }
 0x271   : > { %v1902_v10 = vpop.f32.mrf.mxu1 }
 0x272   : > { %v2047_v49 = vpop.f32.mrf.mxu0 }
 0x273   : > { %v5339_v15 = vpop.f32.mrf.mxu1 }
 0x274   : > { %v5341_v3 = vpop.f32.mrf.mxu0 }
 0x275   : > { %v1907_v31 = vpop.f32.mrf.mxu1 }
 0x276   : > { %v2052_v25 = vpop.f32.mrf.mxu0 }
 0x277   : > { %v5343_v59 = vpop.f32.mrf.mxu1 }
 0x278   : > { %v5345_v41 = vpop.f32.mrf.mxu0 }
 0x279   : > { %v1912_v40 = vpop.f32.mrf.mxu1 }
 0x27a   : > { %v2057_v1 = vpop.f32.mrf.mxu0 }
 0x27b   : > { %v5347_v56 = vpop.f32.mrf.mxu1 }
 0x27c   : > { %v5349_v60 = vpop.f32.mrf.mxu0 }
 0x27d   : > { %v1917_v26 = vpop.f32.mrf.mxu1 }
 0x27e   : > { %v2062_v54 = vpop.f32.mrf.mxu0 }
 0x27f   : > { %v5351_v10 = vpop.f32.mrf.mxu1 }
 0x280   : > { %v5353_v49 = vpop.f32.mrf.mxu0 }
 0x281   : > { %v1922_v29 = vpop.f32.mrf.mxu1 }
 0x282   : > { %v2067_v14 = vpop.f32.mrf.mxu0 }
 0x283   : > { %v5355_v31 = vpop.f32.mrf.mxu1 }
 0x284   : > { %5826 = vst [vmem:[#allocation30_spill] sm:$0xff] %v5355_v31  ;;  %v5357_v25 = vpop.f32.mrf.mxu0 }
 0x285   : > { %v1927_v6 = vpop.f32.mrf.mxu1 }
 0x286   : > { %v2072_v48 = vpop.f32.mrf.mxu0 }
 0x287   : > { %v5359_v40 = vpop.f32.mrf.mxu1  ;;  %v2016_v48 = vadd.f32 %v5304_v43, %v5287_v13  ;;  %v2021_v13 = vadd.f32 %v5310_v53, %v5296_v23 }
 0x288   : > { %v5361_v1 = vpop.f32.mrf.mxu0 }
 0x289   : > { %v1932_v37 = vpop.f32.mrf.mxu1 }
 0x28a   : > { %v2077_v30 = vpop.f32.mrf.mxu0  ;;  %v2011_v37 = vadd.f32 %v5298_v4, %v5280_v9 }
 0x28b   : > { %v5363_v26 = vpop.f32.mrf.mxu1  ;;  %v1871_v30 = vadd.f32 %v5301_v20, %v5208_v52  ;;  %v1876_v20 = vadd.f32 %v5307_v11, %v5212_v5  ;;  %v1891_v5 = vadd.f32 %v5327_v21, %v5232_v2 }
 0x28c   : > { %5827 = vst [vmem:[#allocation31_spill] sm:$0xff] %v5363_v26  ;;  %v5365_v54 = vpop.f32.mrf.mxu0 }
 0x28d   : > { %5828 = vst [vmem:[#allocation32_spill] sm:$0xff] %v5365_v54  ;;  %v1937_v19 = vpop.f32.mrf.mxu1 }
 0x28e   : > { %v2082_v16 = vpop.f32.mrf.mxu0 }
 0x28f   : > { %v5367_v29 = vpop.f32.mrf.mxu1 }
 0x290   : > { %5829 = vst [vmem:[#allocation33_spill] sm:$0xff] %v5367_v29  ;;  %v5369_v14 = vpop.f32.mrf.mxu0  ;;  %v2026_v29 = vadd.f32 %v5316_v12, %v1871_v30 }
 0x291   : > { %5830 = vst [vmem:[#allocation34_spill] sm:$0xff] %v5369_v14  ;;  %v1942_v31 = vpop.f32.mrf.mxu1 }
 0x292   : > { %v2087_v6 = vpop.f32.mrf.mxu0 }
 0x293   : > { %v4159_v47 = vpop.f32.mrf.mxu1  ;;  %v1881_v6 = vadd.f32 %v5313_v24, %v5219_v39 }
 0x294   : > { %v5377_v26 = vpop.f32.mrf.mxu0  ;;  %v2171_v19 = vadd.f32 %v4159_v47, %v2016_v48 }
 0x295   : > { %v2165_v16 = vpop.f32.mrf.mxu1  ;;  %v2036_v23 = vadd.f32 %v5329_v0, %v1881_v6 }
 0x296   : > { %v2255_v54 = vmax.f32 %v2171_v19, 0.0  ;;  %v2092_v14 = vpop.f32.mrf.mxu0  ;;  %v2166_v31 = vadd.f32 %v2165_v16, %v2011_v37  ;;  %v1901_v19 = vadd.f32 %v5335_v63, %v5245_v58 }
 0x297   : > { %v4162_v43 = vpop.f32.mrf.mxu1 }
 0x298   : > { %v5386_v9 = vsel %vm789_vm0, %v2255_v54, -1.0  ;;  %v2254_v52 = vmax.f32 %v2166_v31, 0.0  ;;  %v5388_v4 = vpop.f32.mrf.mxu0  ;;  %v2181_v47 = vadd.f32 %v4162_v43, %v2026_v29  ;;  %v2031_v54 = vadd.f32 %v5321_v22, %v1876_v20  ;;  %v2380_v31 = vld [vmem:[#allocation2 + $0x2] sm:$0xff] }
 0x299   : > { %2291 = vst [vmem:[#allocation2 + $0x1b] sm:$0xff] %v5386_v9  ;;  %v2175_v12 = vpop.f32.mrf.mxu1  ;;  %v2046_v22 = vadd.f32 %v5337_v44, %v1891_v5  ;;  %v2056_v28 = vadd.f32 %v5345_v41, %v1901_v19  ;;  %v1911_v41 = vadd.f32 %v5343_v59, %v5255_v62  ;;  %v2381_v62 = vld [vmem:[#allocation2 + $0xa] sm:$0xff] }
 0x29a   : > { %v5396_v53 = vsel %vm788_vm4, %v2254_v52, -1.0  ;;  %v2257_v39 = vmax.f32 %v2181_v47, 0.0  ;;  %v2176_v35 = vadd.f32 %v2175_v12, %v2021_v13  ;;  %v2097_v24 = vpop.f32.mrf.mxu0  ;;  %v2051_v52 = vadd.f32 %v5341_v3, %v1896_v32  ;;  %v2904_v5 = vld [vmem:[#allocation12 + $0x370] sm:$0xff]  ;;  %v5833_v32 = vld [vmem:[#allocation30_spill] sm:$0xff] }
 0x29b   : > { %2290 = vst [vmem:[#allocation2 + $0x13] sm:$0xff] %v5396_v53  ;;  %v4165_v29 = vpop.f32.mrf.mxu1  ;;  %v1906_v3 = vadd.f32 %v5339_v15, %v5250_v27  ;;  %v2066_v42 = vadd.f32 %v5353_v49, %v1911_v41  ;;  %v5838_v41 = vld [vmem:[#allocation33_spill] sm:$0xff] }
 0x29c   : > { %v5404_v11 = vsel %vm791_vm5, %v2257_v39, -1.0  ;;  %v2256_v0 = vmax.f32 %v2176_v35, 0.0  ;;  %v2191_v14 = vadd.f32 %v4165_v29, %v2036_v23  ;;  %v5831_v29 = vmov 0.0  }
 0x29d   : > { %2293 = vst [vmem:[#allocation2 + $0x2b] sm:$0xff] %v5404_v11  ;;  %v2185_v48 = vpop.f32.mrf.mxu1  ;;  %vm3741_vm5 = vcmask 1045504  }
 0x29e   : > { %v5412_v37 = vsel %vm790_vm6, %v2256_v0, -1.0  ;;  %v2259_v30 = vmax.f32 %v2191_v14, 0.0  ;;  %v2186_v2 = vadd.f32 %v2185_v48, %v2031_v54  ;;  %v2061_v54 = vadd.f32 %v5349_v60, %v1906_v3 }
 0x29f   : > { %2292 = vst [vmem:[#allocation2 + $0x23] sm:$0xff] %v5412_v37  ;;  %v4168_v21 = vpop.f32.mrf.mxu1  ;;  %v1921_v0 = vadd.f32 %v5351_v10, %v5265_v51  ;;  %v1916_v48 = vadd.f32 %v5347_v56, %v5260_v7  ;;  %vm3751_vm6 = vcmask 1043456  }
 0x2a0   : > { %v5420_v57 = vsel %vm793_vm7, %v2259_v30, -1.0  ;;  %v2258_v18 = vmax.f32 %v2186_v2, 0.0  ;;  %v2201_v44 = vadd.f32 %v4168_v21, %v2046_v22  ;;  %v1931_v21 = vadd.f32 %v5359_v40, %v5275_v50  ;;  %v5834_v50 = vld [vmem:[#allocation34_spill] sm:$0xff] }
 0x2a1   : > { %2295 = vst [vmem:[#allocation2 + $0x3b] sm:$0xff] %v5420_v57  ;;  %v2195_v16 = vpop.f32.mrf.mxu1  ;;  %v2076_v55 = vadd.f32 %v5361_v1, %v1921_v0  ;;  %v2071_v2 = vadd.f32 %v5357_v25, %v1916_v48  ;;  %v2901_v48 = vld [vmem:[#allocation12 + $0x358] sm:$0xff]  ;;  %vm3761_vm7 = vcmask 1041408  }
 0x2a2   : > { %v5428_v13 = vsel %vm792_vm8, %v2258_v18, -1.0  ;;  %v2261_v58 = vmax.f32 %v2201_v44, 0.0  ;;  %v2196_v63 = vadd.f32 %v2195_v16, %v2041_v34  ;;  %v2346_v36 = vld [vmem:[#allocation2 + $0x11] sm:$0xff]  ;;  %v2347_v12 = vld [vmem:[#allocation2 + $0x19] sm:$0xff]  ;;  %v2903_v34 = vld [vmem:[#allocation12 + $0x368] sm:$0xff]  ;;  %v2086_v8 = vadd.f32 %v5834_v50, %v1931_v21 }
 0x2a3   : > { %v2416_v43 = vld [vmem:[#allocation2 + $0x12] sm:$0xff]  ;;  %2294 = vst [vmem:[#allocation2 + $0x33] sm:$0xff] %v5428_v13  ;;  %v4171_v17 = vpop.f32.mrf.mxu1  ;;  %3019 = vmatprep.mubr.f32.mxu0 %v2346_v36  ;;  %v5438_v23 = vld [vmem:[#allocation2 + $0x1a] sm:$0xff]  ;;  %v5836_v36 = vld [vmem:[#allocation32_spill] sm:$0xff] }
 0x2a4   : > { %v2310_v6 = vld [vmem:[#allocation2 + $0x10] sm:$0xff]  ;;  %3164 = vmatprep.mubr.f32.mxu1 %v2416_v43  ;;  %v5436_v38 = vsel %vm795_vm9, %v2261_v58, -1.0  ;;  %v2260_v47 = vmax.f32 %v2196_v63, 0.0  ;;  %v2211_v20 = vadd.f32 %v4171_v17, %v2056_v28  ;;  %v2311_v15 = vld [vmem:[#allocation2 + $0x18] sm:$0xff] }
 0x2a5   : > { %3020 = vmatmul.mubr.f32.gmra.mxu0 %v2310_v6  ;;  %3165 = vmatmul.mubr.f32.vlgmr.msra.gmra.mxu1 %v2380_v31  ;;  %2297 = vst [vmem:[#allocation2 + $0x4b] sm:$0xff] %v5436_v38  ;;  %v2205_v39 = vpop.f32.mrf.mxu1  ;;  %v5832_v44 = vld [vmem:[#allocation26_spill] sm:$0xff]  ;;  %v5845_v21 = vld [vmem:[#allocation23_spill] sm:$0xff] }
 0x2a6   : > { %3024 = vmatprep.mubr.f32.mxu0 %v2347_v12  ;;  %3169 = vmatprep.mubr.f32.mxu1 %v5438_v23  ;;  %v5447_v59 = vsel %vm794_vm10, %v2260_v47, -1.0  ;;  %v2263_v35 = vmax.f32 %v2211_v20, 0.0  ;;  %v2206_v24 = vadd.f32 %v2205_v39, %v2051_v52  ;;  %v2348_v33 = vld [vmem:[#allocation2 + $0x21] sm:$0xff]  ;;  %v2349_v18 = vld [vmem:[#allocation2 + $0x29] sm:$0xff]  ;;  %v1926_v16 = vadd.f32 %v5833_v32, %v5832_v44 }
 0x2a7   : > { %3411 = vmatpush1.msra.mxu1 %v2905_v45  ;;  %2296 = vst [vmem:[#allocation2 + $0x43] sm:$0xff] %v5447_v59  ;;  %v4174_v27 = vpop.f32.mrf.mxu1  ;;  %v5458_v60 = vld [vmem:[#allocation2 + $0x22] sm:$0xff]  ;;  %v5478_v25 = vld [vmem:[#allocation2 + $0x2a] sm:$0xff]  ;;  %vm5846_vm4 = vcmp.eq.s32.totalorder %v5845_v21, 1 }
 0x2a8   : > { %3412 = vmatprep.subr.mxu1 %v5831_v29  ;;  %v5456_v46 = vsel %vm797_vm11, %v2263_v35, -1.0  ;;  %v2262_v49 = vmax.f32 %v2206_v24, 0.0  ;;  %v2221_v14 = vadd.f32 %v4174_v27, %v2066_v42  ;;  %v2312_v56 = vld [vmem:[#allocation2 + $0x20] sm:$0xff]  ;;  %v2313_v52 = vld [vmem:[#allocation2 + $0x28] sm:$0xff] }
 0x2a9   : > { %3025 = vmatmul.mubr.f32.gmra.mxu0 %v2311_v15  ;;  %3170 = vmatmul.mubr.f32.gmra.mxu1 %v2381_v62  ;;  %2299 = vst [vmem:[#allocation2 + $0x5b] sm:$0xff] %v5456_v46  ;;  %v2215_v22 = vpop.f32.mrf.mxu1  ;;  %v2902_v17 = vld [vmem:[#allocation12 + $0x360] sm:$0xff]  ;;  %v5837_v45 = vld [vmem:[#allocation28_spill] sm:$0xff] }
 0x2aa   : > { %3029 = vmatprep.mubr.f32.mxu0 %v2348_v33  ;;  %3174 = vmatprep.mubr.f32.mxu1 %v5458_v60  ;;  %v5467_v51 = vsel %vm796_vm12, %v2262_v49, -1.0  ;;  %v2265_v10 = vmax.f32 %v2221_v14, 0.0  ;;  %v2216_v30 = vadd.f32 %v2215_v22, %v2061_v54  ;;  %v1941_v47 = vadd.f32 %v5838_v41, %v5837_v45  ;;  %v2350_v62 = vld [vmem:[#allocation2 + $0x31] sm:$0xff]  ;;  %v5840_v35 = vld [vmem:[#allocation27_spill] sm:$0xff] }
 0x2ab   : > { %3413 = vmatpush1.msra.mxu1 %v2904_v5  ;;  %2298 = vst [vmem:[#allocation2 + $0x53] sm:$0xff] %v5467_v51  ;;  %v4177_v7 = vpop.f32.mrf.mxu1  ;;  %v2420_v42 = vld [vmem:[#allocation2 + $0x32] sm:$0xff]  ;;  %v5841_v24 = vld [vmem:[#allocation31_spill] sm:$0xff] }
 0x2ac   : > { %3414 = vmatprep.subr.mxu1 %v5831_v29  ;;  %v5476_v61 = vsel %vm799_vm13, %v2265_v10, -1.0  ;;  %v2264_v1 = vmax.f32 %v2216_v30, 0.0  ;;  %v2231_v19 = vadd.f32 %v4177_v7, %v2076_v55  ;;  %v1936_v54 = vadd.f32 %v5841_v24, %v5840_v35  ;;  %v2314_v33 = vld [vmem:[#allocation2 + $0x30] sm:$0xff]  ;;  %v2421_v7 = vld [vmem:[#allocation2 + $0x3a] sm:$0xff]  ;;  %v2895_v45 = vld [vmem:[#allocation12 + $0x328] sm:$0xff] }
 0x2ad   : > { %3030 = vmatmul.mubr.f32.gmra.mxu0 %v2312_v56  ;;  %3175 = vmatmul.mubr.f32.gmra.mxu1 %v2416_v43  ;;  %2301 = vst [vmem:[#allocation2 + $0x6b] sm:$0xff] %v5476_v61  ;;  %v2225_v31 = vpop.f32.mrf.mxu1  ;;  %v2081_v43 = vadd.f32 %v5836_v36, %v1926_v16  ;;  %v2096_v15 = vadd.f32 %v5388_v4, %v1941_v47  ;;  %v5843_v55 = vld [vmem:[#allocation22_spill] sm:$0xff]  ;;  %v2899_v16 = vld [vmem:[#allocation12 + $0x348] sm:$0xff]  ;;  %v2916_v21 = vld [vmem:[#allocation12 + $0x3d0] sm:$0xff] }
 0x2ae   : > { %3034 = vmatprep.mubr.f32.mxu0 %v2349_v18  ;;  %3179 = vmatprep.mubr.f32.mxu1 %v5478_v25  ;;  %v5487_v28 = vsel %vm798_vm14, %v2264_v1, -1.0  ;;  %v2267_v58 = vmax.f32 %v2231_v19, 0.0  ;;  %v2226_v63 = vadd.f32 %v2225_v31, %v2071_v2  ;;  %v2091_v22 = vadd.f32 %v5377_v26, %v1936_v54  ;;  %v2351_v2 = vld [vmem:[#allocation2 + $0x39] sm:$0xff]  ;;  %v2352_v31 = vld [vmem:[#allocation2 + $0x41] sm:$0xff]  ;;  %v2353_v36 = vld [vmem:[#allocation2 + $0x49] sm:$0xff] }
 0x2af   : > { %3415 = vmatpush1.msra.mxu1 %v2903_v34  ;;  %2300 = vst [vmem:[#allocation2 + $0x63] sm:$0xff] %v5487_v28  ;;  %v4180_v6 = vpop.f32.mrf.mxu1  ;;  %vm5844_vm0 = vcmp.eq.s32.totalorder %v5843_v55, 1  ;;  %v2900_v34 = vld [vmem:[#allocation12 + $0x350] sm:$0xff]  ;;  %v2422_v50 = vld [vmem:[#allocation2 + $0x42] sm:$0xff] }
 0x2b0   : > { %3416 = vmatprep.subr.mxu1 %v5831_v29  ;;  %v5496_v12 = vsel %vm801_vm15, %v2267_v58, -1.0  ;;  %v2266_v3 = vmax.f32 %v2226_v63, 0.0  ;;  %v2241_v39 = vadd.f32 %v4180_v6, %v2086_v8  ;;  %v2898_v58 = vld [vmem:[#allocation12 + $0x340] sm:$0xff]  ;;  %v2896_v6 = vld [vmem:[#allocation12 + $0x330] sm:$0xff]  ;;  %v2891_v54 = vld [vmem:[#allocation12 + $0x308] sm:$0xff] }
 0x2b1   : > { %3035 = vmatmul.mubr.f32.gmra.mxu0 %v2313_v52  ;;  %3180 = vmatmul.mubr.f32.gmra.mxu1 %v5438_v23  ;;  %2303 = vst [vmem:[#allocation2 + $0x7b] sm:$0xff] %v5496_v12  ;;  %v2235_v27 = vpop.f32.mrf.mxu1  ;;  %v2316_v63 = vld [vmem:[#allocation2 + $0x40] sm:$0xff]  ;;  %v2317_v52 = vld [vmem:[#allocation2 + $0x48] sm:$0xff] }
 0x2b2   : > { %3039 = vmatprep.mubr.f32.mxu0 %v2350_v62  ;;  %3184 = vmatprep.mubr.f32.mxu1 %v2420_v42  ;;  %v5505_v0 = vsel %vm800_vm1, %v2266_v3, -1.0  ;;  %v2269_v49 = vmax.f32 %v2241_v39, 0.0  ;;  %v2236_v14 = vadd.f32 %v2235_v27, %v2081_v43  ;;  %v2423_v43 = vld [vmem:[#allocation2 + $0x4a] sm:$0xff]  ;;  %v2424_v41 = vld [vmem:[#allocation2 + $0x52] sm:$0xff]  ;;  %v2894_v47 = vld [vmem:[#allocation12 + $0x320] sm:$0xff] }
 0x2b3   : > { %3417 = vmatpush1.msra.mxu1 %v2902_v17  ;;  %2302 = vst [vmem:[#allocation2 + $0x73] sm:$0xff] %v5505_v0  ;;  %v4183_v23 = vpop.f32.mrf.mxu1  ;;  %v2354_v17 = vld [vmem:[#allocation2 + $0x51] sm:$0xff]  ;;  %v2355_v3 = vld [vmem:[#allocation2 + $0x59] sm:$0xff]  ;;  %v2919_v55 = vld [vmem:[#allocation12 + $0x3e8] sm:$0xff] }
 0x2b4   : > { %3418 = vmatprep.subr.mxu1 %v5831_v29  ;;  %v5512_v10 = vsel %vm5844_vm0, %v2269_v49, -1.0  ;;  %v2268_v4 = vmax.f32 %v2236_v14, 0.0  ;;  %v2251_v30 = vadd.f32 %v4183_v23, %v2096_v15  ;;  %v2318_v20 = vld [vmem:[#allocation2 + $0x50] sm:$0xff]  ;;  %v2425_v62 = vld [vmem:[#allocation2 + $0x5a] sm:$0xff] }
 0x2b5   : > { %3040 = vmatmul.mubr.f32.gmra.mxu0 %v2314_v33  ;;  %3185 = vmatmul.mubr.f32.gmra.mxu1 %v5458_v60  ;;  %2305 = vst [vmem:[#allocation2 + $0x8b] sm:$0xff] %v5512_v10  ;;  %v2245_v56 = vpop.f32.mrf.mxu1  ;;  %v2315_v60 = vld [vmem:[#allocation2 + $0x38] sm:$0xff]  ;;  %v2920_v33 = vld [vmem:[#allocation12 + $0x3f0] sm:$0xff] }
 0x2b6   : > { %3044 = vmatprep.mubr.f32.mxu0 %v2351_v2  ;;  %3189 = vmatprep.mubr.f32.mxu1 %v2421_v7  ;;  %v5518_v26 = vsel %vm5846_vm4, %v2268_v4, -1.0  ;;  %v2271_v1 = vmax.f32 %v2251_v30, 0.0  ;;  %v2246_v19 = vadd.f32 %v2245_v56, %v2091_v22  ;;  %v2893_v39 = vld [vmem:[#allocation12 + $0x318] sm:$0xff]  ;;  %v2356_v24 = vld [vmem:[#allocation2 + $0x61] sm:$0xff]  ;;  %v2357_v49 = vld [vmem:[#allocation2 + $0x69] sm:$0xff] }
 0x2b7   : > { %3419 = vmatpush1.msra.mxu1 %v2901_v48  ;;  %2304 = vst [vmem:[#allocation2 + $0x83] sm:$0xff] %v5518_v26  ;;  %v2319_v35 = vld [vmem:[#allocation2 + $0x58] sm:$0xff]  ;;  %v2426_v27 = vld [vmem:[#allocation2 + $0x62] sm:$0xff]  ;;  %v2427_v23 = vld [vmem:[#allocation2 + $0x6a] sm:$0xff] }
 0x2b8   : > { %3420 = vmatprep.subr.mxu1 %v5831_v29  ;;  %v5524_v44 = vsel %vm805_vm2, %v2271_v1, -1.0  ;;  %v2270_v32 = vmax.f32 %v2246_v19, 0.0  ;;  %v2890_v15 = vld [vmem:[#allocation12 + $0x300] sm:$0xff]  ;;  %v2921_v14 = vld [vmem:[#allocation12 + $0x3f8] sm:$0xff]  ;;  %v2321_v48 = vld [vmem:[#allocation2 + $0x68] sm:$0xff] }
 0x2b9   : > { %3421 = vmatpush1.msra.mxu1 %v2900_v34  ;;  %3045 = vmatmul.mubr.f32.gmra.mxu0 %v2315_v60  ;;  %2307 = vst [vmem:[#allocation2 + $0x9b] sm:$0xff] %v5524_v44  ;;  %v2320_v5 = vld [vmem:[#allocation2 + $0x60] sm:$0xff]  ;;  %v2917_v56 = vld [vmem:[#allocation12 + $0x3d8] sm:$0xff] }
 0x2ba   : > { %3190 = vmatmul.mubr.f32.gmra.mxu1 %v5478_v25  ;;  %3422 = vmatprep.subr.mxu1 %v5831_v29  ;;  %v5531_v40 = vsel %vm804_vm3, %v2270_v32, -1.0  ;;  %v2897_v25 = vld [vmem:[#allocation12 + $0x338] sm:$0xff]  ;;  %v2918_v30 = vld [vmem:[#allocation12 + $0x3e0] sm:$0xff]  ;;  %v2915_v60 = vld [vmem:[#allocation12 + $0x3c8] sm:$0xff] }
 0x2bb   : > { %3049 = vmatprep.mubr.f32.mxu0 %v2352_v31  ;;  %3194 = vmatprep.mubr.f32.mxu1 %v2422_v50  ;;  %2306 = vst [vmem:[#allocation2 + $0x93] sm:$0xff] %v5531_v40  ;;  %v2358_v22 = vld [vmem:[#allocation2 + $0x71] sm:$0xff]  ;;  %v2429_v34 = vld [vmem:[#allocation2 + $0x7a] sm:$0xff] }
 0x2bc   : > { %3423 = vmatpush1.msra.mxu1 %v2899_v16  ;;  %v2428_v4 = vld [vmem:[#allocation2 + $0x72] sm:$0xff]  ;;  %v2914_v32 = vld [vmem:[#allocation12 + $0x3c0] sm:$0xff] }
 0x2bd   : > { %3424 = vmatprep.subr.mxu1 %v5831_v29  ;;  %3050 = vmatmul.mubr.f32.gmra.mxu0 %v2316_v63  ;;  %v2322_v2 = vld [vmem:[#allocation2 + $0x70] sm:$0xff]  ;;  %v2323_v1 = vld [vmem:[#allocation2 + $0x78] sm:$0xff] }
 0x2be   : > { %3425 = vmatpush1.msra.mxu1 %v2898_v58  ;;  %3054 = vmatprep.mubr.f32.mxu0 %v2353_v36  ;;  %v2360_v19 = vld [vmem:[#allocation2 + $0x81] sm:$0xff]  ;;  %v2361_v31 = vld [vmem:[#allocation2 + $0x89] sm:$0xff]  ;;  %v2488_v36 = vld [vmem:[#allocation2 + $0x14] sm:$0xff] }
 0x2bf   : > { %3195 = vmatmul.mubr.f32.gmra.mxu1 %v2420_v42  ;;  %3426 = vmatprep.subr.mxu1 %v5831_v29  ;;  %v2892_v42 = vld [vmem:[#allocation12 + $0x310] sm:$0xff]  ;;  %v2430_v18 = vld [vmem:[#allocation2 + $0x82] sm:$0xff] }
 0x2c0   : > { %3199 = vmatprep.mubr.f32.mxu1 %v2423_v43  ;;  %3427 = vmatpush1.msra.mxu1 %v2897_v25  ;;  %v2324_v16 = vld [vmem:[#allocation2 + $0x80] sm:$0xff]  ;;  %v2431_v8 = vld [vmem:[#allocation2 + $0x8a] sm:$0xff] }
 0x2c1   : > { %3428 = vmatprep.subr.mxu1 %v5831_v29  ;;  %3055 = vmatmul.mubr.f32.gmra.mxu0 %v2317_v52  ;;  %v2912_v58 = vld [vmem:[#allocation12 + $0x3b0] sm:$0xff]  ;;  %v2911_v25 = vld [vmem:[#allocation12 + $0x3a8] sm:$0xff]  ;;  %v2910_v52 = vld [vmem:[#allocation12 + $0x3a0] sm:$0xff] }
 0x2c2   : > { %3429 = vmatpush1.msra.mxu1 %v2896_v6  ;;  %3059 = vmatprep.mubr.f32.mxu0 %v2354_v17  ;;  %v2325_v63 = vld [vmem:[#allocation2 + $0x88] sm:$0xff]  ;;  %v2432_v6 = vld [vmem:[#allocation2 + $0x92] sm:$0xff] }
 0x2c3   : > { %3200 = vmatmul.mubr.f32.gmra.mxu1 %v2421_v7  ;;  %3430 = vmatprep.subr.mxu1 %v5831_v29  ;;  %v2359_v7 = vld [vmem:[#allocation2 + $0x79] sm:$0xff] }
 0x2c4   : > { %3204 = vmatprep.mubr.f32.mxu1 %v2424_v41  ;;  %3431 = vmatpush1.msra.mxu1 %v2895_v45  ;;  %v5849_v45 = vld [vmem:[#allocation29_spill] sm:$0xff] }
 0x2c5   : > { %3432 = vmatprep.subr.mxu1 %v5831_v29  ;;  %3060 = vmatmul.mubr.f32.gmra.mxu0 %v2318_v20  ;;  %v2433_v20 = vld [vmem:[#allocation2 + $0x9a] sm:$0xff] }
 0x2c6   : > { %3433 = vmatpush1.msra.mxu1 %v2894_v47  ;;  %3064 = vmatprep.mubr.f32.mxu0 %v2355_v3  ;;  %v2489_v3 = vld [vmem:[#allocation2 + $0x1c] sm:$0xff] }
 0x2c7   : > { %3205 = vmatmul.mubr.f32.gmra.mxu1 %v2422_v50  ;;  %3434 = vmatprep.subr.mxu1 %v5831_v29  ;;  %v2913_v50 = vld [vmem:[#allocation12 + $0x3b8] sm:$0xff] }
 0x2c8   : > { %3209 = vmatprep.mubr.f32.mxu1 %v2425_v62  ;;  %3435 = vmatpush1.msra.mxu1 %v2893_v39  ;;  %v2936_v39 = vld [vmem:[#allocation12 + $0x470] sm:$0xff] }
 0x2c9   : > { %3436 = vmatprep.subr.mxu1 %v5831_v29  ;;  %3065 = vmatmul.mubr.f32.gmra.mxu0 %v2319_v35  ;;  %v2907_v35 = vld [vmem:[#allocation12 + $0x388] sm:$0xff] }
 0x2ca   : > { %3437 = vmatpush1.msra.mxu1 %v2892_v42  ;;  %3069 = vmatprep.mubr.f32.mxu0 %v2356_v24  ;;  %v2560_v24 = vld [vmem:[#allocation2 + $0x25] sm:$0xff] }
 0x2cb   : > { %3210 = vmatmul.mubr.f32.gmra.mxu1 %v2423_v43  ;;  %3438 = vmatprep.subr.mxu1 %v5831_v29 }
 0x2cc   : > { %3214 = vmatprep.mubr.f32.mxu1 %v2426_v27  ;;  %3439 = vmatpush1.msra.mxu1 %v2891_v54  ;;  %v2906_v54 = vld [vmem:[#allocation12 + $0x380] sm:$0xff] }
 0x2cd   : > { %3440 = vmatprep.subr.mxu1 %v5831_v29  ;;  %3070 = vmatmul.mubr.f32.gmra.mxu0 %v2320_v5  ;;  %v2934_v5 = vld [vmem:[#allocation12 + $0x460] sm:$0xff] }
 0x2ce   : > { %3441 = vmatpush1.msra.mxu1 %v2890_v15  ;;  %3074 = vmatprep.mubr.f32.mxu0 %v2357_v49  ;;  %v2561_v15 = vld [vmem:[#allocation2 + $0x2d] sm:$0xff] }
 0x2cf   : > { %3215 = vmatmul.mubr.f32.gmra.mxu1 %v2424_v41  ;;  %3442 = vmatprep.subr.mxu1 %v5831_v29  ;;  %v2909_v41 = vld [vmem:[#allocation12 + $0x398] sm:$0xff] }
 0x2d0   : > { %3219 = vmatprep.mubr.f32.mxu1 %v2427_v23  ;;  %3443 = vmatpush2.msra.mxu1 %v2921_v14  ;;  %v2492_v49 = vld [vmem:[#allocation2 + $0x34] sm:$0xff] }
 0x2d1   : > { %3444 = vmatprep.subr.mxu1 %v5831_v29  ;;  %3075 = vmatmul.mubr.f32.gmra.mxu0 %v2321_v48  ;;  %v2933_v14 = vld [vmem:[#allocation12 + $0x458] sm:$0xff]  ;;  %v2931_v48 = vld [vmem:[#allocation12 + $0x448] sm:$0xff] }
 0x2d2   : > { %3445 = vmatpush2.msra.mxu1 %v2920_v33  ;;  %3079 = vmatprep.mubr.f32.mxu0 %v2358_v22  ;;  %v2563_v33 = vld [vmem:[#allocation2 + $0x3d] sm:$0xff]  ;;  %v2564_v22 = vld [vmem:[#allocation2 + $0x45] sm:$0xff] }
 0x2d3   : > { %3220 = vmatmul.mubr.f32.gmra.mxu1 %v2425_v62  ;;  %3446 = vmatprep.subr.mxu1 %v5831_v29  ;;  %v2908_v62 = vld [vmem:[#allocation12 + $0x390] sm:$0xff] }
 0x2d4   : > { %3224 = vmatprep.mubr.f32.mxu1 %v2428_v4  ;;  %3447 = vmatpush2.msra.mxu1 %v2919_v55  ;;  %v5553_v43 = vpop.f32.mrf.mxu0  ;;  %v2930_v55 = vld [vmem:[#allocation12 + $0x440] sm:$0xff] }
 0x2d5   : > { %3448 = vmatprep.subr.mxu1 %v5831_v29  ;;  %3080 = vmatmul.mubr.f32.gmra.mxu0 %v2322_v2  ;;  %v2566_v2 = vld [vmem:[#allocation2 + $0x55] sm:$0xff] }
 0x2d6   : > { %3449 = vmatpush2.msra.mxu1 %v2918_v30  ;;  %3084 = vmatprep.mubr.f32.mxu0 %v2359_v7  ;;  %v3013_v17 = vpop.f32.mrf.mxu0  ;;  %v2929_v30 = vld [vmem:[#allocation12 + $0x438] sm:$0xff]  ;;  %v2928_v7 = vld [vmem:[#allocation12 + $0x430] sm:$0xff] }
 0x2d7   : > { %3225 = vmatmul.mubr.f32.gmra.mxu1 %v2426_v27  ;;  %3450 = vmatprep.subr.mxu1 %v5831_v29  ;;  %v2935_v27 = vld [vmem:[#allocation12 + $0x468] sm:$0xff]  ;;  %v2577_v17 = vld [vmem:[#allocation2 + $0xad] sm:$0xff] }
 0x2d8   : > { %3229 = vmatprep.mubr.f32.mxu1 %v2429_v34  ;;  %3451 = vmatpush2.msra.mxu1 %v2917_v56  ;;  %v5559_v47 = vpop.f32.mrf.mxu0  ;;  %v2567_v56 = vld [vmem:[#allocation2 + $0x5d] sm:$0xff] }
 0x2d9   : > { %3452 = vmatprep.subr.mxu1 %v5831_v29  ;;  %3085 = vmatmul.mubr.f32.gmra.mxu0 %v2323_v1  ;;  %v2926_v1 = vld [vmem:[#allocation12 + $0x420] sm:$0xff] }
 0x2da   : > { %3453 = vmatpush2.msra.mxu1 %v2916_v21  ;;  %3089 = vmatprep.mubr.f32.mxu0 %v2360_v19  ;;  %v3018_v42 = vpop.f32.mrf.mxu0  ;;  %v2568_v21 = vld [vmem:[#allocation2 + $0x65] sm:$0xff]  ;;  %v2569_v19 = vld [vmem:[#allocation2 + $0x6d] sm:$0xff] }
 0x2db   : > { %3230 = vmatmul.mubr.f32.gmra.mxu1 %v2427_v23  ;;  %3454 = vmatprep.subr.mxu1 %v5831_v29  ;;  %v2562_v23 = vld [vmem:[#allocation2 + $0x35] sm:$0xff] }
 0x2dc   : > { %3234 = vmatprep.mubr.f32.mxu1 %v2430_v18  ;;  %3455 = vmatpush2.msra.mxu1 %v2915_v60  ;;  %v2925_v60 = vld [vmem:[#allocation12 + $0x418] sm:$0xff] }
 0x2dd   : > { %3456 = vmatprep.subr.mxu1 %v5831_v29  ;;  %3090 = vmatmul.mubr.f32.gmra.mxu0 %v2324_v16  ;;  %v2571_v16 = vld [vmem:[#allocation2 + $0x7d] sm:$0xff]  ;;  %v2605_v42 = vld [vmem:[#allocation2 + $0x6e] sm:$0xff] }
 0x2de   : > { %3457 = vmatpush2.msra.mxu1 %v2914_v32  ;;  %3094 = vmatprep.mubr.f32.mxu0 %v2361_v31  ;;  %v2924_v32 = vld [vmem:[#allocation12 + $0x410] sm:$0xff]  ;;  %v2923_v31 = vld [vmem:[#allocation12 + $0x408] sm:$0xff] }
 0x2df   : > { %3235 = vmatmul.mubr.f32.gmra.mxu1 %v2428_v4  ;;  %3458 = vmatprep.subr.mxu1 %v5831_v29  ;;  %v2565_v4 = vld [vmem:[#allocation2 + $0x4d] sm:$0xff] }
 0x2e0   : > { %3239 = vmatprep.mubr.f32.mxu1 %v2431_v8  ;;  %3459 = vmatpush2.msra.mxu1 %v2913_v50  ;;  %v2572_v50 = vld [vmem:[#allocation2 + $0x85] sm:$0xff] }
 0x2e1   : > { %3460 = vmatprep.subr.mxu1 %v5831_v29  ;;  %3095 = vmatmul.mubr.f32.gmra.mxu0 %v2325_v63  ;;  %v2574_v63 = vld [vmem:[#allocation2 + $0x95] sm:$0xff] }
 0x2e2   : > { %3461 = vmatpush2.msra.mxu1 %v2912_v58  ;;  %3319 = vmatprep.mubr.f32.mxu0 %v2488_v36  ;;  %v2573_v58 = vld [vmem:[#allocation2 + $0x8d] sm:$0xff]  ;;  %v2505_v36 = vld [vmem:[#allocation2 + $0x9c] sm:$0xff] }
 0x2e3   : > { %3240 = vmatmul.mubr.f32.gmra.mxu1 %v2429_v34  ;;  %3462 = vmatprep.subr.mxu1 %v5831_v29  ;;  %v2927_v34 = vld [vmem:[#allocation12 + $0x428] sm:$0xff] }
 0x2e4   : > { %3244 = vmatprep.mubr.f32.mxu1 %v2432_v6  ;;  %3463 = vmatpush2.msra.mxu1 %v2911_v25  ;;  %v2576_v25 = vld [vmem:[#allocation2 + $0xa5] sm:$0xff] }
 0x2e5   : > { %3464 = vmatprep.subr.mxu1 %v5831_v29  ;;  %3320 = vmatmul.mubr.f32.vlgmr.msra.gmra.mxu0 %v5396_v53  ;;  %v2490_v53 = vld [vmem:[#allocation2 + $0x24] sm:$0xff] }
 0x2e6   : > { %3465 = vmatpush2.msra.mxu1 %v2910_v52  ;;  %4185 = vmatpush3.msra.mxu0 %v5849_v45  ;;  %v2596_v6 = vld [vmem:[#allocation2 + $0x26] sm:$0xff]  ;;  %v2597_v52 = vld [vmem:[#allocation2 + $0x2e] sm:$0xff]  ;;  %v2598_v45 = vld [vmem:[#allocation2 + $0x36] sm:$0xff] }
 0x2e7   : > { %3245 = vmatmul.mubr.f32.gmra.mxu1 %v2430_v18  ;;  %3466 = vmatprep.subr.mxu1 %v5831_v29  ;;  %v2570_v18 = vld [vmem:[#allocation2 + $0x75] sm:$0xff] }
 0x2e8   : > { %3249 = vmatprep.mubr.f32.mxu1 %v2433_v20  ;;  %3324 = vmatprep.mubr.f32.mxu0 %v2489_v3  ;;  %v2600_v20 = vld [vmem:[#allocation2 + $0x46] sm:$0xff]  ;;  %v2601_v3 = vld [vmem:[#allocation2 + $0x4e] sm:$0xff] }
 0x2e9   : > { %3467 = vmatpush2.msra.mxu1 %v2909_v41  ;;  %3325 = vmatmul.mubr.f32.gmra.mxu0 %v5386_v9  ;;  %v2491_v9 = vld [vmem:[#allocation2 + $0x2c] sm:$0xff]  ;;  %v2599_v41 = vld [vmem:[#allocation2 + $0x3e] sm:$0xff] }
 0x2ea   : > { %3468 = vmatprep.subr.mxu1 %v5831_v29  ;;  %4186 = vmatprep.subr.mxu0 %v2936_v39 }
 0x2eb   : > { %3469 = vmatpush2.msra.mxu1 %v2908_v62  ;;  %3329 = vmatprep.mubr.f32.mxu0 %v2490_v53  ;;  %v2604_v62 = vld [vmem:[#allocation2 + $0x66] sm:$0xff] }
 0x2ec   : > { %3250 = vmatmul.mubr.f32.gmra.mxu1 %v2431_v8  ;;  %3470 = vmatprep.subr.mxu1 %v5831_v29  ;;  %v2922_v8 = vld [vmem:[#allocation12 + $0x400] sm:$0xff] }
 0x2ed   : > { %3471 = vmatpush2.msra.mxu1 %v2907_v35  ;;  %3474 = vmatprep.mubr.f32.mxu1 %v2560_v24  ;;  %v2607_v35 = vld [vmem:[#allocation2 + $0x7e] sm:$0xff]  ;;  %v2608_v24 = vld [vmem:[#allocation2 + $0x86] sm:$0xff] }
 0x2ee   : > { %4187 = vmatpush3.msra.mxu0 %v2936_v39  ;;  %3472 = vmatprep.subr.mxu1 %v5831_v29  ;;  %v2932_v29 = vld [vmem:[#allocation12 + $0x450] sm:$0xff]  ;;  %v2603_v39 = vld [vmem:[#allocation2 + $0x5e] sm:$0xff] }
 0x2ef   : > { %3473 = vmatpush2.msra.mxu1 %v2906_v54  ;;  %3330 = vmatmul.mubr.f32.gmra.mxu0 %v5412_v37  ;;  %v2493_v37 = vld [vmem:[#allocation2 + $0x3c] sm:$0xff]  ;;  %v2609_v54 = vld [vmem:[#allocation2 + $0x8e] sm:$0xff] }
 0x2f0   : > { %3475 = vmatmul.mubr.f32.vlgmr.msra.gmra.mxu1 %v2490_v53  ;;  %4188 = vmatprep.subr.mxu0 %v2935_v27  ;;  %v2606_v53 = vld [vmem:[#allocation2 + $0x76] sm:$0xff] }
 0x2f1   : > { %3334 = vmatprep.mubr.f32.mxu0 %v2491_v9  ;;  %3479 = vmatprep.mubr.f32.mxu1 %v2561_v15  ;;  %v2611_v15 = vld [vmem:[#allocation2 + $0x9e] sm:$0xff] }
 0x2f2   : > { %4189 = vmatpush3.msra.mxu0 %v2935_v27  ;;  %v2610_v27 = vld [vmem:[#allocation2 + $0x96] sm:$0xff] }
 0x2f3   : > { %3335 = vmatmul.mubr.f32.gmra.mxu0 %v5404_v11  ;;  %4190 = vmatprep.subr.mxu0 %v2934_v5  ;;  %v2494_v11 = vld [vmem:[#allocation2 + $0x44] sm:$0xff] }
 0x2f4   : > { %3480 = vmatmul.mubr.f32.gmra.mxu1 %v2491_v9  ;;  %3339 = vmatprep.mubr.f32.mxu0 %v2492_v49  ;;  %v2612_v9 = vld [vmem:[#allocation2 + $0xa6] sm:$0xff] }
 0x2f5   : > { %3484 = vmatprep.mubr.f32.mxu1 %v2562_v23  ;;  %4191 = vmatpush3.msra.mxu0 %v2934_v5  ;;  %v2613_v5 = vld [vmem:[#allocation2 + $0xae] sm:$0xff] }
 0x2f6   : > { %4192 = vmatprep.subr.mxu0 %v2933_v14 }
 0x2f7   : > { %3340 = vmatmul.mubr.f32.gmra.mxu0 %v5428_v13  ;;  %v2495_v13 = vld [vmem:[#allocation2 + $0x4c] sm:$0xff] }
 0x2f8   : > { %3485 = vmatmul.mubr.f32.gmra.mxu1 %v2492_v49  ;;  %3344 = vmatprep.mubr.f32.mxu0 %v2493_v37  ;;  %v5582_v49 = vld [vmem:[#allocation14] ss:$0 sm:$0xff] }
 0x2f9   : > { %3489 = vmatprep.mubr.f32.mxu1 %v2563_v33  ;;  %4193 = vmatpush3.msra.mxu0 %v2933_v14  ;;  %v3012_v14 = vadd.f32 %v5582_v49, %v5553_v43 }
 0x2fa   : > { %4194 = vmatprep.subr.mxu0 %v2932_v29 }
 0x2fb   : > { %3345 = vmatmul.mubr.f32.gmra.mxu0 %v5420_v57  ;;  %v2496_v57 = vld [vmem:[#allocation2 + $0x54] sm:$0xff] }
 0x2fc   : > { %3490 = vmatmul.mubr.f32.gmra.mxu1 %v2493_v37  ;;  %3349 = vmatprep.mubr.f32.mxu0 %v2494_v11 }
 0x2fd   : > { %3494 = vmatprep.mubr.f32.mxu1 %v2564_v22  ;;  %4195 = vmatpush3.msra.mxu0 %v2932_v29 }
 0x2fe   : > { %4196 = vmatprep.subr.mxu0 %v2931_v48 }
 0x2ff   : > { %3350 = vmatmul.mubr.f32.gmra.mxu0 %v5447_v59  ;;  %v2497_v59 = vld [vmem:[#allocation2 + $0x5c] sm:$0xff] }
 0x300   : > { %3495 = vmatmul.mubr.f32.gmra.mxu1 %v2494_v11  ;;  %3354 = vmatprep.mubr.f32.mxu0 %v2495_v13 }
 0x301   : > { %3499 = vmatprep.mubr.f32.mxu1 %v2565_v4  ;;  %4197 = vmatpush3.msra.mxu0 %v2931_v48  ;;  %v3017_v48 = vadd.f32 %v5582_v49, %v5559_v47 }
 0x302   : > { %4198 = vmatprep.subr.mxu0 %v2930_v55 }
 0x303   : > { %3355 = vmatmul.mubr.f32.gmra.mxu0 %v5436_v38  ;;  %v2498_v38 = vld [vmem:[#allocation2 + $0x64] sm:$0xff] }
 0x304   : > { %3500 = vmatmul.mubr.f32.gmra.mxu1 %v2495_v13  ;;  %3359 = vmatprep.mubr.f32.mxu0 %v2496_v57 }
 0x305   : > { %3504 = vmatprep.mubr.f32.mxu1 %v2566_v2  ;;  %4199 = vmatpush3.msra.mxu0 %v2930_v55 }
 0x306   : > { %4200 = vmatprep.subr.mxu0 %v2929_v30 }
 0x307   : > { %3360 = vmatmul.mubr.f32.gmra.mxu0 %v5467_v51  ;;  %v2499_v51 = vld [vmem:[#allocation2 + $0x6c] sm:$0xff] }
 0x308   : > { %3505 = vmatmul.mubr.f32.gmra.mxu1 %v2496_v57  ;;  %3364 = vmatprep.mubr.f32.mxu0 %v2497_v59 }
 0x309   : > { %3509 = vmatprep.mubr.f32.mxu1 %v2567_v56  ;;  %4201 = vmatpush3.msra.mxu0 %v2929_v30 }
 0x30a   : > { %4202 = vmatprep.subr.mxu0 %v2928_v7 }
 0x30b   : > { %3365 = vmatmul.mubr.f32.gmra.mxu0 %v5456_v46  ;;  %v2500_v46 = vld [vmem:[#allocation2 + $0x74] sm:$0xff] }
 0x30c   : > { %3510 = vmatmul.mubr.f32.gmra.mxu1 %v2497_v59  ;;  %3369 = vmatprep.mubr.f32.mxu0 %v2498_v38 }
 0x30d   : > { %3514 = vmatprep.mubr.f32.mxu1 %v2568_v21  ;;  %4203 = vmatpush3.msra.mxu0 %v2928_v7 }
 0x30e   : > { %4204 = vmatprep.subr.mxu0 %v2927_v34 }
 0x30f   : > { %3370 = vmatmul.mubr.f32.gmra.mxu0 %v5487_v28  ;;  %v2501_v28 = vld [vmem:[#allocation2 + $0x7c] sm:$0xff] }
 0x310   : > { %3515 = vmatmul.mubr.f32.gmra.mxu1 %v2498_v38  ;;  %3374 = vmatprep.mubr.f32.mxu0 %v2499_v51 }
 0x311   : > { %3519 = vmatprep.mubr.f32.mxu1 %v2569_v19  ;;  %4205 = vmatpush3.msra.mxu0 %v2927_v34 }
 0x312   : > { %4206 = vmatprep.subr.mxu0 %v2926_v1 }
 0x313   : > { %3375 = vmatmul.mubr.f32.gmra.mxu0 %v5476_v61  ;;  %v2502_v61 = vld [vmem:[#allocation2 + $0x84] sm:$0xff] }
 0x314   : > { %3520 = vmatmul.mubr.f32.gmra.mxu1 %v2499_v51  ;;  %3379 = vmatprep.mubr.f32.mxu0 %v2500_v46 }
 0x315   : > { %3524 = vmatprep.mubr.f32.mxu1 %v2570_v18  ;;  %4207 = vmatpush3.msra.mxu0 %v2926_v1 }
 0x316   : > { %4208 = vmatprep.subr.mxu0 %v2925_v60 }
 0x317   : > { %3380 = vmatmul.mubr.f32.gmra.mxu0 %v5505_v0  ;;  %v2503_v0 = vld [vmem:[#allocation2 + $0x8c] sm:$0xff] }
 0x318   : > { %3525 = vmatmul.mubr.f32.gmra.mxu1 %v2500_v46  ;;  %3384 = vmatprep.mubr.f32.mxu0 %v2501_v28 }
 0x319   : > { %3529 = vmatprep.mubr.f32.mxu1 %v2571_v16  ;;  %4209 = vmatpush3.msra.mxu0 %v2925_v60 }
 0x31a   : > { %4210 = vmatprep.subr.mxu0 %v2924_v32 }
 0x31b   : > { %3385 = vmatmul.mubr.f32.gmra.mxu0 %v5496_v12  ;;  %v2504_v12 = vld [vmem:[#allocation2 + $0x94] sm:$0xff] }
 0x31c   : > { %3530 = vmatmul.mubr.f32.gmra.mxu1 %v2501_v28  ;;  %3389 = vmatprep.mubr.f32.mxu0 %v2502_v61 }
 0x31d   : > { %3534 = vmatprep.mubr.f32.mxu1 %v2572_v50  ;;  %4211 = vmatpush3.msra.mxu0 %v2924_v32 }
 0x31e   : > { %4212 = vmatprep.subr.mxu0 %v2923_v31 }
 0x31f   : > { %3390 = vmatmul.mubr.f32.gmra.mxu0 %v5518_v26  ;;  %v2575_v26 = vld [vmem:[#allocation2 + $0x9d] sm:$0xff] }
 0x320   : > { %3535 = vmatmul.mubr.f32.gmra.mxu1 %v2502_v61  ;;  %3394 = vmatprep.mubr.f32.mxu0 %v2503_v0 }
 0x321   : > { %3539 = vmatprep.mubr.f32.mxu1 %v2573_v58  ;;  %4213 = vmatpush3.msra.mxu0 %v2923_v31 }
 0x322   : > { %4214 = vmatprep.subr.mxu0 %v2922_v8 }
 0x323   : > { %3395 = vmatmul.mubr.f32.gmra.mxu0 %v5512_v10  ;;  %v2540_v10 = vld [vmem:[#allocation2 + $0xa4] sm:$0xff] }
 0x324   : > { %3540 = vmatmul.mubr.f32.gmra.mxu1 %v2503_v0  ;;  %3399 = vmatprep.mubr.f32.mxu0 %v2504_v12 }
 0x325   : > { %3544 = vmatprep.mubr.f32.mxu1 %v2574_v63  ;;  %4215 = vmatpush3.msra.mxu0 %v2922_v8 }
 0x327   : > { %3400 = vmatmul.mubr.f32.gmra.mxu0 %v5531_v40  ;;  %v2541_v40 = vld [vmem:[#allocation2 + $0xac] sm:$0xff] }
 0x328   : > { %3545 = vmatmul.mubr.f32.gmra.mxu1 %v2504_v12  ;;  %3404 = vmatprep.mubr.f32.mxu0 %v2505_v36 }
 0x329   : > { %3549 = vmatprep.mubr.f32.mxu1 %v2575_v26 }
 0x32b   : > { %3405 = vmatmul.mubr.f32.gmra.mxu0 %v5524_v44  ;;  %v2602_v44 = vld [vmem:[#allocation2 + $0x56] sm:$0xff] }
 0x32c   : > { %3550 = vmatmul.mubr.f32.gmra.mxu1 %v2505_v36  ;;  %4216 = vmatprep.mubr.f32.mxu0 %v2596_v6 }
 0x32d   : > { %3554 = vmatprep.mubr.f32.mxu1 %v2576_v25 }
 0x32f   : > { %4217 = vmatmul.mubr.f32.vlgmr.msra.gmra.mxu0 %v2597_v52 }
 0x330   : > { %3555 = vmatmul.mubr.f32.gmra.mxu1 %v2540_v10  ;;  %4219 = vmatprep.mubr.f32.mxu0 %v2598_v45 }
 0x331   : > { %3559 = vmatprep.mubr.f32.mxu1 %v2577_v17 }
 0x333   : > { %4220 = vmatmul.mubr.f32.gmra.mxu0 %v2599_v41 }
 0x334   : > { %3560 = vmatmul.mubr.f32.gmra.mxu1 %v2541_v40  ;;  %4222 = vmatprep.mubr.f32.mxu0 %v2600_v20 }
 0x337   : > { %4223 = vmatmul.mubr.f32.gmra.mxu0 %v2601_v3 }
 0x338   : > { %4225 = vmatprep.mubr.f32.mxu0 %v2602_v44 }
 0x33b   : > { %4226 = vmatmul.mubr.f32.gmra.mxu0 %v2603_v39 }
 0x33c   : > { %4228 = vmatprep.mubr.f32.mxu0 %v2604_v62 }
 0x33f   : > { %4229 = vmatmul.mubr.f32.gmra.mxu0 %v2605_v42 }
 0x340   : > { %4231 = vmatprep.mubr.f32.mxu0 %v2606_v53 }
 0x343   : > { %4232 = vmatmul.mubr.f32.gmra.mxu0 %v2607_v35 }
 0x344   : > { %4234 = vmatprep.mubr.f32.mxu0 %v2608_v24 }
 0x347   : > { %4235 = vmatmul.mubr.f32.gmra.mxu0 %v2609_v54 }
 0x348   : > { %4237 = vmatprep.mubr.f32.mxu0 %v2610_v27 }
 0x34b   : > { %4238 = vmatmul.mubr.f32.gmra.mxu0 %v2611_v15 }
 0x34c   : > { %4240 = vmatprep.mubr.f32.mxu0 %v2612_v9 }
 0x34f   : > { %4241 = vmatmul.mubr.f32.gmra.mxu0 %v2613_v5 }
 0x365   : > { %v3021_v23 = vpop.f32.mrf.mxu0  ;;  %v3166_v37 = vpop.f32.mrf.mxu1 }
 0x366   : > { %v5586_v29 = vadd.f32 %v3166_v37, %v3012_v14  ;;  %v3022_v30 = vadd.f32 %v5582_v49, %v3021_v23 }
 0x367   : > { %v3023_v33 = vpop.f32.mrf.mxu0  ;;  %v3168_v11 = vpop.f32.mrf.mxu1 }
 0x369   : > { %v3026_v22 = vpop.f32.mrf.mxu0  ;;  %v3171_v13 = vpop.f32.mrf.mxu1 }
 0x36a   : > { %v5590_v55 = vadd.f32 %v3171_v13, %v3017_v48  ;;  %v3027_v38 = vadd.f32 %v5582_v49, %v3026_v22 }
 0x36b   : > { %v3028_v4 = vpop.f32.mrf.mxu0  ;;  %v3173_v57 = vpop.f32.mrf.mxu1 }
 0x36d   : > { %v3031_v2 = vpop.f32.mrf.mxu0  ;;  %v3176_v59 = vpop.f32.mrf.mxu1 }
 0x36e   : > { %v5593_v43 = vadd.f32 %v3176_v59, %v3022_v30  ;;  %v3032_v19 = vadd.f32 %v5582_v49, %v3031_v2 }
 0x36f   : > { %v3033_v7 = vpop.f32.mrf.mxu0  ;;  %v3178_v56 = vpop.f32.mrf.mxu1 }
 0x371   : > { %v3036_v34 = vpop.f32.mrf.mxu0  ;;  %v3181_v21 = vpop.f32.mrf.mxu1 }
 0x372   : > { %v5596_v51 = vadd.f32 %v3181_v21, %v3027_v38  ;;  %v3037_v16 = vadd.f32 %v5582_v49, %v3036_v34 }
 0x373   : > { %v3038_v47 = vpop.f32.mrf.mxu0  ;;  %v3183_v1 = vpop.f32.mrf.mxu1 }
 0x375   : > { %v3041_v46 = vpop.f32.mrf.mxu0  ;;  %v3186_v60 = vpop.f32.mrf.mxu1 }
 0x376   : > { %v5599_v18 = vadd.f32 %v3186_v60, %v3032_v19  ;;  %v3042_v12 = vadd.f32 %v5582_v49, %v3041_v46 }
 0x377   : > { %v3043_v28 = vpop.f32.mrf.mxu0  ;;  %v3188_v32 = vpop.f32.mrf.mxu1 }
 0x379   : > { %v3046_v61 = vpop.f32.mrf.mxu0 }
 0x37a   : > { %v3191_v31 = vpop.f32.mrf.mxu1  ;;  %v3047_v10 = vadd.f32 %v5582_v49, %v3046_v61 }
 0x37b   : > { %v5602_v50 = vadd.f32 %v3191_v31, %v3037_v16  ;;  %v3048_v0 = vpop.f32.mrf.mxu0 }
 0x37c   : > { %v3193_v8 = vpop.f32.mrf.mxu1 }
 0x37d   : > { %v3051_v58 = vpop.f32.mrf.mxu0 }
 0x37e   : > { %v3052_v20 = vadd.f32 %v5582_v49, %v3051_v58 }
 0x37f   : > { %v3196_v63 = vpop.f32.mrf.mxu1  ;;  %v3053_v36 = vpop.f32.mrf.mxu0 }
 0x380   : > { %v5605_v26 = vadd.f32 %v3196_v63, %v3042_v12 }
 0x381   : > { %v3198_v25 = vpop.f32.mrf.mxu1  ;;  %v3056_v6 = vpop.f32.mrf.mxu0 }
 0x382   : > { %v3057_v53 = vadd.f32 %v5582_v49, %v3056_v6 }
 0x383   : > { %v3201_v52 = vpop.f32.mrf.mxu1  ;;  %v3058_v17 = vpop.f32.mrf.mxu0 }
 0x384   : > { %v5608_v45 = vadd.f32 %v3201_v52, %v3047_v10 }
 0x385   : > { %v3203_v40 = vpop.f32.mrf.mxu1  ;;  %v3061_v41 = vpop.f32.mrf.mxu0 }
 0x386   : > { %v3062_v15 = vadd.f32 %v5582_v49, %v3061_v41 }
 0x387   : > { %v3206_v3 = vpop.f32.mrf.mxu1  ;;  %v3063_v44 = vpop.f32.mrf.mxu0 }
 0x388   : > { %v5611_v39 = vadd.f32 %v3206_v3, %v3052_v20 }
 0x389   : > { %v3208_v62 = vpop.f32.mrf.mxu1  ;;  %v3066_v42 = vpop.f32.mrf.mxu0 }
 0x38a   : > { %v3067_v11 = vadd.f32 %v5582_v49, %v3066_v42 }
 0x38b   : > { %v3211_v35 = vpop.f32.mrf.mxu1  ;;  %v3068_v24 = vpop.f32.mrf.mxu0 }
 0x38c   : > { %v5614_v54 = vadd.f32 %v3211_v35, %v3057_v53 }
 0x38d   : > { %v3213_v27 = vpop.f32.mrf.mxu1  ;;  %v3071_v9 = vpop.f32.mrf.mxu0 }
 0x38e   : > { %v3072_v30 = vadd.f32 %v5582_v49, %v3071_v9 }
 0x38f   : > { %v3216_v5 = vpop.f32.mrf.mxu1  ;;  %v3073_v14 = vpop.f32.mrf.mxu0 }
 0x390   : > { %v5617_v23 = vadd.f32 %v3216_v5, %v3062_v15 }
 0x391   : > { %v3218_v37 = vpop.f32.mrf.mxu1  ;;  %v3076_v33 = vpop.f32.mrf.mxu0 }
 0x392   : > { %v3077_v34 = vadd.f32 %v5582_v49, %v3076_v33 }
 0x393   : > { %v3221_v48 = vpop.f32.mrf.mxu1  ;;  %v3078_v22 = vpop.f32.mrf.mxu0 }
 0x394   : > { %v5620_v13 = vadd.f32 %v3221_v48, %v3067_v11 }
 0x395   : > { %v3223_v4 = vpop.f32.mrf.mxu1  ;;  %v3081_v57 = vpop.f32.mrf.mxu0 }
 0x396   : > { %v3082_v60 = vadd.f32 %v5582_v49, %v3081_v57 }
 0x397   : > { %v3226_v2 = vpop.f32.mrf.mxu1  ;;  %v3083_v59 = vpop.f32.mrf.mxu0 }
 0x398   : > { %v5623_v7 = vadd.f32 %v3226_v2, %v3072_v30 }
 0x399   : > { %v3228_v56 = vpop.f32.mrf.mxu1  ;;  %v3086_v38 = vpop.f32.mrf.mxu0 }
 0x39a   : > { %v3087_v0 = vadd.f32 %v5582_v49, %v3086_v38 }
 0x39b   : > { %v3231_v21 = vpop.f32.mrf.mxu1  ;;  %v3088_v47 = vpop.f32.mrf.mxu0 }
 0x39c   : > { %v5626_v1 = vadd.f32 %v3231_v21, %v3077_v34 }
 0x39d   : > { %v3233_v19 = vpop.f32.mrf.mxu1  ;;  %v3091_v46 = vpop.f32.mrf.mxu0 }
 0x39e   : > { %v3092_v25 = vadd.f32 %v5582_v49, %v3091_v46 }
 0x39f   : > { %v3236_v28 = vpop.f32.mrf.mxu1  ;;  %v3093_v32 = vpop.f32.mrf.mxu0 }
 0x3a0   : > { %v5629_v16 = vadd.f32 %v3236_v28, %v3082_v60 }
 0x3a1   : > { %v3238_v61 = vpop.f32.mrf.mxu1  ;;  %v3096_v31 = vpop.f32.mrf.mxu0 }
 0x3a2   : > { %v3097_v3 = vadd.f32 %v5582_v49, %v3096_v31 }
 0x3a3   : > { %v3241_v8 = vpop.f32.mrf.mxu1  ;;  %v3098_v58 = vpop.f32.mrf.mxu0 }
 0x3a4   : > { %v5632_v12 = vadd.f32 %v3241_v8, %v3087_v0 }
 0x3a5   : > { %v3243_v63 = vpop.f32.mrf.mxu1  ;;  %v3321_v36 = vpop.f32.mrf.mxu0 }
 0x3a6   : > { %v5636_v6 = vadd.f32 %v3321_v36, %v5586_v29 }
 0x3a7   : > { %v3246_v10 = vpop.f32.mrf.mxu1  ;;  %v3323_v52 = vpop.f32.mrf.mxu0 }
 0x3a8   : > { %v5638_v17 = vadd.f32 %v3246_v10, %v3092_v25 }
 0x3a9   : > { %v3248_v40 = vpop.f32.mrf.mxu1  ;;  %v3326_v41 = vpop.f32.mrf.mxu0 }
 0x3aa   : > { %v5641_v20 = vadd.f32 %v3326_v41, %v5590_v55 }
 0x3ab   : > { %v3328_v44 = vpop.f32.mrf.mxu0 }
 0x3ac   : > { %v3251_v62 = vpop.f32.mrf.mxu1 }
 0x3ad   : > { %v5644_v42 = vadd.f32 %v3251_v62, %v3097_v3 }
 0x3ae   : > { %v3253_v53 = vpop.f32.mrf.mxu1 }
 0x3af   : > { %v3331_v35 = vpop.f32.mrf.mxu0 }
 0x3b0   : > { %v5647_v29 = vadd.f32 %v3331_v35, %v5593_v43  ;;  %v5649_v24 = vpop.f32.mrf.mxu1 }
 0x3b1   : > { %v3333_v27 = vpop.f32.mrf.mxu0 }
 0x3b2   : > { %v3478_v9 = vpop.f32.mrf.mxu1 }
 0x3b3   : > { %v5651_v15 = vpop.f32.mrf.mxu0 }
 0x3b4   : > { %v5653_v5 = vpop.f32.mrf.mxu1 }
 0x3b5   : > { %v3338_v55 = vpop.f32.mrf.mxu0 }
 0x3b6   : > { %v3483_v14 = vpop.f32.mrf.mxu1 }
 0x3b7   : > { %v5655_v49 = vpop.f32.mrf.mxu0 }
 0x3b8   : > { %v5657_v37 = vpop.f32.mrf.mxu1 }
 0x3b9   : > { %v3343_v33 = vpop.f32.mrf.mxu0 }
 0x3ba   : > { %v3488_v11 = vpop.f32.mrf.mxu1 }
 0x3bb   : > { %v5659_v48 = vpop.f32.mrf.mxu0 }
 0x3bc   : > { %v3491_v43 = vpop.f32.mrf.mxu1 }
 0x3bd   : > { %v3348_v22 = vpop.f32.mrf.mxu0 }
 0x3be   : > { %v3493_v4 = vpop.f32.mrf.mxu1 }
 0x3bf   : > { %v5661_v57 = vpop.f32.mrf.mxu0 }
 0x3c0   : > { %v5663_v30 = vpop.f32.mrf.mxu1 }
 0x3c1   : > { %v3353_v2 = vpop.f32.mrf.mxu0 }
 0x3c2   : > { %v3498_v59 = vpop.f32.mrf.mxu1 }
 0x3c3   : > { %v5665_v56 = vpop.f32.mrf.mxu0 }
 0x3c4   : > { %v5667_v38 = vpop.f32.mrf.mxu1 }
 0x3c5   : > { %v3358_v34 = vpop.f32.mrf.mxu0 }
 0x3c6   : > { %v3503_v21 = vpop.f32.mrf.mxu1 }
 0x3c7   : > { %v5669_v47 = vpop.f32.mrf.mxu0 }
 0x3c8   : > { %v5671_v19 = vpop.f32.mrf.mxu1 }
 0x3c9   : > { %v3363_v46 = vpop.f32.mrf.mxu0 }
 0x3ca   : > { %v3508_v60 = vpop.f32.mrf.mxu1 }
 0x3cb   : > { %v3366_v28 = vpop.f32.mrf.mxu0 }
 0x3cc   : > { %v5674_v32 = vadd.f32 %v3366_v28, %v5614_v54  ;;  %v5676_v61 = vpop.f32.mrf.mxu1 }
 0x3cd   : > { %v3368_v31 = vpop.f32.mrf.mxu0 }
 0x3ce   : > { %v3513_v0 = vpop.f32.mrf.mxu1 }
 0x3cf   : > { %v3371_v8 = vpop.f32.mrf.mxu0 }
 0x3d0   : > { %v5679_v58 = vadd.f32 %v3371_v8, %v5617_v23  ;;  %v5681_v63 = vpop.f32.mrf.mxu1 }
 0x3d1   : > { %v3373_v36 = vpop.f32.mrf.mxu0 }
 0x3d2   : > { %v3518_v25 = vpop.f32.mrf.mxu1  ;;  %v3477_v36 = vadd.f32 %v5649_v24, %v5636_v6 }
 0x3d3   : > { %v5683_v10 = vpop.f32.mrf.mxu0  ;;  %v3337_v25 = vadd.f32 %v5651_v15, %v5596_v51  ;;  %v3342_v15 = vadd.f32 %v5655_v49, %v5599_v18 }
 0x3d4   : > { %v5685_v52 = vpop.f32.mrf.mxu1 }
 0x3d5   : > { %v3378_v40 = vpop.f32.mrf.mxu0 }
 0x3d6   : > { %v3523_v41 = vpop.f32.mrf.mxu1 }
 0x3d7   : > { %v5687_v54 = vpop.f32.mrf.mxu0 }
 0x3d8   : > { %v5689_v3 = vpop.f32.mrf.mxu1 }
 0x3d9   : > { %v3383_v44 = vpop.f32.mrf.mxu0 }
 0x3da   : > { %v3528_v62 = vpop.f32.mrf.mxu1  ;;  %v3482_v44 = vadd.f32 %v5653_v5, %v5641_v20 }
 0x3db   : > { %v5691_v53 = vpop.f32.mrf.mxu0  ;;  %v3492_v62 = vadd.f32 %v3491_v43, %v3337_v25 }
 0x3dc   : > { %v5693_v23 = vpop.f32.mrf.mxu1 }
 0x3dd   : > { %v3388_v35 = vpop.f32.mrf.mxu0 }
 0x3de   : > { %v3533_v27 = vpop.f32.mrf.mxu1 }
 0x3df   : > { %v5695_v9 = vpop.f32.mrf.mxu0 }
 0x3e0   : > { %v5697_v55 = vpop.f32.mrf.mxu1 }
 0x3e1   : > { %v3393_v14 = vpop.f32.mrf.mxu0 }
 0x3e2   : > { %v3538_v33 = vpop.f32.mrf.mxu1  ;;  %v3487_v14 = vadd.f32 %v5657_v37, %v5647_v29  ;;  %v3497_v29 = vadd.f32 %v5663_v30, %v3342_v15 }
 0x3e3   : > { %v5699_v11 = vpop.f32.mrf.mxu0 }
 0x3e4   : > { %v5701_v22 = vpop.f32.mrf.mxu1 }
 0x3e5   : > { %v3398_v4 = vpop.f32.mrf.mxu0 }
 0x3e6   : > { %v3543_v2 = vpop.f32.mrf.mxu1  ;;  %v3347_v4 = vadd.f32 %v5659_v48, %v5602_v50  ;;  %v3357_v50 = vadd.f32 %v5665_v56, %v5608_v45 }
 0x3e7   : > { %v5703_v59 = vpop.f32.mrf.mxu0 }
 0x3e8   : > { %v5705_v34 = vpop.f32.mrf.mxu1  ;;  %v3502_v20 = vadd.f32 %v5667_v38, %v3347_v4  ;;  %v3512_v49 = vadd.f32 %v5676_v61, %v3357_v50 }
 0x3e9   : > { %v3403_v21 = vpop.f32.mrf.mxu0 }
 0x3ea   : > { %v3548_v46 = vpop.f32.mrf.mxu1 }
 0x3eb   : > { %v5707_v60 = vpop.f32.mrf.mxu0 }
 0x3ec   : > { %v5709_v28 = vpop.f32.mrf.mxu1 }
 0x3ed   : > { %v3408_v31 = vpop.f32.mrf.mxu0 }
 0x3ee   : > { %v3553_v0 = vpop.f32.mrf.mxu1 }
 0x3ef   : > { %v4218_v8 = vpop.f32.mrf.mxu0 }
 0x3f0   : > { %v5715_v40 = vpop.f32.mrf.mxu1  ;;  %v3637_v6 = vadd.f32 %v4218_v8, %v3482_v44  ;;  %v3352_v8 = vadd.f32 %v5661_v57, %v5605_v26 }
 0x3f1   : > { %v3631_v41 = vpop.f32.mrf.mxu0 }
 0x3f2   : > { %v3558_v35 = vpop.f32.mrf.mxu1  ;;  %v3632_v27 = vadd.f32 %v3631_v41, %v3477_v36  ;;  %v3721_v48 = vmax.f32 %v3637_v6, 0.0  ;;  %v3507_v44 = vadd.f32 %v5671_v19, %v3352_v8 }
 0x3f3   : > { %v4221_v33 = vpop.f32.mrf.mxu0  ;;  %v3362_v35 = vadd.f32 %v5669_v47, %v5611_v39 }
 0x3f4   : > { %v3720_v24 = vmax.f32 %v3632_v27, 0.0  ;;  %v5723_v2 = vpop.f32.mrf.mxu1  ;;  %v3647_v51 = vadd.f32 %v4221_v33, %v3492_v62 }
 0x3f5   : > { %v3641_v21 = vpop.f32.mrf.mxu0  ;;  %v3517_v6 = vadd.f32 %v5681_v63, %v3362_v35 }
 0x3f6   : > { %v3723_v5 = vmax.f32 %v3647_v51, 0.0  ;;  %v3642_v43 = vadd.f32 %v3641_v21, %v3487_v14  ;;  %3797 = vxpose.xlu0.b32.start [1/16] (narrow) %v3720_v24, 72  ;;  %v3563_v46 = vpop.f32.mrf.mxu1 }
 0x3f7   : > { %v4224_v37 = vpop.f32.mrf.mxu0  ;;  %v3387_v46 = vadd.f32 %v5691_v53, %v5626_v1  ;;  %v3397_v1 = vadd.f32 %v5699_v11, %v5632_v12 }
 0x3f8   : > { %v3722_v31 = vmax.f32 %v3642_v43, 0.0  ;;  %v3657_v0 = vadd.f32 %v4224_v37, %v3502_v20  ;;  %v3743_v38 = vrot.slane %v3723_v5, 2  ;;  %v3377_v5 = vadd.f32 %v5683_v10, %v5620_v13 }
 0x3f9   : > { %v3651_v18 = vpop.f32.mrf.mxu0 }
 0x3fa   : > { %v3742_v36 = vrot.slane %v3722_v31, 2  ;;  %v3652_v25 = vadd.f32 %v3651_v18, %v3497_v29  ;;  %3798 = vxpose.xlu0.b32.cont [2/16] (narrow) %v3721_v48, 72  ;;  %v3725_v41 = vmax.f32 %v3657_v0, 0.0  ;;  %v3532_v50 = vadd.f32 %v5693_v23, %v3377_v5 }
 0x3fb   : > { %v4227_v30 = vpop.f32.mrf.mxu0  ;;  %v3382_v31 = vadd.f32 %v5687_v54, %v5623_v7  ;;  %v3542_v0 = vadd.f32 %v5701_v22, %v3387_v46  ;;  %v3392_v23 = vadd.f32 %v5695_v9, %v5629_v16  ;;  %v3552_v7 = vadd.f32 %v5709_v28, %v3397_v1 }
 0x3fc   : > { %v3724_v62 = vmax.f32 %v3652_v25, 0.0  ;;  %v3667_v45 = vadd.f32 %v4227_v30, %v3512_v49  ;;  %v3744_v56 = vsel %vm3741_vm5, %v3742_v36, %v3743_v38  ;;  %v3753_v33 = vrot.slane %v3725_v41, 4 }
 0x3fd   : > { %v3661_v26 = vpop.f32.mrf.mxu0  ;;  %v3537_v18 = vadd.f32 %v5697_v55, %v3382_v31  ;;  %v3547_v41 = vadd.f32 %v5705_v34, %v3392_v23  ;;  %v3407_v55 = vadd.f32 %v5707_v60, %v5644_v42  ;;  %v3522_v30 = vadd.f32 %v5685_v52, %v5674_v32 }
 0x3fe   : > { %v3745_v57 = vrot.slane %v3724_v62, 2  ;;  %v3752_v27 = vrot.slane %v3724_v62, 4  ;;  %v3727_v61 = vmax.f32 %v3667_v45, 0.0  ;;  %v3662_v14 = vadd.f32 %v3661_v26, %v3507_v44  ;;  %3799 = vxpose.xlu0.b32.cont [3/16] (narrow) %v3744_v56, 72 }
 0x3ff   : > { %v4230_v4 = vpop.f32.mrf.mxu0  ;;  %v3402_v16 = vadd.f32 %v5703_v59, %v5638_v17  ;;  %v3562_v28 = vadd.f32 %v5723_v2, %v3407_v55  ;;  %v3527_v32 = vadd.f32 %v5689_v3, %v5679_v58 }
 0x400   : > { %v3726_v24 = vmax.f32 %v3662_v14, 0.0  ;;  %v3746_v19 = vsel %vm3741_vm5, %v3743_v38, %v3745_v57  ;;  %v3754_v15 = vsel %vm3751_vm6, %v3752_v27, %v3753_v33  ;;  %v3763_v21 = vrot.slane %v3727_v61, 6 }
 0x401   : > { %v3671_v51 = vpop.f32.mrf.mxu0  ;;  %v3677_v56 = vadd.f32 %v4230_v4, %v3522_v30  ;;  %v3557_v42 = vadd.f32 %v5715_v40, %v3402_v16 }
 0x402   : > { %v3755_v39 = vrot.slane %v3726_v24, 4  ;;  %v3762_v47 = vrot.slane %v3726_v24, 6  ;;  %v3672_v20 = vadd.f32 %v3671_v51, %v3517_v6  ;;  %3800 = vxpose.xlu0.b32.cont [4/16] (narrow) %v3746_v19, 72 }
 0x403   : > { %v4233_v43 = vpop.f32.mrf.mxu0  ;;  %v3729_v4 = vmax.f32 %v3677_v56, 0.0 }
 0x404   : > { %v3728_v63 = vmax.f32 %v3672_v20, 0.0  ;;  %v3756_v29 = vsel %vm3751_vm6, %v3753_v33, %v3755_v39  ;;  %v3764_v37 = vsel %vm3761_vm7, %v3762_v47, %v3763_v21  ;;  %v3687_v13 = vadd.f32 %v4233_v43, %v3532_v50 }
 0x405   : > { %v3681_v48 = vpop.f32.mrf.mxu0 }
 0x406   : > { %v3765_v8 = vrot.slane %v3728_v63, 6  ;;  %3801 = vxpose.xlu0.b32.cont [5/16] (narrow) %v3754_v15, 72  ;;  %v3731_v22 = vmax.f32 %v3687_v13, 0.0  ;;  %v3682_v6 = vadd.f32 %v3681_v48, %v3527_v32 }
 0x407   : > { %v4236_v10 = vpop.f32.mrf.mxu0 }
 0x408   : > { %v3697_v53 = vadd.f32 %v4236_v10, %v3542_v0  ;;  %v3766_v49 = vsel %vm3761_vm7, %v3763_v21, %v3765_v8  ;;  %v3772_v34 = vrot.slane %v3731_v22, 2  ;;  %v3730_v15 = vmax.f32 %v3682_v6, 0.0 }
 0x409   : > { %v3691_v38 = vpop.f32.mrf.mxu0 }
 0x40a   : > { %v3692_v54 = vadd.f32 %v3691_v38, %v3537_v18  ;;  %3802 = vxpose.xlu0.b32.cont [6/16] (narrow) %v3756_v29, 72  ;;  %v3733_v36 = vmax.f32 %v3697_v53, 0.0 }
 0x40b   : > { %v4239_v25 = vpop.f32.mrf.mxu0 }
 0x40c   : > { %v3732_v12 = vmax.f32 %v3692_v54, 0.0  ;;  %v3707_v11 = vadd.f32 %v4239_v25, %v3552_v7  ;;  %v3775_v35 = vrot.slane %v3733_v36, 2  ;;  %v3781_v52 = vrot.slane %v3733_v36, 4 }
 0x40d   : > { %v3701_v9 = vpop.f32.mrf.mxu0 }
 0x40e   : > { %v3773_v44 = vrot.slane %v3732_v12, 2  ;;  %v3735_v62 = vmax.f32 %v3707_v11, 0.0  ;;  %v3702_v45 = vadd.f32 %v3701_v9, %v3547_v41  ;;  %3803 = vxpose.xlu0.b32.cont [7/16] (narrow) %v3764_v37, 72 }
 0x40f   : > { %v4242_v26 = vpop.f32.mrf.mxu0 }
 0x410   : > { %v3734_v60 = vmax.f32 %v3702_v45, 0.0  ;;  %v3717_v57 = vadd.f32 %v4242_v26, %v3562_v28  ;;  %v3774_v59 = vsel %vm3741_vm5, %v3772_v34, %v3773_v44  ;;  %v3776_v2 = vsel %vm3741_vm5, %v3773_v44, %v3775_v35 }
 0x411   : > { %v3711_v17 = vpop.f32.mrf.mxu0  ;;  %v3784_v27 = vrot.slane %v3735_v62, 4  ;;  %v3790_v58 = vrot.slane %v3735_v62, 6 }
 0x412   : > { %v3782_v61 = vrot.slane %v3734_v60, 4  ;;  %v3737_v14 = vmax.f32 %v3717_v57, 0.0  ;;  %v3712_v33 = vadd.f32 %v3711_v17, %v3557_v42  ;;  %3804 = vxpose.xlu0.b32.cont [8/16] (narrow) %v3766_v49, 72 }
 0x414   : > { %v3736_v24 = vmax.f32 %v3712_v33, 0.0  ;;  %v3783_v40 = vsel %vm3751_vm6, %v3781_v52, %v3782_v61  ;;  %v3785_v19 = vsel %vm3751_vm6, %v3782_v61, %v3784_v27  ;;  %v3793_v3 = vrot.slane %v3737_v14, 6 }
 0x416   : > { %v3791_v51 = vrot.slane %v3736_v24, 6  ;;  %3805 = vxpose.xlu0.b32.cont [9/16] (narrow) %v3729_v4, 72 }
 0x418   : > { %v3792_v21 = vsel %vm3761_vm7, %v3790_v58, %v3791_v51  ;;  %v3794_v39 = vsel %vm3761_vm7, %v3791_v51, %v3793_v3 }
 0x41a   : > { %3806 = vxpose.xlu0.b32.cont [10/16] (narrow) %v3730_v15, 72 }
 0x41e   : > { %3807 = vxpose.xlu0.b32.cont [11/16] (narrow) %v3774_v59, 72 }
 0x422   : > { %3808 = vxpose.xlu0.b32.cont [12/16] (narrow) %v3776_v2, 72 }
 0x426   : > { %3809 = vxpose.xlu0.b32.cont [13/16] (narrow) %v3783_v40, 72 }
 0x42a   : > { %3810 = vxpose.xlu0.b32.cont [14/16] (narrow) %v3785_v19, 72 }
 0x42e   : > { %3811 = vxpose.xlu0.b32.cont [15/16] (narrow) %v3792_v21, 72 }
 0x432   : > { %3812 = vxpose.xlu0.b32.end [16/16] (narrow) %v3794_v39, 72 }
 0x472   : > { %v3813_v47 = vpop.trf.xlu0 }
 0x473   : > { %3829 = vst [vmem:[%s401_s23] sm:$0xff] %v3813_v47 }
 0x476   : > { %v3814_v20 = vpop.trf.xlu0 }
 0x477   : > { %3830 = vst [vmem:[%s401_s23 + $0x8] sm:$0xff] %v3814_v20 }
 0x47a   : > { %v3815_v5 = vpop.trf.xlu0 }
 0x47b   : > { %3831 = vst [vmem:[%s401_s23 + $0x10] sm:$0xff] %v3815_v5 }
 0x47e   : > { %v3816_v43 = vpop.trf.xlu0 }
 0x47f   : > { %3832 = vst [vmem:[%s401_s23 + $0x18] sm:$0xff] %v3816_v43 }
 0x482   : > { %v3817_v46 = vpop.trf.xlu0 }
 0x483   : > { %3833 = vst [vmem:[%s401_s23 + $0x20] sm:$0xff] %v3817_v46 }
 0x486   : > { %v3818_v63 = vpop.trf.xlu0 }
 0x487   : > { %3834 = vst [vmem:[%s401_s23 + $0x28] sm:$0xff] %v3818_v63 }
 0x48a   : > { %v3819_v29 = vpop.trf.xlu0 }
 0x48b   : > { %3835 = vst [vmem:[%s401_s23 + $0x30] sm:$0xff] %v3819_v29 }
 0x48e   : > { %v3820_v37 = vpop.trf.xlu0 }
 0x48f   : > { %3836 = vst [vmem:[%s401_s23 + $0x38] sm:$0xff] %v3820_v37 }
 0x492   : > { %v3821_v50 = vpop.trf.xlu0 }
 0x493   : > { %3837 = vst [vmem:[%s401_s23 + $0x40] sm:$0x3] %v3821_v50 }
 0x494 PF: > { %s22_s27 = sadd.s32 1, %s4536_s27  }
 0x495   : > { %p19_p10 = scmp.ge.s32.totalorder %s22_s27, 4  }
 0x497   :  { %21 = sbr.rel (!%p19_p10) target bundleno = 4 (0x4), region = 111 }
 0x49c   :  { %3859 = vsyncpa [#allocation5], 1 }
 0x49d   :  { %3861 = vsyncpa [#allocation5 + $0x1], 1 }
 0x49e   :  { %3862 = vsyncpa [#allocation7], 1 }
 0x49f   :  { %3863 = vsyncpa [#allocation10], 1 }
 0x4a0   :  { %3864 = vsyncpa [#allocation13], 1 }

// kernel: model_forward.3
= control target key start
LH: loop header
LB: loop body
LE: loop exit
PB: predicated region body
PF: predicated region fallthrough
CT: control target
= control target key end

     0   :  { %v11054_v35 = vmov 1983009808   ;;  %v60_v37 = vlaneseq  ;;  %s14657_s0 = inlined_call_operand.vmem [shape: f32[2,8448], index: 0, kind: input, shape index: {}]   ;;  %s14658_s1 = inlined_call_operand.vmem [shape: bf16[8448,200], index: 1, kind: input, shape index: {}]   ;;  %s14659_s2 = inlined_call_operand.vmem [shape: f32[1,200], index: 2, kind: input, shape index: {}]   ;;  %s14660_s3 = inlined_call_operand.vmem [shape: bf16[200,5], index: 3, kind: input, shape index: {}]   ;;  %s14661_s4 = inlined_call_operand.vmem [shape: f32[1,5], index: 4, kind: input, shape index: {}]   ;;  %s14662_s5 = inlined_call_operand.hbm [shape: f32[2,5], index: 5, kind: output, shape index: {}]  }
   0x1   :  { %v9419_v0 = vld [vmem:[%s14658_s1 + $0x74] ss:$8 sps:$4 sm:$0xff]   ;;  %v9421_v1 = vld [vmem:[%s14658_s1 + $0x70] ss:$8 sps:$4 sm:$0xff]   ;;  %v9425_v4 = vld [vmem:[%s14658_s1 + $0x64] ss:$8 sps:$4 sm:$0xff]   ;;  %v58_v36 = vunpack.c.l.s4 %v11054_v35 }
   0x2   :  { %6816 = vmatprep.subr.bf16.mxu0 %v9419_v0  ;;  %v9422_v2 = vld [vmem:[%s14658_s1 + $0x174] ss:$8 sps:$4 sm:$0xff]   ;;  %v9424_v3 = vld [vmem:[%s14658_s1 + $0x170] ss:$8 sps:$4 sm:$0xff]   ;;  %v9427_v5 = vld [vmem:[%s14658_s1 + $0x60] ss:$8 sps:$4 sm:$0xff]  }
   0x3   :  { %6817 = vmatpush1.bf16.msra.mxu0 %v9421_v1  ;;  %6857 = vmatprep.subr.bf16.mxu1 %v9422_v2  ;;  %v9428_v6 = vld [vmem:[%s14658_s1 + $0x164] ss:$8 sps:$4 sm:$0xff]   ;;  %v9430_v7 = vld [vmem:[%s14658_s1 + $0x160] ss:$8 sps:$4 sm:$0xff]   ;;  %v9431_v8 = vld [vmem:[%s14658_s1 + $0x54] ss:$8 sps:$4 sm:$0xff]   ;;  %v59_v42 = vunpack.c.0.s8 %v58_v36 }
   0x4   :  { %6858 = vmatpush1.bf16.msra.mxu1 %v9424_v3  ;;  %6818 = vmatprep.subr.bf16.mxu0 %v9425_v4  ;;  %v9433_v9 = vld [vmem:[%s14658_s1 + $0x50] ss:$8 sps:$4 sm:$0xff]   ;;  %v9434_v10 = vld [vmem:[%s14658_s1 + $0x154] ss:$8 sps:$4 sm:$0xff]   ;;  %v9437_v11 = vld [vmem:[%s14658_s1 + $0x44] ss:$8 sps:$4 sm:$0xff]  }
   0x5   :  { %6859 = vmatprep.subr.bf16.mxu1 %v9428_v6  ;;  %v9436_v12 = vld [vmem:[%s14658_s1 + $0x150] ss:$8 sps:$4 sm:$0xff]   ;;  %v9440_v13 = vld [vmem:[%s14658_s1 + $0x144] ss:$8 sps:$4 sm:$0xff]   ;;  %v9439_v14 = vld [vmem:[%s14658_s1 + $0x40] ss:$8 sps:$4 sm:$0xff]  }
   0x6   :  { %v9443_v15 = vld [vmem:[%s14658_s1 + $0x34] ss:$8 sps:$4 sm:$0xff]   ;;  %v9442_v16 = vld [vmem:[%s14658_s1 + $0x140] ss:$8 sps:$4 sm:$0xff]   ;;  %v9445_v18 = vld [vmem:[%s14658_s1 + $0x30] ss:$8 sps:$4 sm:$0xff]  }
   0x7   :  { %6819 = vmatpush1.bf16.msra.mxu0 %v9427_v5  ;;  %v9446_v17 = vld [vmem:[%s14658_s1 + $0x134] ss:$8 sps:$4 sm:$0xff]   ;;  %v9449_v19 = vld [vmem:[%s14658_s1 + $0x24] ss:$8 sps:$4 sm:$0xff]   ;;  %v9448_v20 = vld [vmem:[%s14658_s1 + $0x130] ss:$8 sps:$4 sm:$0xff]  }
   0x8   :  { %6820 = vmatprep.subr.bf16.mxu0 %v9431_v8  ;;  %6860 = vmatpush1.bf16.msra.mxu1 %v9430_v7  ;;  %v9452_v21 = vld [vmem:[%s14658_s1 + $0x124] ss:$8 sps:$4 sm:$0xff]   ;;  %v9451_v22 = vld [vmem:[%s14658_s1 + $0x20] ss:$8 sps:$4 sm:$0xff]   ;;  %v9455_v23 = vld [vmem:[%s14658_s1 + $0x14] ss:$8 sps:$4 sm:$0xff]  }
   0x9   :  { %6861 = vmatprep.subr.bf16.mxu1 %v9434_v10  ;;  %v9454_v24 = vld [vmem:[%s14658_s1 + $0x120] ss:$8 sps:$4 sm:$0xff]   ;;  %v9458_v25 = vld [vmem:[%s14658_s1 + $0x114] ss:$8 sps:$4 sm:$0xff]   ;;  %v9457_v26 = vld [vmem:[%s14658_s1 + $0x10] ss:$8 sps:$4 sm:$0xff]  }
   0xa   :  { %v9461_v27 = vld [vmem:[%s14658_s1 + $0x4] ss:$8 sps:$4 sm:$0xff]   ;;  %v9460_v28 = vld [vmem:[%s14658_s1 + $0x110] ss:$8 sps:$4 sm:$0xff]   ;;  %v9463_v30 = vld [vmem:[%s14658_s1] ss:$8 sps:$4 sm:$0xff]  }
   0xb   :  { %6821 = vmatpush1.bf16.msra.mxu0 %v9433_v9  ;;  %v9464_v29 = vld [vmem:[%s14658_s1 + $0x104] ss:$8 sps:$4 sm:$0xff]   ;;  %v9467_v31 = vld [vmem:[%s14658_s1 + $0xf4] ss:$8 sps:$4 sm:$0xff]   ;;  %v9466_v32 = vld [vmem:[%s14658_s1 + $0x100] ss:$8 sps:$4 sm:$0xff]  }
   0xc   :  { %6822 = vmatprep.subr.bf16.mxu0 %v9437_v11  ;;  %6862 = vmatpush1.bf16.msra.mxu1 %v9436_v12  ;;  %v9470_v33 = vld [vmem:[%s14658_s1 + $0x1f4] ss:$8 sps:$4 sm:$0xff]   ;;  %v9469_v34 = vld [vmem:[%s14658_s1 + $0xf0] ss:$8 sps:$4 sm:$0xff]   ;;  %v9473_v38 = vld [vmem:[%s14658_s1 + $0xe4] ss:$8 sps:$4 sm:$0xff]  }
   0xd   :  { %6863 = vmatprep.subr.bf16.mxu1 %v9440_v13  ;;  %v9472_v39 = vld [vmem:[%s14658_s1 + $0x1f0] ss:$8 sps:$4 sm:$0xff]   ;;  %v9476_v40 = vld [vmem:[%s14658_s1 + $0x1e4] ss:$8 sps:$4 sm:$0xff]   ;;  %v9475_v41 = vld [vmem:[%s14658_s1 + $0xe0] ss:$8 sps:$4 sm:$0xff]  }
   0xe   :  { %v11204_v43 = vshrl.u32 %v60_v37, 7  ;;  %v9479_v44 = vld [vmem:[%s14658_s1 + $0xd4] ss:$8 sps:$4 sm:$0xff]   ;;  %v9478_v45 = vld [vmem:[%s14658_s1 + $0x1e0] ss:$8 sps:$4 sm:$0xff]  }
   0xf   :  { %6823 = vmatpush1.bf16.msra.mxu0 %v9439_v14  ;;  %v9482_v46 = vld [vmem:[%s14658_s1 + $0x1d4] ss:$8 sps:$4 sm:$0xff]   ;;  %v9481_v47 = vld [vmem:[%s14658_s1 + $0xd0] ss:$8 sps:$4 sm:$0xff]   ;;  %v9485_v49 = vld [vmem:[%s14658_s1 + $0xc4] ss:$8 sps:$4 sm:$0xff]  }
  0x10   :  { %6824 = vmatprep.subr.bf16.mxu0 %v9443_v15  ;;  %6864 = vmatpush1.bf16.msra.mxu1 %v9442_v16  ;;  %v11219_v48 = vsub.s32 %v59_v42, %v11204_v43  ;;  %v9484_v50 = vld [vmem:[%s14658_s1 + $0x1d0] ss:$8 sps:$4 sm:$0xff]   ;;  %v9488_v51 = vld [vmem:[%s14658_s1 + $0x1c4] ss:$8 sps:$4 sm:$0xff]   ;;  %v9487_v53 = vld [vmem:[%s14658_s1 + $0xc0] ss:$8 sps:$4 sm:$0xff]  }
  0x11   :  { %6865 = vmatprep.subr.bf16.mxu1 %v9446_v17  ;;  %v22_v52 = vld [vmem:[%s14657_s0] sm:$0xff]  ;;  %v9491_v56 = vld [vmem:[%s14658_s1 + $0xb4] ss:$8 sps:$4 sm:$0xff]   ;;  %v9493_v61 = vld [vmem:[%s14658_s1 + $0xb0] ss:$8 sps:$4 sm:$0xff]  }
  0x12   :  { %v63_v54 = vrot.slane %v22_v52, %v11219_v48  ;;  %v56_v55 = vcombine.high %v22_v52, %v22_v52  ;;  %v9490_v57 = vld [vmem:[%s14658_s1 + $0x1c0] ss:$8 sps:$4 sm:$0xff]   ;;  %v9494_v60 = vld [vmem:[%s14658_s1 + $0x1b4] ss:$8 sps:$4 sm:$0xff]   ;;  %v9497_v0 = vld [vmem:[%s14658_s1 + $0xa4] ss:$8 sps:$4 sm:$0xff]  }
  0x13   :  { %6825 = vmatpush1.bf16.msra.mxu0 %v9445_v18  ;;  %v9496_v1 = vld [vmem:[%s14658_s1 + $0x1b0] ss:$8 sps:$4 sm:$0xff]   ;;  %v9500_v3 = vld [vmem:[%s14658_s1 + $0x1a4] ss:$8 sps:$4 sm:$0xff]   ;;  %v9499_v4 = vld [vmem:[%s14658_s1 + $0xa0] ss:$8 sps:$4 sm:$0xff]  }
  0x14   :  { %6826 = vmatprep.subr.bf16.mxu0 %v9449_v19  ;;  %6866 = vmatpush1.bf16.msra.mxu1 %v9448_v20  ;;  %v71_v58 = vcombine.high %v63_v54, %v63_v54  ;;  %v70_v59 = vrot.slane %v56_v55, %v11219_v48  ;;  %v9503_v5 = vld [vmem:[%s14658_s1 + $0x94] ss:$8 sps:$4 sm:$0xff]   ;;  %v9502_v6 = vld [vmem:[%s14658_s1 + $0x1a0] ss:$8 sps:$4 sm:$0xff]   ;;  %v9505_v8 = vld [vmem:[%s14658_s1 + $0x90] ss:$8 sps:$4 sm:$0xff]   ;;  %v402_v15 = vpack.c.bf16 %v63_v54, %v63_v54 }
  0x15   :  { %6867 = vmatprep.subr.bf16.mxu1 %v9452_v21  ;;  %v9506_v7 = vld [vmem:[%s14658_s1 + $0x194] ss:$8 sps:$4 sm:$0xff]   ;;  %v9509_v9 = vld [vmem:[%s14658_s1 + $0x84] ss:$8 sps:$4 sm:$0xff]   ;;  %v9508_v10 = vld [vmem:[%s14658_s1 + $0x190] ss:$8 sps:$4 sm:$0xff]  }
  0x16   :  { %v403_v62 = vpack.c.bf16 %v71_v58, %v71_v58  ;;  %v72_v63 = vcombine.high %v70_v59, %v70_v59  ;;  %v9512_v11 = vld [vmem:[%s14658_s1 + $0x184] ss:$8 sps:$4 sm:$0xff]   ;;  %v9511_v12 = vld [vmem:[%s14658_s1 + $0x80] ss:$8 sps:$4 sm:$0xff]   ;;  %v9517_v13 = vld [vmem:[%s14658_s1 + $0x274] ss:$8 sps:$4 sm:$0xff]   ;;  %v404_v18 = vpack.c.bf16 %v70_v59, %v70_v59 }
  0x17   :  { %6827 = vmatpush1.bf16.msra.mxu0 %v9451_v22  ;;  %v9514_v14 = vld [vmem:[%s14658_s1 + $0x180] ss:$8 sps:$4 sm:$0xff]   ;;  %v9521_v16 = vld [vmem:[%s14658_s1 + $0x374] ss:$8 sps:$4 sm:$0xff]   ;;  %v9515_v17 = vld [vmem:[%s14658_s1 + $0x270] ss:$8 sps:$4 sm:$0xff]  }
  0x18   :  { %6828 = vmatprep.subr.bf16.mxu0 %v9455_v23  ;;  %6868 = vmatpush1.bf16.msra.mxu1 %v9454_v24  ;;  %v405_v2 = vpack.c.bf16 %v72_v63, %v72_v63  ;;  %v9524_v19 = vld [vmem:[%s14658_s1 + $0x264] ss:$8 sps:$4 sm:$0xff]   ;;  %v9519_v20 = vld [vmem:[%s14658_s1 + $0x370] ss:$8 sps:$4 sm:$0xff]   ;;  %v9522_v22 = vld [vmem:[%s14658_s1 + $0x260] ss:$8 sps:$4 sm:$0xff]  }
  0x19   :  { %6869 = vmatprep.subr.bf16.mxu1 %v9458_v25  ;;  %6848 = vmatprep.mubr.bf16.mxu0 %v403_v62  ;;  %v9527_v21 = vld [vmem:[%s14658_s1 + $0x364] ss:$8 sps:$4 sm:$0xff]   ;;  %v9530_v23 = vld [vmem:[%s14658_s1 + $0x254] ss:$8 sps:$4 sm:$0xff]   ;;  %v9525_v24 = vld [vmem:[%s14658_s1 + $0x360] ss:$8 sps:$4 sm:$0xff]  }
  0x1a   :  { %6889 = vmatprep.mubr.bf16.mxu1 %v405_v2  ;;  %v9533_v25 = vld [vmem:[%s14658_s1 + $0x354] ss:$8 sps:$4 sm:$0xff]   ;;  %v9548_v35 = vld [vmem:[%s14658_s1 + $0x224] ss:$8 sps:$4 sm:$0xff]   ;;  %v9543_v36 = vld [vmem:[%s14658_s1 + $0x330] ss:$8 sps:$4 sm:$0xff]  }
  0x1b   :  { %6829 = vmatpush1.bf16.msra.mxu0 %v9457_v26  ;;  %v9528_v26 = vld [vmem:[%s14658_s1 + $0x250] ss:$8 sps:$4 sm:$0xff]   ;;  %v9551_v37 = vld [vmem:[%s14658_s1 + $0x324] ss:$8 sps:$4 sm:$0xff]   ;;  %v9557_v42 = vld [vmem:[%s14658_s1 + $0x314] ss:$8 sps:$4 sm:$0xff]  }
  0x1c   :  { %6830 = vmatprep.subr.bf16.mxu0 %v9461_v27  ;;  %6870 = vmatpush1.bf16.msra.mxu1 %v9460_v28  ;;  %v9536_v27 = vld [vmem:[%s14658_s1 + $0x244] ss:$8 sps:$4 sm:$0xff]   ;;  %v9531_v28 = vld [vmem:[%s14658_s1 + $0x350] ss:$8 sps:$4 sm:$0xff]   ;;  %v9558_v55 = vld [vmem:[%s14658_s1 + $0x200] ss:$8 sps:$4 sm:$0xff]  }
  0x1d   :  { %6871 = vmatprep.subr.bf16.mxu1 %v9464_v29  ;;  %v9539_v29 = vld [vmem:[%s14658_s1 + $0x344] ss:$8 sps:$4 sm:$0xff]   ;;  %v9561_v58 = vld [vmem:[%s14658_s1 + $0x300] ss:$8 sps:$4 sm:$0xff]   ;;  %v9569_v59 = vld [vmem:[%s14658_s1 + $0x3f4] ss:$8 sps:$4 sm:$0xff]  }
  0x1e   :  { %v9563_v52 = vld [vmem:[%s14658_s1 + $0x304] ss:$8 sps:$4 sm:$0xff]   ;;  %v9567_v62 = vld [vmem:[%s14658_s1 + $0x3f0] ss:$8 sps:$4 sm:$0xff]   ;;  %v9573_v2 = vld [vmem:[%s14658_s1 + $0x3e0] ss:$8 sps:$4 sm:$0xff]  }
  0x1f   :  { %6831 = vmatpush1.bf16.msra.mxu0 %v9463_v30  ;;  %v9534_v30 = vld [vmem:[%s14658_s1 + $0x240] ss:$8 sps:$4 sm:$0xff]   ;;  %v9575_v63 = vld [vmem:[%s14658_s1 + $0x3e4] ss:$8 sps:$4 sm:$0xff]  }
  0x20   :  { %6832 = vmatprep.subr.bf16.mxu0 %v9467_v31  ;;  %6872 = vmatpush1.bf16.msra.mxu1 %v9466_v32  ;;  %v9542_v31 = vld [vmem:[%s14658_s1 + $0x234] ss:$8 sps:$4 sm:$0xff]   ;;  %v9537_v32 = vld [vmem:[%s14658_s1 + $0x340] ss:$8 sps:$4 sm:$0xff]  }
  0x21   :  { %6873 = vmatprep.subr.bf16.mxu1 %v9470_v33  ;;  %v9545_v33 = vld [vmem:[%s14658_s1 + $0x334] ss:$8 sps:$4 sm:$0xff]  }
  0x23   :  { %6833 = vmatpush2.bf16.msra.mxu0 %v9469_v34  ;;  %v9540_v34 = vld [vmem:[%s14658_s1 + $0x230] ss:$8 sps:$4 sm:$0xff]  }
  0x24   :  { %6834 = vmatprep.subr.bf16.mxu0 %v9473_v38  ;;  %6874 = vmatpush2.bf16.msra.mxu1 %v9472_v39  ;;  %v9546_v38 = vld [vmem:[%s14658_s1 + $0x220] ss:$8 sps:$4 sm:$0xff]   ;;  %v9554_v39 = vld [vmem:[%s14658_s1 + $0x214] ss:$8 sps:$4 sm:$0xff]  }
  0x25   :  { %6875 = vmatprep.subr.bf16.mxu1 %v9476_v40  ;;  %v9549_v40 = vld [vmem:[%s14658_s1 + $0x320] ss:$8 sps:$4 sm:$0xff]  }
  0x27   :  { %6835 = vmatpush2.bf16.msra.mxu0 %v9475_v41  ;;  %v23_v41 = vld [vmem:[%s14657_s0 + $0x8] sm:$0xff] }
  0x28   :  { %6836 = vmatprep.subr.bf16.mxu0 %v9479_v44  ;;  %6876 = vmatpush2.bf16.msra.mxu1 %v9478_v45  ;;  %v11371_v44 = vrot.slane %v23_v41, %v11219_v48  ;;  %v73_v45 = vcombine.high %v23_v41, %v23_v41  ;;  %v9622_v41 = vld [vmem:[%s14658_s1 + $0x560] ss:$8 sps:$4 sm:$0xff]  }
  0x29   :  { %6877 = vmatprep.subr.bf16.mxu1 %v9482_v46  ;;  %v9552_v46 = vld [vmem:[%s14658_s1 + $0x210] ss:$8 sps:$4 sm:$0xff]  }
  0x2b   :  { %6837 = vmatpush2.bf16.msra.mxu0 %v9481_v47  ;;  %v9560_v47 = vld [vmem:[%s14658_s1 + $0x204] ss:$8 sps:$4 sm:$0xff]  }
  0x2c   :  { %6838 = vmatprep.subr.bf16.mxu0 %v9485_v49  ;;  %6878 = vmatpush2.bf16.msra.mxu1 %v9484_v50  ;;  %v88_v49 = vcombine.high %v11371_v44, %v11371_v44  ;;  %v11382_v50 = vrot.slane %v73_v45, %v11219_v48  ;;  %v9630_v45 = vld [vmem:[%s14658_s1 + $0x554] ss:$8 sps:$4 sm:$0xff]  }
  0x2d   :  { %6879 = vmatprep.subr.bf16.mxu1 %v9488_v51  ;;  %v9555_v51 = vld [vmem:[%s14658_s1 + $0x310] ss:$8 sps:$4 sm:$0xff]  }
  0x2e   :  { %v89_v54 = vcombine.high %v11382_v50, %v11382_v50 }
  0x2f   :  { %6839 = vmatpush2.bf16.msra.mxu0 %v9487_v53  ;;  %v407_v53 = vpack.c.bf16 %v88_v49, %v88_v49  ;;  %v9633_v49 = vld [vmem:[%s14658_s1 + $0x444] ss:$8 sps:$4 sm:$0xff]  }
  0x30   :  { %6840 = vmatprep.subr.bf16.mxu0 %v9491_v56  ;;  %6880 = vmatpush2.bf16.msra.mxu1 %v9490_v57  ;;  %v9566_v56 = vld [vmem:[%s14658_s1 + $0x2f4] ss:$8 sps:$4 sm:$0xff]   ;;  %v409_v57 = vpack.c.bf16 %v89_v54, %v89_v54  ;;  %v9634_v54 = vld [vmem:[%s14658_s1 + $0x540] ss:$8 sps:$4 sm:$0xff]  }
  0x31   :  { %6881 = vmatprep.subr.bf16.mxu1 %v9494_v60  ;;  %v9564_v60 = vld [vmem:[%s14658_s1 + $0x2f0] ss:$8 sps:$4 sm:$0xff]  }
  0x33   :  { %6841 = vmatpush2.bf16.msra.mxu0 %v9493_v61  ;;  %v9572_v61 = vld [vmem:[%s14658_s1 + $0x2e4] ss:$8 sps:$4 sm:$0xff]  }
  0x34   :  { %6842 = vmatprep.subr.bf16.mxu0 %v9497_v0  ;;  %6882 = vmatpush2.bf16.msra.mxu1 %v9496_v1  ;;  %v9570_v0 = vld [vmem:[%s14658_s1 + $0x2e0] ss:$8 sps:$4 sm:$0xff]   ;;  %v9578_v1 = vld [vmem:[%s14658_s1 + $0x2d4] ss:$8 sps:$4 sm:$0xff]  }
  0x35   :  { %6883 = vmatprep.subr.bf16.mxu1 %v9500_v3  ;;  %v9581_v3 = vld [vmem:[%s14658_s1 + $0x3d4] ss:$8 sps:$4 sm:$0xff]  }
  0x37   :  { %6843 = vmatpush2.bf16.msra.mxu0 %v9499_v4  ;;  %v9576_v4 = vld [vmem:[%s14658_s1 + $0x2d0] ss:$8 sps:$4 sm:$0xff]  }
  0x38   :  { %6844 = vmatprep.subr.bf16.mxu0 %v9503_v5  ;;  %6884 = vmatpush2.bf16.msra.mxu1 %v9502_v6  ;;  %v9584_v5 = vld [vmem:[%s14658_s1 + $0x2c4] ss:$8 sps:$4 sm:$0xff]   ;;  %v9579_v6 = vld [vmem:[%s14658_s1 + $0x3d0] ss:$8 sps:$4 sm:$0xff]  }
  0x39   :  { %6885 = vmatprep.subr.bf16.mxu1 %v9506_v7  ;;  %v9587_v7 = vld [vmem:[%s14658_s1 + $0x3c4] ss:$8 sps:$4 sm:$0xff]  }
  0x3b   :  { %6845 = vmatpush2.bf16.msra.mxu0 %v9505_v8  ;;  %v9582_v8 = vld [vmem:[%s14658_s1 + $0x2c0] ss:$8 sps:$4 sm:$0xff]  }
  0x3c   :  { %6846 = vmatprep.subr.bf16.mxu0 %v9509_v9  ;;  %6886 = vmatpush2.bf16.msra.mxu1 %v9508_v10  ;;  %v9590_v9 = vld [vmem:[%s14658_s1 + $0x2b4] ss:$8 sps:$4 sm:$0xff]   ;;  %v9585_v10 = vld [vmem:[%s14658_s1 + $0x3c0] ss:$8 sps:$4 sm:$0xff]  }
  0x3d   :  { %6887 = vmatprep.subr.bf16.mxu1 %v9512_v11  ;;  %v9593_v11 = vld [vmem:[%s14658_s1 + $0x3b4] ss:$8 sps:$4 sm:$0xff]  }
  0x3f   :  { %6847 = vmatpush2.bf16.msra.mxu0 %v9511_v12  ;;  %v9588_v12 = vld [vmem:[%s14658_s1 + $0x2b0] ss:$8 sps:$4 sm:$0xff]  }
  0x40   :  { %6898 = vmatprep.subr.bf16.mxu0 %v9517_v13  ;;  %6888 = vmatpush2.bf16.msra.mxu1 %v9514_v14  ;;  %v9596_v13 = vld [vmem:[%s14658_s1 + $0x2a4] ss:$8 sps:$4 sm:$0xff]   ;;  %v9591_v14 = vld [vmem:[%s14658_s1 + $0x3b0] ss:$8 sps:$4 sm:$0xff]  }
  0x41   :  { %6939 = vmatprep.subr.bf16.mxu1 %v9521_v16  ;;  %v9594_v16 = vld [vmem:[%s14658_s1 + $0x2a0] ss:$8 sps:$4 sm:$0xff]  }
  0x42   :  { %6849 = vmatmul.mubr.bf16.vlgmr.msra.gmra.mxu0 %v402_v15  ;;  %v9599_v15 = vld [vmem:[%s14658_s1 + $0x3a4] ss:$8 sps:$4 sm:$0xff]  }
  0x43   :  { %6899 = vmatpush1.bf16.msra.mxu0 %v9515_v17  ;;  %6890 = vmatmul.mubr.bf16.vlgmr.msra.gmra.mxu1 %v404_v18  ;;  %v9602_v17 = vld [vmem:[%s14658_s1 + $0x294] ss:$8 sps:$4 sm:$0xff]   ;;  %v9597_v18 = vld [vmem:[%s14658_s1 + $0x3a0] ss:$8 sps:$4 sm:$0xff]  }
  0x44   :  { %6900 = vmatprep.subr.bf16.mxu0 %v9524_v19  ;;  %6940 = vmatpush1.bf16.msra.mxu1 %v9519_v20  ;;  %v9605_v19 = vld [vmem:[%s14658_s1 + $0x394] ss:$8 sps:$4 sm:$0xff]   ;;  %v9600_v20 = vld [vmem:[%s14658_s1 + $0x290] ss:$8 sps:$4 sm:$0xff]  }
  0x45   :  { %6941 = vmatprep.subr.bf16.mxu1 %v9527_v21  ;;  %6930 = vmatprep.mubr.bf16.mxu0 %v407_v53  ;;  %v9608_v21 = vld [vmem:[%s14658_s1 + $0x284] ss:$8 sps:$4 sm:$0xff]   ;;  %v9639_v53 = vld [vmem:[%s14658_s1 + $0x434] ss:$8 sps:$4 sm:$0xff]  }
  0x46   :  { %6971 = vmatprep.mubr.bf16.mxu1 %v409_v57  ;;  %v9645_v57 = vld [vmem:[%s14658_s1 + $0x424] ss:$8 sps:$4 sm:$0xff]  }
  0x47   :  { %6901 = vmatpush1.bf16.msra.mxu0 %v9522_v22  ;;  %v9603_v22 = vld [vmem:[%s14658_s1 + $0x390] ss:$8 sps:$4 sm:$0xff]  }
  0x48   :  { %6902 = vmatprep.subr.bf16.mxu0 %v9530_v23  ;;  %6942 = vmatpush1.bf16.msra.mxu1 %v9525_v24  ;;  %v9611_v23 = vld [vmem:[%s14658_s1 + $0x384] ss:$8 sps:$4 sm:$0xff]   ;;  %v9606_v24 = vld [vmem:[%s14658_s1 + $0x280] ss:$8 sps:$4 sm:$0xff]  }
  0x49   :  { %6943 = vmatprep.subr.bf16.mxu1 %v9533_v25  ;;  %v9614_v25 = vld [vmem:[%s14658_s1 + $0x474] ss:$8 sps:$4 sm:$0xff]  }
  0x4b   :  { %6903 = vmatpush1.bf16.msra.mxu0 %v9528_v26  ;;  %v9609_v26 = vld [vmem:[%s14658_s1 + $0x380] ss:$8 sps:$4 sm:$0xff]  }
  0x4c   :  { %6904 = vmatprep.subr.bf16.mxu0 %v9536_v27  ;;  %6944 = vmatpush1.bf16.msra.mxu1 %v9531_v28  ;;  %v406_v27 = vpack.c.bf16 %v11371_v44, %v11371_v44  ;;  %v9618_v28 = vld [vmem:[%s14658_s1 + $0x574] ss:$8 sps:$4 sm:$0xff]  }
  0x4d   :  { %6945 = vmatprep.subr.bf16.mxu1 %v9539_v29  ;;  %v9612_v29 = vld [vmem:[%s14658_s1 + $0x470] ss:$8 sps:$4 sm:$0xff]  }
  0x4f   :  { %6905 = vmatpush1.bf16.msra.mxu0 %v9534_v30  ;;  %v408_v30 = vpack.c.bf16 %v11382_v50, %v11382_v50  ;;  %v9628_v50 = vld [vmem:[%s14658_s1 + $0x550] ss:$8 sps:$4 sm:$0xff]  }
  0x50   :  { %6906 = vmatprep.subr.bf16.mxu0 %v9542_v31  ;;  %6946 = vmatpush1.bf16.msra.mxu1 %v9537_v32  ;;  %v9621_v31 = vld [vmem:[%s14658_s1 + $0x464] ss:$8 sps:$4 sm:$0xff]   ;;  %v24_v32 = vld [vmem:[%s14657_s0 + $0x10] sm:$0xff] }
  0x51   :  { %6947 = vmatprep.subr.bf16.mxu1 %v9545_v33  ;;  %v9616_v33 = vld [vmem:[%s14658_s1 + $0x570] ss:$8 sps:$4 sm:$0xff]  }
  0x53   :  { %6907 = vmatpush1.bf16.msra.mxu0 %v9540_v34  ;;  %v11517_v34 = vrot.slane %v24_v32, %v11219_v48 }
  0x54   :  { %6908 = vmatprep.subr.bf16.mxu0 %v9548_v35  ;;  %6948 = vmatpush1.bf16.msra.mxu1 %v9543_v36  ;;  %v90_v35 = vcombine.high %v24_v32, %v24_v32  ;;  %v9624_v36 = vld [vmem:[%s14658_s1 + $0x564] ss:$8 sps:$4 sm:$0xff]  }
  0x55   :  { %6949 = vmatprep.subr.bf16.mxu1 %v9551_v37  ;;  %v9619_v37 = vld [vmem:[%s14658_s1 + $0x460] ss:$8 sps:$4 sm:$0xff]  }
  0x57   :  { %6909 = vmatpush1.bf16.msra.mxu0 %v9546_v38  ;;  %v105_v38 = vcombine.high %v11517_v34, %v11517_v34 }
  0x58   :  { %6910 = vmatprep.subr.bf16.mxu0 %v9554_v39  ;;  %6950 = vmatpush1.bf16.msra.mxu1 %v9549_v40  ;;  %v11528_v39 = vrot.slane %v90_v35, %v11219_v48  ;;  %v9627_v40 = vld [vmem:[%s14658_s1 + $0x454] ss:$8 sps:$4 sm:$0xff]   ;;  %v9697_v35 = vld [vmem:[%s14658_s1 + $0x490] ss:$8 sps:$4 sm:$0xff]  }
  0x59   :  { %6951 = vmatprep.subr.bf16.mxu1 %v9557_v42  ;;  %v411_v42 = vpack.c.bf16 %v105_v38, %v105_v38  ;;  %v9700_v38 = vld [vmem:[%s14658_s1 + $0x590] ss:$8 sps:$4 sm:$0xff]  }
  0x5a   :  { %v106_v44 = vcombine.high %v11528_v39, %v11528_v39 }
  0x5b   :  { %6911 = vmatpush1.bf16.msra.mxu0 %v9552_v46  ;;  %v9625_v46 = vld [vmem:[%s14658_s1 + $0x450] ss:$8 sps:$4 sm:$0xff]  }
  0x5c   :  { %6912 = vmatprep.subr.bf16.mxu0 %v9560_v47  ;;  %6952 = vmatpush1.bf16.msra.mxu1 %v9555_v51  ;;  %v413_v47 = vpack.c.bf16 %v106_v44, %v106_v44  ;;  %v9636_v51 = vld [vmem:[%s14658_s1 + $0x544] ss:$8 sps:$4 sm:$0xff]  }
  0x5d   :  { %6953 = vmatprep.subr.bf16.mxu1 %v9563_v52  ;;  %v9631_v52 = vld [vmem:[%s14658_s1 + $0x440] ss:$8 sps:$4 sm:$0xff]  }
  0x5f   :  { %6913 = vmatpush1.bf16.msra.mxu0 %v9558_v55  ;;  %v9642_v55 = vld [vmem:[%s14658_s1 + $0x534] ss:$8 sps:$4 sm:$0xff]  }
  0x60   :  { %6914 = vmatprep.subr.bf16.mxu0 %v9566_v56  ;;  %6954 = vmatpush1.bf16.msra.mxu1 %v9561_v58  ;;  %v9637_v56 = vld [vmem:[%s14658_s1 + $0x430] ss:$8 sps:$4 sm:$0xff]  }
  0x61   :  { %6955 = vmatprep.subr.bf16.mxu1 %v9569_v59  ;;  %v9640_v58 = vld [vmem:[%s14658_s1 + $0x530] ss:$8 sps:$4 sm:$0xff]   ;;  %v9648_v59 = vld [vmem:[%s14658_s1 + $0x524] ss:$8 sps:$4 sm:$0xff]  }
  0x63   :  { %6915 = vmatpush2.bf16.msra.mxu0 %v9564_v60  ;;  %v9643_v60 = vld [vmem:[%s14658_s1 + $0x420] ss:$8 sps:$4 sm:$0xff]  }
  0x64   :  { %6916 = vmatprep.subr.bf16.mxu0 %v9572_v61  ;;  %6956 = vmatpush2.bf16.msra.mxu1 %v9567_v62  ;;  %v9651_v61 = vld [vmem:[%s14658_s1 + $0x414] ss:$8 sps:$4 sm:$0xff]   ;;  %v9646_v62 = vld [vmem:[%s14658_s1 + $0x520] ss:$8 sps:$4 sm:$0xff]  }
  0x65   :  { %6957 = vmatprep.subr.bf16.mxu1 %v9575_v63  ;;  %v9654_v63 = vld [vmem:[%s14658_s1 + $0x514] ss:$8 sps:$4 sm:$0xff]  }
  0x67   :  { %6917 = vmatpush2.bf16.msra.mxu0 %v9570_v0  ;;  %v9649_v0 = vld [vmem:[%s14658_s1 + $0x410] ss:$8 sps:$4 sm:$0xff]  }
  0x68   :  { %6918 = vmatprep.subr.bf16.mxu0 %v9578_v1  ;;  %6958 = vmatpush2.bf16.msra.mxu1 %v9573_v2  ;;  %v9657_v1 = vld [vmem:[%s14658_s1 + $0x404] ss:$8 sps:$4 sm:$0xff]   ;;  %v9652_v2 = vld [vmem:[%s14658_s1 + $0x510] ss:$8 sps:$4 sm:$0xff]  }
  0x69   :  { %6959 = vmatprep.subr.bf16.mxu1 %v9581_v3  ;;  %v9660_v3 = vld [vmem:[%s14658_s1 + $0x504] ss:$8 sps:$4 sm:$0xff]  }
  0x6b   :  { %6919 = vmatpush2.bf16.msra.mxu0 %v9576_v4  ;;  %v9655_v4 = vld [vmem:[%s14658_s1 + $0x400] ss:$8 sps:$4 sm:$0xff]  }
  0x6c   :  { %6920 = vmatprep.subr.bf16.mxu0 %v9584_v5  ;;  %6960 = vmatpush2.bf16.msra.mxu1 %v9579_v6  ;;  %v9663_v5 = vld [vmem:[%s14658_s1 + $0x4f4] ss:$8 sps:$4 sm:$0xff]   ;;  %v9658_v6 = vld [vmem:[%s14658_s1 + $0x500] ss:$8 sps:$4 sm:$0xff]  }
  0x6d   :  { %6961 = vmatprep.subr.bf16.mxu1 %v9587_v7  ;;  %v9666_v7 = vld [vmem:[%s14658_s1 + $0x5f4] ss:$8 sps:$4 sm:$0xff]  }
  0x6f   :  { %6921 = vmatpush2.bf16.msra.mxu0 %v9582_v8  ;;  %v9661_v8 = vld [vmem:[%s14658_s1 + $0x4f0] ss:$8 sps:$4 sm:$0xff]  }
  0x70   :  { %6922 = vmatprep.subr.bf16.mxu0 %v9590_v9  ;;  %6962 = vmatpush2.bf16.msra.mxu1 %v9585_v10  ;;  %v9669_v9 = vld [vmem:[%s14658_s1 + $0x4e4] ss:$8 sps:$4 sm:$0xff]   ;;  %v9664_v10 = vld [vmem:[%s14658_s1 + $0x5f0] ss:$8 sps:$4 sm:$0xff]  }
  0x71   :  { %6963 = vmatprep.subr.bf16.mxu1 %v9593_v11  ;;  %v9672_v11 = vld [vmem:[%s14658_s1 + $0x5e4] ss:$8 sps:$4 sm:$0xff]  }
  0x73   :  { %6923 = vmatpush2.bf16.msra.mxu0 %v9588_v12  ;;  %v9667_v12 = vld [vmem:[%s14658_s1 + $0x4e0] ss:$8 sps:$4 sm:$0xff]  }
  0x74   :  { %6924 = vmatprep.subr.bf16.mxu0 %v9596_v13  ;;  %6964 = vmatpush2.bf16.msra.mxu1 %v9591_v14  ;;  %v9675_v13 = vld [vmem:[%s14658_s1 + $0x4d4] ss:$8 sps:$4 sm:$0xff]   ;;  %v9670_v14 = vld [vmem:[%s14658_s1 + $0x5e0] ss:$8 sps:$4 sm:$0xff]  }
  0x75   :  { %6965 = vmatprep.subr.bf16.mxu1 %v9599_v15  ;;  %v9678_v15 = vld [vmem:[%s14658_s1 + $0x5d4] ss:$8 sps:$4 sm:$0xff]  }
  0x77   :  { %6925 = vmatpush2.bf16.msra.mxu0 %v9594_v16  ;;  %v9673_v16 = vld [vmem:[%s14658_s1 + $0x4d0] ss:$8 sps:$4 sm:$0xff]  }
  0x78   :  { %6926 = vmatprep.subr.bf16.mxu0 %v9602_v17  ;;  %6966 = vmatpush2.bf16.msra.mxu1 %v9597_v18  ;;  %v9681_v17 = vld [vmem:[%s14658_s1 + $0x4c4] ss:$8 sps:$4 sm:$0xff]   ;;  %v9676_v18 = vld [vmem:[%s14658_s1 + $0x5d0] ss:$8 sps:$4 sm:$0xff]  }
  0x79   :  { %6967 = vmatprep.subr.bf16.mxu1 %v9605_v19  ;;  %v9684_v19 = vld [vmem:[%s14658_s1 + $0x5c4] ss:$8 sps:$4 sm:$0xff]  }
  0x7b   :  { %6927 = vmatpush2.bf16.msra.mxu0 %v9600_v20  ;;  %v9679_v20 = vld [vmem:[%s14658_s1 + $0x4c0] ss:$8 sps:$4 sm:$0xff]  }
  0x7c   :  { %6928 = vmatprep.subr.bf16.mxu0 %v9608_v21  ;;  %6968 = vmatpush2.bf16.msra.mxu1 %v9603_v22  ;;  %v9687_v21 = vld [vmem:[%s14658_s1 + $0x4b4] ss:$8 sps:$4 sm:$0xff]   ;;  %v9682_v22 = vld [vmem:[%s14658_s1 + $0x5c0] ss:$8 sps:$4 sm:$0xff]  }
  0x7d   :  { %6969 = vmatprep.subr.bf16.mxu1 %v9611_v23  ;;  %v9690_v23 = vld [vmem:[%s14658_s1 + $0x5b4] ss:$8 sps:$4 sm:$0xff]  }
  0x7f   :  { %6929 = vmatpush2.bf16.msra.mxu0 %v9606_v24  ;;  %v9685_v24 = vld [vmem:[%s14658_s1 + $0x4b0] ss:$8 sps:$4 sm:$0xff]  }
  0x80   :  { %6980 = vmatprep.subr.bf16.mxu0 %v9614_v25  ;;  %6970 = vmatpush2.bf16.msra.mxu1 %v9609_v26  ;;  %v9693_v25 = vld [vmem:[%s14658_s1 + $0x4a4] ss:$8 sps:$4 sm:$0xff]   ;;  %v9688_v26 = vld [vmem:[%s14658_s1 + $0x5b0] ss:$8 sps:$4 sm:$0xff]  }
  0x81   :  { %7021 = vmatprep.subr.bf16.mxu1 %v9618_v28  ;;  %v25_v28 = vld [vmem:[%s14657_s0 + $0x18] sm:$0xff] }
  0x82   :  { %6931 = vmatmul.mubr.bf16.vlgmr.msra.gmra.mxu0 %v406_v27  ;;  %v9696_v27 = vld [vmem:[%s14658_s1 + $0x5a4] ss:$8 sps:$4 sm:$0xff]   ;;  %v107_v32 = vcombine.high %v25_v28, %v25_v28 }
  0x83   :  { %6981 = vmatpush1.bf16.msra.mxu0 %v9612_v29  ;;  %6972 = vmatmul.mubr.bf16.vlgmr.msra.gmra.mxu1 %v408_v30  ;;  %v9691_v29 = vld [vmem:[%s14658_s1 + $0x4a0] ss:$8 sps:$4 sm:$0xff]   ;;  %v9699_v30 = vld [vmem:[%s14658_s1 + $0x494] ss:$8 sps:$4 sm:$0xff]  }
  0x84   :  { %6982 = vmatprep.subr.bf16.mxu0 %v9621_v31  ;;  %7022 = vmatpush1.bf16.msra.mxu1 %v9616_v33  ;;  %v9694_v31 = vld [vmem:[%s14658_s1 + $0x5a0] ss:$8 sps:$4 sm:$0xff]   ;;  %v9702_v33 = vld [vmem:[%s14658_s1 + $0x594] ss:$8 sps:$4 sm:$0xff]  }
  0x85   :  { %7023 = vmatprep.subr.bf16.mxu1 %v9624_v36  ;;  %7012 = vmatprep.mubr.bf16.mxu0 %v411_v42  ;;  %v11692_v36 = vrot.slane %v25_v28, %v11219_v48  ;;  %v9703_v42 = vld [vmem:[%s14658_s1 + $0x480] ss:$8 sps:$4 sm:$0xff]   ;;  %v9770_v28 = vld [vmem:[%s14658_s1 + $0x6d0] ss:$8 sps:$4 sm:$0xff]  }
  0x86   :  { %7053 = vmatprep.mubr.bf16.mxu1 %v413_v47 }
  0x87   :  { %6983 = vmatpush1.bf16.msra.mxu0 %v9619_v37  ;;  %v9705_v37 = vld [vmem:[%s14658_s1 + $0x484] ss:$8 sps:$4 sm:$0xff]   ;;  %v122_v44 = vcombine.high %v11692_v36, %v11692_v36 }
  0x88   :  { %6984 = vmatprep.subr.bf16.mxu0 %v9627_v40  ;;  %7024 = vmatpush1.bf16.msra.mxu1 %v9622_v41  ;;  %v11701_v40 = vrot.slane %v107_v32, %v11219_v48  ;;  %v9708_v41 = vld [vmem:[%s14658_s1 + $0x584] ss:$8 sps:$4 sm:$0xff]   ;;  %v9776_v32 = vld [vmem:[%s14658_s1 + $0x6c0] ss:$8 sps:$4 sm:$0xff]  }
  0x89   :  { %7025 = vmatprep.subr.bf16.mxu1 %v9630_v45  ;;  %v9711_v45 = vld [vmem:[%s14658_s1 + $0x674] ss:$8 sps:$4 sm:$0xff]  }
  0x8a   :  { %v123_v47 = vcombine.high %v11701_v40, %v11701_v40 }
  0x8b   :  { %6985 = vmatpush1.bf16.msra.mxu0 %v9625_v46  ;;  %v9706_v46 = vld [vmem:[%s14658_s1 + $0x580] ss:$8 sps:$4 sm:$0xff]  }
  0x8c   :  { %6986 = vmatprep.subr.bf16.mxu0 %v9633_v49  ;;  %7026 = vmatpush1.bf16.msra.mxu1 %v9628_v50  ;;  %v410_v49 = vpack.c.bf16 %v11517_v34, %v11517_v34  ;;  %v9715_v50 = vld [vmem:[%s14658_s1 + $0x774] ss:$8 sps:$4 sm:$0xff]   ;;  %v9713_v34 = vld [vmem:[%s14658_s1 + $0x770] ss:$8 sps:$4 sm:$0xff]  }
  0x8d   :  { %7027 = vmatprep.subr.bf16.mxu1 %v9636_v51  ;;  %v9709_v51 = vld [vmem:[%s14658_s1 + $0x670] ss:$8 sps:$4 sm:$0xff]  }
  0x8f   :  { %6987 = vmatpush1.bf16.msra.mxu0 %v9631_v52  ;;  %v415_v52 = vpack.c.bf16 %v122_v44, %v122_v44  ;;  %v9793_v44 = vld [vmem:[%s14658_s1 + $0x7a4] ss:$8 sps:$4 sm:$0xff]  }
  0x90   :  { %6988 = vmatprep.subr.bf16.mxu0 %v9639_v53  ;;  %7028 = vmatpush1.bf16.msra.mxu1 %v9634_v54  ;;  %v412_v53 = vpack.c.bf16 %v11528_v39, %v11528_v39  ;;  %v9718_v54 = vld [vmem:[%s14658_s1 + $0x664] ss:$8 sps:$4 sm:$0xff]   ;;  %v9716_v39 = vld [vmem:[%s14658_s1 + $0x660] ss:$8 sps:$4 sm:$0xff]  }
  0x91   :  { %7029 = vmatprep.subr.bf16.mxu1 %v9642_v55  ;;  %v417_v55 = vpack.c.bf16 %v123_v47, %v123_v47  ;;  %v9796_v47 = vld [vmem:[%s14658_s1 + $0x694] ss:$8 sps:$4 sm:$0xff]  }
  0x93   :  { %6989 = vmatpush1.bf16.msra.mxu0 %v9637_v56  ;;  %v9721_v56 = vld [vmem:[%s14658_s1 + $0x764] ss:$8 sps:$4 sm:$0xff]  }
  0x94   :  { %6990 = vmatprep.subr.bf16.mxu0 %v9645_v57  ;;  %7030 = vmatpush1.bf16.msra.mxu1 %v9640_v58  ;;  %v9724_v57 = vld [vmem:[%s14658_s1 + $0x654] ss:$8 sps:$4 sm:$0xff]   ;;  %v9719_v58 = vld [vmem:[%s14658_s1 + $0x760] ss:$8 sps:$4 sm:$0xff]  }
  0x95   :  { %7031 = vmatprep.subr.bf16.mxu1 %v9648_v59  ;;  %v9727_v59 = vld [vmem:[%s14658_s1 + $0x754] ss:$8 sps:$4 sm:$0xff]  }
  0x97   :  { %6991 = vmatpush1.bf16.msra.mxu0 %v9643_v60  ;;  %v9722_v60 = vld [vmem:[%s14658_s1 + $0x650] ss:$8 sps:$4 sm:$0xff]  }
  0x98   :  { %6992 = vmatprep.subr.bf16.mxu0 %v9651_v61  ;;  %7032 = vmatpush1.bf16.msra.mxu1 %v9646_v62  ;;  %v9730_v61 = vld [vmem:[%s14658_s1 + $0x644] ss:$8 sps:$4 sm:$0xff]   ;;  %v9725_v62 = vld [vmem:[%s14658_s1 + $0x750] ss:$8 sps:$4 sm:$0xff]  }
  0x99   :  { %7033 = vmatprep.subr.bf16.mxu1 %v9654_v63  ;;  %v9733_v63 = vld [vmem:[%s14658_s1 + $0x744] ss:$8 sps:$4 sm:$0xff]  }
  0x9b   :  { %6993 = vmatpush1.bf16.msra.mxu0 %v9649_v0  ;;  %v9728_v0 = vld [vmem:[%s14658_s1 + $0x640] ss:$8 sps:$4 sm:$0xff]  }
  0x9c   :  { %6994 = vmatprep.subr.bf16.mxu0 %v9657_v1  ;;  %7034 = vmatpush1.bf16.msra.mxu1 %v9652_v2  ;;  %v9736_v1 = vld [vmem:[%s14658_s1 + $0x634] ss:$8 sps:$4 sm:$0xff]   ;;  %v9731_v2 = vld [vmem:[%s14658_s1 + $0x740] ss:$8 sps:$4 sm:$0xff]  }
  0x9d   :  { %7035 = vmatprep.subr.bf16.mxu1 %v9660_v3  ;;  %v9739_v3 = vld [vmem:[%s14658_s1 + $0x734] ss:$8 sps:$4 sm:$0xff]  }
  0x9f   :  { %6995 = vmatpush1.bf16.msra.mxu0 %v9655_v4  ;;  %v9734_v4 = vld [vmem:[%s14658_s1 + $0x630] ss:$8 sps:$4 sm:$0xff]  }
  0xa0   :  { %6996 = vmatprep.subr.bf16.mxu0 %v9663_v5  ;;  %7036 = vmatpush1.bf16.msra.mxu1 %v9658_v6  ;;  %v9742_v5 = vld [vmem:[%s14658_s1 + $0x624] ss:$8 sps:$4 sm:$0xff]   ;;  %v9737_v6 = vld [vmem:[%s14658_s1 + $0x730] ss:$8 sps:$4 sm:$0xff]  }
  0xa1   :  { %7037 = vmatprep.subr.bf16.mxu1 %v9666_v7  ;;  %v9745_v7 = vld [vmem:[%s14658_s1 + $0x724] ss:$8 sps:$4 sm:$0xff]  }
  0xa3   :  { %6997 = vmatpush2.bf16.msra.mxu0 %v9661_v8  ;;  %v9740_v8 = vld [vmem:[%s14658_s1 + $0x620] ss:$8 sps:$4 sm:$0xff]  }
  0xa4   :  { %6998 = vmatprep.subr.bf16.mxu0 %v9669_v9  ;;  %7038 = vmatpush2.bf16.msra.mxu1 %v9664_v10  ;;  %v9748_v9 = vld [vmem:[%s14658_s1 + $0x614] ss:$8 sps:$4 sm:$0xff]   ;;  %v9743_v10 = vld [vmem:[%s14658_s1 + $0x720] ss:$8 sps:$4 sm:$0xff]  }
  0xa5   :  { %7039 = vmatprep.subr.bf16.mxu1 %v9672_v11  ;;  %v9751_v11 = vld [vmem:[%s14658_s1 + $0x714] ss:$8 sps:$4 sm:$0xff]  }
  0xa7   :  { %6999 = vmatpush2.bf16.msra.mxu0 %v9667_v12  ;;  %v9746_v12 = vld [vmem:[%s14658_s1 + $0x610] ss:$8 sps:$4 sm:$0xff]  }
  0xa8   :  { %7000 = vmatprep.subr.bf16.mxu0 %v9675_v13  ;;  %7040 = vmatpush2.bf16.msra.mxu1 %v9670_v14  ;;  %v9754_v13 = vld [vmem:[%s14658_s1 + $0x604] ss:$8 sps:$4 sm:$0xff]   ;;  %v9749_v14 = vld [vmem:[%s14658_s1 + $0x710] ss:$8 sps:$4 sm:$0xff]  }
  0xa9   :  { %7041 = vmatprep.subr.bf16.mxu1 %v9678_v15  ;;  %v9757_v15 = vld [vmem:[%s14658_s1 + $0x704] ss:$8 sps:$4 sm:$0xff]  }
  0xab   :  { %7001 = vmatpush2.bf16.msra.mxu0 %v9673_v16  ;;  %v9752_v16 = vld [vmem:[%s14658_s1 + $0x600] ss:$8 sps:$4 sm:$0xff]  }
  0xac   :  { %7002 = vmatprep.subr.bf16.mxu0 %v9681_v17  ;;  %7042 = vmatpush2.bf16.msra.mxu1 %v9676_v18  ;;  %v9760_v17 = vld [vmem:[%s14658_s1 + $0x6f4] ss:$8 sps:$4 sm:$0xff]   ;;  %v9755_v18 = vld [vmem:[%s14658_s1 + $0x700] ss:$8 sps:$4 sm:$0xff]  }
  0xad   :  { %7043 = vmatprep.subr.bf16.mxu1 %v9684_v19  ;;  %v9763_v19 = vld [vmem:[%s14658_s1 + $0x7f4] ss:$8 sps:$4 sm:$0xff]  }
  0xaf   :  { %7003 = vmatpush2.bf16.msra.mxu0 %v9679_v20  ;;  %v9758_v20 = vld [vmem:[%s14658_s1 + $0x6f0] ss:$8 sps:$4 sm:$0xff]  }
  0xb0   :  { %7004 = vmatprep.subr.bf16.mxu0 %v9687_v21  ;;  %7044 = vmatpush2.bf16.msra.mxu1 %v9682_v22  ;;  %v9766_v21 = vld [vmem:[%s14658_s1 + $0x6e4] ss:$8 sps:$4 sm:$0xff]   ;;  %v9761_v22 = vld [vmem:[%s14658_s1 + $0x7f0] ss:$8 sps:$4 sm:$0xff]  }
  0xb1   :  { %7045 = vmatprep.subr.bf16.mxu1 %v9690_v23  ;;  %v9769_v23 = vld [vmem:[%s14658_s1 + $0x7e4] ss:$8 sps:$4 sm:$0xff]  }
  0xb3   :  { %7005 = vmatpush2.bf16.msra.mxu0 %v9685_v24  ;;  %v9764_v24 = vld [vmem:[%s14658_s1 + $0x6e0] ss:$8 sps:$4 sm:$0xff]  }
  0xb4   :  { %7006 = vmatprep.subr.bf16.mxu0 %v9693_v25  ;;  %7046 = vmatpush2.bf16.msra.mxu1 %v9688_v26  ;;  %v9772_v25 = vld [vmem:[%s14658_s1 + $0x6d4] ss:$8 sps:$4 sm:$0xff]   ;;  %v9767_v26 = vld [vmem:[%s14658_s1 + $0x7e0] ss:$8 sps:$4 sm:$0xff]  }
  0xb5   :  { %7047 = vmatprep.subr.bf16.mxu1 %v9696_v27  ;;  %v9775_v27 = vld [vmem:[%s14658_s1 + $0x7d4] ss:$8 sps:$4 sm:$0xff]  }
  0xb7   :  { %7007 = vmatpush2.bf16.msra.mxu0 %v9691_v29  ;;  %v9778_v29 = vld [vmem:[%s14658_s1 + $0x6c4] ss:$8 sps:$4 sm:$0xff]  }
  0xb8   :  { %7008 = vmatprep.subr.bf16.mxu0 %v9699_v30  ;;  %7048 = vmatpush2.bf16.msra.mxu1 %v9694_v31  ;;  %v9773_v30 = vld [vmem:[%s14658_s1 + $0x7d0] ss:$8 sps:$4 sm:$0xff]   ;;  %v9781_v31 = vld [vmem:[%s14658_s1 + $0x7c4] ss:$8 sps:$4 sm:$0xff]  }
  0xb9   :  { %7049 = vmatprep.subr.bf16.mxu1 %v9702_v33  ;;  %v9784_v33 = vld [vmem:[%s14658_s1 + $0x6b4] ss:$8 sps:$4 sm:$0xff]  }
  0xbb   :  { %7009 = vmatpush2.bf16.msra.mxu0 %v9697_v35  ;;  %v9779_v35 = vld [vmem:[%s14658_s1 + $0x7c0] ss:$8 sps:$4 sm:$0xff]  }
  0xbc   :  { %7010 = vmatprep.subr.bf16.mxu0 %v9705_v37  ;;  %7050 = vmatpush2.bf16.msra.mxu1 %v9700_v38  ;;  %v9787_v37 = vld [vmem:[%s14658_s1 + $0x7b4] ss:$8 sps:$4 sm:$0xff]   ;;  %v9782_v38 = vld [vmem:[%s14658_s1 + $0x6b0] ss:$8 sps:$4 sm:$0xff]  }
  0xbd   :  { %7051 = vmatprep.subr.bf16.mxu1 %v9708_v41  ;;  %v9790_v41 = vld [vmem:[%s14658_s1 + $0x6a4] ss:$8 sps:$4 sm:$0xff]  }
  0xbf   :  { %7011 = vmatpush2.bf16.msra.mxu0 %v9703_v42  ;;  %v9785_v42 = vld [vmem:[%s14658_s1 + $0x7b0] ss:$8 sps:$4 sm:$0xff]  }
  0xc0   :  { %7062 = vmatprep.subr.bf16.mxu0 %v9711_v45  ;;  %7052 = vmatpush2.bf16.msra.mxu1 %v9706_v46  ;;  %v26_v45 = vld [vmem:[%s14657_s0 + $0x20] sm:$0xff] }
  0xc1   :  { %7103 = vmatprep.subr.bf16.mxu1 %v9715_v50  ;;  %v9788_v46 = vld [vmem:[%s14658_s1 + $0x6a0] ss:$8 sps:$4 sm:$0xff]   ;;  %v124_v50 = vcombine.high %v26_v45, %v26_v45 }
  0xc2   :  { %7013 = vmatmul.mubr.bf16.vlgmr.msra.gmra.mxu0 %v410_v49  ;;  %v9791_v49 = vld [vmem:[%s14658_s1 + $0x7a0] ss:$8 sps:$4 sm:$0xff]  }
  0xc3   :  { %7063 = vmatpush1.bf16.msra.mxu0 %v9709_v51  ;;  %7094 = vmatprep.mubr.bf16.mxu0 %v415_v52  ;;  %v9799_v51 = vld [vmem:[%s14658_s1 + $0x794] ss:$8 sps:$4 sm:$0xff]   ;;  %v9794_v52 = vld [vmem:[%s14658_s1 + $0x690] ss:$8 sps:$4 sm:$0xff]  }
  0xc4   :  { %7054 = vmatmul.mubr.bf16.vlgmr.msra.gmra.mxu1 %v412_v53  ;;  %7064 = vmatprep.subr.bf16.mxu0 %v9718_v54  ;;  %v11901_v53 = vrot.slane %v26_v45, %v11219_v48  ;;  %v9802_v54 = vld [vmem:[%s14658_s1 + $0x684] ss:$8 sps:$4 sm:$0xff]   ;;  %v9848_v45 = vld [vmem:[%s14658_s1 + $0x914] ss:$8 sps:$4 sm:$0xff]  }
  0xc5   :  { %7104 = vmatpush1.bf16.msra.mxu1 %v9713_v34  ;;  %7135 = vmatprep.mubr.bf16.mxu1 %v417_v55  ;;  %v9797_v34 = vld [vmem:[%s14658_s1 + $0x790] ss:$8 sps:$4 sm:$0xff]   ;;  %v11910_v55 = vrot.slane %v124_v50, %v11219_v48  ;;  %v9854_v50 = vld [vmem:[%s14658_s1 + $0x904] ss:$8 sps:$4 sm:$0xff]  }
  0xc6   :  { %7105 = vmatprep.subr.bf16.mxu1 %v9721_v56  ;;  %v9805_v56 = vld [vmem:[%s14658_s1 + $0x784] ss:$8 sps:$4 sm:$0xff]  }
  0xc7   :  { %7065 = vmatpush1.bf16.msra.mxu0 %v9716_v39  ;;  %v9800_v39 = vld [vmem:[%s14658_s1 + $0x680] ss:$8 sps:$4 sm:$0xff]  }
  0xc8   :  { %7066 = vmatprep.subr.bf16.mxu0 %v9724_v57  ;;  %v1528_v57 = vsub.s32 0, %v11204_v43 }
  0xc9   :  { %7106 = vmatpush1.bf16.msra.mxu1 %v9719_v58  ;;  %v139_v58 = vcombine.high %v11901_v53, %v11901_v53 }
  0xca   :  { %7107 = vmatprep.subr.bf16.mxu1 %v9727_v59  ;;  %v1524_v59 = vld [vmem:[%s14659_s2] sm:$0x3] }
  0xcb   :  { %7067 = vmatpush1.bf16.msra.mxu0 %v9722_v60  ;;  %v9808_v60 = vld [vmem:[%s14658_s1 + $0x874] ss:$8 sps:$4 sm:$0xff]  }
  0xcc   :  { %7068 = vmatprep.subr.bf16.mxu0 %v9730_v61  ;;  %v9803_v61 = vld [vmem:[%s14658_s1 + $0x780] ss:$8 sps:$4 sm:$0xff]  }
  0xcd   :  { %7108 = vmatpush1.bf16.msra.mxu1 %v9725_v62  ;;  %v1532_v62 = vsub.s32 1, %v11204_v43  ;;  %v416_v43 = vpack.c.bf16 %v11701_v40, %v11701_v40  ;;  %v9813_v40 = vld [vmem:[%s14658_s1 + $0x860] ss:$8 sps:$4 sm:$0xff]  }
  0xce   :  { %7109 = vmatprep.subr.bf16.mxu1 %v9733_v63  ;;  %v140_v63 = vcombine.high %v11910_v55, %v11910_v55 }
  0xcf   :  { %7069 = vmatpush1.bf16.msra.mxu0 %v9728_v0  ;;  %v414_v0 = vpack.c.bf16 %v11692_v36, %v11692_v36  ;;  %v1533_v36 = vrot.slane %v1524_v59, %v1532_v62  ;;  %v9872_v62 = vld [vmem:[%s14658_s1 + $0x9d4] ss:$8 sps:$4 sm:$0xff]  }
  0xd0   :  { %7070 = vmatprep.subr.bf16.mxu0 %v9736_v1  ;;  %v9812_v1 = vld [vmem:[%s14658_s1 + $0x974] ss:$8 sps:$4 sm:$0xff]  }
  0xd1   :  { %7110 = vmatpush1.bf16.msra.mxu1 %v9731_v2  ;;  %v1529_v2 = vrot.slane %v1524_v59, %v1528_v57  ;;  %v9861_v57 = vld [vmem:[%s14658_s1 + $0x8e0] ss:$8 sps:$4 sm:$0xff]  }
  0xd2   :  { %7111 = vmatprep.subr.bf16.mxu1 %v9739_v3  ;;  %v9806_v3 = vld [vmem:[%s14658_s1 + $0x870] ss:$8 sps:$4 sm:$0xff]   ;;  %v9864_v59 = vld [vmem:[%s14658_s1 + $0x9e0] ss:$8 sps:$4 sm:$0xff]  }
  0xd3   :  { %7071 = vmatpush1.bf16.msra.mxu0 %v9734_v4  ;;  %v419_v4 = vpack.c.bf16 %v139_v58, %v139_v58  ;;  %v9866_v58 = vld [vmem:[%s14658_s1 + $0x9e4] ss:$8 sps:$4 sm:$0xff]  }
  0xd4   :  { %7072 = vmatprep.subr.bf16.mxu0 %v9742_v5  ;;  %v9815_v5 = vld [vmem:[%s14658_s1 + $0x864] ss:$8 sps:$4 sm:$0xff]  }
  0xd5   :  { %7112 = vmatpush1.bf16.msra.mxu1 %v9737_v6  ;;  %v9810_v6 = vld [vmem:[%s14658_s1 + $0x970] ss:$8 sps:$4 sm:$0xff]  }
  0xd6   :  { %7113 = vmatprep.subr.bf16.mxu1 %v9745_v7  ;;  %v421_v7 = vpack.c.bf16 %v140_v63, %v140_v63  ;;  %v9870_v63 = vld [vmem:[%s14658_s1 + $0x9d0] ss:$8 sps:$4 sm:$0xff]  }
  0xd7   :  { %7073 = vmatpush1.bf16.msra.mxu0 %v9740_v8 }
  0xd8   :  { %7074 = vmatprep.subr.bf16.mxu0 %v9748_v9  ;;  %v9818_v9 = vld [vmem:[%s14658_s1 + $0x964] ss:$8 sps:$4 sm:$0xff]  }
  0xd9   :  { %7114 = vmatpush1.bf16.msra.mxu1 %v9743_v10 }
  0xda   :  { %7115 = vmatprep.subr.bf16.mxu1 %v9751_v11 }
  0xdb   :  { %7075 = vmatpush1.bf16.msra.mxu0 %v9746_v12 }
  0xdc   :  { %7076 = vmatprep.subr.bf16.mxu0 %v9754_v13  ;;  %v9821_v13 = vld [vmem:[%s14658_s1 + $0x854] ss:$8 sps:$4 sm:$0xff]  }
  0xdd   :  { %7116 = vmatpush1.bf16.msra.mxu1 %v9749_v14 }
  0xde   :  { %7117 = vmatprep.subr.bf16.mxu1 %v9757_v15 }
  0xdf   :  { %7077 = vmatpush1.bf16.msra.mxu0 %v9752_v16  ;;  %v9816_v16 = vld [vmem:[%s14658_s1 + $0x960] ss:$8 sps:$4 sm:$0xff]  }
  0xe0   :  { %7078 = vmatprep.subr.bf16.mxu0 %v9760_v17 }
  0xe1   :  { %7118 = vmatpush1.bf16.msra.mxu1 %v9755_v18 }
  0xe2   :  { %7119 = vmatprep.subr.bf16.mxu1 %v9763_v19  ;;  %v9824_v19 = vld [vmem:[%s14658_s1 + $0x954] ss:$8 sps:$4 sm:$0xff]  }
  0xe3   :  { %7079 = vmatpush2.bf16.msra.mxu0 %v9758_v20 }
  0xe4   :  { %7080 = vmatprep.subr.bf16.mxu0 %v9766_v21  ;;  %v9819_v21 = vld [vmem:[%s14658_s1 + $0x850] ss:$8 sps:$4 sm:$0xff]  }
  0xe5   :  { %7120 = vmatpush2.bf16.msra.mxu1 %v9761_v22  ;;  %v9822_v22 = vld [vmem:[%s14658_s1 + $0x950] ss:$8 sps:$4 sm:$0xff]  }
  0xe6   :  { %7121 = vmatprep.subr.bf16.mxu1 %v9769_v23 }
  0xe7   :  { %7081 = vmatpush2.bf16.msra.mxu0 %v9764_v24  ;;  %v9827_v24 = vld [vmem:[%s14658_s1 + $0x844] ss:$8 sps:$4 sm:$0xff]  }
  0xe8   :  { %7082 = vmatprep.subr.bf16.mxu0 %v9772_v25 }
  0xe9   :  { %7122 = vmatpush2.bf16.msra.mxu1 %v9767_v26  ;;  %v9825_v26 = vld [vmem:[%s14658_s1 + $0x840] ss:$8 sps:$4 sm:$0xff]  }
  0xea   :  { %7123 = vmatprep.subr.bf16.mxu1 %v9775_v27  ;;  %v9830_v27 = vld [vmem:[%s14658_s1 + $0x944] ss:$8 sps:$4 sm:$0xff]  }
  0xeb   :  { %7083 = vmatpush2.bf16.msra.mxu0 %v9770_v28 }
  0xec   :  { %7084 = vmatprep.subr.bf16.mxu0 %v9778_v29  ;;  %v9828_v29 = vld [vmem:[%s14658_s1 + $0x940] ss:$8 sps:$4 sm:$0xff]  }
  0xed   :  { %7124 = vmatpush2.bf16.msra.mxu1 %v9773_v30  ;;  %v9833_v30 = vld [vmem:[%s14658_s1 + $0x834] ss:$8 sps:$4 sm:$0xff]  }
  0xee   :  { %7125 = vmatprep.subr.bf16.mxu1 %v9781_v31  ;;  %v9831_v31 = vld [vmem:[%s14658_s1 + $0x830] ss:$8 sps:$4 sm:$0xff]  }
  0xef   :  { %7085 = vmatpush2.bf16.msra.mxu0 %v9776_v32  ;;  %v9836_v32 = vld [vmem:[%s14658_s1 + $0x934] ss:$8 sps:$4 sm:$0xff]  }
  0xf0   :  { %7086 = vmatprep.subr.bf16.mxu0 %v9784_v33  ;;  %v9834_v33 = vld [vmem:[%s14658_s1 + $0x930] ss:$8 sps:$4 sm:$0xff]  }
  0xf1   :  { %7126 = vmatpush2.bf16.msra.mxu1 %v9779_v35  ;;  %v9839_v35 = vld [vmem:[%s14658_s1 + $0x824] ss:$8 sps:$4 sm:$0xff]  }
  0xf2   :  { %7127 = vmatprep.subr.bf16.mxu1 %v9787_v37  ;;  %v9837_v37 = vld [vmem:[%s14658_s1 + $0x820] ss:$8 sps:$4 sm:$0xff]  }
  0xf3   :  { %7087 = vmatpush2.bf16.msra.mxu0 %v9782_v38  ;;  %v9842_v38 = vld [vmem:[%s14658_s1 + $0x924] ss:$8 sps:$4 sm:$0xff]  }
  0xf4   :  { %7088 = vmatprep.subr.bf16.mxu0 %v9790_v41  ;;  %v9840_v41 = vld [vmem:[%s14658_s1 + $0x920] ss:$8 sps:$4 sm:$0xff]  }
  0xf5   :  { %7128 = vmatpush2.bf16.msra.mxu1 %v9785_v42  ;;  %v9845_v42 = vld [vmem:[%s14658_s1 + $0x814] ss:$8 sps:$4 sm:$0xff]  }
  0xf6   :  { %7129 = vmatprep.subr.bf16.mxu1 %v9793_v44  ;;  %v9843_v44 = vld [vmem:[%s14658_s1 + $0x810] ss:$8 sps:$4 sm:$0xff]  }
  0xf7   :  { %7089 = vmatpush2.bf16.msra.mxu0 %v9788_v46  ;;  %v9846_v46 = vld [vmem:[%s14658_s1 + $0x910] ss:$8 sps:$4 sm:$0xff]  }
  0xf8   :  { %7090 = vmatprep.subr.bf16.mxu0 %v9796_v47  ;;  %v9851_v47 = vld [vmem:[%s14658_s1 + $0x804] ss:$8 sps:$4 sm:$0xff]  }
  0xf9   :  { %7130 = vmatpush2.bf16.msra.mxu1 %v9791_v49  ;;  %v9849_v49 = vld [vmem:[%s14658_s1 + $0x800] ss:$8 sps:$4 sm:$0xff]  }
  0xfa   :  { %7131 = vmatprep.subr.bf16.mxu1 %v9799_v51  ;;  %v9852_v51 = vld [vmem:[%s14658_s1 + $0x900] ss:$8 sps:$4 sm:$0xff]  }
  0xfb   :  { %7091 = vmatpush2.bf16.msra.mxu0 %v9794_v52  ;;  %v9857_v52 = vld [vmem:[%s14658_s1 + $0x8f4] ss:$8 sps:$4 sm:$0xff]  }
  0xfc   :  { %7092 = vmatprep.subr.bf16.mxu0 %v9802_v54  ;;  %v9855_v54 = vld [vmem:[%s14658_s1 + $0x8f0] ss:$8 sps:$4 sm:$0xff]  }
  0xfd   :  { %7132 = vmatpush2.bf16.msra.mxu1 %v9797_v34  ;;  %v9860_v34 = vld [vmem:[%s14658_s1 + $0x9f4] ss:$8 sps:$4 sm:$0xff]  }
  0xfe   :  { %7133 = vmatprep.subr.bf16.mxu1 %v9805_v56  ;;  %v9858_v56 = vld [vmem:[%s14658_s1 + $0x9f0] ss:$8 sps:$4 sm:$0xff]  }
  0xff   :  { %7093 = vmatpush2.bf16.msra.mxu0 %v9800_v39  ;;  %v9863_v39 = vld [vmem:[%s14658_s1 + $0x8e4] ss:$8 sps:$4 sm:$0xff]  }
 0x100   :  { %7144 = vmatprep.subr.bf16.mxu0 %v9808_v60  ;;  %v9869_v60 = vld [vmem:[%s14658_s1 + $0x8d4] ss:$8 sps:$4 sm:$0xff]  }
 0x101   :  { %7134 = vmatpush2.bf16.msra.mxu1 %v9803_v61  ;;  %v9867_v61 = vld [vmem:[%s14658_s1 + $0x8d0] ss:$8 sps:$4 sm:$0xff]  }
 0x102   :  { %v6850_v8 = vpop.f32.mrf.mxu0  ;;  %7095 = vmatmul.mubr.bf16.vlgmr.msra.gmra.mxu0 %v414_v0  ;;  %7185 = vmatprep.subr.bf16.mxu1 %v9812_v1  ;;  %v9875_v0 = vld [vmem:[%s14658_s1 + $0x8c4] ss:$8 sps:$4 sm:$0xff]   ;;  %v9873_v1 = vld [vmem:[%s14658_s1 + $0x8c0] ss:$8 sps:$4 sm:$0xff]  }
 0x103   :  { %v6851_v10 = vadd.f32 %v6850_v8, %v1529_v2  ;;  %7145 = vmatpush1.bf16.msra.mxu0 %v9806_v3  ;;  %7176 = vmatprep.mubr.bf16.mxu0 %v419_v4  ;;  %v6891_v12 = vpop.f32.mrf.mxu1  ;;  %v9878_v2 = vld [vmem:[%s14658_s1 + $0x9c4] ss:$8 sps:$4 sm:$0xff]   ;;  %v9876_v3 = vld [vmem:[%s14658_s1 + $0x9c0] ss:$8 sps:$4 sm:$0xff]   ;;  %v9881_v4 = vld [vmem:[%s14658_s1 + $0x8b4] ss:$8 sps:$4 sm:$0xff]  }
 0x104   :  { %v6852_v11 = vpop.f32.mrf.mxu0  ;;  %7136 = vmatmul.mubr.bf16.vlgmr.msra.gmra.mxu1 %v416_v43  ;;  %7146 = vmatprep.subr.bf16.mxu0 %v9815_v5  ;;  %v9879_v43 = vld [vmem:[%s14658_s1 + $0x8b0] ss:$8 sps:$4 sm:$0xff]   ;;  %v9884_v5 = vld [vmem:[%s14658_s1 + $0x9b4] ss:$8 sps:$4 sm:$0xff]   ;;  %v27_v8 = vld [vmem:[%s14657_s0 + $0x28] sm:$0xff] }
 0x105   :  { %v6853_v14 = vadd.f32 %v6852_v11, %v1533_v36  ;;  %v11958_v15 = vadd.f32 %v6891_v12, %v6851_v10  ;;  %7186 = vmatpush1.bf16.msra.mxu1 %v9810_v6  ;;  %7217 = vmatprep.mubr.bf16.mxu1 %v421_v7  ;;  %v6893_v18 = vpop.f32.mrf.mxu1  ;;  %v9882_v36 = vld [vmem:[%s14658_s1 + $0x9b0] ss:$8 sps:$4 sm:$0xff]   ;;  %v9887_v6 = vld [vmem:[%s14658_s1 + $0x8a4] ss:$8 sps:$4 sm:$0xff]   ;;  %v9893_v10 = vld [vmem:[%s14658_s1 + $0x894] ss:$8 sps:$4 sm:$0xff]   ;;  %v141_v11 = vcombine.high %v27_v8, %v27_v8 }
 0x106   :  { %v6854_v17 = vpop.f32.mrf.mxu0  ;;  %7187 = vmatprep.subr.bf16.mxu1 %v9818_v9  ;;  %v9890_v7 = vld [vmem:[%s14658_s1 + $0x9a4] ss:$8 sps:$4 sm:$0xff]   ;;  %v9885_v9 = vld [vmem:[%s14658_s1 + $0x8a0] ss:$8 sps:$4 sm:$0xff]   ;;  %v9896_v12 = vld [vmem:[%s14658_s1 + $0x994] ss:$8 sps:$4 sm:$0xff]  }
 0x107   :  { %v11966_v20 = vadd.f32 %v6893_v18, %v6853_v14  ;;  %7147 = vmatpush1.bf16.msra.mxu0 %v9813_v40  ;;  %v6895_v25 = vpop.f32.mrf.mxu1  ;;  %v9888_v40 = vld [vmem:[%s14658_s1 + $0x9a0] ss:$8 sps:$4 sm:$0xff]   ;;  %v12119_v14 = vrot.slane %v27_v8, %v11219_v48  ;;  %v9894_v17 = vld [vmem:[%s14658_s1 + $0x990] ss:$8 sps:$4 sm:$0xff]   ;;  %v12128_v18 = vrot.slane %v141_v11, %v11219_v48 }
 0x108   :  { %v6855_v23 = vpop.f32.mrf.mxu0  ;;  %7148 = vmatprep.subr.bf16.mxu0 %v9821_v13  ;;  %v9891_v13 = vld [vmem:[%s14658_s1 + $0x890] ss:$8 sps:$4 sm:$0xff]   ;;  %v9949_v8 = vld [vmem:[%s14658_s1 + $0xb00] ss:$8 sps:$4 sm:$0xff]  }
 0x109   :  { %7188 = vmatpush1.bf16.msra.mxu1 %v9816_v16  ;;  %v6896_v28 = vpop.f32.mrf.mxu1  ;;  %v9899_v16 = vld [vmem:[%s14658_s1 + $0x884] ss:$8 sps:$4 sm:$0xff]   ;;  %v156_v23 = vcombine.high %v12119_v14, %v12119_v14  ;;  %v9903_v25 = vld [vmem:[%s14658_s1 + $0xa70] ss:$8 sps:$4 sm:$0xff]  }
 0x10a   :  { %7189 = vmatprep.subr.bf16.mxu1 %v9824_v19  ;;  %v9897_v19 = vld [vmem:[%s14658_s1 + $0x880] ss:$8 sps:$4 sm:$0xff]   ;;  %v9909_v28 = vld [vmem:[%s14658_s1 + $0xb74] ss:$8 sps:$4 sm:$0xff]   ;;  %v9955_v11 = vld [vmem:[%s14658_s1 + $0xbf0] ss:$8 sps:$4 sm:$0xff]  }
 0x10b   :  { %7149 = vmatpush1.bf16.msra.mxu0 %v9819_v21  ;;  %v9902_v21 = vld [vmem:[%s14658_s1 + $0x984] ss:$8 sps:$4 sm:$0xff]  }
 0x10c   :  { %7150 = vmatprep.subr.bf16.mxu0 %v9827_v24  ;;  %v9905_v24 = vld [vmem:[%s14658_s1 + $0xa74] ss:$8 sps:$4 sm:$0xff]  }
 0x10d   :  { %7190 = vmatpush1.bf16.msra.mxu1 %v9822_v22  ;;  %v9900_v22 = vld [vmem:[%s14658_s1 + $0x980] ss:$8 sps:$4 sm:$0xff]  }
 0x10e   :  { %7191 = vmatprep.subr.bf16.mxu1 %v9830_v27  ;;  %v418_v27 = vpack.c.bf16 %v11901_v53, %v11901_v53  ;;  %v9910_v53 = vld [vmem:[%s14658_s1 + $0xa60] ss:$8 sps:$4 sm:$0xff]  }
 0x10f   :  { %7151 = vmatpush1.bf16.msra.mxu0 %v9825_v26  ;;  %v157_v26 = vcombine.high %v12128_v18, %v12128_v18 }
 0x110   :  { %7152 = vmatprep.subr.bf16.mxu0 %v9833_v30  ;;  %v423_v30 = vpack.c.bf16 %v156_v23, %v156_v23  ;;  %v9967_v23 = vld [vmem:[%s14658_s1 + $0xbd0] ss:$8 sps:$4 sm:$0xff]  }
 0x111   :  { %7192 = vmatpush1.bf16.msra.mxu1 %v9828_v29  ;;  %v9907_v29 = vld [vmem:[%s14658_s1 + $0xb70] ss:$8 sps:$4 sm:$0xff]  }
 0x112   :  { %7193 = vmatprep.subr.bf16.mxu1 %v9836_v32  ;;  %v9912_v32 = vld [vmem:[%s14658_s1 + $0xa64] ss:$8 sps:$4 sm:$0xff]  }
 0x113   :  { %7153 = vmatpush1.bf16.msra.mxu0 %v9831_v31  ;;  %v420_v31 = vpack.c.bf16 %v11910_v55, %v11910_v55  ;;  %v9913_v55 = vld [vmem:[%s14658_s1 + $0xb60] ss:$8 sps:$4 sm:$0xff]  }
 0x114   :  { %7154 = vmatprep.subr.bf16.mxu0 %v9839_v35 }
 0x115   :  { %7194 = vmatpush1.bf16.msra.mxu1 %v9834_v33  ;;  %v425_v33 = vpack.c.bf16 %v157_v26, %v157_v26  ;;  %v9975_v26 = vld [vmem:[%s14658_s1 + $0xbc4] ss:$8 sps:$4 sm:$0xff]  }
 0x116   :  { %7195 = vmatprep.subr.bf16.mxu1 %v9842_v38 }
 0x117   :  { %7155 = vmatpush1.bf16.msra.mxu0 %v9837_v37  ;;  %v9915_v37 = vld [vmem:[%s14658_s1 + $0xb64] ss:$8 sps:$4 sm:$0xff]  }
 0x118   :  { %7156 = vmatprep.subr.bf16.mxu0 %v9845_v42 }
 0x119   :  { %7196 = vmatpush1.bf16.msra.mxu1 %v9840_v41 }
 0x11a   :  { %7197 = vmatprep.subr.bf16.mxu1 %v9848_v45 }
 0x11b   :  { %7157 = vmatpush1.bf16.msra.mxu0 %v9843_v44  ;;  %v9918_v44 = vld [vmem:[%s14658_s1 + $0xa54] ss:$8 sps:$4 sm:$0xff]  }
 0x11c   :  { %7158 = vmatprep.subr.bf16.mxu0 %v9851_v47 }
 0x11d   :  { %7198 = vmatpush1.bf16.msra.mxu1 %v9846_v46 }
 0x11e   :  { %7199 = vmatprep.subr.bf16.mxu1 %v9854_v50  ;;  %v9921_v50 = vld [vmem:[%s14658_s1 + $0xb54] ss:$8 sps:$4 sm:$0xff]  }
 0x11f   :  { %7159 = vmatpush1.bf16.msra.mxu0 %v9849_v49 }
 0x120   :  { %7160 = vmatprep.subr.bf16.mxu0 %v9857_v52 }
 0x121   :  { %7200 = vmatpush1.bf16.msra.mxu1 %v9852_v51 }
 0x122   :  { %7201 = vmatprep.subr.bf16.mxu1 %v9860_v34 }
 0x123   :  { %7161 = vmatpush2.bf16.msra.mxu0 %v9855_v54  ;;  %v9924_v54 = vld [vmem:[%s14658_s1 + $0xa44] ss:$8 sps:$4 sm:$0xff]  }
 0x124   :  { %7162 = vmatprep.subr.bf16.mxu0 %v9863_v39  ;;  %v9927_v39 = vld [vmem:[%s14658_s1 + $0xb44] ss:$8 sps:$4 sm:$0xff]  }
 0x125   :  { %7202 = vmatpush2.bf16.msra.mxu1 %v9858_v56  ;;  %v9922_v56 = vld [vmem:[%s14658_s1 + $0xa40] ss:$8 sps:$4 sm:$0xff]  }
 0x126   :  { %7203 = vmatprep.subr.bf16.mxu1 %v9866_v58  ;;  %v9925_v58 = vld [vmem:[%s14658_s1 + $0xb40] ss:$8 sps:$4 sm:$0xff]  }
 0x127   :  { %7163 = vmatpush2.bf16.msra.mxu0 %v9861_v57 }
 0x128   :  { %7164 = vmatprep.subr.bf16.mxu0 %v9869_v60  ;;  %v9928_v60 = vld [vmem:[%s14658_s1 + $0xa30] ss:$8 sps:$4 sm:$0xff]  }
 0x129   :  { %7204 = vmatpush2.bf16.msra.mxu1 %v9864_v59  ;;  %v9930_v59 = vld [vmem:[%s14658_s1 + $0xa34] ss:$8 sps:$4 sm:$0xff]  }
 0x12a   :  { %7205 = vmatprep.subr.bf16.mxu1 %v9872_v62  ;;  %v9931_v62 = vld [vmem:[%s14658_s1 + $0xb30] ss:$8 sps:$4 sm:$0xff]  }
 0x12b   :  { %7165 = vmatpush2.bf16.msra.mxu0 %v9867_v61  ;;  %v9933_v61 = vld [vmem:[%s14658_s1 + $0xb34] ss:$8 sps:$4 sm:$0xff]  }
 0x12c   :  { %7166 = vmatprep.subr.bf16.mxu0 %v9875_v0  ;;  %v9934_v0 = vld [vmem:[%s14658_s1 + $0xa20] ss:$8 sps:$4 sm:$0xff]  }
 0x12d   :  { %7206 = vmatpush2.bf16.msra.mxu1 %v9870_v63  ;;  %v9936_v63 = vld [vmem:[%s14658_s1 + $0xa24] ss:$8 sps:$4 sm:$0xff]  }
 0x12e   :  { %7207 = vmatprep.subr.bf16.mxu1 %v9878_v2  ;;  %v9937_v2 = vld [vmem:[%s14658_s1 + $0xb20] ss:$8 sps:$4 sm:$0xff]  }
 0x12f   :  { %7167 = vmatpush2.bf16.msra.mxu0 %v9873_v1  ;;  %v9939_v1 = vld [vmem:[%s14658_s1 + $0xb24] ss:$8 sps:$4 sm:$0xff]  }
 0x130   :  { %7168 = vmatprep.subr.bf16.mxu0 %v9881_v4  ;;  %v9940_v4 = vld [vmem:[%s14658_s1 + $0xa10] ss:$8 sps:$4 sm:$0xff]  }
 0x131   :  { %7208 = vmatpush2.bf16.msra.mxu1 %v9876_v3  ;;  %v9942_v3 = vld [vmem:[%s14658_s1 + $0xa14] ss:$8 sps:$4 sm:$0xff]  }
 0x132   :  { %7209 = vmatprep.subr.bf16.mxu1 %v9884_v5  ;;  %v9943_v5 = vld [vmem:[%s14658_s1 + $0xb10] ss:$8 sps:$4 sm:$0xff]  }
 0x133   :  { %7169 = vmatpush2.bf16.msra.mxu0 %v9879_v43  ;;  %v9945_v43 = vld [vmem:[%s14658_s1 + $0xb14] ss:$8 sps:$4 sm:$0xff]  }
 0x134   :  { %7170 = vmatprep.subr.bf16.mxu0 %v9887_v6  ;;  %v9946_v6 = vld [vmem:[%s14658_s1 + $0xa00] ss:$8 sps:$4 sm:$0xff]  }
 0x135   :  { %7210 = vmatpush2.bf16.msra.mxu1 %v9882_v36  ;;  %v9948_v36 = vld [vmem:[%s14658_s1 + $0xa04] ss:$8 sps:$4 sm:$0xff]  }
 0x136   :  { %7211 = vmatprep.subr.bf16.mxu1 %v9890_v7  ;;  %v9951_v7 = vld [vmem:[%s14658_s1 + $0xb04] ss:$8 sps:$4 sm:$0xff]  }
 0x137   :  { %7171 = vmatpush2.bf16.msra.mxu0 %v9885_v9  ;;  %v9954_v9 = vld [vmem:[%s14658_s1 + $0xaf4] ss:$8 sps:$4 sm:$0xff]  }
 0x138   :  { %7172 = vmatprep.subr.bf16.mxu0 %v9893_v10  ;;  %v9952_v10 = vld [vmem:[%s14658_s1 + $0xaf0] ss:$8 sps:$4 sm:$0xff]  }
 0x139   :  { %7212 = vmatpush2.bf16.msra.mxu1 %v9888_v40  ;;  %v9957_v40 = vld [vmem:[%s14658_s1 + $0xbf4] ss:$8 sps:$4 sm:$0xff]  }
 0x13a   :  { %7213 = vmatprep.subr.bf16.mxu1 %v9896_v12  ;;  %v9960_v12 = vld [vmem:[%s14658_s1 + $0xae4] ss:$8 sps:$4 sm:$0xff]  }
 0x13b   :  { %7173 = vmatpush2.bf16.msra.mxu0 %v9891_v13  ;;  %v9958_v13 = vld [vmem:[%s14658_s1 + $0xae0] ss:$8 sps:$4 sm:$0xff]  }
 0x13c   :  { %7174 = vmatprep.subr.bf16.mxu0 %v9899_v16  ;;  %v9963_v16 = vld [vmem:[%s14658_s1 + $0xbe4] ss:$8 sps:$4 sm:$0xff]  }
 0x13d   :  { %7214 = vmatpush2.bf16.msra.mxu1 %v9894_v17  ;;  %v9961_v17 = vld [vmem:[%s14658_s1 + $0xbe0] ss:$8 sps:$4 sm:$0xff]  }
 0x13e   :  { %7215 = vmatprep.subr.bf16.mxu1 %v9902_v21  ;;  %v9964_v21 = vld [vmem:[%s14658_s1 + $0xad0] ss:$8 sps:$4 sm:$0xff]  }
 0x13f   :  { %7175 = vmatpush2.bf16.msra.mxu0 %v9897_v19  ;;  %v9966_v19 = vld [vmem:[%s14658_s1 + $0xad4] ss:$8 sps:$4 sm:$0xff]  }
 0x140   :  { %7226 = vmatprep.subr.bf16.mxu0 %v9905_v24  ;;  %v9972_v24 = vld [vmem:[%s14658_s1 + $0xac4] ss:$8 sps:$4 sm:$0xff]  }
 0x141   :  { %7216 = vmatpush2.bf16.msra.mxu1 %v9900_v22  ;;  %v9969_v22 = vld [vmem:[%s14658_s1 + $0xbd4] ss:$8 sps:$4 sm:$0xff]  }
 0x142   :  { %v6932_v35 = vpop.f32.mrf.mxu0  ;;  %7177 = vmatmul.mubr.bf16.vlgmr.msra.gmra.mxu0 %v418_v27  ;;  %7267 = vmatprep.subr.bf16.mxu1 %v9909_v28  ;;  %v9973_v27 = vld [vmem:[%s14658_s1 + $0xbc0] ss:$8 sps:$4 sm:$0xff]   ;;  %v9978_v28 = vld [vmem:[%s14658_s1 + $0xab4] ss:$8 sps:$4 sm:$0xff]  }
 0x143   :  { %v6933_v38 = vadd.f32 %v6932_v35, %v11958_v15  ;;  %7227 = vmatpush1.bf16.msra.mxu0 %v9903_v25  ;;  %7258 = vmatprep.mubr.bf16.mxu0 %v423_v30  ;;  %v6973_v42 = vpop.f32.mrf.mxu1  ;;  %v9916_v15 = vld [vmem:[%s14658_s1 + $0xa50] ss:$8 sps:$4 sm:$0xff]   ;;  %v9970_v25 = vld [vmem:[%s14658_s1 + $0xac0] ss:$8 sps:$4 sm:$0xff]   ;;  %v9981_v30 = vld [vmem:[%s14658_s1 + $0xbb4] ss:$8 sps:$4 sm:$0xff]  }
 0x144   :  { %v6934_v41 = vpop.f32.mrf.mxu0  ;;  %7218 = vmatmul.mubr.bf16.vlgmr.msra.gmra.mxu1 %v420_v31  ;;  %7228 = vmatprep.subr.bf16.mxu0 %v9912_v32  ;;  %v9979_v31 = vld [vmem:[%s14658_s1 + $0xbb0] ss:$8 sps:$4 sm:$0xff]   ;;  %v9984_v32 = vld [vmem:[%s14658_s1 + $0xaa4] ss:$8 sps:$4 sm:$0xff]   ;;  %v9982_v35 = vld [vmem:[%s14658_s1 + $0xaa0] ss:$8 sps:$4 sm:$0xff]  }
 0x145   :  { %v6935_v45 = vadd.f32 %v6934_v41, %v11966_v20  ;;  %v12176_v46 = vadd.f32 %v6973_v42, %v6933_v38  ;;  %7268 = vmatpush1.bf16.msra.mxu1 %v9907_v29  ;;  %7299 = vmatprep.mubr.bf16.mxu1 %v425_v33  ;;  %v6975_v49 = vpop.f32.mrf.mxu1  ;;  %v9919_v20 = vld [vmem:[%s14658_s1 + $0xb50] ss:$8 sps:$4 sm:$0xff]   ;;  %v9985_v38 = vld [vmem:[%s14658_s1 + $0xba0] ss:$8 sps:$4 sm:$0xff]   ;;  %v9993_v41 = vld [vmem:[%s14658_s1 + $0xb94] ss:$8 sps:$4 sm:$0xff]  }
 0x146   :  { %v6936_v47 = vpop.f32.mrf.mxu0  ;;  %7269 = vmatprep.subr.bf16.mxu1 %v9915_v37  ;;  %v9976_v29 = vld [vmem:[%s14658_s1 + $0xab0] ss:$8 sps:$4 sm:$0xff]   ;;  %v9990_v37 = vld [vmem:[%s14658_s1 + $0xa94] ss:$8 sps:$4 sm:$0xff]  }
 0x147   :  { %v12184_v51 = vadd.f32 %v6975_v49, %v6935_v45  ;;  %7229 = vmatpush1.bf16.msra.mxu0 %v9910_v53  ;;  %v6977_v34 = vpop.f32.mrf.mxu1  ;;  %v9987_v53 = vld [vmem:[%s14658_s1 + $0xba4] ss:$8 sps:$4 sm:$0xff]   ;;  %v28_v33 = vld [vmem:[%s14657_s0 + $0x30] sm:$0xff]  ;;  %v9994_v49 = vld [vmem:[%s14658_s1 + $0xa80] ss:$8 sps:$4 sm:$0xff]  }
 0x148   :  { %v6937_v52 = vpop.f32.mrf.mxu0  ;;  %7230 = vmatprep.subr.bf16.mxu0 %v9918_v44  ;;  %v9988_v42 = vld [vmem:[%s14658_s1 + $0xa90] ss:$8 sps:$4 sm:$0xff]   ;;  %v12334_v44 = vrot.slane %v28_v33, %v11219_v48  ;;  %v9996_v45 = vld [vmem:[%s14658_s1 + $0xa84] ss:$8 sps:$4 sm:$0xff]  }
 0x149   :  { %7270 = vmatpush1.bf16.msra.mxu1 %v9913_v55  ;;  %v6978_v57 = vpop.f32.mrf.mxu1  ;;  %v158_v55 = vcombine.high %v28_v33, %v28_v33  ;;  %v10000_v34 = vld [vmem:[%s14658_s1 + $0xc70] ss:$8 sps:$4 sm:$0xff]   ;;  %v10046_v33 = vld [vmem:[%s14658_s1 + $0xd00] ss:$8 sps:$4 sm:$0xff]  }
 0x14a   :  { %7271 = vmatprep.subr.bf16.mxu1 %v9921_v50  ;;  %v9999_v50 = vld [vmem:[%s14658_s1 + $0xb84] ss:$8 sps:$4 sm:$0xff]   ;;  %v173_v52 = vcombine.high %v12334_v44, %v12334_v44  ;;  %v10006_v57 = vld [vmem:[%s14658_s1 + $0xd74] ss:$8 sps:$4 sm:$0xff]  }
 0x14b   :  { %7231 = vmatpush1.bf16.msra.mxu0 %v9916_v15  ;;  %v9991_v15 = vld [vmem:[%s14658_s1 + $0xb90] ss:$8 sps:$4 sm:$0xff]   ;;  %v12343_v47 = vrot.slane %v158_v55, %v11219_v48 }
 0x14c   :  { %7232 = vmatprep.subr.bf16.mxu0 %v9924_v54  ;;  %v10002_v54 = vld [vmem:[%s14658_s1 + $0xc74] ss:$8 sps:$4 sm:$0xff]   ;;  %v10052_v55 = vld [vmem:[%s14658_s1 + $0xdf0] ss:$8 sps:$4 sm:$0xff]  }
 0x14d   :  { %7272 = vmatpush1.bf16.msra.mxu1 %v9919_v20  ;;  %v9997_v20 = vld [vmem:[%s14658_s1 + $0xb80] ss:$8 sps:$4 sm:$0xff]  }
 0x14e   :  { %7273 = vmatprep.subr.bf16.mxu1 %v9927_v39  ;;  %v422_v39 = vpack.c.bf16 %v12119_v14, %v12119_v14  ;;  %v10007_v14 = vld [vmem:[%s14658_s1 + $0xc60] ss:$8 sps:$4 sm:$0xff]  }
 0x14f   :  { %7233 = vmatpush1.bf16.msra.mxu0 %v9922_v56  ;;  %v174_v56 = vcombine.high %v12343_v47, %v12343_v47 }
 0x150   :  { %7234 = vmatprep.subr.bf16.mxu0 %v9930_v59  ;;  %v427_v59 = vpack.c.bf16 %v173_v52, %v173_v52  ;;  %v10064_v52 = vld [vmem:[%s14658_s1 + $0xdd0] ss:$8 sps:$4 sm:$0xff]  }
 0x151   :  { %7274 = vmatpush1.bf16.msra.mxu1 %v9925_v58  ;;  %v10004_v58 = vld [vmem:[%s14658_s1 + $0xd70] ss:$8 sps:$4 sm:$0xff]  }
 0x152   :  { %7275 = vmatprep.subr.bf16.mxu1 %v9933_v61  ;;  %v10009_v61 = vld [vmem:[%s14658_s1 + $0xc64] ss:$8 sps:$4 sm:$0xff]  }
 0x153   :  { %7235 = vmatpush1.bf16.msra.mxu0 %v9928_v60  ;;  %v424_v60 = vpack.c.bf16 %v12128_v18, %v12128_v18  ;;  %v10010_v18 = vld [vmem:[%s14658_s1 + $0xd60] ss:$8 sps:$4 sm:$0xff]  }
 0x154   :  { %7236 = vmatprep.subr.bf16.mxu0 %v9936_v63 }
 0x155   :  { %7276 = vmatpush1.bf16.msra.mxu1 %v9931_v62  ;;  %v429_v62 = vpack.c.bf16 %v174_v56, %v174_v56  ;;  %v10072_v56 = vld [vmem:[%s14658_s1 + $0xdc4] ss:$8 sps:$4 sm:$0xff]  }
 0x156   :  { %7277 = vmatprep.subr.bf16.mxu1 %v9939_v1 }
 0x157   :  { %7237 = vmatpush1.bf16.msra.mxu0 %v9934_v0  ;;  %v10012_v0 = vld [vmem:[%s14658_s1 + $0xd64] ss:$8 sps:$4 sm:$0xff]  }
 0x158   :  { %7238 = vmatprep.subr.bf16.mxu0 %v9942_v3 }
 0x159   :  { %7278 = vmatpush1.bf16.msra.mxu1 %v9937_v2 }
 0x15a   :  { %7279 = vmatprep.subr.bf16.mxu1 %v9945_v43 }
 0x15b   :  { %7239 = vmatpush1.bf16.msra.mxu0 %v9940_v4  ;;  %v10015_v4 = vld [vmem:[%s14658_s1 + $0xc54] ss:$8 sps:$4 sm:$0xff]  }
 0x15c   :  { %7240 = vmatprep.subr.bf16.mxu0 %v9948_v36 }
 0x15d   :  { %7280 = vmatpush1.bf16.msra.mxu1 %v9943_v5 }
 0x15e   :  { %7281 = vmatprep.subr.bf16.mxu1 %v9951_v7  ;;  %v10018_v7 = vld [vmem:[%s14658_s1 + $0xd54] ss:$8 sps:$4 sm:$0xff]  }
 0x15f   :  { %7241 = vmatpush1.bf16.msra.mxu0 %v9946_v6 }
 0x160   :  { %7242 = vmatprep.subr.bf16.mxu0 %v9954_v9 }
 0x161   :  { %7282 = vmatpush1.bf16.msra.mxu1 %v9949_v8 }
 0x162   :  { %7283 = vmatprep.subr.bf16.mxu1 %v9957_v40 }
 0x163   :  { %7243 = vmatpush2.bf16.msra.mxu0 %v9952_v10  ;;  %v10021_v10 = vld [vmem:[%s14658_s1 + $0xc44] ss:$8 sps:$4 sm:$0xff]  }
 0x164   :  { %7244 = vmatprep.subr.bf16.mxu0 %v9960_v12  ;;  %v10024_v12 = vld [vmem:[%s14658_s1 + $0xd44] ss:$8 sps:$4 sm:$0xff]  }
 0x165   :  { %7284 = vmatpush2.bf16.msra.mxu1 %v9955_v11  ;;  %v10019_v11 = vld [vmem:[%s14658_s1 + $0xc40] ss:$8 sps:$4 sm:$0xff]  }
 0x166   :  { %7285 = vmatprep.subr.bf16.mxu1 %v9963_v16  ;;  %v10022_v16 = vld [vmem:[%s14658_s1 + $0xd40] ss:$8 sps:$4 sm:$0xff]  }
 0x167   :  { %7245 = vmatpush2.bf16.msra.mxu0 %v9958_v13 }
 0x168   :  { %7246 = vmatprep.subr.bf16.mxu0 %v9966_v19  ;;  %v10025_v19 = vld [vmem:[%s14658_s1 + $0xc30] ss:$8 sps:$4 sm:$0xff]  }
 0x169   :  { %7286 = vmatpush2.bf16.msra.mxu1 %v9961_v17  ;;  %v10027_v17 = vld [vmem:[%s14658_s1 + $0xc34] ss:$8 sps:$4 sm:$0xff]  }
 0x16a   :  { %7287 = vmatprep.subr.bf16.mxu1 %v9969_v22  ;;  %v10028_v22 = vld [vmem:[%s14658_s1 + $0xd30] ss:$8 sps:$4 sm:$0xff]  }
 0x16b   :  { %7247 = vmatpush2.bf16.msra.mxu0 %v9964_v21  ;;  %v10030_v21 = vld [vmem:[%s14658_s1 + $0xd34] ss:$8 sps:$4 sm:$0xff]  }
 0x16c   :  { %7248 = vmatprep.subr.bf16.mxu0 %v9972_v24  ;;  %v10031_v24 = vld [vmem:[%s14658_s1 + $0xc20] ss:$8 sps:$4 sm:$0xff]  }
 0x16d   :  { %7288 = vmatpush2.bf16.msra.mxu1 %v9967_v23  ;;  %v10033_v23 = vld [vmem:[%s14658_s1 + $0xc24] ss:$8 sps:$4 sm:$0xff]  }
 0x16e   :  { %7289 = vmatprep.subr.bf16.mxu1 %v9975_v26  ;;  %v10034_v26 = vld [vmem:[%s14658_s1 + $0xd20] ss:$8 sps:$4 sm:$0xff]  }
 0x16f   :  { %7249 = vmatpush2.bf16.msra.mxu0 %v9970_v25  ;;  %v10036_v25 = vld [vmem:[%s14658_s1 + $0xd24] ss:$8 sps:$4 sm:$0xff]  }
 0x170   :  { %7250 = vmatprep.subr.bf16.mxu0 %v9978_v28  ;;  %v10037_v28 = vld [vmem:[%s14658_s1 + $0xc10] ss:$8 sps:$4 sm:$0xff]  }
 0x171   :  { %7290 = vmatpush2.bf16.msra.mxu1 %v9973_v27  ;;  %v10039_v27 = vld [vmem:[%s14658_s1 + $0xc14] ss:$8 sps:$4 sm:$0xff]  }
 0x172   :  { %7291 = vmatprep.subr.bf16.mxu1 %v9981_v30  ;;  %v10040_v30 = vld [vmem:[%s14658_s1 + $0xd10] ss:$8 sps:$4 sm:$0xff]  }
 0x173   :  { %7251 = vmatpush2.bf16.msra.mxu0 %v9976_v29  ;;  %v10042_v29 = vld [vmem:[%s14658_s1 + $0xd14] ss:$8 sps:$4 sm:$0xff]  }
 0x174   :  { %7252 = vmatprep.subr.bf16.mxu0 %v9984_v32  ;;  %v10043_v32 = vld [vmem:[%s14658_s1 + $0xc00] ss:$8 sps:$4 sm:$0xff]  }
 0x175   :  { %7292 = vmatpush2.bf16.msra.mxu1 %v9979_v31  ;;  %v10045_v31 = vld [vmem:[%s14658_s1 + $0xc04] ss:$8 sps:$4 sm:$0xff]  }
 0x176   :  { %7293 = vmatprep.subr.bf16.mxu1 %v9987_v53  ;;  %v10048_v53 = vld [vmem:[%s14658_s1 + $0xd04] ss:$8 sps:$4 sm:$0xff]  }
 0x177   :  { %7253 = vmatpush2.bf16.msra.mxu0 %v9982_v35  ;;  %v10051_v35 = vld [vmem:[%s14658_s1 + $0xcf4] ss:$8 sps:$4 sm:$0xff]  }
 0x178   :  { %7254 = vmatprep.subr.bf16.mxu0 %v9990_v37  ;;  %v10049_v37 = vld [vmem:[%s14658_s1 + $0xcf0] ss:$8 sps:$4 sm:$0xff]  }
 0x179   :  { %7294 = vmatpush2.bf16.msra.mxu1 %v9985_v38  ;;  %v10054_v38 = vld [vmem:[%s14658_s1 + $0xdf4] ss:$8 sps:$4 sm:$0xff]  }
 0x17a   :  { %7295 = vmatprep.subr.bf16.mxu1 %v9993_v41  ;;  %v10057_v41 = vld [vmem:[%s14658_s1 + $0xce4] ss:$8 sps:$4 sm:$0xff]  }
 0x17b   :  { %7255 = vmatpush2.bf16.msra.mxu0 %v9988_v42  ;;  %v10055_v42 = vld [vmem:[%s14658_s1 + $0xce0] ss:$8 sps:$4 sm:$0xff]  }
 0x17c   :  { %7256 = vmatprep.subr.bf16.mxu0 %v9996_v45  ;;  %v10060_v45 = vld [vmem:[%s14658_s1 + $0xde4] ss:$8 sps:$4 sm:$0xff]  }
 0x17d   :  { %7296 = vmatpush2.bf16.msra.mxu1 %v9991_v15  ;;  %v10058_v15 = vld [vmem:[%s14658_s1 + $0xde0] ss:$8 sps:$4 sm:$0xff]  }
 0x17e   :  { %7297 = vmatprep.subr.bf16.mxu1 %v9999_v50  ;;  %v10061_v50 = vld [vmem:[%s14658_s1 + $0xcd0] ss:$8 sps:$4 sm:$0xff]  }
 0x17f   :  { %7257 = vmatpush2.bf16.msra.mxu0 %v9994_v49  ;;  %v10063_v49 = vld [vmem:[%s14658_s1 + $0xcd4] ss:$8 sps:$4 sm:$0xff]  }
 0x180   :  { %7308 = vmatprep.subr.bf16.mxu0 %v10002_v54  ;;  %v10069_v54 = vld [vmem:[%s14658_s1 + $0xcc4] ss:$8 sps:$4 sm:$0xff]  }
 0x181   :  { %7298 = vmatpush2.bf16.msra.mxu1 %v9997_v20  ;;  %v10066_v20 = vld [vmem:[%s14658_s1 + $0xdd4] ss:$8 sps:$4 sm:$0xff]  }
 0x182   :  { %v7014_v63 = vpop.f32.mrf.mxu0  ;;  %7259 = vmatmul.mubr.bf16.vlgmr.msra.gmra.mxu0 %v422_v39  ;;  %7349 = vmatprep.subr.bf16.mxu1 %v10006_v57  ;;  %v10070_v39 = vld [vmem:[%s14658_s1 + $0xdc0] ss:$8 sps:$4 sm:$0xff]   ;;  %v10075_v57 = vld [vmem:[%s14658_s1 + $0xcb4] ss:$8 sps:$4 sm:$0xff]  }
 0x183   :  { %v7015_v1 = vadd.f32 %v7014_v63, %v12176_v46  ;;  %7309 = vmatpush1.bf16.msra.mxu0 %v10000_v34  ;;  %7340 = vmatprep.mubr.bf16.mxu0 %v427_v59  ;;  %v10013_v46 = vld [vmem:[%s14658_s1 + $0xc50] ss:$8 sps:$4 sm:$0xff]   ;;  %v10067_v34 = vld [vmem:[%s14658_s1 + $0xcc0] ss:$8 sps:$4 sm:$0xff]   ;;  %v10078_v59 = vld [vmem:[%s14658_s1 + $0xdb4] ss:$8 sps:$4 sm:$0xff]  }
 0x184   :  { %v7016_v2 = vpop.f32.mrf.mxu0  ;;  %v7055_v3 = vpop.f32.mrf.mxu1  ;;  %7300 = vmatmul.mubr.bf16.vlgmr.msra.gmra.mxu1 %v424_v60  ;;  %7310 = vmatprep.subr.bf16.mxu0 %v10009_v61  ;;  %v10076_v60 = vld [vmem:[%s14658_s1 + $0xdb0] ss:$8 sps:$4 sm:$0xff]   ;;  %v10081_v61 = vld [vmem:[%s14658_s1 + $0xca4] ss:$8 sps:$4 sm:$0xff]   ;;  %v10079_v63 = vld [vmem:[%s14658_s1 + $0xca0] ss:$8 sps:$4 sm:$0xff]  }
 0x185   :  { %v7017_v43 = vadd.f32 %v7016_v2, %v12184_v51  ;;  %v12391_v5 = vadd.f32 %v7055_v3, %v7015_v1  ;;  %7350 = vmatpush1.bf16.msra.mxu1 %v10004_v58  ;;  %7381 = vmatprep.mubr.bf16.mxu1 %v429_v62  ;;  %v10016_v51 = vld [vmem:[%s14658_s1 + $0xd50] ss:$8 sps:$4 sm:$0xff]   ;;  %v10082_v1 = vld [vmem:[%s14658_s1 + $0xda0] ss:$8 sps:$4 sm:$0xff]   ;;  %v10090_v2 = vld [vmem:[%s14658_s1 + $0xd94] ss:$8 sps:$4 sm:$0xff]  }
 0x186   :  { %v7018_v36 = vpop.f32.mrf.mxu0  ;;  %v7057_v6 = vpop.f32.mrf.mxu1  ;;  %7351 = vmatprep.subr.bf16.mxu1 %v10012_v0  ;;  %v10073_v58 = vld [vmem:[%s14658_s1 + $0xcb0] ss:$8 sps:$4 sm:$0xff]   ;;  %v10087_v0 = vld [vmem:[%s14658_s1 + $0xc94] ss:$8 sps:$4 sm:$0xff]  }
 0x187   :  { %v12399_v8 = vadd.f32 %v7057_v6, %v7017_v43  ;;  %7311 = vmatpush1.bf16.msra.mxu0 %v10007_v14  ;;  %v10084_v14 = vld [vmem:[%s14658_s1 + $0xda4] ss:$8 sps:$4 sm:$0xff]   ;;  %v29_v62 = vld [vmem:[%s14657_s0 + $0x38] sm:$0xff]  ;;  %v10091_v6 = vld [vmem:[%s14658_s1 + $0xc80] ss:$8 sps:$4 sm:$0xff]  }
 0x188   :  { %v7019_v9 = vpop.f32.mrf.mxu0  ;;  %7312 = vmatprep.subr.bf16.mxu0 %v10015_v4  ;;  %v7059_v40 = vpop.f32.mrf.mxu1  ;;  %v10085_v3 = vld [vmem:[%s14658_s1 + $0xc90] ss:$8 sps:$4 sm:$0xff]   ;;  %v12549_v4 = vrot.slane %v29_v62, %v11219_v48  ;;  %v10093_v43 = vld [vmem:[%s14658_s1 + $0xc84] ss:$8 sps:$4 sm:$0xff]  }
 0x189   :  { %7352 = vmatpush1.bf16.msra.mxu1 %v10010_v18  ;;  %v175_v18 = vcombine.high %v29_v62, %v29_v62  ;;  %v10097_v40 = vld [vmem:[%s14658_s1 + $0xe70] ss:$8 sps:$4 sm:$0xff]   ;;  %v10143_v62 = vld [vmem:[%s14658_s1 + $0xf00] ss:$8 sps:$4 sm:$0xff]  }
 0x18a   :  { %7353 = vmatprep.subr.bf16.mxu1 %v10018_v7  ;;  %v7060_v13 = vpop.f32.mrf.mxu1  ;;  %v10096_v7 = vld [vmem:[%s14658_s1 + $0xd84] ss:$8 sps:$4 sm:$0xff]   ;;  %v190_v9 = vcombine.high %v12549_v4, %v12549_v4 }
 0x18b   :  { %7313 = vmatpush1.bf16.msra.mxu0 %v10013_v46  ;;  %v10088_v46 = vld [vmem:[%s14658_s1 + $0xd90] ss:$8 sps:$4 sm:$0xff]   ;;  %v12558_v36 = vrot.slane %v175_v18, %v11219_v48  ;;  %v10103_v13 = vld [vmem:[%s14658_s1 + $0xf74] ss:$8 sps:$4 sm:$0xff]  }
 0x18c   :  { %7314 = vmatprep.subr.bf16.mxu0 %v10021_v10  ;;  %v10099_v10 = vld [vmem:[%s14658_s1 + $0xe74] ss:$8 sps:$4 sm:$0xff]   ;;  %v10149_v18 = vld [vmem:[%s14658_s1 + $0xff0] ss:$8 sps:$4 sm:$0xff]  }
 0x18d   :  { %7354 = vmatpush1.bf16.msra.mxu1 %v10016_v51  ;;  %v10094_v51 = vld [vmem:[%s14658_s1 + $0xd80] ss:$8 sps:$4 sm:$0xff]  }
 0x18e   :  { %7355 = vmatprep.subr.bf16.mxu1 %v10024_v12  ;;  %v426_v12 = vpack.c.bf16 %v12334_v44, %v12334_v44  ;;  %v10104_v44 = vld [vmem:[%s14658_s1 + $0xe60] ss:$8 sps:$4 sm:$0xff]  }
 0x18f   :  { %7315 = vmatpush1.bf16.msra.mxu0 %v10019_v11  ;;  %v191_v11 = vcombine.high %v12558_v36, %v12558_v36 }
 0x190   :  { %7316 = vmatprep.subr.bf16.mxu0 %v10027_v17  ;;  %v431_v17 = vpack.c.bf16 %v190_v9, %v190_v9  ;;  %v10161_v9 = vld [vmem:[%s14658_s1 + $0xfd0] ss:$8 sps:$4 sm:$0xff]  }
 0x191   :  { %7356 = vmatpush1.bf16.msra.mxu1 %v10022_v16  ;;  %v10101_v16 = vld [vmem:[%s14658_s1 + $0xf70] ss:$8 sps:$4 sm:$0xff]  }
 0x192   :  { %7357 = vmatprep.subr.bf16.mxu1 %v10030_v21  ;;  %v10106_v21 = vld [vmem:[%s14658_s1 + $0xe64] ss:$8 sps:$4 sm:$0xff]  }
 0x193   :  { %7317 = vmatpush1.bf16.msra.mxu0 %v10025_v19  ;;  %v428_v19 = vpack.c.bf16 %v12343_v47, %v12343_v47  ;;  %v10107_v47 = vld [vmem:[%s14658_s1 + $0xf60] ss:$8 sps:$4 sm:$0xff]  }
 0x194   :  { %7318 = vmatprep.subr.bf16.mxu0 %v10033_v23 }
 0x195   :  { %7358 = vmatpush1.bf16.msra.mxu1 %v10028_v22  ;;  %v433_v22 = vpack.c.bf16 %v191_v11, %v191_v11  ;;  %v10169_v11 = vld [vmem:[%s14658_s1 + $0xfc4] ss:$8 sps:$4 sm:$0xff]  }
 0x196   :  { %7359 = vmatprep.subr.bf16.mxu1 %v10036_v25 }
 0x197   :  { %7319 = vmatpush1.bf16.msra.mxu0 %v10031_v24  ;;  %v10109_v24 = vld [vmem:[%s14658_s1 + $0xf64] ss:$8 sps:$4 sm:$0xff]  }
 0x198   :  { %7320 = vmatprep.subr.bf16.mxu0 %v10039_v27 }
 0x199   :  { %7360 = vmatpush1.bf16.msra.mxu1 %v10034_v26 }
 0x19a   :  { %7361 = vmatprep.subr.bf16.mxu1 %v10042_v29 }
 0x19b   :  { %7321 = vmatpush1.bf16.msra.mxu0 %v10037_v28  ;;  %v10112_v28 = vld [vmem:[%s14658_s1 + $0xe54] ss:$8 sps:$4 sm:$0xff]  }
 0x19c   :  { %7322 = vmatprep.subr.bf16.mxu0 %v10045_v31 }
 0x19d   :  { %7362 = vmatpush1.bf16.msra.mxu1 %v10040_v30 }
 0x19e   :  { %7363 = vmatprep.subr.bf16.mxu1 %v10048_v53  ;;  %v10115_v53 = vld [vmem:[%s14658_s1 + $0xf54] ss:$8 sps:$4 sm:$0xff]  }
 0x19f   :  { %7323 = vmatpush1.bf16.msra.mxu0 %v10043_v32 }
 0x1a0   :  { %7324 = vmatprep.subr.bf16.mxu0 %v10051_v35 }
 0x1a1   :  { %7364 = vmatpush1.bf16.msra.mxu1 %v10046_v33 }
 0x1a2   :  { %7365 = vmatprep.subr.bf16.mxu1 %v10054_v38 }
 0x1a3   :  { %7325 = vmatpush2.bf16.msra.mxu0 %v10049_v37  ;;  %v10118_v37 = vld [vmem:[%s14658_s1 + $0xe44] ss:$8 sps:$4 sm:$0xff]  }
 0x1a4   :  { %7326 = vmatprep.subr.bf16.mxu0 %v10057_v41  ;;  %v10121_v41 = vld [vmem:[%s14658_s1 + $0xf44] ss:$8 sps:$4 sm:$0xff]  }
 0x1a5   :  { %7366 = vmatpush2.bf16.msra.mxu1 %v10052_v55  ;;  %v10116_v55 = vld [vmem:[%s14658_s1 + $0xe40] ss:$8 sps:$4 sm:$0xff]  }
 0x1a6   :  { %7367 = vmatprep.subr.bf16.mxu1 %v10060_v45  ;;  %v10119_v45 = vld [vmem:[%s14658_s1 + $0xf40] ss:$8 sps:$4 sm:$0xff]  }
 0x1a7   :  { %7327 = vmatpush2.bf16.msra.mxu0 %v10055_v42 }
 0x1a8   :  { %7328 = vmatprep.subr.bf16.mxu0 %v10063_v49  ;;  %v10122_v49 = vld [vmem:[%s14658_s1 + $0xe30] ss:$8 sps:$4 sm:$0xff]  }
 0x1a9   :  { %7368 = vmatpush2.bf16.msra.mxu1 %v10058_v15  ;;  %v10124_v15 = vld [vmem:[%s14658_s1 + $0xe34] ss:$8 sps:$4 sm:$0xff]  }
 0x1aa   :  { %7369 = vmatprep.subr.bf16.mxu1 %v10066_v20  ;;  %v10125_v20 = vld [vmem:[%s14658_s1 + $0xf30] ss:$8 sps:$4 sm:$0xff]  }
 0x1ab   :  { %7329 = vmatpush2.bf16.msra.mxu0 %v10061_v50  ;;  %v10127_v50 = vld [vmem:[%s14658_s1 + $0xf34] ss:$8 sps:$4 sm:$0xff]  }
 0x1ac   :  { %7330 = vmatprep.subr.bf16.mxu0 %v10069_v54  ;;  %v10128_v54 = vld [vmem:[%s14658_s1 + $0xe20] ss:$8 sps:$4 sm:$0xff]  }
 0x1ad   :  { %7370 = vmatpush2.bf16.msra.mxu1 %v10064_v52  ;;  %v10130_v52 = vld [vmem:[%s14658_s1 + $0xe24] ss:$8 sps:$4 sm:$0xff]  }
 0x1ae   :  { %7371 = vmatprep.subr.bf16.mxu1 %v10072_v56  ;;  %v10131_v56 = vld [vmem:[%s14658_s1 + $0xf20] ss:$8 sps:$4 sm:$0xff]  }
 0x1af   :  { %7331 = vmatpush2.bf16.msra.mxu0 %v10067_v34  ;;  %v10133_v34 = vld [vmem:[%s14658_s1 + $0xf24] ss:$8 sps:$4 sm:$0xff]  }
 0x1b0   :  { %7332 = vmatprep.subr.bf16.mxu0 %v10075_v57  ;;  %v10134_v57 = vld [vmem:[%s14658_s1 + $0xe10] ss:$8 sps:$4 sm:$0xff]  }
 0x1b1   :  { %7372 = vmatpush2.bf16.msra.mxu1 %v10070_v39  ;;  %v10136_v39 = vld [vmem:[%s14658_s1 + $0xe14] ss:$8 sps:$4 sm:$0xff]  }
 0x1b2   :  { %7373 = vmatprep.subr.bf16.mxu1 %v10078_v59  ;;  %v10137_v59 = vld [vmem:[%s14658_s1 + $0xf10] ss:$8 sps:$4 sm:$0xff]  }
 0x1b3   :  { %7333 = vmatpush2.bf16.msra.mxu0 %v10073_v58  ;;  %v10139_v58 = vld [vmem:[%s14658_s1 + $0xf14] ss:$8 sps:$4 sm:$0xff]  }
 0x1b4   :  { %7334 = vmatprep.subr.bf16.mxu0 %v10081_v61  ;;  %v10140_v61 = vld [vmem:[%s14658_s1 + $0xe00] ss:$8 sps:$4 sm:$0xff]  }
 0x1b5   :  { %7374 = vmatpush2.bf16.msra.mxu1 %v10076_v60  ;;  %v10142_v60 = vld [vmem:[%s14658_s1 + $0xe04] ss:$8 sps:$4 sm:$0xff]  }
 0x1b6   :  { %7375 = vmatprep.subr.bf16.mxu1 %v10084_v14  ;;  %v10145_v14 = vld [vmem:[%s14658_s1 + $0xf04] ss:$8 sps:$4 sm:$0xff]  }
 0x1b7   :  { %7335 = vmatpush2.bf16.msra.mxu0 %v10079_v63  ;;  %v10148_v63 = vld [vmem:[%s14658_s1 + $0xef4] ss:$8 sps:$4 sm:$0xff]  }
 0x1b8   :  { %7336 = vmatprep.subr.bf16.mxu0 %v10087_v0  ;;  %v10146_v0 = vld [vmem:[%s14658_s1 + $0xef0] ss:$8 sps:$4 sm:$0xff]  }
 0x1b9   :  { %7376 = vmatpush2.bf16.msra.mxu1 %v10082_v1  ;;  %v10151_v1 = vld [vmem:[%s14658_s1 + $0xff4] ss:$8 sps:$4 sm:$0xff]  }
 0x1ba   :  { %7377 = vmatprep.subr.bf16.mxu1 %v10090_v2  ;;  %v10154_v2 = vld [vmem:[%s14658_s1 + $0xee4] ss:$8 sps:$4 sm:$0xff]  }
 0x1bb   :  { %7337 = vmatpush2.bf16.msra.mxu0 %v10085_v3  ;;  %v10152_v3 = vld [vmem:[%s14658_s1 + $0xee0] ss:$8 sps:$4 sm:$0xff]  }
 0x1bc   :  { %7338 = vmatprep.subr.bf16.mxu0 %v10093_v43  ;;  %v10157_v43 = vld [vmem:[%s14658_s1 + $0xfe4] ss:$8 sps:$4 sm:$0xff]  }
 0x1bd   :  { %7378 = vmatpush2.bf16.msra.mxu1 %v10088_v46  ;;  %v10155_v46 = vld [vmem:[%s14658_s1 + $0xfe0] ss:$8 sps:$4 sm:$0xff]  }
 0x1be   :  { %7379 = vmatprep.subr.bf16.mxu1 %v10096_v7  ;;  %v10158_v7 = vld [vmem:[%s14658_s1 + $0xed0] ss:$8 sps:$4 sm:$0xff]  }
 0x1bf   :  { %7339 = vmatpush2.bf16.msra.mxu0 %v10091_v6  ;;  %v10160_v6 = vld [vmem:[%s14658_s1 + $0xed4] ss:$8 sps:$4 sm:$0xff]  }
 0x1c0   :  { %7390 = vmatprep.subr.bf16.mxu0 %v10099_v10  ;;  %v10166_v10 = vld [vmem:[%s14658_s1 + $0xec4] ss:$8 sps:$4 sm:$0xff]  }
 0x1c1   :  { %7380 = vmatpush2.bf16.msra.mxu1 %v10094_v51  ;;  %v10163_v51 = vld [vmem:[%s14658_s1 + $0xfd4] ss:$8 sps:$4 sm:$0xff]  }
 0x1c2   :  { %v7096_v23 = vpop.f32.mrf.mxu0  ;;  %7341 = vmatmul.mubr.bf16.vlgmr.msra.gmra.mxu0 %v426_v12  ;;  %7431 = vmatprep.subr.bf16.mxu1 %v10103_v13  ;;  %v10167_v12 = vld [vmem:[%s14658_s1 + $0xfc0] ss:$8 sps:$4 sm:$0xff]   ;;  %v10172_v13 = vld [vmem:[%s14658_s1 + $0xeb4] ss:$8 sps:$4 sm:$0xff]  }
 0x1c3   :  { %v7097_v25 = vadd.f32 %v7096_v23, %v12391_v5  ;;  %7391 = vmatpush1.bf16.msra.mxu0 %v10097_v40  ;;  %7422 = vmatprep.mubr.bf16.mxu0 %v431_v17  ;;  %v10110_v5 = vld [vmem:[%s14658_s1 + $0xe50] ss:$8 sps:$4 sm:$0xff]   ;;  %v10164_v40 = vld [vmem:[%s14658_s1 + $0xec0] ss:$8 sps:$4 sm:$0xff]   ;;  %v10175_v17 = vld [vmem:[%s14658_s1 + $0xfb4] ss:$8 sps:$4 sm:$0xff]  }
 0x1c4   :  { %v7098_v26 = vpop.f32.mrf.mxu0  ;;  %v7137_v27 = vpop.f32.mrf.mxu1  ;;  %7382 = vmatmul.mubr.bf16.vlgmr.msra.gmra.mxu1 %v428_v19  ;;  %7392 = vmatprep.subr.bf16.mxu0 %v10106_v21  ;;  %v10173_v19 = vld [vmem:[%s14658_s1 + $0xfb0] ss:$8 sps:$4 sm:$0xff]   ;;  %v10178_v21 = vld [vmem:[%s14658_s1 + $0xea4] ss:$8 sps:$4 sm:$0xff]   ;;  %v10176_v23 = vld [vmem:[%s14658_s1 + $0xea0] ss:$8 sps:$4 sm:$0xff]  }
 0x1c5   :  { %v7099_v29 = vadd.f32 %v7098_v26, %v12399_v8  ;;  %v12606_v30 = vadd.f32 %v7137_v27, %v7097_v25  ;;  %7432 = vmatpush1.bf16.msra.mxu1 %v10101_v16  ;;  %7463 = vmatprep.mubr.bf16.mxu1 %v433_v22  ;;  %v10113_v8 = vld [vmem:[%s14658_s1 + $0xf50] ss:$8 sps:$4 sm:$0xff]   ;;  %v30_v22 = vld [vmem:[%s14657_s0 + $0x40] sm:$0xff]  ;;  %v10187_v26 = vld [vmem:[%s14658_s1 + $0xf94] ss:$8 sps:$4 sm:$0xff]  }
 0x1c6   :  { %v7100_v31 = vpop.f32.mrf.mxu0  ;;  %v7139_v32 = vpop.f32.mrf.mxu1  ;;  %7433 = vmatprep.subr.bf16.mxu1 %v10109_v24  ;;  %v10170_v16 = vld [vmem:[%s14658_s1 + $0xeb0] ss:$8 sps:$4 sm:$0xff]   ;;  %v10184_v24 = vld [vmem:[%s14658_s1 + $0xe94] ss:$8 sps:$4 sm:$0xff]   ;;  %v10179_v25 = vld [vmem:[%s14658_s1 + $0xfa0] ss:$8 sps:$4 sm:$0xff]  }
 0x1c7   :  { %v12614_v33 = vadd.f32 %v7139_v32, %v7099_v29  ;;  %7393 = vmatpush1.bf16.msra.mxu0 %v10104_v44  ;;  %v10181_v44 = vld [vmem:[%s14658_s1 + $0xfa4] ss:$8 sps:$4 sm:$0xff]   ;;  %v10182_v27 = vld [vmem:[%s14658_s1 + $0xe90] ss:$8 sps:$4 sm:$0xff]   ;;  %v10188_v32 = vld [vmem:[%s14658_s1 + $0xe80] ss:$8 sps:$4 sm:$0xff]  }
 0x1c8   :  { %v7101_v35 = vpop.f32.mrf.mxu0  ;;  %7394 = vmatprep.subr.bf16.mxu0 %v10112_v28  ;;  %v7141_v38 = vpop.f32.mrf.mxu1  ;;  %v12764_v28 = vrot.slane %v30_v22, %v11219_v48  ;;  %v10190_v29 = vld [vmem:[%s14658_s1 + $0xe84] ss:$8 sps:$4 sm:$0xff]  }
 0x1c9   :  { %7434 = vmatpush1.bf16.msra.mxu1 %v10107_v47  ;;  %v192_v47 = vcombine.high %v30_v22, %v30_v22  ;;  %v10194_v38 = vld [vmem:[%s14658_s1 + $0x1070] ss:$8 sps:$4 sm:$0xff]   ;;  %v10240_v22 = vld [vmem:[%s14658_s1 + $0x1100] ss:$8 sps:$4 sm:$0xff]  }
 0x1ca   :  { %7435 = vmatprep.subr.bf16.mxu1 %v10115_v53  ;;  %v7142_v42 = vpop.f32.mrf.mxu1  ;;  %v10193_v53 = vld [vmem:[%s14658_s1 + $0xf84] ss:$8 sps:$4 sm:$0xff]   ;;  %v207_v35 = vcombine.high %v12764_v28, %v12764_v28 }
 0x1cb   :  { %7395 = vmatpush1.bf16.msra.mxu0 %v10110_v5  ;;  %v10185_v5 = vld [vmem:[%s14658_s1 + $0xf90] ss:$8 sps:$4 sm:$0xff]   ;;  %v12773_v31 = vrot.slane %v192_v47, %v11219_v48  ;;  %v10200_v42 = vld [vmem:[%s14658_s1 + $0x1174] ss:$8 sps:$4 sm:$0xff]  }
 0x1cc   :  { %7396 = vmatprep.subr.bf16.mxu0 %v10118_v37  ;;  %v10196_v37 = vld [vmem:[%s14658_s1 + $0x1074] ss:$8 sps:$4 sm:$0xff]   ;;  %v10246_v47 = vld [vmem:[%s14658_s1 + $0x11f0] ss:$8 sps:$4 sm:$0xff]  }
 0x1cd   :  { %7436 = vmatpush1.bf16.msra.mxu1 %v10113_v8  ;;  %v10191_v8 = vld [vmem:[%s14658_s1 + $0xf80] ss:$8 sps:$4 sm:$0xff]  }
 0x1ce   :  { %7437 = vmatprep.subr.bf16.mxu1 %v10121_v41  ;;  %v430_v41 = vpack.c.bf16 %v12549_v4, %v12549_v4  ;;  %v10201_v4 = vld [vmem:[%s14658_s1 + $0x1060] ss:$8 sps:$4 sm:$0xff]  }
 0x1cf   :  { %7397 = vmatpush1.bf16.msra.mxu0 %v10116_v55  ;;  %v208_v55 = vcombine.high %v12773_v31, %v12773_v31 }
 0x1d0   :  { %7398 = vmatprep.subr.bf16.mxu0 %v10124_v15  ;;  %v435_v15 = vpack.c.bf16 %v207_v35, %v207_v35  ;;  %v10258_v35 = vld [vmem:[%s14658_s1 + $0x11d0] ss:$8 sps:$4 sm:$0xff]  }
 0x1d1   :  { %7438 = vmatpush1.bf16.msra.mxu1 %v10119_v45  ;;  %v10198_v45 = vld [vmem:[%s14658_s1 + $0x1170] ss:$8 sps:$4 sm:$0xff]  }
 0x1d2   :  { %7439 = vmatprep.subr.bf16.mxu1 %v10127_v50  ;;  %v10203_v50 = vld [vmem:[%s14658_s1 + $0x1064] ss:$8 sps:$4 sm:$0xff]  }
 0x1d3   :  { %7399 = vmatpush1.bf16.msra.mxu0 %v10122_v49  ;;  %v432_v49 = vpack.c.bf16 %v12558_v36, %v12558_v36  ;;  %v10204_v36 = vld [vmem:[%s14658_s1 + $0x1160] ss:$8 sps:$4 sm:$0xff]  }
 0x1d4   :  { %7400 = vmatprep.subr.bf16.mxu0 %v10130_v52 }
 0x1d5   :  { %7440 = vmatpush1.bf16.msra.mxu1 %v10125_v20  ;;  %v437_v20 = vpack.c.bf16 %v208_v55, %v208_v55  ;;  %v10266_v55 = vld [vmem:[%s14658_s1 + $0x11c4] ss:$8 sps:$4 sm:$0xff]  }
 0x1d6   :  { %7441 = vmatprep.subr.bf16.mxu1 %v10133_v34 }
 0x1d7   :  { %7401 = vmatpush1.bf16.msra.mxu0 %v10128_v54  ;;  %v10206_v54 = vld [vmem:[%s14658_s1 + $0x1164] ss:$8 sps:$4 sm:$0xff]  }
 0x1d8   :  { %7402 = vmatprep.subr.bf16.mxu0 %v10136_v39 }
 0x1d9   :  { %7442 = vmatpush1.bf16.msra.mxu1 %v10131_v56 }
 0x1da   :  { %7443 = vmatprep.subr.bf16.mxu1 %v10139_v58 }
 0x1db   :  { %7403 = vmatpush1.bf16.msra.mxu0 %v10134_v57  ;;  %v10209_v57 = vld [vmem:[%s14658_s1 + $0x1054] ss:$8 sps:$4 sm:$0xff]  }
 0x1dc   :  { %7404 = vmatprep.subr.bf16.mxu0 %v10142_v60 }
 0x1dd   :  { %7444 = vmatpush1.bf16.msra.mxu1 %v10137_v59 }
 0x1de   :  { %7445 = vmatprep.subr.bf16.mxu1 %v10145_v14  ;;  %v10212_v14 = vld [vmem:[%s14658_s1 + $0x1154] ss:$8 sps:$4 sm:$0xff]  }
 0x1df   :  { %7405 = vmatpush1.bf16.msra.mxu0 %v10140_v61 }
 0x1e0   :  { %7406 = vmatprep.subr.bf16.mxu0 %v10148_v63 }
 0x1e1   :  { %7446 = vmatpush1.bf16.msra.mxu1 %v10143_v62 }
 0x1e2   :  { %7447 = vmatprep.subr.bf16.mxu1 %v10151_v1 }
 0x1e3   :  { %7407 = vmatpush2.bf16.msra.mxu0 %v10146_v0  ;;  %v10215_v0 = vld [vmem:[%s14658_s1 + $0x1044] ss:$8 sps:$4 sm:$0xff]  }
 0x1e4   :  { %7408 = vmatprep.subr.bf16.mxu0 %v10154_v2  ;;  %v10218_v2 = vld [vmem:[%s14658_s1 + $0x1144] ss:$8 sps:$4 sm:$0xff]  }
 0x1e5   :  { %7448 = vmatpush2.bf16.msra.mxu1 %v10149_v18  ;;  %v10213_v18 = vld [vmem:[%s14658_s1 + $0x1040] ss:$8 sps:$4 sm:$0xff]  }
 0x1e6   :  { %7449 = vmatprep.subr.bf16.mxu1 %v10157_v43  ;;  %v10216_v43 = vld [vmem:[%s14658_s1 + $0x1140] ss:$8 sps:$4 sm:$0xff]  }
 0x1e7   :  { %7409 = vmatpush2.bf16.msra.mxu0 %v10152_v3 }
 0x1e8   :  { %7410 = vmatprep.subr.bf16.mxu0 %v10160_v6  ;;  %v10219_v6 = vld [vmem:[%s14658_s1 + $0x1030] ss:$8 sps:$4 sm:$0xff]  }
 0x1e9   :  { %7450 = vmatpush2.bf16.msra.mxu1 %v10155_v46  ;;  %v10221_v46 = vld [vmem:[%s14658_s1 + $0x1034] ss:$8 sps:$4 sm:$0xff]  }
 0x1ea   :  { %7451 = vmatprep.subr.bf16.mxu1 %v10163_v51  ;;  %v10222_v51 = vld [vmem:[%s14658_s1 + $0x1130] ss:$8 sps:$4 sm:$0xff]  }
 0x1eb   :  { %7411 = vmatpush2.bf16.msra.mxu0 %v10158_v7  ;;  %v10224_v7 = vld [vmem:[%s14658_s1 + $0x1134] ss:$8 sps:$4 sm:$0xff]  }
 0x1ec   :  { %7412 = vmatprep.subr.bf16.mxu0 %v10166_v10  ;;  %v10225_v10 = vld [vmem:[%s14658_s1 + $0x1020] ss:$8 sps:$4 sm:$0xff]  }
 0x1ed   :  { %7452 = vmatpush2.bf16.msra.mxu1 %v10161_v9  ;;  %v10227_v9 = vld [vmem:[%s14658_s1 + $0x1024] ss:$8 sps:$4 sm:$0xff]  }
 0x1ee   :  { %7453 = vmatprep.subr.bf16.mxu1 %v10169_v11  ;;  %v10228_v11 = vld [vmem:[%s14658_s1 + $0x1120] ss:$8 sps:$4 sm:$0xff]  }
 0x1ef   :  { %7413 = vmatpush2.bf16.msra.mxu0 %v10164_v40  ;;  %v10230_v40 = vld [vmem:[%s14658_s1 + $0x1124] ss:$8 sps:$4 sm:$0xff]  }
 0x1f0   :  { %7414 = vmatprep.subr.bf16.mxu0 %v10172_v13  ;;  %v10231_v13 = vld [vmem:[%s14658_s1 + $0x1010] ss:$8 sps:$4 sm:$0xff]  }
 0x1f1   :  { %7454 = vmatpush2.bf16.msra.mxu1 %v10167_v12  ;;  %v10233_v12 = vld [vmem:[%s14658_s1 + $0x1014] ss:$8 sps:$4 sm:$0xff]  }
 0x1f2   :  { %7455 = vmatprep.subr.bf16.mxu1 %v10175_v17  ;;  %v10234_v17 = vld [vmem:[%s14658_s1 + $0x1110] ss:$8 sps:$4 sm:$0xff]  }
 0x1f3   :  { %7415 = vmatpush2.bf16.msra.mxu0 %v10170_v16  ;;  %v10236_v16 = vld [vmem:[%s14658_s1 + $0x1114] ss:$8 sps:$4 sm:$0xff]  }
 0x1f4   :  { %7416 = vmatprep.subr.bf16.mxu0 %v10178_v21  ;;  %v10237_v21 = vld [vmem:[%s14658_s1 + $0x1000] ss:$8 sps:$4 sm:$0xff]  }
 0x1f5   :  { %7456 = vmatpush2.bf16.msra.mxu1 %v10173_v19  ;;  %v10239_v19 = vld [vmem:[%s14658_s1 + $0x1004] ss:$8 sps:$4 sm:$0xff]  }
 0x1f6   :  { %7457 = vmatprep.subr.bf16.mxu1 %v10181_v44  ;;  %v10242_v44 = vld [vmem:[%s14658_s1 + $0x1104] ss:$8 sps:$4 sm:$0xff]  }
 0x1f7   :  { %7417 = vmatpush2.bf16.msra.mxu0 %v10176_v23  ;;  %v10245_v23 = vld [vmem:[%s14658_s1 + $0x10f4] ss:$8 sps:$4 sm:$0xff]  }
 0x1f8   :  { %7418 = vmatprep.subr.bf16.mxu0 %v10184_v24  ;;  %v10243_v24 = vld [vmem:[%s14658_s1 + $0x10f0] ss:$8 sps:$4 sm:$0xff]  }
 0x1f9   :  { %7458 = vmatpush2.bf16.msra.mxu1 %v10179_v25  ;;  %v10248_v25 = vld [vmem:[%s14658_s1 + $0x11f4] ss:$8 sps:$4 sm:$0xff]  }
 0x1fa   :  { %7459 = vmatprep.subr.bf16.mxu1 %v10187_v26  ;;  %v10251_v26 = vld [vmem:[%s14658_s1 + $0x10e4] ss:$8 sps:$4 sm:$0xff]  }
 0x1fb   :  { %7419 = vmatpush2.bf16.msra.mxu0 %v10182_v27  ;;  %v10249_v27 = vld [vmem:[%s14658_s1 + $0x10e0] ss:$8 sps:$4 sm:$0xff]  }
 0x1fc   :  { %7420 = vmatprep.subr.bf16.mxu0 %v10190_v29  ;;  %v10254_v29 = vld [vmem:[%s14658_s1 + $0x11e4] ss:$8 sps:$4 sm:$0xff]  }
 0x1fd   :  { %7460 = vmatpush2.bf16.msra.mxu1 %v10185_v5  ;;  %v10252_v5 = vld [vmem:[%s14658_s1 + $0x11e0] ss:$8 sps:$4 sm:$0xff]  }
 0x1fe   :  { %7461 = vmatprep.subr.bf16.mxu1 %v10193_v53  ;;  %v10255_v53 = vld [vmem:[%s14658_s1 + $0x10d0] ss:$8 sps:$4 sm:$0xff]  }
 0x1ff   :  { %7421 = vmatpush2.bf16.msra.mxu0 %v10188_v32  ;;  %v10257_v32 = vld [vmem:[%s14658_s1 + $0x10d4] ss:$8 sps:$4 sm:$0xff]  }
 0x200   :  { %7472 = vmatprep.subr.bf16.mxu0 %v10196_v37  ;;  %v10263_v37 = vld [vmem:[%s14658_s1 + $0x10c4] ss:$8 sps:$4 sm:$0xff]  }
 0x201   :  { %7462 = vmatpush2.bf16.msra.mxu1 %v10191_v8  ;;  %v10260_v8 = vld [vmem:[%s14658_s1 + $0x11d4] ss:$8 sps:$4 sm:$0xff]  }
 0x202   :  { %v7178_v52 = vpop.f32.mrf.mxu0  ;;  %7423 = vmatmul.mubr.bf16.vlgmr.msra.gmra.mxu0 %v430_v41  ;;  %7513 = vmatprep.subr.bf16.mxu1 %v10200_v42  ;;  %v10264_v41 = vld [vmem:[%s14658_s1 + $0x11c0] ss:$8 sps:$4 sm:$0xff]   ;;  %v10269_v42 = vld [vmem:[%s14658_s1 + $0x10b4] ss:$8 sps:$4 sm:$0xff]  }
 0x203   :  { %v7179_v34 = vadd.f32 %v7178_v52, %v12606_v30  ;;  %7473 = vmatpush1.bf16.msra.mxu0 %v10194_v38  ;;  %7504 = vmatprep.mubr.bf16.mxu0 %v435_v15  ;;  %v10207_v30 = vld [vmem:[%s14658_s1 + $0x1050] ss:$8 sps:$4 sm:$0xff]   ;;  %v10261_v38 = vld [vmem:[%s14658_s1 + $0x10c0] ss:$8 sps:$4 sm:$0xff]   ;;  %v10272_v15 = vld [vmem:[%s14658_s1 + $0x11b4] ss:$8 sps:$4 sm:$0xff]  }
 0x204   :  { %v7180_v56 = vpop.f32.mrf.mxu0  ;;  %v7219_v39 = vpop.f32.mrf.mxu1  ;;  %7464 = vmatmul.mubr.bf16.vlgmr.msra.gmra.mxu1 %v432_v49  ;;  %7474 = vmatprep.subr.bf16.mxu0 %v10203_v50  ;;  %v10270_v49 = vld [vmem:[%s14658_s1 + $0x11b0] ss:$8 sps:$4 sm:$0xff]   ;;  %v10275_v50 = vld [vmem:[%s14658_s1 + $0x10a4] ss:$8 sps:$4 sm:$0xff]   ;;  %v10273_v52 = vld [vmem:[%s14658_s1 + $0x10a0] ss:$8 sps:$4 sm:$0xff]  }
 0x205   :  { %v7181_v58 = vadd.f32 %v7180_v56, %v12614_v33  ;;  %v12821_v59 = vadd.f32 %v7219_v39, %v7179_v34  ;;  %7514 = vmatpush1.bf16.msra.mxu1 %v10198_v45  ;;  %7545 = vmatprep.mubr.bf16.mxu1 %v437_v20  ;;  %v10210_v33 = vld [vmem:[%s14658_s1 + $0x1150] ss:$8 sps:$4 sm:$0xff]   ;;  %v31_v20 = vld [vmem:[%s14657_s0 + $0x48] sm:$0xff]  ;;  %v10284_v56 = vld [vmem:[%s14658_s1 + $0x1194] ss:$8 sps:$4 sm:$0xff]  }
 0x206   :  { %v7182_v60 = vpop.f32.mrf.mxu0  ;;  %v7221_v61 = vpop.f32.mrf.mxu1  ;;  %7515 = vmatprep.subr.bf16.mxu1 %v10206_v54  ;;  %v10267_v45 = vld [vmem:[%s14658_s1 + $0x10b0] ss:$8 sps:$4 sm:$0xff]   ;;  %v10281_v54 = vld [vmem:[%s14658_s1 + $0x1094] ss:$8 sps:$4 sm:$0xff]   ;;  %v10276_v34 = vld [vmem:[%s14658_s1 + $0x11a0] ss:$8 sps:$4 sm:$0xff]  }
 0x207   :  { %v12829_v62 = vadd.f32 %v7221_v61, %v7181_v58  ;;  %7475 = vmatpush1.bf16.msra.mxu0 %v10201_v4  ;;  %v10278_v4 = vld [vmem:[%s14658_s1 + $0x11a4] ss:$8 sps:$4 sm:$0xff]   ;;  %v10279_v39 = vld [vmem:[%s14658_s1 + $0x1090] ss:$8 sps:$4 sm:$0xff]  }
 0x208   :  { %v7183_v63 = vpop.f32.mrf.mxu0  ;;  %7476 = vmatprep.subr.bf16.mxu0 %v10209_v57  ;;  %v7223_v1 = vpop.f32.mrf.mxu1  ;;  %v12979_v57 = vrot.slane %v31_v20, %v11219_v48  ;;  %v10287_v58 = vld [vmem:[%s14658_s1 + $0x1084] ss:$8 sps:$4 sm:$0xff]  }
 0x209   :  { %7516 = vmatpush1.bf16.msra.mxu1 %v10204_v36  ;;  %v209_v36 = vcombine.high %v31_v20, %v31_v20  ;;  %v10290_v61 = vld [vmem:[%s14658_s1 + $0x1184] ss:$8 sps:$4 sm:$0xff]   ;;  %v10293_v63 = vld [vmem:[%s14658_s1 + $0x1274] ss:$8 sps:$4 sm:$0xff]  }
 0x20a   :  { %7517 = vmatprep.subr.bf16.mxu1 %v10212_v14  ;;  %v7224_v3 = vpop.f32.mrf.mxu1  ;;  %v10285_v14 = vld [vmem:[%s14658_s1 + $0x1080] ss:$8 sps:$4 sm:$0xff]   ;;  %v10342_v20 = vld [vmem:[%s14658_s1 + $0x12f4] ss:$8 sps:$4 sm:$0xff]  }
 0x20b   :  { %7477 = vmatpush1.bf16.msra.mxu0 %v10207_v30  ;;  %v10282_v30 = vld [vmem:[%s14658_s1 + $0x1190] ss:$8 sps:$4 sm:$0xff]   ;;  %v12988_v60 = vrot.slane %v209_v36, %v11219_v48  ;;  %v10348_v36 = vld [vmem:[%s14658_s1 + $0x12e4] ss:$8 sps:$4 sm:$0xff]  }
 0x20c   :  { %7478 = vmatprep.subr.bf16.mxu0 %v10215_v0  ;;  %v10288_v0 = vld [vmem:[%s14658_s1 + $0x1180] ss:$8 sps:$4 sm:$0xff]   ;;  %v10291_v3 = vld [vmem:[%s14658_s1 + $0x1270] ss:$8 sps:$4 sm:$0xff]  }
 0x20d   :  { %7518 = vmatpush1.bf16.msra.mxu1 %v10210_v33  ;;  %v224_v33 = vcombine.high %v12979_v57, %v12979_v57  ;;  %v225_v1 = vcombine.high %v12988_v60, %v12988_v60 }
 0x20e   :  { %7519 = vmatprep.subr.bf16.mxu1 %v10218_v2  ;;  %v10297_v2 = vld [vmem:[%s14658_s1 + $0x1374] ss:$8 sps:$4 sm:$0xff]  }
 0x20f   :  { %7479 = vmatpush1.bf16.msra.mxu0 %v10213_v18  ;;  %v434_v18 = vpack.c.bf16 %v12764_v28, %v12764_v28  ;;  %v10295_v28 = vld [vmem:[%s14658_s1 + $0x1370] ss:$8 sps:$4 sm:$0xff]  }
 0x210   :  { %7480 = vmatprep.subr.bf16.mxu0 %v10221_v46  ;;  %v436_v46 = vpack.c.bf16 %v12773_v31, %v12773_v31  ;;  %v10298_v31 = vld [vmem:[%s14658_s1 + $0x1260] ss:$8 sps:$4 sm:$0xff]  }
 0x211   :  { %7520 = vmatpush1.bf16.msra.mxu1 %v10216_v43  ;;  %v439_v43 = vpack.c.bf16 %v224_v33, %v224_v33 }
 0x212   :  { %7521 = vmatprep.subr.bf16.mxu1 %v10224_v7  ;;  %v441_v7 = vpack.c.bf16 %v225_v1, %v225_v1 }
 0x213   :  { %7481 = vmatpush1.bf16.msra.mxu0 %v10219_v6  ;;  %v10300_v6 = vld [vmem:[%s14658_s1 + $0x1264] ss:$8 sps:$4 sm:$0xff]  }
 0x214   :  { %7482 = vmatprep.subr.bf16.mxu0 %v10227_v9  ;;  %v10303_v9 = vld [vmem:[%s14658_s1 + $0x1364] ss:$8 sps:$4 sm:$0xff]  }
 0x215   :  { %7522 = vmatpush1.bf16.msra.mxu1 %v10222_v51 }
 0x216   :  { %7523 = vmatprep.subr.bf16.mxu1 %v10230_v40 }
 0x217   :  { %7483 = vmatpush1.bf16.msra.mxu0 %v10225_v10 }
 0x218   :  { %7484 = vmatprep.subr.bf16.mxu0 %v10233_v12  ;;  %v10306_v12 = vld [vmem:[%s14658_s1 + $0x1254] ss:$8 sps:$4 sm:$0xff]  }
 0x219   :  { %7524 = vmatpush1.bf16.msra.mxu1 %v10228_v11 }
 0x21a   :  { %7525 = vmatprep.subr.bf16.mxu1 %v10236_v16 }
 0x21b   :  { %7485 = vmatpush1.bf16.msra.mxu0 %v10231_v13 }
 0x21c   :  { %7486 = vmatprep.subr.bf16.mxu0 %v10239_v19 }
 0x21d   :  { %7526 = vmatpush1.bf16.msra.mxu1 %v10234_v17 }
 0x21e   :  { %7527 = vmatprep.subr.bf16.mxu1 %v10242_v44 }
 0x21f   :  { %7487 = vmatpush1.bf16.msra.mxu0 %v10237_v21  ;;  %v10309_v21 = vld [vmem:[%s14658_s1 + $0x1354] ss:$8 sps:$4 sm:$0xff]  }
 0x220   :  { %7488 = vmatprep.subr.bf16.mxu0 %v10245_v23  ;;  %v10312_v23 = vld [vmem:[%s14658_s1 + $0x1244] ss:$8 sps:$4 sm:$0xff]  }
 0x221   :  { %7528 = vmatpush1.bf16.msra.mxu1 %v10240_v22 }
 0x222   :  { %7529 = vmatprep.subr.bf16.mxu1 %v10248_v25  ;;  %v10307_v25 = vld [vmem:[%s14658_s1 + $0x1350] ss:$8 sps:$4 sm:$0xff]  }
 0x223   :  { %7489 = vmatpush2.bf16.msra.mxu0 %v10243_v24 }
 0x224   :  { %7490 = vmatprep.subr.bf16.mxu0 %v10251_v26 }
 0x225   :  { %7530 = vmatpush2.bf16.msra.mxu1 %v10246_v47  ;;  %v10315_v47 = vld [vmem:[%s14658_s1 + $0x1344] ss:$8 sps:$4 sm:$0xff]  }
 0x226   :  { %7531 = vmatprep.subr.bf16.mxu1 %v10254_v29  ;;  %v10318_v29 = vld [vmem:[%s14658_s1 + $0x1234] ss:$8 sps:$4 sm:$0xff]  }
 0x227   :  { %7491 = vmatpush2.bf16.msra.mxu0 %v10249_v27  ;;  %v10310_v27 = vld [vmem:[%s14658_s1 + $0x1240] ss:$8 sps:$4 sm:$0xff]  }
 0x228   :  { %7492 = vmatprep.subr.bf16.mxu0 %v10257_v32  ;;  %v10321_v32 = vld [vmem:[%s14658_s1 + $0x1334] ss:$8 sps:$4 sm:$0xff]  }
 0x229   :  { %7532 = vmatpush2.bf16.msra.mxu1 %v10252_v5  ;;  %v10313_v5 = vld [vmem:[%s14658_s1 + $0x1340] ss:$8 sps:$4 sm:$0xff]  }
 0x22a   :  { %7533 = vmatprep.subr.bf16.mxu1 %v10260_v8  ;;  %v10324_v8 = vld [vmem:[%s14658_s1 + $0x1224] ss:$8 sps:$4 sm:$0xff]  }
 0x22b   :  { %7493 = vmatpush2.bf16.msra.mxu0 %v10255_v53  ;;  %v10316_v53 = vld [vmem:[%s14658_s1 + $0x1230] ss:$8 sps:$4 sm:$0xff]  }
 0x22c   :  { %7494 = vmatprep.subr.bf16.mxu0 %v10263_v37  ;;  %v10327_v37 = vld [vmem:[%s14658_s1 + $0x1324] ss:$8 sps:$4 sm:$0xff]  }
 0x22d   :  { %7534 = vmatpush2.bf16.msra.mxu1 %v10258_v35  ;;  %v10319_v35 = vld [vmem:[%s14658_s1 + $0x1330] ss:$8 sps:$4 sm:$0xff]  }
 0x22e   :  { %7535 = vmatprep.subr.bf16.mxu1 %v10266_v55  ;;  %v10330_v55 = vld [vmem:[%s14658_s1 + $0x1214] ss:$8 sps:$4 sm:$0xff]  }
 0x22f   :  { %7495 = vmatpush2.bf16.msra.mxu0 %v10261_v38  ;;  %v10322_v38 = vld [vmem:[%s14658_s1 + $0x1220] ss:$8 sps:$4 sm:$0xff]  }
 0x230   :  { %7496 = vmatprep.subr.bf16.mxu0 %v10269_v42  ;;  %v10333_v42 = vld [vmem:[%s14658_s1 + $0x1314] ss:$8 sps:$4 sm:$0xff]  }
 0x231   :  { %7536 = vmatpush2.bf16.msra.mxu1 %v10264_v41  ;;  %v10325_v41 = vld [vmem:[%s14658_s1 + $0x1320] ss:$8 sps:$4 sm:$0xff]  }
 0x232   :  { %7537 = vmatprep.subr.bf16.mxu1 %v10272_v15  ;;  %v10336_v15 = vld [vmem:[%s14658_s1 + $0x1204] ss:$8 sps:$4 sm:$0xff]  }
 0x233   :  { %7497 = vmatpush2.bf16.msra.mxu0 %v10267_v45  ;;  %v10328_v45 = vld [vmem:[%s14658_s1 + $0x1210] ss:$8 sps:$4 sm:$0xff]  }
 0x234   :  { %7498 = vmatprep.subr.bf16.mxu0 %v10275_v50  ;;  %v10339_v50 = vld [vmem:[%s14658_s1 + $0x1304] ss:$8 sps:$4 sm:$0xff]  }
 0x235   :  { %7538 = vmatpush2.bf16.msra.mxu1 %v10270_v49  ;;  %v10331_v49 = vld [vmem:[%s14658_s1 + $0x1310] ss:$8 sps:$4 sm:$0xff]  }
 0x236   :  { %7539 = vmatprep.subr.bf16.mxu1 %v10278_v4  ;;  %v10334_v4 = vld [vmem:[%s14658_s1 + $0x1200] ss:$8 sps:$4 sm:$0xff]  }
 0x237   :  { %7499 = vmatpush2.bf16.msra.mxu0 %v10273_v52  ;;  %v10337_v52 = vld [vmem:[%s14658_s1 + $0x1300] ss:$8 sps:$4 sm:$0xff]  }
 0x238   :  { %7500 = vmatprep.subr.bf16.mxu0 %v10281_v54  ;;  %v10345_v54 = vld [vmem:[%s14658_s1 + $0x13f4] ss:$8 sps:$4 sm:$0xff]  }
 0x239   :  { %7540 = vmatpush2.bf16.msra.mxu1 %v10276_v34  ;;  %v10340_v34 = vld [vmem:[%s14658_s1 + $0x12f0] ss:$8 sps:$4 sm:$0xff]  }
 0x23a   :  { %7541 = vmatprep.subr.bf16.mxu1 %v10284_v56  ;;  %v10343_v56 = vld [vmem:[%s14658_s1 + $0x13f0] ss:$8 sps:$4 sm:$0xff]  }
 0x23b   :  { %7501 = vmatpush2.bf16.msra.mxu0 %v10279_v39  ;;  %v10351_v39 = vld [vmem:[%s14658_s1 + $0x13e4] ss:$8 sps:$4 sm:$0xff]  }
 0x23c   :  { %7502 = vmatprep.subr.bf16.mxu0 %v10287_v58 }
 0x23d   :  { %7542 = vmatpush2.bf16.msra.mxu1 %v10282_v30 }
 0x23e   :  { %7543 = vmatprep.subr.bf16.mxu1 %v10290_v61 }
 0x23f   :  { %7503 = vmatpush2.bf16.msra.mxu0 %v10285_v14 }
 0x240   :  { %7554 = vmatprep.subr.bf16.mxu0 %v10293_v63 }
 0x241   :  { %7544 = vmatpush2.bf16.msra.mxu1 %v10288_v0 }
 0x242   :  { %v7260_v51 = vpop.f32.mrf.mxu0  ;;  %7505 = vmatmul.mubr.bf16.vlgmr.msra.gmra.mxu0 %v434_v18  ;;  %7595 = vmatprep.subr.bf16.mxu1 %v10297_v2 }
 0x243   :  { %v7261_v10 = vadd.f32 %v7260_v51, %v12821_v59  ;;  %7555 = vmatpush1.bf16.msra.mxu0 %v10291_v3  ;;  %7586 = vmatprep.mubr.bf16.mxu0 %v439_v43  ;;  %v10301_v59 = vld [vmem:[%s14658_s1 + $0x1360] ss:$8 sps:$4 sm:$0xff]  }
 0x244   :  { %v7262_v40 = vpop.f32.mrf.mxu0  ;;  %v7301_v11 = vpop.f32.mrf.mxu1  ;;  %7546 = vmatmul.mubr.bf16.vlgmr.msra.gmra.mxu1 %v436_v46  ;;  %7556 = vmatprep.subr.bf16.mxu0 %v10300_v6 }
 0x245   :  { %v7263_v13 = vadd.f32 %v7262_v40, %v12829_v62  ;;  %v13033_v16 = vadd.f32 %v7301_v11, %v7261_v10  ;;  %7596 = vmatpush1.bf16.msra.mxu1 %v10295_v28  ;;  %7627 = vmatprep.mubr.bf16.mxu1 %v441_v7  ;;  %v10304_v62 = vld [vmem:[%s14658_s1 + $0x1250] ss:$8 sps:$4 sm:$0xff]  }
 0x246   :  { %v7264_v17 = vpop.f32.mrf.mxu0  ;;  %v7303_v19 = vpop.f32.mrf.mxu1  ;;  %7597 = vmatprep.subr.bf16.mxu1 %v10303_v9 }
 0x247   :  { %v13041_v44 = vadd.f32 %v7303_v19, %v7263_v13  ;;  %7557 = vmatpush1.bf16.msra.mxu0 %v10298_v31 }
 0x248   :  { %v7265_v22 = vpop.f32.mrf.mxu0  ;;  %7558 = vmatprep.subr.bf16.mxu0 %v10306_v12  ;;  %v7305_v24 = vpop.f32.mrf.mxu1 }
 0x249   :  { %7598 = vmatpush1.bf16.msra.mxu1 %v10301_v59 }
 0x24a   :  { %7599 = vmatprep.subr.bf16.mxu1 %v10309_v21  ;;  %v7306_v26 = vpop.f32.mrf.mxu1 }
 0x24b   :  { %7559 = vmatpush1.bf16.msra.mxu0 %v10304_v62 }
 0x24c   :  { %7560 = vmatprep.subr.bf16.mxu0 %v10312_v23 }
 0x24d   :  { %7600 = vmatpush1.bf16.msra.mxu1 %v10307_v25 }
 0x24e   :  { %7601 = vmatprep.subr.bf16.mxu1 %v10315_v47 }
 0x24f   :  { %7561 = vmatpush1.bf16.msra.mxu0 %v10310_v27 }
 0x250   :  { %7562 = vmatprep.subr.bf16.mxu0 %v10318_v29 }
 0x251   :  { %7602 = vmatpush1.bf16.msra.mxu1 %v10313_v5 }
 0x252   :  { %7603 = vmatprep.subr.bf16.mxu1 %v10321_v32 }
 0x253   :  { %7563 = vmatpush1.bf16.msra.mxu0 %v10316_v53 }
 0x254   :  { %7564 = vmatprep.subr.bf16.mxu0 %v10324_v8 }
 0x255   :  { %7604 = vmatpush1.bf16.msra.mxu1 %v10319_v35 }
 0x256   :  { %7605 = vmatprep.subr.bf16.mxu1 %v10327_v37 }
 0x257   :  { %7565 = vmatpush1.bf16.msra.mxu0 %v10322_v38 }
 0x258   :  { %7566 = vmatprep.subr.bf16.mxu0 %v10330_v55 }
 0x259   :  { %7606 = vmatpush1.bf16.msra.mxu1 %v10325_v41 }
 0x25a   :  { %7607 = vmatprep.subr.bf16.mxu1 %v10333_v42 }
 0x25b   :  { %7567 = vmatpush1.bf16.msra.mxu0 %v10328_v45 }
 0x25c   :  { %7568 = vmatprep.subr.bf16.mxu0 %v10336_v15 }
 0x25d   :  { %7608 = vmatpush1.bf16.msra.mxu1 %v10331_v49 }
 0x25e   :  { %7609 = vmatprep.subr.bf16.mxu1 %v10339_v50 }
 0x25f   :  { %7569 = vmatpush1.bf16.msra.mxu0 %v10334_v4 }
 0x260   :  { %7570 = vmatprep.subr.bf16.mxu0 %v10342_v20 }
 0x261   :  { %7610 = vmatpush1.bf16.msra.mxu1 %v10337_v52 }
 0x262   :  { %7611 = vmatprep.subr.bf16.mxu1 %v10345_v54 }
 0x263   :  { %10 = vsyncpa [#allocation3], 0  ;;  %7571 = vmatpush2.bf16.msra.mxu0 %v10340_v34  ;;  %v10346_v58 = vld [vmem:[%s14658_s1 + $0x12e0] ss:$8 sps:$4 sm:$0xff]   ;;  %v10354_v30 = vld [vmem:[%s14658_s1 + $0x12d4] ss:$8 sps:$4 sm:$0xff]   ;;  %v438_v47 = vpack.c.bf16 %v12979_v57, %v12979_v57  ;;  %v440_v5 = vpack.c.bf16 %v12988_v60, %v12988_v60 }
 0x264   :  { %7572 = vmatprep.subr.bf16.mxu0 %v10348_v36  ;;  %v10349_v61 = vld [vmem:[%s14658_s1 + $0x13e0] ss:$8 sps:$4 sm:$0xff]   ;;  %v10357_v14 = vld [vmem:[%s14658_s1 + $0x13d4] ss:$8 sps:$4 sm:$0xff]   ;;  %v10352_v33 = vld [vmem:[%s14658_s1 + $0x12d0] ss:$8 sps:$4 sm:$0xff]  }
 0x265   :  { %7612 = vmatpush2.bf16.msra.mxu1 %v10343_v56  ;;  %v10360_v63 = vld [vmem:[%s14658_s1 + $0x12c4] ss:$8 sps:$4 sm:$0xff]   ;;  %v10355_v0 = vld [vmem:[%s14658_s1 + $0x13d0] ss:$8 sps:$4 sm:$0xff]   ;;  %v10358_v18 = vld [vmem:[%s14658_s1 + $0x12c0] ss:$8 sps:$4 sm:$0xff]  }
 0x266   :  { %7613 = vmatprep.subr.bf16.mxu1 %v10351_v39  ;;  %v10363_v1 = vld [vmem:[%s14658_s1 + $0x13c4] ss:$8 sps:$4 sm:$0xff]   ;;  %v10366_v2 = vld [vmem:[%s14658_s1 + $0x12b4] ss:$8 sps:$4 sm:$0xff]   ;;  %v10361_v3 = vld [vmem:[%s14658_s1 + $0x13c0] ss:$8 sps:$4 sm:$0xff]  }
 0x267   :  { %7573 = vmatpush2.bf16.msra.mxu0 %v10346_v58  ;;  %v10369_v43 = vld [vmem:[%s14658_s1 + $0x13b4] ss:$8 sps:$4 sm:$0xff]   ;;  %v10364_v46 = vld [vmem:[%s14658_s1 + $0x12b0] ss:$8 sps:$4 sm:$0xff]   ;;  %v10372_v6 = vld [vmem:[%s14658_s1 + $0x12a4] ss:$8 sps:$4 sm:$0xff]  }
 0x268   :  { %7574 = vmatprep.subr.bf16.mxu0 %v10354_v30  ;;  %v10367_v28 = vld [vmem:[%s14658_s1 + $0x13b0] ss:$8 sps:$4 sm:$0xff]   ;;  %v10375_v7 = vld [vmem:[%s14658_s1 + $0x13a4] ss:$8 sps:$4 sm:$0xff]   ;;  %v10370_v9 = vld [vmem:[%s14658_s1 + $0x12a0] ss:$8 sps:$4 sm:$0xff]  }
 0x269   :  { %7614 = vmatpush2.bf16.msra.mxu1 %v10349_v61  ;;  %v32_v51 = vld [vmem:[%s14657_s0 + $0x50] sm:$0xff]  ;;  %v10373_v31 = vld [vmem:[%s14658_s1 + $0x13a0] ss:$8 sps:$4 sm:$0xff]   ;;  %v10384_v59 = vld [vmem:[%s14658_s1 + $0x1284] ss:$8 sps:$4 sm:$0xff]   ;;  %vm8284_vm0 = vcmask 1043456  }
 0x26a   :  { %7615 = vmatprep.subr.bf16.mxu1 %v10357_v14  ;;  %v10378_v10 = vld [vmem:[%s14658_s1 + $0x1294] ss:$8 sps:$4 sm:$0xff]   ;;  %v226_v40 = vcombine.high %v32_v51, %v32_v51  ;;  %v10376_v12 = vld [vmem:[%s14658_s1 + $0x1290] ss:$8 sps:$4 sm:$0xff]   ;;  %v13194_v13 = vrot.slane %v32_v51, %v11219_v48  ;;  %v10387_v21 = vld [vmem:[%s14658_s1 + $0x1384] ss:$8 sps:$4 sm:$0xff]  }
 0x26b   :  { %7575 = vmatpush2.bf16.msra.mxu0 %v10352_v33  ;;  %v10381_v11 = vld [vmem:[%s14658_s1 + $0x1394] ss:$8 sps:$4 sm:$0xff]   ;;  %v10379_v17 = vld [vmem:[%s14658_s1 + $0x1390] ss:$8 sps:$4 sm:$0xff]   ;;  %v10382_v62 = vld [vmem:[%s14658_s1 + $0x1280] ss:$8 sps:$4 sm:$0xff]  }
 0x26c   :  { %7576 = vmatprep.subr.bf16.mxu0 %v10360_v63  ;;  %v13203_v19 = vrot.slane %v226_v40, %v11219_v48  ;;  %v241_v22 = vcombine.high %v13194_v13, %v13194_v13  ;;  %v10390_v23 = vld [vmem:[%s14658_s1 + $0x1474] ss:$8 sps:$4 sm:$0xff]   ;;  %v10385_v24 = vld [vmem:[%s14658_s1 + $0x1380] ss:$8 sps:$4 sm:$0xff]   ;;  %v10388_v27 = vld [vmem:[%s14658_s1 + $0x1470] ss:$8 sps:$4 sm:$0xff]  }
 0x26d   :  { %7616 = vmatpush2.bf16.msra.mxu1 %v10355_v0  ;;  %v10394_v26 = vld [vmem:[%s14658_s1 + $0x1574] ss:$8 sps:$4 sm:$0xff]   ;;  %v10397_v32 = vld [vmem:[%s14658_s1 + $0x1464] ss:$8 sps:$4 sm:$0xff]   ;;  %v10392_v57 = vld [vmem:[%s14658_s1 + $0x1570] ss:$8 sps:$4 sm:$0xff]  }
 0x26e   :  { %7617 = vmatprep.subr.bf16.mxu1 %v10363_v1  ;;  %v242_v25 = vcombine.high %v13203_v19, %v13203_v19  ;;  %v443_v29 = vpack.c.bf16 %v241_v22, %v241_v22  ;;  %v10400_v35 = vld [vmem:[%s14658_s1 + $0x1564] ss:$8 sps:$4 sm:$0xff]   ;;  %v10395_v60 = vld [vmem:[%s14658_s1 + $0x1460] ss:$8 sps:$4 sm:$0xff]   ;;  %v10403_v41 = vld [vmem:[%s14658_s1 + $0x1454] ss:$8 sps:$4 sm:$0xff]  }
 0x26f   :  { %7577 = vmatpush2.bf16.msra.mxu0 %v10358_v18  ;;  %v10406_v50 = vld [vmem:[%s14658_s1 + $0x1554] ss:$8 sps:$4 sm:$0xff]   ;;  %v10409_v52 = vld [vmem:[%s14658_s1 + $0x1444] ss:$8 sps:$4 sm:$0xff]   ;;  %v10404_v34 = vld [vmem:[%s14658_s1 + $0x1550] ss:$8 sps:$4 sm:$0xff]  }
 0x270   :  { %7578 = vmatprep.subr.bf16.mxu0 %v10366_v2  ;;  %v445_v53 = vpack.c.bf16 %v242_v25, %v242_v25  ;;  %v10412_v36 = vld [vmem:[%s14658_s1 + $0x1544] ss:$8 sps:$4 sm:$0xff]   ;;  %v10407_v39 = vld [vmem:[%s14658_s1 + $0x1440] ss:$8 sps:$4 sm:$0xff]   ;;  %v10415_v58 = vld [vmem:[%s14658_s1 + $0x1434] ss:$8 sps:$4 sm:$0xff]  }
 0x271   :  { %7618 = vmatpush2.bf16.msra.mxu1 %v10361_v3  ;;  %v10410_v30 = vld [vmem:[%s14658_s1 + $0x1540] ss:$8 sps:$4 sm:$0xff]   ;;  %v10418_v61 = vld [vmem:[%s14658_s1 + $0x1534] ss:$8 sps:$4 sm:$0xff]   ;;  %v10413_v14 = vld [vmem:[%s14658_s1 + $0x1430] ss:$8 sps:$4 sm:$0xff]  }
 0x272   :  { %7619 = vmatprep.subr.bf16.mxu1 %v10369_v43  ;;  %v10421_v33 = vld [vmem:[%s14658_s1 + $0x1424] ss:$8 sps:$4 sm:$0xff]   ;;  %v10416_v63 = vld [vmem:[%s14658_s1 + $0x1530] ss:$8 sps:$4 sm:$0xff]   ;;  %v10419_v1 = vld [vmem:[%s14658_s1 + $0x1420] ss:$8 sps:$4 sm:$0xff]  }
 0x273   :  { %7579 = vmatpush2.bf16.msra.mxu0 %v10364_v46  ;;  %v10424_v0 = vld [vmem:[%s14658_s1 + $0x1524] ss:$8 sps:$4 sm:$0xff]   ;;  %v10427_v18 = vld [vmem:[%s14658_s1 + $0x1414] ss:$8 sps:$4 sm:$0xff]   ;;  %v10422_v2 = vld [vmem:[%s14658_s1 + $0x1520] ss:$8 sps:$4 sm:$0xff]  }
 0x274   :  { %7580 = vmatprep.subr.bf16.mxu0 %v10372_v6  ;;  %v10430_v3 = vld [vmem:[%s14658_s1 + $0x1514] ss:$8 sps:$4 sm:$0xff]   ;;  %v10425_v43 = vld [vmem:[%s14658_s1 + $0x1410] ss:$8 sps:$4 sm:$0xff]   ;;  %v10433_v46 = vld [vmem:[%s14658_s1 + $0x1404] ss:$8 sps:$4 sm:$0xff]  }
 0x275   :  { %7620 = vmatpush2.bf16.msra.mxu1 %v10367_v28  ;;  %v10428_v6 = vld [vmem:[%s14658_s1 + $0x1510] ss:$8 sps:$4 sm:$0xff]   ;;  %v10436_v28 = vld [vmem:[%s14658_s1 + $0x1504] ss:$8 sps:$4 sm:$0xff]   ;;  %v10439_v51 = vld [vmem:[%s14658_s1 + $0x14f4] ss:$8 sps:$4 sm:$0xff]  }
 0x276   :  { %7621 = vmatprep.subr.bf16.mxu1 %v10375_v7  ;;  %v10431_v7 = vld [vmem:[%s14658_s1 + $0x1400] ss:$8 sps:$4 sm:$0xff]   ;;  %v10445_v40 = vld [vmem:[%s14658_s1 + $0x14e4] ss:$8 sps:$4 sm:$0xff]   ;;  %v10449_v22 = vld [vmem:[%s14658_s1 + $0x14d0] ss:$8 sps:$4 sm:$0xff]  }
 0x277   :  { %7581 = vmatpush2.bf16.msra.mxu0 %v10370_v9  ;;  %v10434_v9 = vld [vmem:[%s14658_s1 + $0x1500] ss:$8 sps:$4 sm:$0xff]   ;;  %v10460_v25 = vld [vmem:[%s14658_s1 + $0x15c4] ss:$8 sps:$4 sm:$0xff]   ;;  %vm8280_vm1 = vcmask 588800   ;;  %s11056_s24 = smov [#allocation2]  }
 0x278   :  { %7582 = vmatprep.subr.bf16.mxu0 %v10378_v10  ;;  %v10442_v10 = vld [vmem:[%s14658_s1 + $0x15f4] ss:$8 sps:$4 sm:$0xff]   ;;  %vm8328_vm2 = vcmask 33792  }
 0x279   :  { %7622 = vmatpush2.bf16.msra.mxu1 %v10373_v31  ;;  %v10437_v31 = vld [vmem:[%s14658_s1 + $0x14f0] ss:$8 sps:$4 sm:$0xff]  }
 0x27a   :  { %7623 = vmatprep.subr.bf16.mxu1 %v10381_v11  ;;  %v10440_v11 = vld [vmem:[%s14658_s1 + $0x15f0] ss:$8 sps:$4 sm:$0xff]  }
 0x27b   :  { %7583 = vmatpush2.bf16.msra.mxu0 %v10376_v12  ;;  %v10448_v12 = vld [vmem:[%s14658_s1 + $0x15e4] ss:$8 sps:$4 sm:$0xff]  }
 0x27c   :  { %7584 = vmatprep.subr.bf16.mxu0 %v10384_v59  ;;  %v10443_v59 = vld [vmem:[%s14658_s1 + $0x14e0] ss:$8 sps:$4 sm:$0xff]  }
 0x27d   :  { %7624 = vmatpush2.bf16.msra.mxu1 %v10379_v17  ;;  %v10451_v17 = vld [vmem:[%s14658_s1 + $0x14d4] ss:$8 sps:$4 sm:$0xff]  }
 0x27e   :  { %7625 = vmatprep.subr.bf16.mxu1 %v10387_v21  ;;  %v10446_v21 = vld [vmem:[%s14658_s1 + $0x15e0] ss:$8 sps:$4 sm:$0xff]  }
 0x27f   :  { %7585 = vmatpush2.bf16.msra.mxu0 %v10382_v62  ;;  %v10454_v62 = vld [vmem:[%s14658_s1 + $0x15d4] ss:$8 sps:$4 sm:$0xff]  }
 0x280   :  { %7636 = vmatprep.subr.bf16.mxu0 %v10390_v23  ;;  %v10457_v23 = vld [vmem:[%s14658_s1 + $0x14c4] ss:$8 sps:$4 sm:$0xff]  }
 0x281   :  { %7626 = vmatpush2.bf16.msra.mxu1 %v10385_v24  ;;  %v10452_v24 = vld [vmem:[%s14658_s1 + $0x15d0] ss:$8 sps:$4 sm:$0xff]  }
 0x282   :  { %v7342_v8 = vpop.f32.mrf.mxu0  ;;  %7587 = vmatmul.mubr.bf16.vlgmr.msra.gmra.mxu0 %v438_v47  ;;  %7677 = vmatprep.subr.bf16.mxu1 %v10394_v26  ;;  %v10455_v47 = vld [vmem:[%s14658_s1 + $0x14c0] ss:$8 sps:$4 sm:$0xff]   ;;  %v10463_v26 = vld [vmem:[%s14658_s1 + $0x14b4] ss:$8 sps:$4 sm:$0xff]  }
 0x283   :  { %v7343_v37 = vadd.f32 %v7342_v8, %v13033_v16  ;;  %7637 = vmatpush1.bf16.msra.mxu0 %v10388_v27  ;;  %7668 = vmatprep.mubr.bf16.mxu0 %v443_v29  ;;  %v10398_v16 = vld [vmem:[%s14658_s1 + $0x1560] ss:$8 sps:$4 sm:$0xff]   ;;  %v10466_v29 = vld [vmem:[%s14658_s1 + $0x15b4] ss:$8 sps:$4 sm:$0xff]  }
 0x284   :  { %v7344_v38 = vpop.f32.mrf.mxu0  ;;  %v7383_v55 = vpop.f32.mrf.mxu1  ;;  %7628 = vmatmul.mubr.bf16.vlgmr.msra.gmra.mxu1 %v440_v5  ;;  %7638 = vmatprep.subr.bf16.mxu0 %v10397_v32  ;;  %v10458_v27 = vld [vmem:[%s14658_s1 + $0x15c0] ss:$8 sps:$4 sm:$0xff]   ;;  %v10461_v5 = vld [vmem:[%s14658_s1 + $0x14b0] ss:$8 sps:$4 sm:$0xff]   ;;  %v10469_v32 = vld [vmem:[%s14658_s1 + $0x14a4] ss:$8 sps:$4 sm:$0xff]  }
 0x285   :  { %v7345_v42 = vadd.f32 %v7344_v38, %v13041_v44  ;;  %v13248_v45 = vadd.f32 %v7383_v55, %v7343_v37  ;;  %7678 = vmatpush1.bf16.msra.mxu1 %v10392_v57  ;;  %7709 = vmatprep.mubr.bf16.mxu1 %v445_v53  ;;  %v10401_v44 = vld [vmem:[%s14658_s1 + $0x1450] ss:$8 sps:$4 sm:$0xff]   ;;  %v10472_v53 = vld [vmem:[%s14658_s1 + $0x15a4] ss:$8 sps:$4 sm:$0xff]   ;;  %v10475_v37 = vld [vmem:[%s14658_s1 + $0x1494] ss:$8 sps:$4 sm:$0xff]  }
 0x286   :  { %v7346_v15 = vpop.f32.mrf.mxu0  ;;  %v7385_v49 = vpop.f32.mrf.mxu1  ;;  %7679 = vmatprep.subr.bf16.mxu1 %v10400_v35  ;;  %v10464_v57 = vld [vmem:[%s14658_s1 + $0x15b0] ss:$8 sps:$4 sm:$0xff]   ;;  %v10467_v35 = vld [vmem:[%s14658_s1 + $0x14a0] ss:$8 sps:$4 sm:$0xff]   ;;  %v10478_v55 = vld [vmem:[%s14658_s1 + $0x1594] ss:$8 sps:$4 sm:$0xff]  }
 0x287   :  { %v13256_v4 = vadd.f32 %v7385_v49, %v7345_v42  ;;  %7639 = vmatpush1.bf16.msra.mxu0 %v10395_v60  ;;  %v33_v8 = vld [vmem:[%s14657_s0 + $0x58] sm:$0xff]  ;;  %v10470_v60 = vld [vmem:[%s14658_s1 + $0x15a0] ss:$8 sps:$4 sm:$0xff]  }
 0x288   :  { %v7347_v20 = vpop.f32.mrf.mxu0  ;;  %7640 = vmatprep.subr.bf16.mxu0 %v10403_v41  ;;  %v7387_v54 = vpop.f32.mrf.mxu1  ;;  %v243_v38 = vcombine.high %v33_v8, %v33_v8  ;;  %v10473_v41 = vld [vmem:[%s14658_s1 + $0x1490] ss:$8 sps:$4 sm:$0xff]   ;;  %v13409_v42 = vrot.slane %v33_v8, %v11219_v48  ;;  %v10536_v8 = vld [vmem:[%s14658_s1 + $0x16f4] ss:$8 sps:$4 sm:$0xff]  }
 0x289   :  { %7680 = vmatpush1.bf16.msra.mxu1 %v10398_v16  ;;  %v10481_v16 = vld [vmem:[%s14658_s1 + $0x1484] ss:$8 sps:$4 sm:$0xff]   ;;  %v10476_v15 = vld [vmem:[%s14658_s1 + $0x1590] ss:$8 sps:$4 sm:$0xff]   ;;  %v10482_v54 = vld [vmem:[%s14658_s1 + $0x1580] ss:$8 sps:$4 sm:$0xff]  }
 0x28a   :  { %7681 = vmatprep.subr.bf16.mxu1 %v10406_v50  ;;  %v7388_v56 = vpop.f32.mrf.mxu1  ;;  %v13418_v49 = vrot.slane %v243_v38, %v11219_v48  ;;  %v10484_v50 = vld [vmem:[%s14658_s1 + $0x1584] ss:$8 sps:$4 sm:$0xff]   ;;  %v258_v20 = vcombine.high %v13409_v42, %v13409_v42 }
 0x28b   :  { %7641 = vmatpush1.bf16.msra.mxu0 %v10401_v44  ;;  %v10479_v44 = vld [vmem:[%s14658_s1 + $0x1480] ss:$8 sps:$4 sm:$0xff]   ;;  %v10491_v56 = vld [vmem:[%s14658_s1 + $0x1774] ss:$8 sps:$4 sm:$0xff]   ;;  %v10542_v38 = vld [vmem:[%s14658_s1 + $0x16e4] ss:$8 sps:$4 sm:$0xff]  }
 0x28c   :  { %7642 = vmatprep.subr.bf16.mxu0 %v10409_v52  ;;  %v10487_v52 = vld [vmem:[%s14658_s1 + $0x1674] ss:$8 sps:$4 sm:$0xff]  }
 0x28d   :  { %7682 = vmatpush1.bf16.msra.mxu1 %v10404_v34  ;;  %v259_v34 = vcombine.high %v13418_v49, %v13418_v49 }
 0x28e   :  { %7683 = vmatprep.subr.bf16.mxu1 %v10412_v36  ;;  %v442_v36 = vpack.c.bf16 %v13194_v13, %v13194_v13  ;;  %v10489_v13 = vld [vmem:[%s14658_s1 + $0x1770] ss:$8 sps:$4 sm:$0xff]  }
 0x28f   :  { %7643 = vmatpush1.bf16.msra.mxu0 %v10407_v39  ;;  %v10485_v39 = vld [vmem:[%s14658_s1 + $0x1670] ss:$8 sps:$4 sm:$0xff]  }
 0x290   :  { %7644 = vmatprep.subr.bf16.mxu0 %v10415_v58  ;;  %v447_v58 = vpack.c.bf16 %v258_v20, %v258_v20  ;;  %v10546_v20 = vld [vmem:[%s14658_s1 + $0x16d0] ss:$8 sps:$4 sm:$0xff]  }
 0x291   :  { %7684 = vmatpush1.bf16.msra.mxu1 %v10410_v30  ;;  %v444_v30 = vpack.c.bf16 %v13203_v19, %v13203_v19  ;;  %v10492_v19 = vld [vmem:[%s14658_s1 + $0x1660] ss:$8 sps:$4 sm:$0xff]  }
 0x292   :  { %7685 = vmatprep.subr.bf16.mxu1 %v10418_v61  ;;  %v10494_v61 = vld [vmem:[%s14658_s1 + $0x1664] ss:$8 sps:$4 sm:$0xff]  }
 0x293   :  { %7645 = vmatpush1.bf16.msra.mxu0 %v10413_v14  ;;  %v449_v14 = vpack.c.bf16 %v259_v34, %v259_v34  ;;  %v10557_v34 = vld [vmem:[%s14658_s1 + $0x17c4] ss:$8 sps:$4 sm:$0xff]  }
 0x294   :  { %7646 = vmatprep.subr.bf16.mxu0 %v10421_v33 }
 0x295   :  { %7686 = vmatpush1.bf16.msra.mxu1 %v10416_v63  ;;  %v10497_v63 = vld [vmem:[%s14658_s1 + $0x1764] ss:$8 sps:$4 sm:$0xff]  }
 0x296   :  { %7687 = vmatprep.subr.bf16.mxu1 %v10424_v0 }
 0x297   :  { %7647 = vmatpush1.bf16.msra.mxu0 %v10419_v1 }
 0x298   :  { %7648 = vmatprep.subr.bf16.mxu0 %v10427_v18 }
 0x299   :  { %7688 = vmatpush1.bf16.msra.mxu1 %v10422_v2  ;;  %v10500_v2 = vld [vmem:[%s14658_s1 + $0x1654] ss:$8 sps:$4 sm:$0xff]  }
 0x29a   :  { %7689 = vmatprep.subr.bf16.mxu1 %v10430_v3 }
 0x29b   :  { %7649 = vmatpush1.bf16.msra.mxu0 %v10425_v43 }
 0x29c   :  { %7650 = vmatprep.subr.bf16.mxu0 %v10433_v46 }
 0x29d   :  { %7690 = vmatpush1.bf16.msra.mxu1 %v10428_v6 }
 0x29e   :  { %7691 = vmatprep.subr.bf16.mxu1 %v10436_v28  ;;  %v10503_v28 = vld [vmem:[%s14658_s1 + $0x1754] ss:$8 sps:$4 sm:$0xff]  }
 0x29f   :  { %7651 = vmatpush1.bf16.msra.mxu0 %v10431_v7 }
 0x2a0   :  { %7652 = vmatprep.subr.bf16.mxu0 %v10439_v51 }
 0x2a1   :  { %7692 = vmatpush1.bf16.msra.mxu1 %v10434_v9  ;;  %v10506_v9 = vld [vmem:[%s14658_s1 + $0x1644] ss:$8 sps:$4 sm:$0xff]  }
 0x2a2   :  { %7693 = vmatprep.subr.bf16.mxu1 %v10442_v10 }
 0x2a3   :  { %7653 = vmatpush2.bf16.msra.mxu0 %v10437_v31  ;;  %v10501_v31 = vld [vmem:[%s14658_s1 + $0x1750] ss:$8 sps:$4 sm:$0xff]  }
 0x2a4   :  { %7654 = vmatprep.subr.bf16.mxu0 %v10445_v40  ;;  %v10509_v40 = vld [vmem:[%s14658_s1 + $0x1744] ss:$8 sps:$4 sm:$0xff]  }
 0x2a5   :  { %7694 = vmatpush2.bf16.msra.mxu1 %v10440_v11 }
 0x2a6   :  { %7695 = vmatprep.subr.bf16.mxu1 %v10448_v12  ;;  %v10504_v12 = vld [vmem:[%s14658_s1 + $0x1640] ss:$8 sps:$4 sm:$0xff]  }
 0x2a7   :  { %7655 = vmatpush2.bf16.msra.mxu0 %v10443_v59  ;;  %v10512_v59 = vld [vmem:[%s14658_s1 + $0x1634] ss:$8 sps:$4 sm:$0xff]  }
 0x2a8   :  { %7656 = vmatprep.subr.bf16.mxu0 %v10451_v17  ;;  %v10507_v17 = vld [vmem:[%s14658_s1 + $0x1740] ss:$8 sps:$4 sm:$0xff]  }
 0x2a9   :  { %7696 = vmatpush2.bf16.msra.mxu1 %v10446_v21  ;;  %v10515_v21 = vld [vmem:[%s14658_s1 + $0x1734] ss:$8 sps:$4 sm:$0xff]  }
 0x2aa   :  { %7697 = vmatprep.subr.bf16.mxu1 %v10454_v62  ;;  %v10510_v62 = vld [vmem:[%s14658_s1 + $0x1630] ss:$8 sps:$4 sm:$0xff]  }
 0x2ab   :  { %7657 = vmatpush2.bf16.msra.mxu0 %v10449_v22  ;;  %v10518_v22 = vld [vmem:[%s14658_s1 + $0x1624] ss:$8 sps:$4 sm:$0xff]  }
 0x2ac   :  { %7658 = vmatprep.subr.bf16.mxu0 %v10457_v23  ;;  %v10513_v23 = vld [vmem:[%s14658_s1 + $0x1730] ss:$8 sps:$4 sm:$0xff]  }
 0x2ad   :  { %7698 = vmatpush2.bf16.msra.mxu1 %v10452_v24  ;;  %v10521_v24 = vld [vmem:[%s14658_s1 + $0x1724] ss:$8 sps:$4 sm:$0xff]  }
 0x2ae   :  { %7699 = vmatprep.subr.bf16.mxu1 %v10460_v25  ;;  %v10516_v25 = vld [vmem:[%s14658_s1 + $0x1620] ss:$8 sps:$4 sm:$0xff]  }
 0x2af   :  { %7659 = vmatpush2.bf16.msra.mxu0 %v10455_v47  ;;  %v10524_v47 = vld [vmem:[%s14658_s1 + $0x1614] ss:$8 sps:$4 sm:$0xff]  }
 0x2b0   :  { %7660 = vmatprep.subr.bf16.mxu0 %v10463_v26  ;;  %v10519_v26 = vld [vmem:[%s14658_s1 + $0x1720] ss:$8 sps:$4 sm:$0xff]  }
 0x2b1   :  { %7700 = vmatpush2.bf16.msra.mxu1 %v10458_v27  ;;  %v10527_v27 = vld [vmem:[%s14658_s1 + $0x1714] ss:$8 sps:$4 sm:$0xff]  }
 0x2b2   :  { %7701 = vmatprep.subr.bf16.mxu1 %v10466_v29  ;;  %v10522_v29 = vld [vmem:[%s14658_s1 + $0x1610] ss:$8 sps:$4 sm:$0xff]  }
 0x2b3   :  { %7661 = vmatpush2.bf16.msra.mxu0 %v10461_v5  ;;  %v10530_v5 = vld [vmem:[%s14658_s1 + $0x1604] ss:$8 sps:$4 sm:$0xff]  }
 0x2b4   :  { %7662 = vmatprep.subr.bf16.mxu0 %v10469_v32  ;;  %v10525_v32 = vld [vmem:[%s14658_s1 + $0x1710] ss:$8 sps:$4 sm:$0xff]  }
 0x2b5   :  { %7702 = vmatpush2.bf16.msra.mxu1 %v10464_v57  ;;  %v10533_v57 = vld [vmem:[%s14658_s1 + $0x1704] ss:$8 sps:$4 sm:$0xff]  }
 0x2b6   :  { %7703 = vmatprep.subr.bf16.mxu1 %v10472_v53  ;;  %v10528_v53 = vld [vmem:[%s14658_s1 + $0x1600] ss:$8 sps:$4 sm:$0xff]  }
 0x2b7   :  { %7663 = vmatpush2.bf16.msra.mxu0 %v10467_v35  ;;  %v10531_v35 = vld [vmem:[%s14658_s1 + $0x1700] ss:$8 sps:$4 sm:$0xff]  }
 0x2b8   :  { %7664 = vmatprep.subr.bf16.mxu0 %v10475_v37  ;;  %v10539_v37 = vld [vmem:[%s14658_s1 + $0x17f4] ss:$8 sps:$4 sm:$0xff]  }
 0x2b9   :  { %7704 = vmatpush2.bf16.msra.mxu1 %v10470_v60  ;;  %v10534_v60 = vld [vmem:[%s14658_s1 + $0x16f0] ss:$8 sps:$4 sm:$0xff]  }
 0x2ba   :  { %7705 = vmatprep.subr.bf16.mxu1 %v10478_v55  ;;  %v10537_v55 = vld [vmem:[%s14658_s1 + $0x17f0] ss:$8 sps:$4 sm:$0xff]  }
 0x2bb   :  { %7665 = vmatpush2.bf16.msra.mxu0 %v10473_v41  ;;  %v10545_v41 = vld [vmem:[%s14658_s1 + $0x17e4] ss:$8 sps:$4 sm:$0xff]  }
 0x2bc   :  { %7666 = vmatprep.subr.bf16.mxu0 %v10481_v16  ;;  %v10540_v16 = vld [vmem:[%s14658_s1 + $0x16e0] ss:$8 sps:$4 sm:$0xff]  }
 0x2bd   :  { %7706 = vmatpush2.bf16.msra.mxu1 %v10476_v15  ;;  %v10548_v15 = vld [vmem:[%s14658_s1 + $0x16d4] ss:$8 sps:$4 sm:$0xff]  }
 0x2be   :  { %7707 = vmatprep.subr.bf16.mxu1 %v10484_v50  ;;  %v10543_v50 = vld [vmem:[%s14658_s1 + $0x17e0] ss:$8 sps:$4 sm:$0xff]  }
 0x2bf   :  { %7667 = vmatpush2.bf16.msra.mxu0 %v10479_v44  ;;  %v10551_v44 = vld [vmem:[%s14658_s1 + $0x17d4] ss:$8 sps:$4 sm:$0xff]  }
 0x2c0   :  { %7718 = vmatprep.subr.bf16.mxu0 %v10487_v52  ;;  %v10554_v52 = vld [vmem:[%s14658_s1 + $0x16c4] ss:$8 sps:$4 sm:$0xff]  }
 0x2c1   :  { %7708 = vmatpush2.bf16.msra.mxu1 %v10482_v54  ;;  %v10549_v54 = vld [vmem:[%s14658_s1 + $0x17d0] ss:$8 sps:$4 sm:$0xff]  }
 0x2c2   :  { %v7424_v33 = vpop.f32.mrf.mxu0  ;;  %7669 = vmatmul.mubr.bf16.vlgmr.msra.gmra.mxu0 %v442_v36  ;;  %7759 = vmatprep.subr.bf16.mxu1 %v10491_v56  ;;  %v10552_v36 = vld [vmem:[%s14658_s1 + $0x16c0] ss:$8 sps:$4 sm:$0xff]   ;;  %v10560_v56 = vld [vmem:[%s14658_s1 + $0x16b4] ss:$8 sps:$4 sm:$0xff]  }
 0x2c3   :  { %v7425_v0 = vadd.f32 %v7424_v33, %v13248_v45  ;;  %7719 = vmatpush1.bf16.msra.mxu0 %v10485_v39  ;;  %7750 = vmatprep.mubr.bf16.mxu0 %v447_v58  ;;  %v10495_v45 = vld [vmem:[%s14658_s1 + $0x1760] ss:$8 sps:$4 sm:$0xff]   ;;  %v10563_v58 = vld [vmem:[%s14658_s1 + $0x17b4] ss:$8 sps:$4 sm:$0xff]  }
 0x2c4   :  { %v7426_v1 = vpop.f32.mrf.mxu0  ;;  %v7465_v18 = vpop.f32.mrf.mxu1  ;;  %7710 = vmatmul.mubr.bf16.vlgmr.msra.gmra.mxu1 %v444_v30  ;;  %7720 = vmatprep.subr.bf16.mxu0 %v10494_v61  ;;  %v10555_v39 = vld [vmem:[%s14658_s1 + $0x17c0] ss:$8 sps:$4 sm:$0xff]   ;;  %v10558_v30 = vld [vmem:[%s14658_s1 + $0x16b0] ss:$8 sps:$4 sm:$0xff]   ;;  %v10566_v61 = vld [vmem:[%s14658_s1 + $0x16a4] ss:$8 sps:$4 sm:$0xff]  }
 0x2c5   :  { %v7427_v3 = vadd.f32 %v7426_v1, %v13256_v4  ;;  %v13463_v43 = vadd.f32 %v7465_v18, %v7425_v0  ;;  %7760 = vmatpush1.bf16.msra.mxu1 %v10489_v13  ;;  %7791 = vmatprep.mubr.bf16.mxu1 %v449_v14  ;;  %v10498_v4 = vld [vmem:[%s14658_s1 + $0x1650] ss:$8 sps:$4 sm:$0xff]   ;;  %v10569_v14 = vld [vmem:[%s14658_s1 + $0x17a4] ss:$8 sps:$4 sm:$0xff]   ;;  %v10572_v0 = vld [vmem:[%s14658_s1 + $0x1694] ss:$8 sps:$4 sm:$0xff]  }
 0x2c6   :  { %v7428_v46 = vpop.f32.mrf.mxu0  ;;  %v7467_v6 = vpop.f32.mrf.mxu1  ;;  %7761 = vmatprep.subr.bf16.mxu1 %v10497_v63  ;;  %v10561_v13 = vld [vmem:[%s14658_s1 + $0x17b0] ss:$8 sps:$4 sm:$0xff]   ;;  %v34_v33 = vld [vmem:[%s14657_s0 + $0x60] sm:$0xff]  ;;  %v10575_v18 = vld [vmem:[%s14658_s1 + $0x1794] ss:$8 sps:$4 sm:$0xff]  }
 0x2c7   :  { %v13471_v7 = vadd.f32 %v7467_v6, %v7427_v3  ;;  %7721 = vmatpush1.bf16.msra.mxu0 %v10492_v19  ;;  %v10564_v63 = vld [vmem:[%s14658_s1 + $0x16a0] ss:$8 sps:$4 sm:$0xff]   ;;  %v260_v1 = vcombine.high %v34_v33, %v34_v33  ;;  %v13624_v3 = vrot.slane %v34_v33, %v11219_v48  ;;  %v10573_v46 = vld [vmem:[%s14658_s1 + $0x1790] ss:$8 sps:$4 sm:$0xff]   ;;  %v10633_v33 = vld [vmem:[%s14658_s1 + $0x18f4] ss:$8 sps:$4 sm:$0xff]  }
 0x2c8   :  { %v7429_v51 = vpop.f32.mrf.mxu0  ;;  %7722 = vmatprep.subr.bf16.mxu0 %v10500_v2  ;;  %v7469_v10 = vpop.f32.mrf.mxu1  ;;  %v10567_v19 = vld [vmem:[%s14658_s1 + $0x17a0] ss:$8 sps:$4 sm:$0xff]   ;;  %v10570_v2 = vld [vmem:[%s14658_s1 + $0x1690] ss:$8 sps:$4 sm:$0xff]  }
 0x2c9   :  { %7762 = vmatpush1.bf16.msra.mxu1 %v10495_v45  ;;  %v10578_v45 = vld [vmem:[%s14658_s1 + $0x1684] ss:$8 sps:$4 sm:$0xff]   ;;  %v13633_v6 = vrot.slane %v260_v1, %v11219_v48  ;;  %v275_v51 = vcombine.high %v13624_v3, %v13624_v3  ;;  %v10579_v10 = vld [vmem:[%s14658_s1 + $0x1780] ss:$8 sps:$4 sm:$0xff]  }
 0x2ca   :  { %7763 = vmatprep.subr.bf16.mxu1 %v10503_v28  ;;  %v7470_v11 = vpop.f32.mrf.mxu1  ;;  %v10581_v28 = vld [vmem:[%s14658_s1 + $0x1784] ss:$8 sps:$4 sm:$0xff]  }
 0x2cb   :  { %7723 = vmatpush1.bf16.msra.mxu0 %v10498_v4  ;;  %v10576_v4 = vld [vmem:[%s14658_s1 + $0x1680] ss:$8 sps:$4 sm:$0xff]   ;;  %v10588_v11 = vld [vmem:[%s14658_s1 + $0x1974] ss:$8 sps:$4 sm:$0xff]   ;;  %v10639_v1 = vld [vmem:[%s14658_s1 + $0x18e4] ss:$8 sps:$4 sm:$0xff]  }
 0x2cc   :  { %7724 = vmatprep.subr.bf16.mxu0 %v10506_v9  ;;  %v10584_v9 = vld [vmem:[%s14658_s1 + $0x1874] ss:$8 sps:$4 sm:$0xff]  }
 0x2cd   :  { %7764 = vmatpush1.bf16.msra.mxu1 %v10501_v31  ;;  %v276_v31 = vcombine.high %v13633_v6, %v13633_v6 }
 0x2ce   :  { %7765 = vmatprep.subr.bf16.mxu1 %v10509_v40  ;;  %v446_v40 = vpack.c.bf16 %v13409_v42, %v13409_v42  ;;  %v10586_v42 = vld [vmem:[%s14658_s1 + $0x1970] ss:$8 sps:$4 sm:$0xff]  }
 0x2cf   :  { %7725 = vmatpush1.bf16.msra.mxu0 %v10504_v12  ;;  %v10582_v12 = vld [vmem:[%s14658_s1 + $0x1870] ss:$8 sps:$4 sm:$0xff]  }
 0x2d0   :  { %7726 = vmatprep.subr.bf16.mxu0 %v10512_v59  ;;  %v451_v59 = vpack.c.bf16 %v275_v51, %v275_v51  ;;  %v10643_v51 = vld [vmem:[%s14658_s1 + $0x18d0] ss:$8 sps:$4 sm:$0xff]  }
 0x2d1   :  { %7766 = vmatpush1.bf16.msra.mxu1 %v10507_v17  ;;  %v448_v17 = vpack.c.bf16 %v13418_v49, %v13418_v49  ;;  %v10589_v49 = vld [vmem:[%s14658_s1 + $0x1860] ss:$8 sps:$4 sm:$0xff]  }
 0x2d2   :  { %7767 = vmatprep.subr.bf16.mxu1 %v10515_v21  ;;  %v10591_v21 = vld [vmem:[%s14658_s1 + $0x1864] ss:$8 sps:$4 sm:$0xff]  }
 0x2d3   :  { %7727 = vmatpush1.bf16.msra.mxu0 %v10510_v62  ;;  %v453_v62 = vpack.c.bf16 %v276_v31, %v276_v31  ;;  %v10654_v31 = vld [vmem:[%s14658_s1 + $0x19c4] ss:$8 sps:$4 sm:$0xff]  }
 0x2d4   :  { %7728 = vmatprep.subr.bf16.mxu0 %v10518_v22 }
 0x2d5   :  { %7768 = vmatpush1.bf16.msra.mxu1 %v10513_v23  ;;  %v10594_v23 = vld [vmem:[%s14658_s1 + $0x1964] ss:$8 sps:$4 sm:$0xff]  }
 0x2d6   :  { %7769 = vmatprep.subr.bf16.mxu1 %v10521_v24 }
 0x2d7   :  { %7729 = vmatpush1.bf16.msra.mxu0 %v10516_v25 }
 0x2d8   :  { %7730 = vmatprep.subr.bf16.mxu0 %v10524_v47 }
 0x2d9   :  { %7770 = vmatpush1.bf16.msra.mxu1 %v10519_v26  ;;  %v10597_v26 = vld [vmem:[%s14658_s1 + $0x1854] ss:$8 sps:$4 sm:$0xff]  }
 0x2da   :  { %7771 = vmatprep.subr.bf16.mxu1 %v10527_v27 }
 0x2db   :  { %7731 = vmatpush1.bf16.msra.mxu0 %v10522_v29 }
 0x2dc   :  { %7732 = vmatprep.subr.bf16.mxu0 %v10530_v5 }
 0x2dd   :  { %7772 = vmatpush1.bf16.msra.mxu1 %v10525_v32 }
 0x2de   :  { %7773 = vmatprep.subr.bf16.mxu1 %v10533_v57  ;;  %v10600_v57 = vld [vmem:[%s14658_s1 + $0x1954] ss:$8 sps:$4 sm:$0xff]  }
 0x2df   :  { %7733 = vmatpush1.bf16.msra.mxu0 %v10528_v53 }
 0x2e0   :  { %7734 = vmatprep.subr.bf16.mxu0 %v10536_v8 }
 0x2e1   :  { %7774 = vmatpush1.bf16.msra.mxu1 %v10531_v35  ;;  %v10603_v35 = vld [vmem:[%s14658_s1 + $0x1844] ss:$8 sps:$4 sm:$0xff]  }
 0x2e2   :  { %7775 = vmatprep.subr.bf16.mxu1 %v10539_v37 }
 0x2e3   :  { %7735 = vmatpush2.bf16.msra.mxu0 %v10534_v60  ;;  %v10598_v60 = vld [vmem:[%s14658_s1 + $0x1950] ss:$8 sps:$4 sm:$0xff]  }
 0x2e4   :  { %7736 = vmatprep.subr.bf16.mxu0 %v10542_v38  ;;  %v10606_v38 = vld [vmem:[%s14658_s1 + $0x1944] ss:$8 sps:$4 sm:$0xff]  }
 0x2e5   :  { %7776 = vmatpush2.bf16.msra.mxu1 %v10537_v55 }
 0x2e6   :  { %7777 = vmatprep.subr.bf16.mxu1 %v10545_v41  ;;  %v10601_v41 = vld [vmem:[%s14658_s1 + $0x1840] ss:$8 sps:$4 sm:$0xff]  }
 0x2e7   :  { %7737 = vmatpush2.bf16.msra.mxu0 %v10540_v16  ;;  %v10609_v16 = vld [vmem:[%s14658_s1 + $0x1834] ss:$8 sps:$4 sm:$0xff]  }
 0x2e8   :  { %7738 = vmatprep.subr.bf16.mxu0 %v10548_v15  ;;  %v10604_v15 = vld [vmem:[%s14658_s1 + $0x1940] ss:$8 sps:$4 sm:$0xff]  }
 0x2e9   :  { %7778 = vmatpush2.bf16.msra.mxu1 %v10543_v50  ;;  %v10612_v50 = vld [vmem:[%s14658_s1 + $0x1934] ss:$8 sps:$4 sm:$0xff]  }
 0x2ea   :  { %7779 = vmatprep.subr.bf16.mxu1 %v10551_v44  ;;  %v10607_v44 = vld [vmem:[%s14658_s1 + $0x1830] ss:$8 sps:$4 sm:$0xff]  }
 0x2eb   :  { %7739 = vmatpush2.bf16.msra.mxu0 %v10546_v20  ;;  %v10615_v20 = vld [vmem:[%s14658_s1 + $0x1824] ss:$8 sps:$4 sm:$0xff]  }
 0x2ec   :  { %7740 = vmatprep.subr.bf16.mxu0 %v10554_v52  ;;  %v10610_v52 = vld [vmem:[%s14658_s1 + $0x1930] ss:$8 sps:$4 sm:$0xff]  }
 0x2ed   :  { %7780 = vmatpush2.bf16.msra.mxu1 %v10549_v54  ;;  %v10618_v54 = vld [vmem:[%s14658_s1 + $0x1924] ss:$8 sps:$4 sm:$0xff]  }
 0x2ee   :  { %7781 = vmatprep.subr.bf16.mxu1 %v10557_v34  ;;  %v10613_v34 = vld [vmem:[%s14658_s1 + $0x1820] ss:$8 sps:$4 sm:$0xff]  }
 0x2ef   :  { %7741 = vmatpush2.bf16.msra.mxu0 %v10552_v36  ;;  %v10621_v36 = vld [vmem:[%s14658_s1 + $0x1814] ss:$8 sps:$4 sm:$0xff]  }
 0x2f0   :  { %7742 = vmatprep.subr.bf16.mxu0 %v10560_v56  ;;  %v10616_v56 = vld [vmem:[%s14658_s1 + $0x1920] ss:$8 sps:$4 sm:$0xff]  }
 0x2f1   :  { %7782 = vmatpush2.bf16.msra.mxu1 %v10555_v39  ;;  %v10624_v39 = vld [vmem:[%s14658_s1 + $0x1914] ss:$8 sps:$4 sm:$0xff]  }
 0x2f2   :  { %7783 = vmatprep.subr.bf16.mxu1 %v10563_v58  ;;  %v10619_v58 = vld [vmem:[%s14658_s1 + $0x1810] ss:$8 sps:$4 sm:$0xff]  }
 0x2f3   :  { %7743 = vmatpush2.bf16.msra.mxu0 %v10558_v30  ;;  %v10627_v30 = vld [vmem:[%s14658_s1 + $0x1804] ss:$8 sps:$4 sm:$0xff]  }
 0x2f4   :  { %7744 = vmatprep.subr.bf16.mxu0 %v10566_v61  ;;  %v10622_v61 = vld [vmem:[%s14658_s1 + $0x1910] ss:$8 sps:$4 sm:$0xff]  }
 0x2f5   :  { %7784 = vmatpush2.bf16.msra.mxu1 %v10561_v13  ;;  %v10630_v13 = vld [vmem:[%s14658_s1 + $0x1904] ss:$8 sps:$4 sm:$0xff]  }
 0x2f6   :  { %7785 = vmatprep.subr.bf16.mxu1 %v10569_v14  ;;  %v10625_v14 = vld [vmem:[%s14658_s1 + $0x1800] ss:$8 sps:$4 sm:$0xff]  }
 0x2f7   :  { %7745 = vmatpush2.bf16.msra.mxu0 %v10564_v63  ;;  %v10628_v63 = vld [vmem:[%s14658_s1 + $0x1900] ss:$8 sps:$4 sm:$0xff]  }
 0x2f8   :  { %7746 = vmatprep.subr.bf16.mxu0 %v10572_v0  ;;  %v10636_v0 = vld [vmem:[%s14658_s1 + $0x19f4] ss:$8 sps:$4 sm:$0xff]  }
 0x2f9   :  { %7786 = vmatpush2.bf16.msra.mxu1 %v10567_v19  ;;  %v10631_v19 = vld [vmem:[%s14658_s1 + $0x18f0] ss:$8 sps:$4 sm:$0xff]  }
 0x2fa   :  { %7787 = vmatprep.subr.bf16.mxu1 %v10575_v18  ;;  %v10634_v18 = vld [vmem:[%s14658_s1 + $0x19f0] ss:$8 sps:$4 sm:$0xff]  }
 0x2fb   :  { %7747 = vmatpush2.bf16.msra.mxu0 %v10570_v2  ;;  %v10642_v2 = vld [vmem:[%s14658_s1 + $0x19e4] ss:$8 sps:$4 sm:$0xff]  }
 0x2fc   :  { %7748 = vmatprep.subr.bf16.mxu0 %v10578_v45  ;;  %v10637_v45 = vld [vmem:[%s14658_s1 + $0x18e0] ss:$8 sps:$4 sm:$0xff]  }
 0x2fd   :  { %7788 = vmatpush2.bf16.msra.mxu1 %v10573_v46  ;;  %v10645_v46 = vld [vmem:[%s14658_s1 + $0x18d4] ss:$8 sps:$4 sm:$0xff]  }
 0x2fe   :  { %7789 = vmatprep.subr.bf16.mxu1 %v10581_v28  ;;  %v10640_v28 = vld [vmem:[%s14658_s1 + $0x19e0] ss:$8 sps:$4 sm:$0xff]  }
 0x2ff   :  { %7749 = vmatpush2.bf16.msra.mxu0 %v10576_v4  ;;  %v10648_v4 = vld [vmem:[%s14658_s1 + $0x19d4] ss:$8 sps:$4 sm:$0xff]  }
 0x300   :  { %7800 = vmatprep.subr.bf16.mxu0 %v10584_v9  ;;  %v10651_v9 = vld [vmem:[%s14658_s1 + $0x18c4] ss:$8 sps:$4 sm:$0xff]  }
 0x301   :  { %7790 = vmatpush2.bf16.msra.mxu1 %v10579_v10  ;;  %v10646_v10 = vld [vmem:[%s14658_s1 + $0x19d0] ss:$8 sps:$4 sm:$0xff]  }
 0x302   :  { %v7506_v22 = vpop.f32.mrf.mxu0  ;;  %7751 = vmatmul.mubr.bf16.vlgmr.msra.gmra.mxu0 %v446_v40  ;;  %7841 = vmatprep.subr.bf16.mxu1 %v10588_v11  ;;  %v10649_v40 = vld [vmem:[%s14658_s1 + $0x18c0] ss:$8 sps:$4 sm:$0xff]   ;;  %v10657_v11 = vld [vmem:[%s14658_s1 + $0x18b4] ss:$8 sps:$4 sm:$0xff]  }
 0x303   :  { %v7507_v24 = vadd.f32 %v7506_v22, %v13463_v43  ;;  %7801 = vmatpush1.bf16.msra.mxu0 %v10582_v12  ;;  %7832 = vmatprep.mubr.bf16.mxu0 %v451_v59  ;;  %v10592_v43 = vld [vmem:[%s14658_s1 + $0x1960] ss:$8 sps:$4 sm:$0xff]   ;;  %v10660_v59 = vld [vmem:[%s14658_s1 + $0x19b4] ss:$8 sps:$4 sm:$0xff]  }
 0x304   :  { %v7508_v25 = vpop.f32.mrf.mxu0  ;;  %v7547_v47 = vpop.f32.mrf.mxu1  ;;  %7792 = vmatmul.mubr.bf16.vlgmr.msra.gmra.mxu1 %v448_v17  ;;  %7802 = vmatprep.subr.bf16.mxu0 %v10591_v21  ;;  %v10652_v12 = vld [vmem:[%s14658_s1 + $0x19c0] ss:$8 sps:$4 sm:$0xff]   ;;  %v10655_v17 = vld [vmem:[%s14658_s1 + $0x18b0] ss:$8 sps:$4 sm:$0xff]   ;;  %v10663_v21 = vld [vmem:[%s14658_s1 + $0x18a4] ss:$8 sps:$4 sm:$0xff]  }
 0x305   :  { %v7509_v27 = vadd.f32 %v7508_v25, %v13471_v7  ;;  %v13678_v29 = vadd.f32 %v7547_v47, %v7507_v24  ;;  %7842 = vmatpush1.bf16.msra.mxu1 %v10586_v42  ;;  %7873 = vmatprep.mubr.bf16.mxu1 %v453_v62  ;;  %v10595_v7 = vld [vmem:[%s14658_s1 + $0x1850] ss:$8 sps:$4 sm:$0xff]   ;;  %v10666_v62 = vld [vmem:[%s14658_s1 + $0x19a4] ss:$8 sps:$4 sm:$0xff]   ;;  %v10669_v24 = vld [vmem:[%s14658_s1 + $0x1894] ss:$8 sps:$4 sm:$0xff]  }
 0x306   :  { %v7510_v5 = vpop.f32.mrf.mxu0  ;;  %v7549_v32 = vpop.f32.mrf.mxu1  ;;  %7843 = vmatprep.subr.bf16.mxu1 %v10594_v23  ;;  %v10658_v42 = vld [vmem:[%s14658_s1 + $0x19b0] ss:$8 sps:$4 sm:$0xff]   ;;  %v35_v22 = vld [vmem:[%s14657_s0 + $0x68] sm:$0xff]  ;;  %v10672_v47 = vld [vmem:[%s14658_s1 + $0x1994] ss:$8 sps:$4 sm:$0xff]  }
 0x307   :  { %v13686_v53 = vadd.f32 %v7549_v32, %v7509_v27  ;;  %7803 = vmatpush1.bf16.msra.mxu0 %v10589_v49  ;;  %v10661_v23 = vld [vmem:[%s14658_s1 + $0x18a0] ss:$8 sps:$4 sm:$0xff]   ;;  %v277_v25 = vcombine.high %v35_v22, %v35_v22  ;;  %v13839_v27 = vrot.slane %v35_v22, %v11219_v48  ;;  %v10670_v5 = vld [vmem:[%s14658_s1 + $0x1990] ss:$8 sps:$4 sm:$0xff]   ;;  %v10730_v22 = vld [vmem:[%s14658_s1 + $0x1af4] ss:$8 sps:$4 sm:$0xff]  }
 0x308   :  { %v7511_v8 = vpop.f32.mrf.mxu0  ;;  %7804 = vmatprep.subr.bf16.mxu0 %v10597_v26  ;;  %v7551_v37 = vpop.f32.mrf.mxu1  ;;  %v10664_v49 = vld [vmem:[%s14658_s1 + $0x19a0] ss:$8 sps:$4 sm:$0xff]   ;;  %v10667_v26 = vld [vmem:[%s14658_s1 + $0x1890] ss:$8 sps:$4 sm:$0xff]  }
 0x309   :  { %7844 = vmatpush1.bf16.msra.mxu1 %v10592_v43  ;;  %v10675_v43 = vld [vmem:[%s14658_s1 + $0x1884] ss:$8 sps:$4 sm:$0xff]   ;;  %v13848_v32 = vrot.slane %v277_v25, %v11219_v48  ;;  %v292_v8 = vcombine.high %v13839_v27, %v13839_v27  ;;  %v10676_v37 = vld [vmem:[%s14658_s1 + $0x1980] ss:$8 sps:$4 sm:$0xff]  }
 0x30a   :  { %7845 = vmatprep.subr.bf16.mxu1 %v10600_v57  ;;  %v7552_v55 = vpop.f32.mrf.mxu1  ;;  %v10678_v57 = vld [vmem:[%s14658_s1 + $0x1984] ss:$8 sps:$4 sm:$0xff]  }
 0x30b   :  { %7805 = vmatpush1.bf16.msra.mxu0 %v10595_v7  ;;  %v10673_v7 = vld [vmem:[%s14658_s1 + $0x1880] ss:$8 sps:$4 sm:$0xff]   ;;  %v10685_v55 = vld [vmem:[%s14658_s1 + $0x1b74] ss:$8 sps:$4 sm:$0xff]   ;;  %v10736_v25 = vld [vmem:[%s14658_s1 + $0x1ae4] ss:$8 sps:$4 sm:$0xff]  }
 0x30c   :  { %7806 = vmatprep.subr.bf16.mxu0 %v10603_v35  ;;  %v10681_v35 = vld [vmem:[%s14658_s1 + $0x1a74] ss:$8 sps:$4 sm:$0xff]  }
 0x30d   :  { %7846 = vmatpush1.bf16.msra.mxu1 %v10598_v60  ;;  %v293_v60 = vcombine.high %v13848_v32, %v13848_v32 }
 0x30e   :  { %7847 = vmatprep.subr.bf16.mxu1 %v10606_v38  ;;  %v450_v38 = vpack.c.bf16 %v13624_v3, %v13624_v3  ;;  %v10683_v3 = vld [vmem:[%s14658_s1 + $0x1b70] ss:$8 sps:$4 sm:$0xff]  }
 0x30f   :  { %7807 = vmatpush1.bf16.msra.mxu0 %v10601_v41  ;;  %v10679_v41 = vld [vmem:[%s14658_s1 + $0x1a70] ss:$8 sps:$4 sm:$0xff]  }
 0x310   :  { %7808 = vmatprep.subr.bf16.mxu0 %v10609_v16  ;;  %v455_v16 = vpack.c.bf16 %v292_v8, %v292_v8  ;;  %v10740_v8 = vld [vmem:[%s14658_s1 + $0x1ad0] ss:$8 sps:$4 sm:$0xff]  }
 0x311   :  { %7848 = vmatpush1.bf16.msra.mxu1 %v10604_v15  ;;  %v452_v15 = vpack.c.bf16 %v13633_v6, %v13633_v6  ;;  %v10686_v6 = vld [vmem:[%s14658_s1 + $0x1a60] ss:$8 sps:$4 sm:$0xff]  }
 0x312   :  { %7849 = vmatprep.subr.bf16.mxu1 %v10612_v50  ;;  %v10688_v50 = vld [vmem:[%s14658_s1 + $0x1a64] ss:$8 sps:$4 sm:$0xff]  }
 0x313   :  { %7809 = vmatpush1.bf16.msra.mxu0 %v10607_v44  ;;  %v457_v44 = vpack.c.bf16 %v293_v60, %v293_v60  ;;  %v10751_v60 = vld [vmem:[%s14658_s1 + $0x1bc4] ss:$8 sps:$4 sm:$0xff]  }
 0x314   :  { %7810 = vmatprep.subr.bf16.mxu0 %v10615_v20 }
 0x315   :  { %7850 = vmatpush1.bf16.msra.mxu1 %v10610_v52  ;;  %v10691_v52 = vld [vmem:[%s14658_s1 + $0x1b64] ss:$8 sps:$4 sm:$0xff]  }
 0x316   :  { %7851 = vmatprep.subr.bf16.mxu1 %v10618_v54 }
 0x317   :  { %7811 = vmatpush1.bf16.msra.mxu0 %v10613_v34 }
 0x318   :  { %7812 = vmatprep.subr.bf16.mxu0 %v10621_v36 }
 0x319   :  { %7852 = vmatpush1.bf16.msra.mxu1 %v10616_v56  ;;  %v10694_v56 = vld [vmem:[%s14658_s1 + $0x1a54] ss:$8 sps:$4 sm:$0xff]  }
 0x31a   :  { %7853 = vmatprep.subr.bf16.mxu1 %v10624_v39 }
 0x31b   :  { %7813 = vmatpush1.bf16.msra.mxu0 %v10619_v58 }
 0x31c   :  { %7814 = vmatprep.subr.bf16.mxu0 %v10627_v30 }
 0x31d   :  { %7854 = vmatpush1.bf16.msra.mxu1 %v10622_v61 }
 0x31e   :  { %7855 = vmatprep.subr.bf16.mxu1 %v10630_v13  ;;  %v10697_v13 = vld [vmem:[%s14658_s1 + $0x1b54] ss:$8 sps:$4 sm:$0xff]  }
 0x31f   :  { %7815 = vmatpush1.bf16.msra.mxu0 %v10625_v14 }
 0x320   :  { %7816 = vmatprep.subr.bf16.mxu0 %v10633_v33 }
 0x321   :  { %7856 = vmatpush1.bf16.msra.mxu1 %v10628_v63  ;;  %v10700_v63 = vld [vmem:[%s14658_s1 + $0x1a44] ss:$8 sps:$4 sm:$0xff]  }
 0x322   :  { %7857 = vmatprep.subr.bf16.mxu1 %v10636_v0 }
 0x323   :  { %7817 = vmatpush2.bf16.msra.mxu0 %v10631_v19  ;;  %v10695_v19 = vld [vmem:[%s14658_s1 + $0x1b50] ss:$8 sps:$4 sm:$0xff]  }
 0x324   :  { %7818 = vmatprep.subr.bf16.mxu0 %v10639_v1  ;;  %v10703_v1 = vld [vmem:[%s14658_s1 + $0x1b44] ss:$8 sps:$4 sm:$0xff]  }
 0x325   :  { %7858 = vmatpush2.bf16.msra.mxu1 %v10634_v18 }
 0x326   :  { %7859 = vmatprep.subr.bf16.mxu1 %v10642_v2  ;;  %v10698_v2 = vld [vmem:[%s14658_s1 + $0x1a40] ss:$8 sps:$4 sm:$0xff]  }
 0x327   :  { %7819 = vmatpush2.bf16.msra.mxu0 %v10637_v45  ;;  %v10706_v45 = vld [vmem:[%s14658_s1 + $0x1a34] ss:$8 sps:$4 sm:$0xff]  }
 0x328   :  { %7820 = vmatprep.subr.bf16.mxu0 %v10645_v46  ;;  %v10701_v46 = vld [vmem:[%s14658_s1 + $0x1b40] ss:$8 sps:$4 sm:$0xff]  }
 0x329   :  { %7860 = vmatpush2.bf16.msra.mxu1 %v10640_v28  ;;  %v10709_v28 = vld [vmem:[%s14658_s1 + $0x1b34] ss:$8 sps:$4 sm:$0xff]  }
 0x32a   :  { %7861 = vmatprep.subr.bf16.mxu1 %v10648_v4  ;;  %v10704_v4 = vld [vmem:[%s14658_s1 + $0x1a30] ss:$8 sps:$4 sm:$0xff]  }
 0x32b   :  { %7821 = vmatpush2.bf16.msra.mxu0 %v10643_v51  ;;  %v10712_v51 = vld [vmem:[%s14658_s1 + $0x1a24] ss:$8 sps:$4 sm:$0xff]  }
 0x32c   :  { %7822 = vmatprep.subr.bf16.mxu0 %v10651_v9  ;;  %v10707_v9 = vld [vmem:[%s14658_s1 + $0x1b30] ss:$8 sps:$4 sm:$0xff]  }
 0x32d   :  { %7862 = vmatpush2.bf16.msra.mxu1 %v10646_v10  ;;  %v10715_v10 = vld [vmem:[%s14658_s1 + $0x1b24] ss:$8 sps:$4 sm:$0xff]  }
 0x32e   :  { %7863 = vmatprep.subr.bf16.mxu1 %v10654_v31  ;;  %v10710_v31 = vld [vmem:[%s14658_s1 + $0x1a20] ss:$8 sps:$4 sm:$0xff]  }
 0x32f   :  { %7823 = vmatpush2.bf16.msra.mxu0 %v10649_v40  ;;  %v10718_v40 = vld [vmem:[%s14658_s1 + $0x1a14] ss:$8 sps:$4 sm:$0xff]  }
 0x330   :  { %7824 = vmatprep.subr.bf16.mxu0 %v10657_v11  ;;  %v10713_v11 = vld [vmem:[%s14658_s1 + $0x1b20] ss:$8 sps:$4 sm:$0xff]  }
 0x331   :  { %7864 = vmatpush2.bf16.msra.mxu1 %v10652_v12  ;;  %v10721_v12 = vld [vmem:[%s14658_s1 + $0x1b14] ss:$8 sps:$4 sm:$0xff]  }
 0x332   :  { %7865 = vmatprep.subr.bf16.mxu1 %v10660_v59  ;;  %v10716_v59 = vld [vmem:[%s14658_s1 + $0x1a10] ss:$8 sps:$4 sm:$0xff]  }
 0x333   :  { %7825 = vmatpush2.bf16.msra.mxu0 %v10655_v17  ;;  %v10724_v17 = vld [vmem:[%s14658_s1 + $0x1a04] ss:$8 sps:$4 sm:$0xff]  }
 0x334   :  { %7826 = vmatprep.subr.bf16.mxu0 %v10663_v21  ;;  %v10719_v21 = vld [vmem:[%s14658_s1 + $0x1b10] ss:$8 sps:$4 sm:$0xff]  }
 0x335   :  { %7866 = vmatpush2.bf16.msra.mxu1 %v10658_v42  ;;  %v10727_v42 = vld [vmem:[%s14658_s1 + $0x1b04] ss:$8 sps:$4 sm:$0xff]  }
 0x336   :  { %7867 = vmatprep.subr.bf16.mxu1 %v10666_v62  ;;  %v10722_v62 = vld [vmem:[%s14658_s1 + $0x1a00] ss:$8 sps:$4 sm:$0xff]  }
 0x337   :  { %7827 = vmatpush2.bf16.msra.mxu0 %v10661_v23  ;;  %v10725_v23 = vld [vmem:[%s14658_s1 + $0x1b00] ss:$8 sps:$4 sm:$0xff]  }
 0x338   :  { %7828 = vmatprep.subr.bf16.mxu0 %v10669_v24  ;;  %v10733_v24 = vld [vmem:[%s14658_s1 + $0x1bf4] ss:$8 sps:$4 sm:$0xff]  }
 0x339   :  { %7868 = vmatpush2.bf16.msra.mxu1 %v10664_v49  ;;  %v10728_v49 = vld [vmem:[%s14658_s1 + $0x1af0] ss:$8 sps:$4 sm:$0xff]  }
 0x33a   :  { %7869 = vmatprep.subr.bf16.mxu1 %v10672_v47  ;;  %v10731_v47 = vld [vmem:[%s14658_s1 + $0x1bf0] ss:$8 sps:$4 sm:$0xff]  }
 0x33b   :  { %7829 = vmatpush2.bf16.msra.mxu0 %v10667_v26  ;;  %v10739_v26 = vld [vmem:[%s14658_s1 + $0x1be4] ss:$8 sps:$4 sm:$0xff]  }
 0x33c   :  { %7830 = vmatprep.subr.bf16.mxu0 %v10675_v43  ;;  %v10734_v43 = vld [vmem:[%s14658_s1 + $0x1ae0] ss:$8 sps:$4 sm:$0xff]  }
 0x33d   :  { %7870 = vmatpush2.bf16.msra.mxu1 %v10670_v5  ;;  %v10742_v5 = vld [vmem:[%s14658_s1 + $0x1ad4] ss:$8 sps:$4 sm:$0xff]  }
 0x33e   :  { %7871 = vmatprep.subr.bf16.mxu1 %v10678_v57  ;;  %v10737_v57 = vld [vmem:[%s14658_s1 + $0x1be0] ss:$8 sps:$4 sm:$0xff]  }
 0x33f   :  { %7831 = vmatpush2.bf16.msra.mxu0 %v10673_v7  ;;  %v10745_v7 = vld [vmem:[%s14658_s1 + $0x1bd4] ss:$8 sps:$4 sm:$0xff]  }
 0x340   :  { %7882 = vmatprep.subr.bf16.mxu0 %v10681_v35  ;;  %v10748_v35 = vld [vmem:[%s14658_s1 + $0x1ac4] ss:$8 sps:$4 sm:$0xff]  }
 0x341   :  { %7872 = vmatpush2.bf16.msra.mxu1 %v10676_v37  ;;  %v10743_v37 = vld [vmem:[%s14658_s1 + $0x1bd0] ss:$8 sps:$4 sm:$0xff]  }
 0x342   :  { %v7588_v20 = vpop.f32.mrf.mxu0  ;;  %7833 = vmatmul.mubr.bf16.vlgmr.msra.gmra.mxu0 %v450_v38  ;;  %7923 = vmatprep.subr.bf16.mxu1 %v10685_v55  ;;  %v10746_v38 = vld [vmem:[%s14658_s1 + $0x1ac0] ss:$8 sps:$4 sm:$0xff]   ;;  %v10754_v55 = vld [vmem:[%s14658_s1 + $0x1ab4] ss:$8 sps:$4 sm:$0xff]  }
 0x343   :  { %v7589_v54 = vadd.f32 %v7588_v20, %v13678_v29  ;;  %7883 = vmatpush1.bf16.msra.mxu0 %v10679_v41  ;;  %7914 = vmatprep.mubr.bf16.mxu0 %v455_v16  ;;  %v10689_v29 = vld [vmem:[%s14658_s1 + $0x1b60] ss:$8 sps:$4 sm:$0xff]   ;;  %v10757_v16 = vld [vmem:[%s14658_s1 + $0x1bb4] ss:$8 sps:$4 sm:$0xff]  }
 0x344   :  { %v7590_v34 = vpop.f32.mrf.mxu0  ;;  %v7629_v36 = vpop.f32.mrf.mxu1  ;;  %7874 = vmatmul.mubr.bf16.vlgmr.msra.gmra.mxu1 %v452_v15  ;;  %7884 = vmatprep.subr.bf16.mxu0 %v10688_v50  ;;  %v10749_v41 = vld [vmem:[%s14658_s1 + $0x1bc0] ss:$8 sps:$4 sm:$0xff]   ;;  %v10752_v15 = vld [vmem:[%s14658_s1 + $0x1ab0] ss:$8 sps:$4 sm:$0xff]   ;;  %v10760_v50 = vld [vmem:[%s14658_s1 + $0x1aa4] ss:$8 sps:$4 sm:$0xff]  }
 0x345   :  { %v7591_v39 = vadd.f32 %v7590_v34, %v13686_v53  ;;  %v13893_v58 = vadd.f32 %v7629_v36, %v7589_v54  ;;  %7924 = vmatpush1.bf16.msra.mxu1 %v10683_v3  ;;  %7955 = vmatprep.mubr.bf16.mxu1 %v457_v44  ;;  %v10692_v53 = vld [vmem:[%s14658_s1 + $0x1a50] ss:$8 sps:$4 sm:$0xff]   ;;  %v10763_v44 = vld [vmem:[%s14658_s1 + $0x1ba4] ss:$8 sps:$4 sm:$0xff]   ;;  %v10766_v54 = vld [vmem:[%s14658_s1 + $0x1a94] ss:$8 sps:$4 sm:$0xff]  }
 0x346   :  { %v7592_v30 = vpop.f32.mrf.mxu0  ;;  %v7631_v61 = vpop.f32.mrf.mxu1  ;;  %7925 = vmatprep.subr.bf16.mxu1 %v10691_v52  ;;  %v10755_v3 = vld [vmem:[%s14658_s1 + $0x1bb0] ss:$8 sps:$4 sm:$0xff]   ;;  %v10758_v52 = vld [vmem:[%s14658_s1 + $0x1aa0] ss:$8 sps:$4 sm:$0xff]   ;;  %v10769_v36 = vld [vmem:[%s14658_s1 + $0x1b94] ss:$8 sps:$4 sm:$0xff]  }
 0x347   :  { %v13901_v14 = vadd.f32 %v7631_v61, %v7591_v39  ;;  %7885 = vmatpush1.bf16.msra.mxu0 %v10686_v6  ;;  %v36_v20 = vld [vmem:[%s14657_s0 + $0x70] sm:$0xff]  ;;  %v10761_v6 = vld [vmem:[%s14658_s1 + $0x1ba0] ss:$8 sps:$4 sm:$0xff]  }
 0x348   :  { %v7593_v33 = vpop.f32.mrf.mxu0  ;;  %7886 = vmatprep.subr.bf16.mxu0 %v10694_v56  ;;  %v7633_v0 = vpop.f32.mrf.mxu1  ;;  %v294_v34 = vcombine.high %v36_v20, %v36_v20  ;;  %v10764_v56 = vld [vmem:[%s14658_s1 + $0x1a90] ss:$8 sps:$4 sm:$0xff]   ;;  %v14054_v39 = vrot.slane %v36_v20, %v11219_v48  ;;  %v10827_v20 = vld [vmem:[%s14658_s1 + $0x1cf4] ss:$8 sps:$4 sm:$0xff]  }
 0x349   :  { %7926 = vmatpush1.bf16.msra.mxu1 %v10689_v29  ;;  %v10772_v29 = vld [vmem:[%s14658_s1 + $0x1a84] ss:$8 sps:$4 sm:$0xff]   ;;  %v10767_v30 = vld [vmem:[%s14658_s1 + $0x1b90] ss:$8 sps:$4 sm:$0xff]   ;;  %v10773_v0 = vld [vmem:[%s14658_s1 + $0x1b80] ss:$8 sps:$4 sm:$0xff]  }
 0x34a   :  { %7927 = vmatprep.subr.bf16.mxu1 %v10697_v13  ;;  %v7634_v18 = vpop.f32.mrf.mxu1  ;;  %v14063_v61 = vrot.slane %v294_v34, %v11219_v48  ;;  %v10775_v13 = vld [vmem:[%s14658_s1 + $0x1b84] ss:$8 sps:$4 sm:$0xff]   ;;  %v309_v33 = vcombine.high %v14054_v39, %v14054_v39 }
 0x34b   :  { %7887 = vmatpush1.bf16.msra.mxu0 %v10692_v53  ;;  %v10770_v53 = vld [vmem:[%s14658_s1 + $0x1a80] ss:$8 sps:$4 sm:$0xff]   ;;  %v10782_v18 = vld [vmem:[%s14658_s1 + $0x1d74] ss:$8 sps:$4 sm:$0xff]   ;;  %v10833_v34 = vld [vmem:[%s14658_s1 + $0x1ce4] ss:$8 sps:$4 sm:$0xff]  }
 0x34c   :  { %7888 = vmatprep.subr.bf16.mxu0 %v10700_v63  ;;  %v10778_v63 = vld [vmem:[%s14658_s1 + $0x1c74] ss:$8 sps:$4 sm:$0xff]  }
 0x34d   :  { %7928 = vmatpush1.bf16.msra.mxu1 %v10695_v19  ;;  %v310_v19 = vcombine.high %v14063_v61, %v14063_v61 }
 0x34e   :  { %7929 = vmatprep.subr.bf16.mxu1 %v10703_v1  ;;  %v454_v1 = vpack.c.bf16 %v13839_v27, %v13839_v27  ;;  %v10780_v27 = vld [vmem:[%s14658_s1 + $0x1d70] ss:$8 sps:$4 sm:$0xff]  }
 0x34f   :  { %7889 = vmatpush1.bf16.msra.mxu0 %v10698_v2  ;;  %v10776_v2 = vld [vmem:[%s14658_s1 + $0x1c70] ss:$8 sps:$4 sm:$0xff]  }
 0x350   :  { %7890 = vmatprep.subr.bf16.mxu0 %v10706_v45  ;;  %v459_v45 = vpack.c.bf16 %v309_v33, %v309_v33  ;;  %v10837_v33 = vld [vmem:[%s14658_s1 + $0x1cd0] ss:$8 sps:$4 sm:$0xff]  }
 0x351   :  { %7930 = vmatpush1.bf16.msra.mxu1 %v10701_v46  ;;  %v456_v46 = vpack.c.bf16 %v13848_v32, %v13848_v32  ;;  %v10783_v32 = vld [vmem:[%s14658_s1 + $0x1c60] ss:$8 sps:$4 sm:$0xff]  }
 0x352   :  { %7931 = vmatprep.subr.bf16.mxu1 %v10709_v28  ;;  %v10785_v28 = vld [vmem:[%s14658_s1 + $0x1c64] ss:$8 sps:$4 sm:$0xff]  }
 0x353   :  { %7891 = vmatpush1.bf16.msra.mxu0 %v10704_v4  ;;  %v461_v4 = vpack.c.bf16 %v310_v19, %v310_v19  ;;  %v10848_v19 = vld [vmem:[%s14658_s1 + $0x1dc4] ss:$8 sps:$4 sm:$0xff]  }
 0x354   :  { %7892 = vmatprep.subr.bf16.mxu0 %v10712_v51 }
 0x355   :  { %7932 = vmatpush1.bf16.msra.mxu1 %v10707_v9  ;;  %v10788_v9 = vld [vmem:[%s14658_s1 + $0x1d64] ss:$8 sps:$4 sm:$0xff]  }
 0x356   :  { %7933 = vmatprep.subr.bf16.mxu1 %v10715_v10 }
 0x357   :  { %7893 = vmatpush1.bf16.msra.mxu0 %v10710_v31 }
 0x358   :  { %7894 = vmatprep.subr.bf16.mxu0 %v10718_v40 }
 0x359   :  { %7934 = vmatpush1.bf16.msra.mxu1 %v10713_v11  ;;  %v10791_v11 = vld [vmem:[%s14658_s1 + $0x1c54] ss:$8 sps:$4 sm:$0xff]  }
 0x35a   :  { %7935 = vmatprep.subr.bf16.mxu1 %v10721_v12 }
 0x35b   :  { %7895 = vmatpush1.bf16.msra.mxu0 %v10716_v59 }
 0x35c   :  { %7896 = vmatprep.subr.bf16.mxu0 %v10724_v17 }
 0x35d   :  { %7936 = vmatpush1.bf16.msra.mxu1 %v10719_v21 }
 0x35e   :  { %7937 = vmatprep.subr.bf16.mxu1 %v10727_v42  ;;  %v10794_v42 = vld [vmem:[%s14658_s1 + $0x1d54] ss:$8 sps:$4 sm:$0xff]  }
 0x35f   :  { %7897 = vmatpush1.bf16.msra.mxu0 %v10722_v62 }
 0x360   :  { %7898 = vmatprep.subr.bf16.mxu0 %v10730_v22 }
 0x361   :  { %7938 = vmatpush1.bf16.msra.mxu1 %v10725_v23  ;;  %v10797_v23 = vld [vmem:[%s14658_s1 + $0x1c44] ss:$8 sps:$4 sm:$0xff]  }
 0x362   :  { %7939 = vmatprep.subr.bf16.mxu1 %v10733_v24 }
 0x363   :  { %7899 = vmatpush2.bf16.msra.mxu0 %v10728_v49  ;;  %v10792_v49 = vld [vmem:[%s14658_s1 + $0x1d50] ss:$8 sps:$4 sm:$0xff]  }
 0x364   :  { %7900 = vmatprep.subr.bf16.mxu0 %v10736_v25  ;;  %v10800_v25 = vld [vmem:[%s14658_s1 + $0x1d44] ss:$8 sps:$4 sm:$0xff]  }
 0x365   :  { %7940 = vmatpush2.bf16.msra.mxu1 %v10731_v47 }
 0x366   :  { %7941 = vmatprep.subr.bf16.mxu1 %v10739_v26  ;;  %v10795_v26 = vld [vmem:[%s14658_s1 + $0x1c40] ss:$8 sps:$4 sm:$0xff]  }
 0x367   :  { %7901 = vmatpush2.bf16.msra.mxu0 %v10734_v43  ;;  %v10803_v43 = vld [vmem:[%s14658_s1 + $0x1c34] ss:$8 sps:$4 sm:$0xff]  }
 0x368   :  { %7902 = vmatprep.subr.bf16.mxu0 %v10742_v5  ;;  %v10798_v5 = vld [vmem:[%s14658_s1 + $0x1d40] ss:$8 sps:$4 sm:$0xff]  }
 0x369   :  { %7942 = vmatpush2.bf16.msra.mxu1 %v10737_v57  ;;  %v10806_v57 = vld [vmem:[%s14658_s1 + $0x1d34] ss:$8 sps:$4 sm:$0xff]  }
 0x36a   :  { %7943 = vmatprep.subr.bf16.mxu1 %v10745_v7  ;;  %v10801_v7 = vld [vmem:[%s14658_s1 + $0x1c30] ss:$8 sps:$4 sm:$0xff]  }
 0x36b   :  { %7903 = vmatpush2.bf16.msra.mxu0 %v10740_v8  ;;  %v10809_v8 = vld [vmem:[%s14658_s1 + $0x1c24] ss:$8 sps:$4 sm:$0xff]  }
 0x36c   :  { %7904 = vmatprep.subr.bf16.mxu0 %v10748_v35  ;;  %v10804_v35 = vld [vmem:[%s14658_s1 + $0x1d30] ss:$8 sps:$4 sm:$0xff]  }
 0x36d   :  { %7944 = vmatpush2.bf16.msra.mxu1 %v10743_v37  ;;  %v10812_v37 = vld [vmem:[%s14658_s1 + $0x1d24] ss:$8 sps:$4 sm:$0xff]  }
 0x36e   :  { %7945 = vmatprep.subr.bf16.mxu1 %v10751_v60  ;;  %v10807_v60 = vld [vmem:[%s14658_s1 + $0x1c20] ss:$8 sps:$4 sm:$0xff]  }
 0x36f   :  { %7905 = vmatpush2.bf16.msra.mxu0 %v10746_v38  ;;  %v10815_v38 = vld [vmem:[%s14658_s1 + $0x1c14] ss:$8 sps:$4 sm:$0xff]  }
 0x370   :  { %7906 = vmatprep.subr.bf16.mxu0 %v10754_v55  ;;  %v10810_v55 = vld [vmem:[%s14658_s1 + $0x1d20] ss:$8 sps:$4 sm:$0xff]  }
 0x371   :  { %7946 = vmatpush2.bf16.msra.mxu1 %v10749_v41  ;;  %v10818_v41 = vld [vmem:[%s14658_s1 + $0x1d14] ss:$8 sps:$4 sm:$0xff]  }
 0x372   :  { %7947 = vmatprep.subr.bf16.mxu1 %v10757_v16  ;;  %v10813_v16 = vld [vmem:[%s14658_s1 + $0x1c10] ss:$8 sps:$4 sm:$0xff]  }
 0x373   :  { %7907 = vmatpush2.bf16.msra.mxu0 %v10752_v15  ;;  %v10821_v15 = vld [vmem:[%s14658_s1 + $0x1c04] ss:$8 sps:$4 sm:$0xff]  }
 0x374   :  { %7908 = vmatprep.subr.bf16.mxu0 %v10760_v50  ;;  %v10816_v50 = vld [vmem:[%s14658_s1 + $0x1d10] ss:$8 sps:$4 sm:$0xff]  }
 0x375   :  { %7948 = vmatpush2.bf16.msra.mxu1 %v10755_v3  ;;  %v10824_v3 = vld [vmem:[%s14658_s1 + $0x1d04] ss:$8 sps:$4 sm:$0xff]  }
 0x376   :  { %7949 = vmatprep.subr.bf16.mxu1 %v10763_v44  ;;  %v10819_v44 = vld [vmem:[%s14658_s1 + $0x1c00] ss:$8 sps:$4 sm:$0xff]  }
 0x377   :  { %7909 = vmatpush2.bf16.msra.mxu0 %v10758_v52  ;;  %v10822_v52 = vld [vmem:[%s14658_s1 + $0x1d00] ss:$8 sps:$4 sm:$0xff]  }
 0x378   :  { %7910 = vmatprep.subr.bf16.mxu0 %v10766_v54  ;;  %v10830_v54 = vld [vmem:[%s14658_s1 + $0x1df4] ss:$8 sps:$4 sm:$0xff]  }
 0x379   :  { %7950 = vmatpush2.bf16.msra.mxu1 %v10761_v6  ;;  %v10825_v6 = vld [vmem:[%s14658_s1 + $0x1cf0] ss:$8 sps:$4 sm:$0xff]  }
 0x37a   :  { %7951 = vmatprep.subr.bf16.mxu1 %v10769_v36  ;;  %v10828_v36 = vld [vmem:[%s14658_s1 + $0x1df0] ss:$8 sps:$4 sm:$0xff]  }
 0x37b   :  { %7911 = vmatpush2.bf16.msra.mxu0 %v10764_v56  ;;  %v10836_v56 = vld [vmem:[%s14658_s1 + $0x1de4] ss:$8 sps:$4 sm:$0xff]  }
 0x37c   :  { %7912 = vmatprep.subr.bf16.mxu0 %v10772_v29  ;;  %v10831_v29 = vld [vmem:[%s14658_s1 + $0x1ce0] ss:$8 sps:$4 sm:$0xff]  }
 0x37d   :  { %7952 = vmatpush2.bf16.msra.mxu1 %v10767_v30  ;;  %v10839_v30 = vld [vmem:[%s14658_s1 + $0x1cd4] ss:$8 sps:$4 sm:$0xff]  }
 0x37e   :  { %7953 = vmatprep.subr.bf16.mxu1 %v10775_v13  ;;  %v10834_v13 = vld [vmem:[%s14658_s1 + $0x1de0] ss:$8 sps:$4 sm:$0xff]  }
 0x37f   :  { %7913 = vmatpush2.bf16.msra.mxu0 %v10770_v53  ;;  %v10842_v53 = vld [vmem:[%s14658_s1 + $0x1dd4] ss:$8 sps:$4 sm:$0xff]  }
 0x380   :  { %7964 = vmatprep.subr.bf16.mxu0 %v10778_v63  ;;  %v10845_v63 = vld [vmem:[%s14658_s1 + $0x1cc4] ss:$8 sps:$4 sm:$0xff]  }
 0x381   :  { %7954 = vmatpush2.bf16.msra.mxu1 %v10773_v0  ;;  %v10840_v0 = vld [vmem:[%s14658_s1 + $0x1dd0] ss:$8 sps:$4 sm:$0xff]  }
 0x382   :  { %v7670_v51 = vpop.f32.mrf.mxu0  ;;  %7915 = vmatmul.mubr.bf16.vlgmr.msra.gmra.mxu0 %v454_v1  ;;  %8005 = vmatprep.subr.bf16.mxu1 %v10782_v18  ;;  %v10843_v1 = vld [vmem:[%s14658_s1 + $0x1cc0] ss:$8 sps:$4 sm:$0xff]   ;;  %v10851_v18 = vld [vmem:[%s14658_s1 + $0x1cb4] ss:$8 sps:$4 sm:$0xff]  }
 0x383   :  { %v7671_v10 = vadd.f32 %v7670_v51, %v13893_v58  ;;  %7965 = vmatpush1.bf16.msra.mxu0 %v10776_v2  ;;  %7996 = vmatprep.mubr.bf16.mxu0 %v459_v45  ;;  %v10786_v58 = vld [vmem:[%s14658_s1 + $0x1d60] ss:$8 sps:$4 sm:$0xff]   ;;  %v10854_v45 = vld [vmem:[%s14658_s1 + $0x1db4] ss:$8 sps:$4 sm:$0xff]  }
 0x384   :  { %v7672_v31 = vpop.f32.mrf.mxu0  ;;  %v7711_v40 = vpop.f32.mrf.mxu1  ;;  %7956 = vmatmul.mubr.bf16.vlgmr.msra.gmra.mxu1 %v456_v46  ;;  %7966 = vmatprep.subr.bf16.mxu0 %v10785_v28  ;;  %v10846_v2 = vld [vmem:[%s14658_s1 + $0x1dc0] ss:$8 sps:$4 sm:$0xff]   ;;  %v10849_v46 = vld [vmem:[%s14658_s1 + $0x1cb0] ss:$8 sps:$4 sm:$0xff]   ;;  %v10857_v28 = vld [vmem:[%s14658_s1 + $0x1ca4] ss:$8 sps:$4 sm:$0xff]  }
 0x385   :  { %v7673_v12 = vadd.f32 %v7672_v31, %v13901_v14  ;;  %v14108_v59 = vadd.f32 %v7711_v40, %v7671_v10  ;;  %8006 = vmatpush1.bf16.msra.mxu1 %v10780_v27  ;;  %8037 = vmatprep.mubr.bf16.mxu1 %v461_v4  ;;  %v10789_v14 = vld [vmem:[%s14658_s1 + $0x1c50] ss:$8 sps:$4 sm:$0xff]   ;;  %v10860_v4 = vld [vmem:[%s14658_s1 + $0x1da4] ss:$8 sps:$4 sm:$0xff]   ;;  %v10863_v10 = vld [vmem:[%s14658_s1 + $0x1c94] ss:$8 sps:$4 sm:$0xff]  }
 0x386   :  { %v7674_v17 = vpop.f32.mrf.mxu0  ;;  %v7713_v21 = vpop.f32.mrf.mxu1  ;;  %8007 = vmatprep.subr.bf16.mxu1 %v10788_v9  ;;  %v10852_v27 = vld [vmem:[%s14658_s1 + $0x1db0] ss:$8 sps:$4 sm:$0xff]   ;;  %v10855_v9 = vld [vmem:[%s14658_s1 + $0x1ca0] ss:$8 sps:$4 sm:$0xff]   ;;  %v10866_v40 = vld [vmem:[%s14658_s1 + $0x1d94] ss:$8 sps:$4 sm:$0xff]  }
 0x387   :  { %v14116_v62 = vadd.f32 %v7713_v21, %v7673_v12  ;;  %7967 = vmatpush1.bf16.msra.mxu0 %v10783_v32  ;;  %v37_v51 = vld [vmem:[%s14657_s0 + $0x78] sm:$0xff]  ;;  %v10858_v32 = vld [vmem:[%s14658_s1 + $0x1da0] ss:$8 sps:$4 sm:$0xff]  }
 0x388   :  { %v7675_v22 = vpop.f32.mrf.mxu0  ;;  %7968 = vmatprep.subr.bf16.mxu0 %v10791_v11  ;;  %v7715_v24 = vpop.f32.mrf.mxu1  ;;  %v311_v31 = vcombine.high %v37_v51, %v37_v51  ;;  %v10861_v11 = vld [vmem:[%s14658_s1 + $0x1c90] ss:$8 sps:$4 sm:$0xff]   ;;  %v14269_v12 = vrot.slane %v37_v51, %v11219_v48  ;;  %v10919_v51 = vld [vmem:[%s14658_s1 + $0x1f00] ss:$8 sps:$4 sm:$0xff]  }
 0x389   :  { %8008 = vmatpush1.bf16.msra.mxu1 %v10786_v58  ;;  %v10869_v58 = vld [vmem:[%s14658_s1 + $0x1c84] ss:$8 sps:$4 sm:$0xff]   ;;  %v10864_v17 = vld [vmem:[%s14658_s1 + $0x1d90] ss:$8 sps:$4 sm:$0xff]  }
 0x38a   :  { %8009 = vmatprep.subr.bf16.mxu1 %v10794_v42  ;;  %v7716_v47 = vpop.f32.mrf.mxu1  ;;  %v14278_v21 = vrot.slane %v311_v31, %v11219_v48  ;;  %v10872_v42 = vld [vmem:[%s14658_s1 + $0x1d84] ss:$8 sps:$4 sm:$0xff]   ;;  %v326_v22 = vcombine.high %v14269_v12, %v14269_v12  ;;  %v10870_v48 = vld [vmem:[%s14658_s1 + $0x1d80] ss:$8 sps:$4 sm:$0xff]   ;;  %v10925_v31 = vld [vmem:[%s14658_s1 + $0x1ff0] ss:$8 sps:$4 sm:$0xff]  }
 0x38b   :  { %7969 = vmatpush1.bf16.msra.mxu0 %v10789_v14  ;;  %v10867_v14 = vld [vmem:[%s14658_s1 + $0x1c80] ss:$8 sps:$4 sm:$0xff]   ;;  %v10873_v47 = vld [vmem:[%s14658_s1 + $0x1e70] ss:$8 sps:$4 sm:$0xff]  }
 0x38c   :  { %7970 = vmatprep.subr.bf16.mxu0 %v10797_v23  ;;  %v10875_v23 = vld [vmem:[%s14658_s1 + $0x1e74] ss:$8 sps:$4 sm:$0xff]   ;;  %v327_v24 = vcombine.high %v14278_v21, %v14278_v21 }
 0x38d   :  { %8010 = vmatpush1.bf16.msra.mxu1 %v10792_v49  ;;  %v458_v49 = vpack.c.bf16 %v14054_v39, %v14054_v39  ;;  %v10877_v39 = vld [vmem:[%s14658_s1 + $0x1f70] ss:$8 sps:$4 sm:$0xff]  }
 0x38e   :  { %8011 = vmatprep.subr.bf16.mxu1 %v10800_v25  ;;  %v10879_v25 = vld [vmem:[%s14658_s1 + $0x1f74] ss:$8 sps:$4 sm:$0xff]  }
 0x38f   :  { %7971 = vmatpush1.bf16.msra.mxu0 %v10795_v26  ;;  %v463_v26 = vpack.c.bf16 %v326_v22, %v326_v22  ;;  %v10942_v22 = vld [vmem:[%s14658_s1 + $0x1ec4] ss:$8 sps:$4 sm:$0xff]  }
 0x390   :  { %7972 = vmatprep.subr.bf16.mxu0 %v10803_v43  ;;  %v460_v43 = vpack.c.bf16 %v14063_v61, %v14063_v61  ;;  %v10880_v61 = vld [vmem:[%s14658_s1 + $0x1e60] ss:$8 sps:$4 sm:$0xff]  }
 0x391   :  { %8012 = vmatpush1.bf16.msra.mxu1 %v10798_v5  ;;  %v10882_v5 = vld [vmem:[%s14658_s1 + $0x1e64] ss:$8 sps:$4 sm:$0xff]  }
 0x392   :  { %8013 = vmatprep.subr.bf16.mxu1 %v10806_v57  ;;  %v465_v57 = vpack.c.bf16 %v327_v24, %v327_v24  ;;  %v10940_v24 = vld [vmem:[%s14658_s1 + $0x1ec0] ss:$8 sps:$4 sm:$0xff]  }
 0x393   :  { %7973 = vmatpush1.bf16.msra.mxu0 %v10801_v7 }
 0x394   :  { %7974 = vmatprep.subr.bf16.mxu0 %v10809_v8  ;;  %v10885_v8 = vld [vmem:[%s14658_s1 + $0x1f64] ss:$8 sps:$4 sm:$0xff]  }
 0x395   :  { %8014 = vmatpush1.bf16.msra.mxu1 %v10804_v35 }
 0x396   :  { %8015 = vmatprep.subr.bf16.mxu1 %v10812_v37 }
 0x397   :  { %7975 = vmatpush1.bf16.msra.mxu0 %v10807_v60 }
 0x398   :  { %7976 = vmatprep.subr.bf16.mxu0 %v10815_v38  ;;  %v10888_v38 = vld [vmem:[%s14658_s1 + $0x1e54] ss:$8 sps:$4 sm:$0xff]  }
 0x399   :  { %8016 = vmatpush1.bf16.msra.mxu1 %v10810_v55 }
 0x39a   :  { %8017 = vmatprep.subr.bf16.mxu1 %v10818_v41 }
 0x39b   :  { %7977 = vmatpush1.bf16.msra.mxu0 %v10813_v16 }
 0x39c   :  { %7978 = vmatprep.subr.bf16.mxu0 %v10821_v15 }
 0x39d   :  { %8018 = vmatpush1.bf16.msra.mxu1 %v10816_v50  ;;  %v10891_v50 = vld [vmem:[%s14658_s1 + $0x1f54] ss:$8 sps:$4 sm:$0xff]  }
 0x39e   :  { %8019 = vmatprep.subr.bf16.mxu1 %v10824_v3 }
 0x39f   :  { %7979 = vmatpush1.bf16.msra.mxu0 %v10819_v44 }
 0x3a0   :  { %7980 = vmatprep.subr.bf16.mxu0 %v10827_v20  ;;  %v10894_v20 = vld [vmem:[%s14658_s1 + $0x1e44] ss:$8 sps:$4 sm:$0xff]  }
 0x3a1   :  { %8020 = vmatpush1.bf16.msra.mxu1 %v10822_v52 }
 0x3a2   :  { %8021 = vmatprep.subr.bf16.mxu1 %v10830_v54  ;;  %v10889_v54 = vld [vmem:[%s14658_s1 + $0x1f50] ss:$8 sps:$4 sm:$0xff]  }
 0x3a3   :  { %7981 = vmatpush2.bf16.msra.mxu0 %v10825_v6  ;;  %v10897_v6 = vld [vmem:[%s14658_s1 + $0x1f44] ss:$8 sps:$4 sm:$0xff]  }
 0x3a4   :  { %7982 = vmatprep.subr.bf16.mxu0 %v10833_v34 }
 0x3a5   :  { %8022 = vmatpush2.bf16.msra.mxu1 %v10828_v36  ;;  %v10892_v36 = vld [vmem:[%s14658_s1 + $0x1e40] ss:$8 sps:$4 sm:$0xff]  }
 0x3a6   :  { %8023 = vmatprep.subr.bf16.mxu1 %v10836_v56  ;;  %v10900_v56 = vld [vmem:[%s14658_s1 + $0x1e34] ss:$8 sps:$4 sm:$0xff]  }
 0x3a7   :  { %7983 = vmatpush2.bf16.msra.mxu0 %v10831_v29  ;;  %v10895_v29 = vld [vmem:[%s14658_s1 + $0x1f40] ss:$8 sps:$4 sm:$0xff]  }
 0x3a8   :  { %7984 = vmatprep.subr.bf16.mxu0 %v10839_v30  ;;  %v10903_v30 = vld [vmem:[%s14658_s1 + $0x1f34] ss:$8 sps:$4 sm:$0xff]  }
 0x3a9   :  { %8024 = vmatpush2.bf16.msra.mxu1 %v10834_v13  ;;  %v10898_v13 = vld [vmem:[%s14658_s1 + $0x1e30] ss:$8 sps:$4 sm:$0xff]  }
 0x3aa   :  { %8025 = vmatprep.subr.bf16.mxu1 %v10842_v53  ;;  %v10906_v53 = vld [vmem:[%s14658_s1 + $0x1e24] ss:$8 sps:$4 sm:$0xff]  }
 0x3ab   :  { %7985 = vmatpush2.bf16.msra.mxu0 %v10837_v33  ;;  %v10901_v33 = vld [vmem:[%s14658_s1 + $0x1f30] ss:$8 sps:$4 sm:$0xff]  }
 0x3ac   :  { %7986 = vmatprep.subr.bf16.mxu0 %v10845_v63  ;;  %v10909_v63 = vld [vmem:[%s14658_s1 + $0x1f24] ss:$8 sps:$4 sm:$0xff]  }
 0x3ad   :  { %8026 = vmatpush2.bf16.msra.mxu1 %v10840_v0  ;;  %v10904_v0 = vld [vmem:[%s14658_s1 + $0x1e20] ss:$8 sps:$4 sm:$0xff]  }
 0x3ae   :  { %8027 = vmatprep.subr.bf16.mxu1 %v10848_v19  ;;  %v10912_v19 = vld [vmem:[%s14658_s1 + $0x1e14] ss:$8 sps:$4 sm:$0xff]  }
 0x3af   :  { %7987 = vmatpush2.bf16.msra.mxu0 %v10843_v1  ;;  %v10907_v1 = vld [vmem:[%s14658_s1 + $0x1f20] ss:$8 sps:$4 sm:$0xff]  }
 0x3b0   :  { %7988 = vmatprep.subr.bf16.mxu0 %v10851_v18  ;;  %v10915_v18 = vld [vmem:[%s14658_s1 + $0x1f14] ss:$8 sps:$4 sm:$0xff]  }
 0x3b1   :  { %8028 = vmatpush2.bf16.msra.mxu1 %v10846_v2  ;;  %v10910_v2 = vld [vmem:[%s14658_s1 + $0x1e10] ss:$8 sps:$4 sm:$0xff]  }
 0x3b2   :  { %8029 = vmatprep.subr.bf16.mxu1 %v10854_v45  ;;  %v10918_v45 = vld [vmem:[%s14658_s1 + $0x1e04] ss:$8 sps:$4 sm:$0xff]  }
 0x3b3   :  { %7989 = vmatpush2.bf16.msra.mxu0 %v10849_v46  ;;  %v10913_v46 = vld [vmem:[%s14658_s1 + $0x1f10] ss:$8 sps:$4 sm:$0xff]  }
 0x3b4   :  { %7990 = vmatprep.subr.bf16.mxu0 %v10857_v28  ;;  %v10921_v28 = vld [vmem:[%s14658_s1 + $0x1f04] ss:$8 sps:$4 sm:$0xff]  }
 0x3b5   :  { %8030 = vmatpush2.bf16.msra.mxu1 %v10852_v27  ;;  %v10916_v27 = vld [vmem:[%s14658_s1 + $0x1e00] ss:$8 sps:$4 sm:$0xff]  }
 0x3b6   :  { %8031 = vmatprep.subr.bf16.mxu1 %v10860_v4  ;;  %v10924_v4 = vld [vmem:[%s14658_s1 + $0x1ef4] ss:$8 sps:$4 sm:$0xff]  }
 0x3b7   :  { %7991 = vmatpush2.bf16.msra.mxu0 %v10855_v9  ;;  %v10927_v9 = vld [vmem:[%s14658_s1 + $0x1ff4] ss:$8 sps:$4 sm:$0xff]  }
 0x3b8   :  { %7992 = vmatprep.subr.bf16.mxu0 %v10863_v10  ;;  %v10922_v10 = vld [vmem:[%s14658_s1 + $0x1ef0] ss:$8 sps:$4 sm:$0xff]  }
 0x3b9   :  { %8032 = vmatpush2.bf16.msra.mxu1 %v10858_v32  ;;  %v10930_v32 = vld [vmem:[%s14658_s1 + $0x1ee4] ss:$8 sps:$4 sm:$0xff]  }
 0x3ba   :  { %8033 = vmatprep.subr.bf16.mxu1 %v10866_v40  ;;  %v10933_v40 = vld [vmem:[%s14658_s1 + $0x1fe4] ss:$8 sps:$4 sm:$0xff]  }
 0x3bb   :  { %7993 = vmatpush2.bf16.msra.mxu0 %v10861_v11  ;;  %v10928_v11 = vld [vmem:[%s14658_s1 + $0x1ee0] ss:$8 sps:$4 sm:$0xff]  }
 0x3bc   :  { %7994 = vmatprep.subr.bf16.mxu0 %v10869_v58  ;;  %v10936_v58 = vld [vmem:[%s14658_s1 + $0x1ed4] ss:$8 sps:$4 sm:$0xff]  }
 0x3bd   :  { %8034 = vmatpush2.bf16.msra.mxu1 %v10864_v17  ;;  %v10931_v17 = vld [vmem:[%s14658_s1 + $0x1fe0] ss:$8 sps:$4 sm:$0xff]  }
 0x3be   :  { %8035 = vmatprep.subr.bf16.mxu1 %v10872_v42  ;;  %v10939_v42 = vld [vmem:[%s14658_s1 + $0x1fd4] ss:$8 sps:$4 sm:$0xff]  }
 0x3bf   :  { %7995 = vmatpush2.bf16.msra.mxu0 %v10867_v14  ;;  %v10934_v14 = vld [vmem:[%s14658_s1 + $0x1ed0] ss:$8 sps:$4 sm:$0xff]  }
 0x3c0   :  { %8046 = vmatprep.subr.bf16.mxu0 %v10875_v23  ;;  %v10937_v23 = vld [vmem:[%s14658_s1 + $0x1fd0] ss:$8 sps:$4 sm:$0xff]  }
 0x3c1   :  { %8036 = vmatpush2.bf16.msra.mxu1 %v10870_v48  ;;  %v10945_v48 = vld [vmem:[%s14658_s1 + $0x1fc4] ss:$8 sps:$4 sm:$0xff]  }
 0x3c2   :  { %v7752_v7 = vpop.f32.mrf.mxu0  ;;  %7997 = vmatmul.mubr.bf16.vlgmr.msra.gmra.mxu0 %v458_v49  ;;  %8087 = vmatprep.subr.bf16.mxu1 %v10879_v25  ;;  %v10948_v49 = vld [vmem:[%s14658_s1 + $0x1eb4] ss:$8 sps:$4 sm:$0xff]   ;;  %v10943_v25 = vld [vmem:[%s14658_s1 + $0x1fc0] ss:$8 sps:$4 sm:$0xff]  }
 0x3c3   :  { %v7753_v35 = vadd.f32 %v7752_v7, %v14108_v59  ;;  %8047 = vmatpush1.bf16.msra.mxu0 %v10873_v47  ;;  %8078 = vmatprep.mubr.bf16.mxu0 %v463_v26  ;;  %v10883_v59 = vld [vmem:[%s14658_s1 + $0x1f60] ss:$8 sps:$4 sm:$0xff]   ;;  %v10951_v47 = vld [vmem:[%s14658_s1 + $0x1fb4] ss:$8 sps:$4 sm:$0xff]   ;;  %v10946_v26 = vld [vmem:[%s14658_s1 + $0x1eb0] ss:$8 sps:$4 sm:$0xff]  }
 0x3c4   :  { %v7754_v37 = vpop.f32.mrf.mxu0  ;;  %v7793_v60 = vpop.f32.mrf.mxu1  ;;  %8038 = vmatmul.mubr.bf16.vlgmr.msra.gmra.mxu1 %v460_v43  ;;  %8048 = vmatprep.subr.bf16.mxu0 %v10882_v5  ;;  %v10954_v43 = vld [vmem:[%s14658_s1 + $0x1ea4] ss:$8 sps:$4 sm:$0xff]   ;;  %v10949_v5 = vld [vmem:[%s14658_s1 + $0x1fb0] ss:$8 sps:$4 sm:$0xff]   ;;  %v10960_v7 = vld [vmem:[%s14658_s1 + $0x1e94] ss:$8 sps:$4 sm:$0xff]  }
 0x3c5   :  { %v7755_v55 = vadd.f32 %v7754_v37, %v14116_v62  ;;  %v14323_v41 = vadd.f32 %v7793_v60, %v7753_v35  ;;  %8088 = vmatpush1.bf16.msra.mxu1 %v10877_v39  ;;  %8119 = vmatprep.mubr.bf16.mxu1 %v465_v57  ;;  %v10886_v62 = vld [vmem:[%s14658_s1 + $0x1e50] ss:$8 sps:$4 sm:$0xff]   ;;  %v10957_v39 = vld [vmem:[%s14658_s1 + $0x1fa4] ss:$8 sps:$4 sm:$0xff]   ;;  %v10952_v57 = vld [vmem:[%s14658_s1 + $0x1ea0] ss:$8 sps:$4 sm:$0xff]  }
 0x3c6   :  { %v7756_v16 = vpop.f32.mrf.mxu0  ;;  %v7795_v15 = vpop.f32.mrf.mxu1  ;;  %8089 = vmatprep.subr.bf16.mxu1 %v10885_v8  ;;  %v10955_v8 = vld [vmem:[%s14658_s1 + $0x1fa0] ss:$8 sps:$4 sm:$0xff]   ;;  %v10963_v35 = vld [vmem:[%s14658_s1 + $0x1f94] ss:$8 sps:$4 sm:$0xff]   ;;  %v10966_v37 = vld [vmem:[%s14658_s1 + $0x1e84] ss:$8 sps:$4 sm:$0xff]  }
 0x3c7   :  { %v14331_v3 = vadd.f32 %v7795_v15, %v7755_v55  ;;  %8049 = vmatpush1.bf16.msra.mxu0 %v10880_v61  ;;  %v10958_v61 = vld [vmem:[%s14658_s1 + $0x1e90] ss:$8 sps:$4 sm:$0xff]   ;;  %v14486_v60 = vld.sshfl [vmem:[%s14657_s0 + $0x80] sm:$0x33 pattern:$0x76325410] }
 0x3c8   :  { %v7757_v44 = vpop.f32.mrf.mxu0  ;;  %8050 = vmatprep.subr.bf16.mxu0 %v10888_v38  ;;  %v7797_v52 = vpop.f32.mrf.mxu1  ;;  %v10961_v38 = vld [vmem:[%s14658_s1 + $0x1f90] ss:$8 sps:$4 sm:$0xff]   ;;  %v10969_v55 = vld [vmem:[%s14658_s1 + $0x1f84] ss:$8 sps:$4 sm:$0xff]   ;;  %v335_v16 = vcombine.high %v14486_v60, %v14486_v60  ;;  %v10972_v15 = vld [vmem:[%s14658_s1 + $0x2074] ss:$8 sps:$4 sm:$0xff]  }
 0x3c9   :  { %8090 = vmatpush1.bf16.msra.mxu1 %v10883_v59  ;;  %v10964_v59 = vld [vmem:[%s14658_s1 + $0x1e80] ss:$8 sps:$4 sm:$0xff]   ;;  %v10970_v44 = vld [vmem:[%s14658_s1 + $0x2070] ss:$8 sps:$4 sm:$0xff]   ;;  %v464_v52 = vpack.c.bf16 %v14278_v21, %v14278_v21  ;;  %v10979_v21 = vld [vmem:[%s14658_s1 + $0x2054] ss:$8 sps:$4 sm:$0xff]  }
 0x3ca   :  { %8091 = vmatprep.subr.bf16.mxu1 %v10891_v50  ;;  %v7798_v34 = vpop.f32.mrf.mxu1  ;;  %v10967_v50 = vld [vmem:[%s14658_s1 + $0x1f80] ss:$8 sps:$4 sm:$0xff]  }
 0x3cb   :  { %8051 = vmatpush1.bf16.msra.mxu0 %v10886_v62  ;;  %v462_v62 = vpack.c.bf16 %v14269_v12, %v14269_v12  ;;  %v10974_v12 = vld [vmem:[%s14658_s1 + $0x2060] ss:$8 sps:$4 sm:$0xff]  }
 0x3cc   :  { %8052 = vmatprep.subr.bf16.mxu0 %v10894_v20  ;;  %v467_v20 = vpack.c.bf16 %v335_v16, %v335_v16  ;;  %v11020_v16 = vld [vmem:[%s14660_s3 + $0x30] sm:$0xff]  }
 0x3cd   :  { %8092 = vmatpush1.bf16.msra.mxu1 %v10889_v54  ;;  %v10976_v54 = vld [vmem:[%s14658_s1 + $0x2064] ss:$8 sps:$4 sm:$0xff]  }
 0x3ce   :  { %8093 = vmatprep.subr.bf16.mxu1 %v10897_v6 }
 0x3cf   :  { %8053 = vmatpush1.bf16.msra.mxu0 %v10892_v36 }
 0x3d0   :  { %8054 = vmatprep.subr.bf16.mxu0 %v10900_v56 }
 0x3d1   :  { %8094 = vmatpush1.bf16.msra.mxu1 %v10895_v29 }
 0x3d2   :  { %8095 = vmatprep.subr.bf16.mxu1 %v10903_v30 }
 0x3d3   :  { %8055 = vmatpush1.bf16.msra.mxu0 %v10898_v13 }
 0x3d4   :  { %8056 = vmatprep.subr.bf16.mxu0 %v10906_v53 }
 0x3d5   :  { %8096 = vmatpush1.bf16.msra.mxu1 %v10901_v33  ;;  %v10977_v33 = vld [vmem:[%s14658_s1 + $0x2050] ss:$8 sps:$4 sm:$0xff]  }
 0x3d6   :  { %8097 = vmatprep.subr.bf16.mxu1 %v10909_v63 }
 0x3d7   :  { %8057 = vmatpush1.bf16.msra.mxu0 %v10904_v0  ;;  %v10982_v0 = vld [vmem:[%s14658_s1 + $0x2044] ss:$8 sps:$4 sm:$0xff]  }
 0x3d8   :  { %8058 = vmatprep.subr.bf16.mxu0 %v10912_v19 }
 0x3d9   :  { %8098 = vmatpush1.bf16.msra.mxu1 %v10907_v1 }
 0x3da   :  { %8099 = vmatprep.subr.bf16.mxu1 %v10915_v18  ;;  %v10985_v18 = vld [vmem:[%s14658_s1 + $0x2034] ss:$8 sps:$4 sm:$0xff]  }
 0x3db   :  { %8059 = vmatpush1.bf16.msra.mxu0 %v10910_v2  ;;  %v10983_v2 = vld [vmem:[%s14658_s1 + $0x2030] ss:$8 sps:$4 sm:$0xff]  }
 0x3dc   :  { %8060 = vmatprep.subr.bf16.mxu0 %v10918_v45  ;;  %v10988_v45 = vld [vmem:[%s14658_s1 + $0x2024] ss:$8 sps:$4 sm:$0xff]  }
 0x3dd   :  { %8100 = vmatpush1.bf16.msra.mxu1 %v10913_v46  ;;  %v10986_v46 = vld [vmem:[%s14658_s1 + $0x2020] ss:$8 sps:$4 sm:$0xff]  }
 0x3de   :  { %8101 = vmatprep.subr.bf16.mxu1 %v10921_v28  ;;  %v10991_v28 = vld [vmem:[%s14658_s1 + $0x2014] ss:$8 sps:$4 sm:$0xff]  }
 0x3df   :  { %8061 = vmatpush1.bf16.msra.mxu0 %v10916_v27  ;;  %v10989_v27 = vld [vmem:[%s14658_s1 + $0x2010] ss:$8 sps:$4 sm:$0xff]  }
 0x3e0   :  { %8062 = vmatprep.subr.bf16.mxu0 %v10924_v4  ;;  %v10994_v4 = vld [vmem:[%s14658_s1 + $0x2004] ss:$8 sps:$4 sm:$0xff]  }
 0x3e1   :  { %8102 = vmatpush1.bf16.msra.mxu1 %v10919_v51  ;;  %v10992_v51 = vld [vmem:[%s14658_s1 + $0x2000] ss:$8 sps:$4 sm:$0xff]  }
 0x3e2   :  { %8103 = vmatprep.subr.bf16.mxu1 %v10927_v9  ;;  %v10997_v9 = vld [vmem:[%s14658_s1 + $0x20f4] ss:$8 sps:$4 sm:$0xff]  }
 0x3e3   :  { %8063 = vmatpush2.bf16.msra.mxu0 %v10922_v10  ;;  %v10995_v10 = vld [vmem:[%s14658_s1 + $0x20f0] ss:$8 sps:$4 sm:$0xff]  }
 0x3e4   :  { %8064 = vmatprep.subr.bf16.mxu0 %v10930_v32  ;;  %v11000_v32 = vld [vmem:[%s14658_s1 + $0x20e4] ss:$8 sps:$4 sm:$0xff]  }
 0x3e5   :  { %8104 = vmatpush2.bf16.msra.mxu1 %v10925_v31  ;;  %v10998_v31 = vld [vmem:[%s14658_s1 + $0x20e0] ss:$8 sps:$4 sm:$0xff]  }
 0x3e6   :  { %8105 = vmatprep.subr.bf16.mxu1 %v10933_v40  ;;  %v11003_v40 = vld [vmem:[%s14658_s1 + $0x20d4] ss:$8 sps:$4 sm:$0xff]  }
 0x3e7   :  { %8065 = vmatpush2.bf16.msra.mxu0 %v10928_v11  ;;  %v11001_v11 = vld [vmem:[%s14658_s1 + $0x20d0] ss:$8 sps:$4 sm:$0xff]  }
 0x3e8   :  { %8066 = vmatprep.subr.bf16.mxu0 %v10936_v58  ;;  %v11006_v58 = vld [vmem:[%s14658_s1 + $0x20c4] ss:$8 sps:$4 sm:$0xff]  }
 0x3e9   :  { %8106 = vmatpush2.bf16.msra.mxu1 %v10931_v17  ;;  %v11004_v17 = vld [vmem:[%s14658_s1 + $0x20c0] ss:$8 sps:$4 sm:$0xff]  }
 0x3ea   :  { %8107 = vmatprep.subr.bf16.mxu1 %v10939_v42  ;;  %v11009_v42 = vld [vmem:[%s14658_s1 + $0x20b4] ss:$8 sps:$4 sm:$0xff]  }
 0x3eb   :  { %8067 = vmatpush2.bf16.msra.mxu0 %v10934_v14  ;;  %v11007_v14 = vld [vmem:[%s14658_s1 + $0x20b0] ss:$8 sps:$4 sm:$0xff]  }
 0x3ec   :  { %8068 = vmatprep.subr.bf16.mxu0 %v10942_v22  ;;  %v11012_v22 = vld [vmem:[%s14658_s1 + $0x20a4] ss:$8 sps:$4 sm:$0xff]  }
 0x3ed   :  { %8108 = vmatpush2.bf16.msra.mxu1 %v10937_v23  ;;  %v11010_v23 = vld [vmem:[%s14658_s1 + $0x20a0] ss:$8 sps:$4 sm:$0xff]  }
 0x3ee   :  { %8109 = vmatprep.subr.bf16.mxu1 %v10945_v48  ;;  %v11015_v48 = vld [vmem:[%s14658_s1 + $0x2094] ss:$8 sps:$4 sm:$0xff]  }
 0x3ef   :  { %8069 = vmatpush2.bf16.msra.mxu0 %v10940_v24  ;;  %v11013_v24 = vld [vmem:[%s14658_s1 + $0x2090] ss:$8 sps:$4 sm:$0xff]  }
 0x3f0   :  { %8070 = vmatprep.subr.bf16.mxu0 %v10948_v49  ;;  %v11018_v49 = vld [vmem:[%s14658_s1 + $0x2084] ss:$8 sps:$4 sm:$0xff]  }
 0x3f1   :  { %8110 = vmatpush2.bf16.msra.mxu1 %v10943_v25  ;;  %v11016_v25 = vld [vmem:[%s14658_s1 + $0x2080] ss:$8 sps:$4 sm:$0xff]  }
 0x3f2   :  { %8111 = vmatprep.subr.bf16.mxu1 %v10951_v47  ;;  %v466_v47 = vpack.c.bf16 %v14486_v60, %v14486_v60  ;;  %v11055_v60 = vmov 0  }
 0x3f3   :  { %8071 = vmatpush2.bf16.msra.mxu0 %v10946_v26 }
 0x3f4   :  { %8072 = vmatprep.subr.bf16.mxu0 %v10954_v43 }
 0x3f5   :  { %8112 = vmatpush2.bf16.msra.mxu1 %v10949_v5 }
 0x3f6   :  { %8113 = vmatprep.subr.bf16.mxu1 %v10957_v39 }
 0x3f7   :  { %8073 = vmatpush2.bf16.msra.mxu0 %v10952_v57 }
 0x3f8   :  { %8074 = vmatprep.subr.bf16.mxu0 %v10960_v7 }
 0x3f9   :  { %8114 = vmatpush2.bf16.msra.mxu1 %v10955_v8 }
 0x3fa   :  { %8115 = vmatprep.subr.bf16.mxu1 %v10963_v35 }
 0x3fb   :  { %8075 = vmatpush2.bf16.msra.mxu0 %v10958_v61 }
 0x3fc   :  { %8076 = vmatprep.subr.bf16.mxu0 %v10966_v37 }
 0x3fd   :  { %8116 = vmatpush2.bf16.msra.mxu1 %v10961_v38 }
 0x3fe   :  { %8117 = vmatprep.subr.bf16.mxu1 %v10969_v55  ;;  %v11019_v55 = vld [vmem:[%s14660_s3 + $0x38] sm:$0xff]  }
 0x3ff   :  { %8077 = vmatpush2.bf16.msra.mxu0 %v10964_v59 }
 0x400   :  { %8128 = vmatprep.subr.bf16.mxu0 %v10972_v15  ;;  %v11021_v15 = vld [vmem:[%s14660_s3 + $0x28] sm:$0xff]  }
 0x401   :  { %8118 = vmatpush2.bf16.msra.mxu1 %v10967_v50  ;;  %v11022_v50 = vld [vmem:[%s14660_s3 + $0x20] sm:$0xff]  }
 0x402   :  { %v7834_v6 = vpop.f32.mrf.mxu0  ;;  %8079 = vmatmul.mubr.bf16.vlgmr.msra.gmra.mxu0 %v462_v62  ;;  %8288 = vmatprep.subr.bf16.mxu1 %v11055_v60  ;;  %v11023_v62 = vld [vmem:[%s14660_s3 + $0x18] sm:$0xff]  }
 0x403   :  { %v7835_v34 = vadd.f32 %v7834_v6, %v14323_v41  ;;  %8129 = vmatpush1.bf16.msra.mxu0 %v10970_v44  ;;  %8160 = vmatprep.mubr.bf16.mxu0 %v467_v20  ;;  %v11024_v44 = vld [vmem:[%s14660_s3 + $0x10] sm:$0xff]   ;;  %v11025_v20 = vld [vmem:[%s14660_s3 + $0x8] sm:$0xff]  }
 0x404   :  { %v7836_v36 = vpop.f32.mrf.mxu0  ;;  %v7875_v56 = vpop.f32.mrf.mxu1  ;;  %8120 = vmatmul.mubr.bf16.vlgmr.msra.gmra.mxu1 %v464_v52  ;;  %8130 = vmatprep.subr.bf16.mxu0 %v10976_v54  ;;  %v11026_v52 = vld [vmem:[%s14660_s3] sm:$0xff]  }
 0x405   :  { %v7837_v29 = vadd.f32 %v7836_v36, %v14331_v3  ;;  %v14523_v30 = vadd.f32 %v7875_v56, %v7835_v34  ;;  %v10980_v3 = vld [vmem:[%s14658_s1 + $0x2040] ss:$8 sps:$4 sm:$0xff]   ;;  %8289 = vmatpush1.bf16.msra.mxu1 %v11019_v55  ;;  %v11028_v34 = vld [vmem:[%s14660_s3 + $0x58] sm:$0xff]   ;;  %s8336_s1 = sshll.u32 %s11056_s24, 4  ;;  %s8337_s1 = int_to_ptr.vmem [resolvable:$true] %s8336_s1 }
 0x406   :  { %v7838_v13 = vpop.f32.mrf.mxu0  ;;  %v7877_v41 = vpop.f32.mrf.mxu1  ;;  %8290 = vmatprep.subr.bf16.mxu1 %v11055_v60  ;;  %v11027_v54 = vld [vmem:[%s14660_s3 + $0x60] ss:$0 sps:$4 sm:$0xff]   ;;  %s11032_s25 = scalar_lea.vmem %s8337_s1, 32  ;;  %p11037_p1 = scmp.lt.s32.totalorder %s8337_s1, %s8337_s1 }
 0x407   :  { %v14525_v53 = vadd.f32 %v7877_v41, %v7837_v29  ;;  %8131 = vmatpush1.bf16.msra.mxu0 %v10974_v12  ;;  %v8286_v6 = vsel %vm8284_vm0, %v11027_v54, 0  ;;  %v11029_v12 = vld [vmem:[%s14660_s3 + $0x50] sm:$0xff]   ;;  %p11033_p0 = scmp.ne.s32.totalorder %s8337_s1, %s11032_s25  ;;  %p11038_p2 = scmp.lt.s32.totalorder %s11032_s25, %s11032_s25 }
 0x408   :  { %v7839_v63 = vpop.f32.mrf.mxu0  ;;  %8132 = vmatprep.subr.bf16.mxu0 %v10979_v21  ;;  %v7879_v19 = vpop.f32.mrf.mxu1  ;;  %v11030_v21 = vld [vmem:[%s14660_s3 + $0x48] sm:$0xff]  }
 0x409   :  { %8291 = vmatpush1.bf16.msra.mxu1 %v11020_v16  ;;  %p11039_p3 = por %p11038_p2, %p11037_p1 }
 0x40a   :  { %v7880_v1 = vpop.f32.mrf.mxu1  ;;  %8292 = vmatprep.subr.bf16.mxu1 %v11055_v60 }
 0x40b   :  { %8133 = vmatpush1.bf16.msra.mxu0 %v10977_v33  ;;  %p11040_p4 = pnand %p11039_p3, %p11033_p0 }
 0x40c   :  { %8134 = vmatprep.subr.bf16.mxu0 %v10982_v0  ;;  %v11031_v0 = vld [vmem:[%s14660_s3 + $0x40] sm:$0xff]  }
 0x40d   :  { %8293 = vmatpush1.bf16.msra.mxu1 %v11021_v15 }
 0x40e   :  { %8294 = vmatprep.subr.bf16.mxu1 %v11055_v60 }
 0x40f   :  { %8135 = vmatpush1.bf16.msra.mxu0 %v10980_v3 }
 0x410   :  { %8136 = vmatprep.subr.bf16.mxu0 %v10985_v18 }
 0x411   :  { %8295 = vmatpush1.bf16.msra.mxu1 %v11022_v50 }
 0x412   :  { %8296 = vmatprep.subr.bf16.mxu1 %v11055_v60 }
 0x413   :  { %8137 = vmatpush1.bf16.msra.mxu0 %v10983_v2 }
 0x414   :  { %8138 = vmatprep.subr.bf16.mxu0 %v10988_v45 }
 0x415   :  { %8297 = vmatpush1.bf16.msra.mxu1 %v11023_v62 }
 0x416   :  { %8298 = vmatprep.subr.bf16.mxu1 %v11055_v60 }
 0x417   :  { %8139 = vmatpush1.bf16.msra.mxu0 %v10986_v46 }
 0x418   :  { %8140 = vmatprep.subr.bf16.mxu0 %v10991_v28 }
 0x419   :  { %8299 = vmatpush1.bf16.msra.mxu1 %v11024_v44 }
 0x41a   :  { %8300 = vmatprep.subr.bf16.mxu1 %v11055_v60 }
 0x41b   :  { %8141 = vmatpush1.bf16.msra.mxu0 %v10989_v27 }
 0x41c   :  { %8142 = vmatprep.subr.bf16.mxu0 %v10994_v4 }
 0x41d   :  { %8301 = vmatpush1.bf16.msra.mxu1 %v11025_v20 }
 0x41e   :  { %8302 = vmatprep.subr.bf16.mxu1 %v11055_v60 }
 0x41f   :  { %8143 = vmatpush1.bf16.msra.mxu0 %v10992_v51 }
 0x420   :  { %8144 = vmatprep.subr.bf16.mxu0 %v10997_v9 }
 0x421   :  { %8303 = vmatpush1.bf16.msra.mxu1 %v11026_v52 }
 0x422   :  { %8310 = vmatprep.subr.bf16.mxu1 %v11055_v60 }
 0x423   :  { %8145 = vmatpush2.bf16.msra.mxu0 %v10995_v10 }
 0x424   :  { %8146 = vmatprep.subr.bf16.mxu0 %v11000_v32 }
 0x425   :  { %8311 = vmatpush2.bf16.msra.mxu1 %v8286_v6 }
 0x426   :  { %8312 = vmatprep.subr.bf16.mxu1 %v11055_v60 }
 0x427   :  { %8147 = vmatpush2.bf16.msra.mxu0 %v10998_v31 }
 0x428   :  { %8148 = vmatprep.subr.bf16.mxu0 %v11003_v40 }
 0x429   :  { %8313 = vmatpush2.bf16.msra.mxu1 %v11028_v34 }
 0x42a   :  { %8314 = vmatprep.subr.bf16.mxu1 %v11055_v60 }
 0x42b   :  { %8149 = vmatpush2.bf16.msra.mxu0 %v11001_v11 }
 0x42c   :  { %8150 = vmatprep.subr.bf16.mxu0 %v11006_v58 }
 0x42d   :  { %8315 = vmatpush2.bf16.msra.mxu1 %v11029_v12 }
 0x42e   :  { %8316 = vmatprep.subr.bf16.mxu1 %v11055_v60 }
 0x42f   :  { %8151 = vmatpush2.bf16.msra.mxu0 %v11004_v17 }
 0x430   :  { %8152 = vmatprep.subr.bf16.mxu0 %v11009_v42 }
 0x431   :  { %8317 = vmatpush2.bf16.msra.mxu1 %v11030_v21 }
 0x432   :  { %8318 = vmatprep.subr.bf16.mxu1 %v11055_v60 }
 0x433   :  { %8153 = vmatpush2.bf16.msra.mxu0 %v11007_v14 }
 0x434   :  { %8154 = vmatprep.subr.bf16.mxu0 %v11012_v22 }
 0x435   :  { %8319 = vmatpush2.bf16.msra.mxu1 %v11031_v0 }
 0x437   :  { %8155 = vmatpush2.bf16.msra.mxu0 %v11010_v23 }
 0x438   :  { %8156 = vmatprep.subr.bf16.mxu0 %v11015_v48 }
 0x43b   :  { %8157 = vmatpush2.bf16.msra.mxu0 %v11013_v24 }
 0x43c   :  { %8158 = vmatprep.subr.bf16.mxu0 %v11018_v49  ;;  %v9401_v49 = vld [vmem:[%s14661_s4] ss:$0 sm:$0xff] }
 0x43f   :  { %8159 = vmatpush2.bf16.msra.mxu0 %v11016_v25 }
 0x442   :  { %v7916_v26 = vpop.f32.mrf.mxu0  ;;  %8161 = vmatmul.mubr.bf16.vlgmr.msra.gmra.mxu0 %v466_v47 }
 0x443   :  { %v7917_v43 = vadd.f32 %v7916_v26, %v14523_v30 }
 0x444   :  { %v7918_v5 = vpop.f32.mrf.mxu0  ;;  %v7957_v39 = vpop.f32.mrf.mxu1 }
 0x445   :  { %v7919_v57 = vadd.f32 %v7918_v5, %v14525_v53  ;;  %v7958_v7 = vadd.f32 %v7957_v39, %v7917_v43 }
 0x446   :  { %v7920_v8 = vpop.f32.mrf.mxu0  ;;  %v7959_v35 = vpop.f32.mrf.mxu1 }
 0x447   :  { %v7960_v61 = vadd.f32 %v7959_v35, %v7919_v57 }
 0x448   :  { %v7921_v37 = vpop.f32.mrf.mxu0  ;;  %v7961_v38 = vpop.f32.mrf.mxu1 }
 0x44a   :  { %v7962_v59 = vpop.f32.mrf.mxu1 }
 0x482   :  { %v7998_v36 = vpop.f32.mrf.mxu0 }
 0x483   :  { %v7999_v56 = vadd.f32 %v7998_v36, %v7958_v7 }
 0x484   :  { %v8000_v29 = vpop.f32.mrf.mxu0  ;;  %v8039_v30 = vpop.f32.mrf.mxu1 }
 0x485   :  { %v8001_v13 = vadd.f32 %v8000_v29, %v7960_v61  ;;  %v8040_v41 = vadd.f32 %v8039_v30, %v7999_v56 }
 0x486   :  { %v8002_v53 = vpop.f32.mrf.mxu0  ;;  %v8041_v33 = vpop.f32.mrf.mxu1 }
 0x487   :  { %v8042_v63 = vadd.f32 %v8041_v33, %v8001_v13 }
 0x488   :  { %v8003_v19 = vpop.f32.mrf.mxu0  ;;  %v8043_v1 = vpop.f32.mrf.mxu1 }
 0x48a   :  { %v8044_v3 = vpop.f32.mrf.mxu1 }
 0x4c2   :  { %v8080_v18 = vpop.f32.mrf.mxu0 }
 0x4c3   :  { %v8081_v9 = vadd.f32 %v8080_v18, %v8040_v41 }
 0x4c4   :  { %v8082_v2 = vpop.f32.mrf.mxu0  ;;  %v8121_v45 = vpop.f32.mrf.mxu1 }
 0x4c5   :  { %v8083_v10 = vadd.f32 %v8082_v2, %v8042_v63  ;;  %v8122_v32 = vadd.f32 %v8121_v45, %v8081_v9 }
 0x4c6   :  { %v8084_v46 = vpop.f32.mrf.mxu0  ;;  %v8123_v28 = vpop.f32.mrf.mxu1 }
 0x4c7   :  { %v8124_v40 = vadd.f32 %v8123_v28, %v8083_v10 }
 0x4c8   :  { %v8085_v27 = vpop.f32.mrf.mxu0  ;;  %v8125_v4 = vpop.f32.mrf.mxu1 }
 0x4ca   :  { %v8126_v51 = vpop.f32.mrf.mxu1 }
 0x502   :  { %v8162_v31 = vpop.f32.mrf.mxu0 }
 0x503   :  { %v8163_v11 = vadd.f32 %v8162_v31, %v8122_v32 }
 0x504   :  { %v8164_v58 = vpop.f32.mrf.mxu0 }
 0x505   :  { %v8165_v17 = vadd.f32 %v8164_v58, %v8124_v40  ;;  %v8169_v42 = vmax.f32 %v8163_v11, 0.0 }
 0x506   :  { %v8166_v14 = vpop.f32.mrf.mxu0 }
 0x507   :  { %v8170_v22 = vmax.f32 %v8165_v17, 0.0  ;;  %v8171_v24 = vpack.c.bf16 %v8169_v42, %v8169_v42 }
 0x508   :  { %v8167_v23 = vpop.f32.mrf.mxu0 }
 0x509   :  { %v8172_v48 = vpack.c.bf16 %v8170_v22, %v8170_v22 }
 0x50b   :  { %9415 = vmatprep.mubr.msk.bf16.mxu1 %vm8280_vm1, %v8172_v48 }
 0x50c   :  { %8321 = vmatmul.mubr.bf16.vlgmr.msra.gmra.mxu1 %v8171_v24 }
 0x5cc   :  { %v8322_v25 = vpop.f32.mrf.mxu1 }
 0x5cd   :  { %v8323_v47 = vadd.f32 %v9401_v49, %v8322_v25 }
 0x5ce   :  { %v8324_v26 = vpop.f32.mrf.mxu1 }
 0x5cf   :  { %8329 = vst.msk [vmem:[#allocation2] sm:$0x3] %vm8328_vm2, %v8323_v47 }
 0x5d0   :  { %v8325_v43 = vpop.f32.mrf.mxu1 }
 0x5d1   :  { %11043 = shalt.err (!%p11040_p4)
}
 0x5d2   :  { %8339 = dma.vmem_to_hbm [thread:$0]  %s8337_s1, 32, %s14662_s5, [#allocation3]   ;;  %v8326_v5 = vpop.f32.mrf.mxu1 }
 0x5d3   :  { %11052 = dma.done.wait [#allocation3], 32  }
 0x5d4   :  { %11053 = vsyncadd [#allocation3], 4294967264 }
 0x5d5   :  { %8343 = vsyncpa [#allocation3], 1 }

</bundles_post_ra>
